<compile_context>
chip_gen: v5e
topology: v5e:2x2
jax: 0.10.0
libtpu: 0.0.40
codegen_flags: <defaults>
</compile_context>

<pallas_src>
import math

import jax
import jax.numpy as jnp
from jax.experimental import pallas as pl
from jax.experimental.pallas import tpu as pltpu


# ----------------------------------------------------------------------------
# Fused Conv3x3(pad=1, stride=1) + bias + ReLU + MaxPool2x2 kernel.
#
# The wrapper builds im2col patches for the WHOLE batch with row order
#     row = pw*(2*N*Ho*Wo) + ph*(N*Ho*Wo) + n*(Ho*Wo) + hq*Wo + wq
# (pw/ph = w/h parity inside each 2x2 pooling window, hq/wq = pooled coords,
#  Ho = H/2, Wo = W/2).  With that ordering the conv output (4*N*Ho*Wo, Cout) is
# 2x2-max-pooled by two tile-aligned "max of leading half vs trailing half" ops,
# so the kernel body is: one MXU dot, bias+ReLU, two vector maxes, one dense store.
# ----------------------------------------------------------------------------
def conv_relu_pool_kernel(p_ref, w_ref, b_ref, o_ref):
    # p_ref: (4*N*Ho*Wo, 9*Cin)   w_ref: (9*Cin, Cout)   b_ref: (1, Cout)
    # o_ref: (N*Ho*Wo, Cout)
    a = jnp.dot(p_ref[...], w_ref[...], preferred_element_type=jnp.float32)
    a = jnp.maximum(a + b_ref[...], 0.0)
    half = a.shape[0] // 2
    a = jnp.maximum(a[:half], a[half:])          # pool over w-parity
    quarter = half // 2
    a = jnp.maximum(a[:quarter], a[quarter:])    # pool over h-parity
    o_ref[...] = a.astype(o_ref.dtype)


def _im2col_pool_order(x_nhwc):
    """(N,H,W,C) -> (4*N*(H/2)*(W/2), 9*C) 3x3 patches in pooling-friendly row order."""
    N, H, W, C = x_nhwc.shape
    xp = jnp.pad(x_nhwc, ((0, 0), (1, 1), (1, 1), (0, 0)))
    taps = [xp[:, ky:ky + H, kx:kx + W, :] for ky in range(3) for kx in range(3)]
    p = jnp.stack(taps, axis=3)                      # (N, H, W, 9, C)
    p = p.reshape(N, H // 2, 2, W // 2, 2, 9 * C)    # (N, hq, ph, wq, pw, 9C)
    p = p.transpose(4, 2, 0, 1, 3, 5)                # (pw, ph, N, hq, wq, 9C)
    return p.reshape(4 * N * (H // 2) * (W // 2), 9 * C)


def conv3x3_relu_pool(x_nhwc, w, b):
    """Conv3x3(pad=1) + bias + ReLU + MaxPool2x2.  Returns (N, H/2, W/2, Cout)."""
    N, H, W, Cin = x_nhwc.shape
    Cout = w.shape[-1]
    Ho, Wo = H // 2, W // 2
    patches = _im2col_pool_order(x_nhwc)             # (4*N*Ho*Wo, 9*Cin)
    w2d = w.reshape(9 * Cin, Cout)                   # row = (ky*3+kx)*Cin + cin
    out = pl.pallas_call(
        conv_relu_pool_kernel,
        out_shape=jax.ShapeDtypeStruct((N * Ho * Wo, Cout), x_nhwc.dtype),
    )(patches, w2d, b.reshape(1, Cout))
    return out.reshape(N, Ho, Wo, Cout)


# ----------------------------------------------------------------------------
# Fused classifier: Dropout(id) -> Linear -> ReLU -> Dropout(id) -> Linear -> ReLU
#                   -> Linear.  Single pallas_call; weights are bf16 (halved HBM
# traffic, native MXU path), accumulation / bias / ReLU stay in f32.
# ----------------------------------------------------------------------------
def classifier_kernel(x_ref, w1_ref, b1_ref, w2_ref, b2_ref, w3_ref, b3_ref, o_ref):
    h = jnp.dot(x_ref[...].astype(jnp.bfloat16), w1_ref[...],
                preferred_element_type=jnp.float32)
    h = jnp.maximum(h + b1_ref[...], 0.0)
    h = jnp.dot(h.astype(jnp.bfloat16), w2_ref[...],
                preferred_element_type=jnp.float32)
    h = jnp.maximum(h + b2_ref[...], 0.0)
    y = jnp.dot(h.astype(jnp.bfloat16), w3_ref[...],
                preferred_element_type=jnp.float32)
    o_ref[...] = (y + b3_ref[...]).astype(o_ref.dtype)


def classifier(x, params):
    B = x.shape[0]
    return pl.pallas_call(
        classifier_kernel,
        out_shape=jax.ShapeDtypeStruct((B, 10), jnp.float32),
        compiler_params=pltpu.CompilerParams(vmem_limit_bytes=32 * 1024 * 1024),
    )(x,
      params["w_fc1"], params["b_fc1"].reshape(1, -1),
      params["w_fc2"], params["b_fc2"].reshape(1, -1),
      params["w_fc3"], params["b_fc3"].reshape(1, -1))


# ----------------------------------------------------------------------------
# Parameters (deterministic, mirroring the module's init scheme).
# ----------------------------------------------------------------------------
def init_params(key):
    ks = jax.random.split(key, 8)
    params = {}

    def conv_init(k, cin, cout):
        n = 3 * 3 * cout                                  # kernel_size[0]*[1]*out_channels
        w = jax.random.normal(k, (3, 3, cin, cout), jnp.float32) * math.sqrt(2.0 / n)
        return w, jnp.zeros((cout,), jnp.float32)         # bias zeroed

    def fc_init(kw, kb, fan_in, fan_out):
        bound = 1.0 / math.sqrt(fan_in)                   # torch Linear default init
        w = jax.random.uniform(kw, (fan_in, fan_out), jnp.float32, -bound, bound)
        b = jax.random.uniform(kb, (fan_out,), jnp.float32, -bound, bound)
        return w.astype(jnp.bfloat16), b                  # bf16 weights, f32 bias

    params["w_conv1"], params["b_conv1"] = conv_init(ks[0], 3, 32)
    params["w_conv2"], params["b_conv2"] = conv_init(ks[1], 32, 64)
    params["w_fc1"], params["b_fc1"] = fc_init(ks[2], ks[3], 1024, 1024)
    params["w_fc2"], params["b_fc2"] = fc_init(ks[4], ks[5], 1024, 1024)
    params["w_fc3"], params["b_fc3"] = fc_init(ks[6], ks[7], 1024, 10)
    return params


# ----------------------------------------------------------------------------
# Forward pass (im2col / flatten glue in plain JAX, heavy ops in Pallas kernels).
# ----------------------------------------------------------------------------
def vgg_forward(x_nchw, params):
    x = jnp.transpose(x_nchw, (0, 2, 3, 1))               # NCHW -> NHWC
    # features
    x = conv3x3_relu_pool(x, params["w_conv1"], params["b_conv1"])   # (N, 8, 8, 32)
    x = conv3x3_relu_pool(x, params["w_conv2"], params["b_conv2"])   # (N, 4, 4, 64)
    # flatten in PyTorch NCHW order: x.view(N, C*H*W)
    x = jnp.transpose(x, (0, 3, 1, 2)).reshape(x.shape[0], -1)       # (N, 1024)
    # classifier (Dropout layers are identity in eval mode)
    return classifier(x, params)


if __name__ == "__main__":
    key = jax.random.PRNGKey(0)
    k_x, k_p = jax.random.split(key)
    x = jax.random.normal(k_x, (2, 3, 16, 16), jnp.float32)          # NCHW, like PyTorch
    params = init_params(k_p)

    fwd = jax.jit(vgg_forward)
    out = jax.block_until_ready(fwd(x, params))
    assert out.shape == (2, 10) and out.dtype == jnp.float32
    print("KERNEL_OK")
</pallas_src>

<mosaic_0001>
module attributes {stable_mosaic.version = 11 : i64} {
  func.func @conv_relu_pool_kernel(%arg0: memref<512x27xf32, #tpu.memory_space<vmem>>, %arg1: memref<27x32xf32, #tpu.memory_space<vmem>>, %arg2: memref<1x32xf32, #tpu.memory_space<vmem>>, %arg3: memref<128x32xf32, #tpu.memory_space<vmem>>) attributes {dimension_semantics = [], scalar_prefetch = 0 : i64, scratch_operands = 0 : i64, tpu.core_type = #tpu.core_type<tc>} {
    %c0 = arith.constant 0 : index
    %c0_0 = arith.constant 0 : index
    %0 = vector.load %arg0[%c0, %c0_0] : memref<512x27xf32, #tpu.memory_space<vmem>>, vector<512x27xf32>
    %c0_1 = arith.constant 0 : index
    %c0_2 = arith.constant 0 : index
    %1 = vector.load %arg1[%c0_1, %c0_2] : memref<27x32xf32, #tpu.memory_space<vmem>>, vector<27x32xf32>
    %cst = arith.constant dense<0.000000e+00> : vector<512x32xf32>
    %2 = tpu.matmul %0, %1, %cst {dimension_numbers = #tpu.dot_dimension_numbers<[1], [0], [0], [1], [0, 0, 1, 1], [], []>} : vector<512x27xf32>, vector<27x32xf32>, vector<512x32xf32> -> vector<512x32xf32>
    %c0_3 = arith.constant 0 : index
    %c0_4 = arith.constant 0 : index
    %3 = vector.load %arg2[%c0_3, %c0_4] : memref<1x32xf32, #tpu.memory_space<vmem>>, vector<1x32xf32>
    %4 = vector.broadcast %3 : vector<1x32xf32> to vector<512x32xf32>
    %5 = arith.addf %2, %4 : vector<512x32xf32>
    %cst_5 = arith.constant 0.000000e+00 : f32
    %6 = vector.broadcast %cst_5 : f32 to vector<512x32xf32>
    %7 = arith.maximumf %5, %6 : vector<512x32xf32>
    %8 = vector.extract_strided_slice %7 {offsets = [0, 0], sizes = [256, 32], strides = [1, 1]} : vector<512x32xf32> to vector<256x32xf32>
    %9 = vector.extract_strided_slice %7 {offsets = [256, 0], sizes = [256, 32], strides = [1, 1]} : vector<512x32xf32> to vector<256x32xf32>
    %10 = arith.maximumf %8, %9 : vector<256x32xf32>
    %11 = vector.extract_strided_slice %10 {offsets = [0, 0], sizes = [128, 32], strides = [1, 1]} : vector<256x32xf32> to vector<128x32xf32>
    %12 = vector.extract_strided_slice %10 {offsets = [128, 0], sizes = [128, 32], strides = [1, 1]} : vector<256x32xf32> to vector<128x32xf32>
    %13 = arith.maximumf %11, %12 : vector<128x32xf32>
    %c0_6 = arith.constant 0 : index
    %c0_7 = arith.constant 0 : index
    %14 = vector.load %arg3[%c0_6, %c0_7] : memref<128x32xf32, #tpu.memory_space<vmem>>, vector<128x32xf32>
    tpu.vector_store %arg3[%c0_6, %c0_7], %13 {strides = array<i32>} : memref<128x32xf32, #tpu.memory_space<vmem>>, vector<128x32xf32>,
    return
  }
}

module attributes {stable_mosaic.version = 11 : i64} {
  func.func @conv_relu_pool_kernel(%arg0: memref<128x288xf32, #tpu.memory_space<vmem>>, %arg1: memref<288x64xf32, #tpu.memory_space<vmem>>, %arg2: memref<1x64xf32, #tpu.memory_space<vmem>>, %arg3: memref<32x64xf32, #tpu.memory_space<vmem>>) attributes {dimension_semantics = [], scalar_prefetch = 0 : i64, scratch_operands = 0 : i64, tpu.core_type = #tpu.core_type<tc>} {
    %c0 = arith.constant 0 : index
    %c0_0 = arith.constant 0 : index
    %0 = vector.load %arg0[%c0, %c0_0] : memref<128x288xf32, #tpu.memory_space<vmem>>, vector<128x288xf32>
    %c0_1 = arith.constant 0 : index
    %c0_2 = arith.constant 0 : index
    %1 = vector.load %arg1[%c0_1, %c0_2] : memref<288x64xf32, #tpu.memory_space<vmem>>, vector<288x64xf32>
    %cst = arith.constant dense<0.000000e+00> : vector<128x64xf32>
    %2 = tpu.matmul %0, %1, %cst {dimension_numbers = #tpu.dot_dimension_numbers<[1], [0], [0], [1], [0, 0, 1, 1], [], []>} : vector<128x288xf32>, vector<288x64xf32>, vector<128x64xf32> -> vector<128x64xf32>
    %c0_3 = arith.constant 0 : index
    %c0_4 = arith.constant 0 : index
    %3 = vector.load %arg2[%c0_3, %c0_4] : memref<1x64xf32, #tpu.memory_space<vmem>>, vector<1x64xf32>
    %4 = vector.broadcast %3 : vector<1x64xf32> to vector<128x64xf32>
    %5 = arith.addf %2, %4 : vector<128x64xf32>
    %cst_5 = arith.constant 0.000000e+00 : f32
    %6 = vector.broadcast %cst_5 : f32 to vector<128x64xf32>
    %7 = arith.maximumf %5, %6 : vector<128x64xf32>
    %8 = vector.extract_strided_slice %7 {offsets = [0, 0], sizes = [64, 64], strides = [1, 1]} : vector<128x64xf32> to vector<64x64xf32>
    %9 = vector.extract_strided_slice %7 {offsets = [64, 0], sizes = [64, 64], strides = [1, 1]} : vector<128x64xf32> to vector<64x64xf32>
    %10 = arith.maximumf %8, %9 : vector<64x64xf32>
    %11 = vector.extract_strided_slice %10 {offsets = [0, 0], sizes = [32, 64], strides = [1, 1]} : vector<64x64xf32> to vector<32x64xf32>
    %12 = vector.extract_strided_slice %10 {offsets = [32, 0], sizes = [32, 64], strides = [1, 1]} : vector<64x64xf32> to vector<32x64xf32>
    %13 = arith.maximumf %11, %12 : vector<32x64xf32>
    %c0_6 = arith.constant 0 : index
    %c0_7 = arith.constant 0 : index
    %14 = vector.load %arg3[%c0_6, %c0_7] : memref<32x64xf32, #tpu.memory_space<vmem>>, vector<32x64xf32>
    tpu.vector_store %arg3[%c0_6, %c0_7], %13 {strides = array<i32>} : memref<32x64xf32, #tpu.memory_space<vmem>>, vector<32x64xf32>,
    return
  }
}

module attributes {stable_mosaic.version = 11 : i64} {
  func.func @classifier_kernel(%arg0: memref<2x1024xf32, #tpu.memory_space<vmem>>, %arg1: memref<1024x1024xbf16, #tpu.memory_space<vmem>>, %arg2: memref<1x1024xf32, #tpu.memory_space<vmem>>, %arg3: memref<1024x1024xbf16, #tpu.memory_space<vmem>>, %arg4: memref<1x1024xf32, #tpu.memory_space<vmem>>, %arg5: memref<1024x10xbf16, #tpu.memory_space<vmem>>, %arg6: memref<1x10xf32, #tpu.memory_space<vmem>>, %arg7: memref<2x10xf32, #tpu.memory_space<vmem>>) attributes {dimension_semantics = [], scalar_prefetch = 0 : i64, scratch_operands = 0 : i64, tpu.core_type = #tpu.core_type<tc>} {
    %c0 = arith.constant 0 : index
    %c0_0 = arith.constant 0 : index
    %0 = vector.load %arg0[%c0, %c0_0] : memref<2x1024xf32, #tpu.memory_space<vmem>>, vector<2x1024xf32>
    %1 = arith.truncf %0 : vector<2x1024xf32> to vector<2x1024xbf16>
    %c0_1 = arith.constant 0 : index
    %c0_2 = arith.constant 0 : index
    %2 = vector.load %arg1[%c0_1, %c0_2] : memref<1024x1024xbf16, #tpu.memory_space<vmem>>, vector<1024x1024xbf16>
    %cst = arith.constant dense<0.000000e+00> : vector<2x1024xf32>
    %3 = tpu.matmul %1, %2, %cst {dimension_numbers = #tpu.dot_dimension_numbers<[1], [0], [0], [1], [0, 0, 1, 1], [], []>} : vector<2x1024xbf16>, vector<1024x1024xbf16>, vector<2x1024xf32> -> vector<2x1024xf32>
    %c0_3 = arith.constant 0 : index
    %c0_4 = arith.constant 0 : index
    %4 = vector.load %arg2[%c0_3, %c0_4] : memref<1x1024xf32, #tpu.memory_space<vmem>>, vector<1x1024xf32>
    %5 = vector.broadcast %4 : vector<1x1024xf32> to vector<2x1024xf32>
    %6 = arith.addf %3, %5 : vector<2x1024xf32>
    %cst_5 = arith.constant 0.000000e+00 : f32
    %7 = vector.broadcast %cst_5 : f32 to vector<2x1024xf32>
    %8 = arith.maximumf %6, %7 : vector<2x1024xf32>
    %9 = arith.truncf %8 : vector<2x1024xf32> to vector<2x1024xbf16>
    %c0_6 = arith.constant 0 : index
    %c0_7 = arith.constant 0 : index
    %10 = vector.load %arg3[%c0_6, %c0_7] : memref<1024x1024xbf16, #tpu.memory_space<vmem>>, vector<1024x1024xbf16>
    %cst_8 = arith.constant dense<0.000000e+00> : vector<2x1024xf32>
    %11 = tpu.matmul %9, %10, %cst_8 {dimension_numbers = #tpu.dot_dimension_numbers<[1], [0], [0], [1], [0, 0, 1, 1], [], []>} : vector<2x1024xbf16>, vector<1024x1024xbf16>, vector<2x1024xf32> -> vector<2x1024xf32>
    %c0_9 = arith.constant 0 : index
    %c0_10 = arith.constant 0 : index
    %12 = vector.load %arg4[%c0_9, %c0_10] : memref<1x1024xf32, #tpu.memory_space<vmem>>, vector<1x1024xf32>
    %13 = vector.broadcast %12 : vector<1x1024xf32> to vector<2x1024xf32>
    %14 = arith.addf %11, %13 : vector<2x1024xf32>
    %cst_11 = arith.constant 0.000000e+00 : f32
    %15 = vector.broadcast %cst_11 : f32 to vector<2x1024xf32>
    %16 = arith.maximumf %14, %15 : vector<2x1024xf32>
    %17 = arith.truncf %16 : vector<2x1024xf32> to vector<2x1024xbf16>
    %c0_12 = arith.constant 0 : index
    %c0_13 = arith.constant 0 : index
    %18 = vector.load %arg5[%c0_12, %c0_13] : memref<1024x10xbf16, #tpu.memory_space<vmem>>, vector<1024x10xbf16>
    %cst_14 = arith.constant dense<0.000000e+00> : vector<2x10xf32>
    %19 = tpu.matmul %17, %18, %cst_14 {dimension_numbers = #tpu.dot_dimension_numbers<[1], [0], [0], [1], [0, 0, 1, 1], [], []>} : vector<2x1024xbf16>, vector<1024x10xbf16>, vector<2x10xf32> -> vector<2x10xf32>
    %c0_15 = arith.constant 0 : index
    %c0_16 = arith.constant 0 : index
    %20 = vector.load %arg6[%c0_15, %c0_16] : memref<1x10xf32, #tpu.memory_space<vmem>>, vector<1x10xf32>
    %21 = vector.broadcast %20 : vector<1x10xf32> to vector<2x10xf32>
    %22 = arith.addf %19, %21 : vector<2x10xf32>
    %c0_17 = arith.constant 0 : index
    %c0_18 = arith.constant 0 : index
    %23 = vector.load %arg7[%c0_17, %c0_18] : memref<2x10xf32, #tpu.memory_space<vmem>>, vector<2x10xf32>
    tpu.vector_store %arg7[%c0_17, %c0_18], %22 {strides = array<i32>} : memref<2x10xf32, #tpu.memory_space<vmem>>, vector<2x10xf32>,
    return
  }
}

</mosaic_0001>

<bundles_post_ra>
// kernel: vgg_forward.3
= control target key start
LH: loop header
LB: loop body
LE: loop exit
PB: predicated region body
PF: predicated region fallthrough
CT: control target
= control target key end

     0   :  { %vm279_vm0 = vcmask 1042432   ;;  %vm86_vm1 = vcmask 220160   ;;  %vm604_vm2 = vcmask 261120   ;;  %s1124_s1 = inlined_call_operand.vmem [shape: f32[27,32], index: 1, kind: input, shape index: {}]   ;;  %s1125_s0 = inlined_call_operand.vmem [shape: f32[512,27], index: 0, kind: input, shape index: {}]   ;;  %s1126_s2 = inlined_call_operand.vmem [shape: f32[1,32], index: 2, kind: input, shape index: {}]   ;;  %s1127_s3 = inlined_call_operand.vmem [shape: f32[128,32], index: 3, kind: output, shape index: {}]  }
   0x1   :  { %v81_v0 = vld [vmem:[%s1124_s1 + $0x18] sm:$0x7]  ;;  %v80_v1 = vld [vmem:[%s1124_s1 + $0x10] sm:$0xff]  ;;  %v79_v2 = vld [vmem:[%s1124_s1 + $0x8] sm:$0xff] }
   0x2   :  { %691 = vmatpush.msk.msra.mxu2 %vm279_vm0, %v81_v0  ;;  %692 = vmatpush.msk.msra.mxu3 %vm279_vm0, %v81_v0  ;;  %v78_v3 = vld [vmem:[%s1124_s1] sm:$0xff]  ;;  %v47_v8 = vld [vmem:[%s1125_s0 + $0x108] sm:$0xff]  ;;  %v48_v12 = vld [vmem:[%s1125_s0 + $0x110] sm:$0xff] }
   0x3   :  { %625 = vmatpush.msk.msra.mxu0 %vm279_vm0, %v81_v0  ;;  %690 = vmatpush.msk.msra.mxu1 %vm279_vm0, %v81_v0  ;;  %v46_v4 = vld [vmem:[%s1125_s0 + $0x100] sm:$0xff]  ;;  %v63_v9 = vld [vmem:[%s1125_s0 + $0x188] sm:$0xff]  ;;  %v64_v13 = vld [vmem:[%s1125_s0 + $0x190] sm:$0xff] }
   0x4   :  { %694 = vmatpush.msra.mxu2 %v80_v1  ;;  %695 = vmatpush.msra.mxu3 %v80_v1  ;;  %v62_v5 = vld [vmem:[%s1125_s0 + $0x180] sm:$0xff]  ;;  %v15_v10 = vld [vmem:[%s1125_s0 + $0x8] sm:$0xff]  ;;  %v16_v14 = vld [vmem:[%s1125_s0 + $0x10] sm:$0xff] }
   0x5   :  { %296 = vmatpush.msra.mxu0 %v80_v1  ;;  %693 = vmatpush.msra.mxu1 %v80_v1  ;;  %v14_v6 = vld [vmem:[%s1125_s0] sm:$0xff]  ;;  %v31_v11 = vld [vmem:[%s1125_s0 + $0x88] sm:$0xff]  ;;  %v32_v15 = vld [vmem:[%s1125_s0 + $0x90] sm:$0xff] }
   0x6   :  { %697 = vmatpush.msra.mxu2 %v79_v2  ;;  %698 = vmatpush.msra.mxu3 %v79_v2  ;;  %v30_v7 = vld [vmem:[%s1125_s0 + $0x80] sm:$0xff]  ;;  %v49_v16 = vld [vmem:[%s1125_s0 + $0x118] sm:$0xff]  ;;  %v51_v24 = vld [vmem:[%s1125_s0 + $0x128] sm:$0xff] }
   0x7   :  { %297 = vmatpush.msra.mxu0 %v79_v2  ;;  %696 = vmatpush.msra.mxu1 %v79_v2  ;;  %v65_v17 = vld [vmem:[%s1125_s0 + $0x198] sm:$0xff]  ;;  %v50_v20 = vld [vmem:[%s1125_s0 + $0x120] sm:$0xff]  ;;  %v67_v25 = vld [vmem:[%s1125_s0 + $0x1a8] sm:$0xff] }
   0x8   :  { %700 = vmatpush.msra.mxu2 %v78_v3  ;;  %701 = vmatpush.msra.mxu3 %v78_v3  ;;  %v17_v18 = vld [vmem:[%s1125_s0 + $0x18] sm:$0xff]  ;;  %v66_v21 = vld [vmem:[%s1125_s0 + $0x1a0] sm:$0xff]  ;;  %v19_v26 = vld [vmem:[%s1125_s0 + $0x28] sm:$0xff] }
   0x9   :  { %658 = vmatmul.msk.f32.vlgmr.msra.gmra.mxu2 %vm86_vm1, %v46_v4  ;;  %674 = vmatmul.msk.f32.vlgmr.msra.gmra.mxu3 %vm86_vm1, %v62_v5  ;;  %v33_v19 = vld [vmem:[%s1125_s0 + $0x98] sm:$0xff]  ;;  %v18_v22 = vld [vmem:[%s1125_s0 + $0x20] sm:$0xff]  ;;  %v35_v27 = vld [vmem:[%s1125_s0 + $0xa8] sm:$0xff] }
   0xa   :  { %298 = vmatpush.msra.mxu0 %v78_v3  ;;  %699 = vmatpush.msra.mxu1 %v78_v3  ;;  %v34_v23 = vld [vmem:[%s1125_s0 + $0xa0] sm:$0xff]  ;;  %v52_v28 = vld [vmem:[%s1125_s0 + $0x130] sm:$0xff]  ;;  %v53_v32 = vld [vmem:[%s1125_s0 + $0x138] sm:$0xff] }
   0xb   :  { %626 = vmatmul.msk.f32.vlgmr.msra.gmra.mxu0 %vm86_vm1, %v14_v6  ;;  %642 = vmatmul.msk.f32.vlgmr.msra.gmra.mxu1 %vm86_vm1, %v30_v7  ;;  %v68_v29 = vld [vmem:[%s1125_s0 + $0x1b0] sm:$0xff]  ;;  %v69_v33 = vld [vmem:[%s1125_s0 + $0x1b8] sm:$0xff]  ;;  %v54_v36 = vld [vmem:[%s1125_s0 + $0x140] sm:$0xff] }
   0xc   :  { %v20_v30 = vld [vmem:[%s1125_s0 + $0x30] sm:$0xff]  ;;  %v21_v34 = vld [vmem:[%s1125_s0 + $0x38] sm:$0xff]  ;;  %v70_v37 = vld [vmem:[%s1125_s0 + $0x1c0] sm:$0xff] }
   0xd   :  { %v36_v31 = vld [vmem:[%s1125_s0 + $0xb0] sm:$0xff]  ;;  %v37_v35 = vld [vmem:[%s1125_s0 + $0xb8] sm:$0xff]  ;;  %v22_v38 = vld [vmem:[%s1125_s0 + $0x40] sm:$0xff] }
   0xe   :  { %v38_v39 = vld [vmem:[%s1125_s0 + $0xc0] sm:$0xff]  ;;  %v55_v40 = vld [vmem:[%s1125_s0 + $0x148] sm:$0xff]  ;;  %v56_v44 = vld [vmem:[%s1125_s0 + $0x150] sm:$0xff] }
   0xf   :  { %v71_v41 = vld [vmem:[%s1125_s0 + $0x1c8] sm:$0xff]  ;;  %v72_v45 = vld [vmem:[%s1125_s0 + $0x1d0] sm:$0xff]  ;;  %v57_v48 = vld [vmem:[%s1125_s0 + $0x158] sm:$0xff] }
  0x10   :  { %v23_v42 = vld [vmem:[%s1125_s0 + $0x48] sm:$0xff]  ;;  %v24_v46 = vld [vmem:[%s1125_s0 + $0x50] sm:$0xff]  ;;  %v73_v49 = vld [vmem:[%s1125_s0 + $0x1d8] sm:$0xff] }
  0x11   :  { %659 = vmatmul.msk.f32.gmra.mxu2 %vm86_vm1, %v47_v8  ;;  %675 = vmatmul.msk.f32.gmra.mxu3 %vm86_vm1, %v63_v9  ;;  %v39_v43 = vld [vmem:[%s1125_s0 + $0xc8] sm:$0xff]  ;;  %v40_v47 = vld [vmem:[%s1125_s0 + $0xd0] sm:$0xff]  ;;  %v25_v50 = vld [vmem:[%s1125_s0 + $0x58] sm:$0xff] }
  0x12   :  { %v41_v51 = vld [vmem:[%s1125_s0 + $0xd8] sm:$0xff]  ;;  %v58_v52 = vld [vmem:[%s1125_s0 + $0x160] sm:$0xff]  ;;  %v59_v56 = vld [vmem:[%s1125_s0 + $0x168] sm:$0xff] }
  0x13   :  { %627 = vmatmul.msk.f32.gmra.mxu0 %vm86_vm1, %v15_v10  ;;  %643 = vmatmul.msk.f32.gmra.mxu1 %vm86_vm1, %v31_v11  ;;  %v74_v53 = vld [vmem:[%s1125_s0 + $0x1e0] sm:$0xff]  ;;  %v75_v57 = vld [vmem:[%s1125_s0 + $0x1e8] sm:$0xff]  ;;  %v60_v60 = vld [vmem:[%s1125_s0 + $0x170] sm:$0xff] }
  0x14   :  { %v26_v54 = vld [vmem:[%s1125_s0 + $0x60] sm:$0xff]  ;;  %v27_v58 = vld [vmem:[%s1125_s0 + $0x68] sm:$0xff]  ;;  %v76_v61 = vld [vmem:[%s1125_s0 + $0x1f0] sm:$0xff] }
  0x15   :  { %v42_v55 = vld [vmem:[%s1125_s0 + $0xe0] sm:$0xff]  ;;  %v43_v59 = vld [vmem:[%s1125_s0 + $0xe8] sm:$0xff]  ;;  %v28_v62 = vld [vmem:[%s1125_s0 + $0x70] sm:$0xff] }
  0x16   :  { %v44_v63 = vld [vmem:[%s1125_s0 + $0xf0] sm:$0xff]  ;;  %v61_v0 = vld [vmem:[%s1125_s0 + $0x178] sm:$0xff]  ;;  %v994_v4 = vld [vmem:[%s1126_s2] ss:$0 sm:$0xff] }
  0x17   :  { %v77_v1 = vld [vmem:[%s1125_s0 + $0x1f8] sm:$0xff] }
  0x18   :  { %v29_v2 = vld [vmem:[%s1125_s0 + $0x78] sm:$0xff] }
  0x19   :  { %660 = vmatmul.msk.f32.gmra.mxu2 %vm86_vm1, %v48_v12  ;;  %676 = vmatmul.msk.f32.gmra.mxu3 %vm86_vm1, %v64_v13  ;;  %v45_v3 = vld [vmem:[%s1125_s0 + $0xf8] sm:$0xff] }
  0x1b   :  { %628 = vmatmul.msk.f32.gmra.mxu0 %vm86_vm1, %v16_v14  ;;  %644 = vmatmul.msk.f32.gmra.mxu1 %vm86_vm1, %v32_v15 }
  0x21   :  { %661 = vmatmul.msk.f32.gmra.mxu2 %vm86_vm1, %v49_v16  ;;  %677 = vmatmul.msk.f32.gmra.mxu3 %vm86_vm1, %v65_v17 }
  0x23   :  { %629 = vmatmul.msk.f32.gmra.mxu0 %vm86_vm1, %v17_v18  ;;  %645 = vmatmul.msk.f32.gmra.mxu1 %vm86_vm1, %v33_v19 }
  0x29   :  { %662 = vmatmul.msk.f32.gmra.mxu2 %vm86_vm1, %v50_v20  ;;  %678 = vmatmul.msk.f32.gmra.mxu3 %vm86_vm1, %v66_v21 }
  0x2b   :  { %630 = vmatmul.msk.f32.gmra.mxu0 %vm86_vm1, %v18_v22  ;;  %646 = vmatmul.msk.f32.gmra.mxu1 %vm86_vm1, %v34_v23 }
  0x31   :  { %663 = vmatmul.msk.f32.gmra.mxu2 %vm86_vm1, %v51_v24  ;;  %679 = vmatmul.msk.f32.gmra.mxu3 %vm86_vm1, %v67_v25 }
  0x33   :  { %631 = vmatmul.msk.f32.gmra.mxu0 %vm86_vm1, %v19_v26  ;;  %647 = vmatmul.msk.f32.gmra.mxu1 %vm86_vm1, %v35_v27 }
  0x39   :  { %664 = vmatmul.msk.f32.gmra.mxu2 %vm86_vm1, %v52_v28  ;;  %680 = vmatmul.msk.f32.gmra.mxu3 %vm86_vm1, %v68_v29 }
  0x3b   :  { %632 = vmatmul.msk.f32.gmra.mxu0 %vm86_vm1, %v20_v30  ;;  %648 = vmatmul.msk.f32.gmra.mxu1 %vm86_vm1, %v36_v31 }
  0x41   :  { %665 = vmatmul.msk.f32.gmra.mxu2 %vm86_vm1, %v53_v32  ;;  %681 = vmatmul.msk.f32.gmra.mxu3 %vm86_vm1, %v69_v33 }
  0x43   :  { %633 = vmatmul.msk.f32.gmra.mxu0 %vm86_vm1, %v21_v34  ;;  %649 = vmatmul.msk.f32.gmra.mxu1 %vm86_vm1, %v37_v35 }
  0x49   :  { %666 = vmatmul.msk.f32.gmra.mxu2 %vm86_vm1, %v54_v36  ;;  %682 = vmatmul.msk.f32.gmra.mxu3 %vm86_vm1, %v70_v37 }
  0x4b   :  { %634 = vmatmul.msk.f32.gmra.mxu0 %vm86_vm1, %v22_v38  ;;  %650 = vmatmul.msk.f32.gmra.mxu1 %vm86_vm1, %v38_v39 }
  0x51   :  { %667 = vmatmul.msk.f32.gmra.mxu2 %vm86_vm1, %v55_v40  ;;  %683 = vmatmul.msk.f32.gmra.mxu3 %vm86_vm1, %v71_v41 }
  0x53   :  { %635 = vmatmul.msk.f32.gmra.mxu0 %vm86_vm1, %v23_v42  ;;  %651 = vmatmul.msk.f32.gmra.mxu1 %vm86_vm1, %v39_v43 }
  0x59   :  { %668 = vmatmul.msk.f32.gmra.mxu2 %vm86_vm1, %v56_v44  ;;  %684 = vmatmul.msk.f32.gmra.mxu3 %vm86_vm1, %v72_v45 }
  0x5b   :  { %636 = vmatmul.msk.f32.gmra.mxu0 %vm86_vm1, %v24_v46  ;;  %652 = vmatmul.msk.f32.gmra.mxu1 %vm86_vm1, %v40_v47 }
  0x61   :  { %669 = vmatmul.msk.f32.gmra.mxu2 %vm86_vm1, %v57_v48  ;;  %685 = vmatmul.msk.f32.gmra.mxu3 %vm86_vm1, %v73_v49 }
  0x63   :  { %637 = vmatmul.msk.f32.gmra.mxu0 %vm86_vm1, %v25_v50  ;;  %653 = vmatmul.msk.f32.gmra.mxu1 %vm86_vm1, %v41_v51 }
  0x69   :  { %670 = vmatmul.msk.f32.gmra.mxu2 %vm86_vm1, %v58_v52  ;;  %686 = vmatmul.msk.f32.gmra.mxu3 %vm86_vm1, %v74_v53 }
  0x6b   :  { %638 = vmatmul.msk.f32.gmra.mxu0 %vm86_vm1, %v26_v54  ;;  %654 = vmatmul.msk.f32.gmra.mxu1 %vm86_vm1, %v42_v55 }
  0x71   :  { %671 = vmatmul.msk.f32.gmra.mxu2 %vm86_vm1, %v59_v56  ;;  %687 = vmatmul.msk.f32.gmra.mxu3 %vm86_vm1, %v75_v57 }
  0x73   :  { %639 = vmatmul.msk.f32.gmra.mxu0 %vm86_vm1, %v27_v58  ;;  %655 = vmatmul.msk.f32.gmra.mxu1 %vm86_vm1, %v43_v59 }
  0x79   :  { %672 = vmatmul.msk.f32.gmra.mxu2 %vm86_vm1, %v60_v60  ;;  %688 = vmatmul.msk.f32.gmra.mxu3 %vm86_vm1, %v76_v61 }
  0x7b   :  { %640 = vmatmul.msk.f32.gmra.mxu0 %vm86_vm1, %v28_v62  ;;  %656 = vmatmul.msk.f32.gmra.mxu1 %vm86_vm1, %v44_v63 }
  0x81   :  { %673 = vmatmul.msk.f32.gmra.mxu2 %vm86_vm1, %v61_v0  ;;  %689 = vmatmul.msk.f32.gmra.mxu3 %vm86_vm1, %v77_v1 }
  0x83   :  { %641 = vmatmul.msk.f32.gmra.mxu0 %vm86_vm1, %v29_v2  ;;  %657 = vmatmul.msk.f32.gmra.mxu1 %vm86_vm1, %v45_v3 }
  0x88   :  { %v300_v5 = vpop.f32.mrf.mxu0  ;;  %v348_v6 = vpop.f32.mrf.mxu1 }
  0x89   :  { %v301_v7 = vadd.f32 %v994_v4, %v300_v5  ;;  %v349_v8 = vadd.f32 %v994_v4, %v348_v6 }
  0x8b   :  { %v492_v11 = vmax.f32 %v301_v7, 0.0  ;;  %v508_v12 = vmax.f32 %v349_v8, 0.0 }
  0x8c   :  { %v396_v9 = vpop.f32.mrf.mxu2  ;;  %v444_v10 = vpop.f32.mrf.mxu3 }
  0x8d   :  { %v397_v13 = vadd.f32 %v994_v4, %v396_v9  ;;  %v445_v14 = vadd.f32 %v994_v4, %v444_v10 }
  0x8f   :  { %v524_v15 = vmax.f32 %v397_v13, 0.0  ;;  %v540_v16 = vmax.f32 %v445_v14, 0.0 }
  0x90   :  { %v303_v17 = vpop.f32.mrf.mxu0  ;;  %v351_v18 = vpop.f32.mrf.mxu1 }
  0x91   :  { %v556_v19 = vmax.f32 %v492_v11, %v524_v15  ;;  %v572_v20 = vmax.f32 %v508_v12, %v540_v16  ;;  %v304_v21 = vadd.f32 %v994_v4, %v303_v17  ;;  %v352_v22 = vadd.f32 %v994_v4, %v351_v18 }
  0x93   :  { %v588_v23 = vmax.f32 %v556_v19, %v572_v20  ;;  %v493_v26 = vmax.f32 %v304_v21, 0.0  ;;  %v509_v27 = vmax.f32 %v352_v22, 0.0 }
  0x94   :  { %v399_v24 = vpop.f32.mrf.mxu2  ;;  %v447_v25 = vpop.f32.mrf.mxu3 }
  0x95   :  { %605 = vst.msk [vmem:[%s1127_s3] sm:$0xff] %vm604_vm2, %v588_v23  ;;  %v400_v28 = vadd.f32 %v994_v4, %v399_v24  ;;  %v448_v29 = vadd.f32 %v994_v4, %v447_v25 }
  0x97   :  { %v525_v30 = vmax.f32 %v400_v28, 0.0  ;;  %v541_v31 = vmax.f32 %v448_v29, 0.0 }
  0x98   :  { %v306_v32 = vpop.f32.mrf.mxu0  ;;  %v354_v33 = vpop.f32.mrf.mxu1 }
  0x99   :  { %v557_v34 = vmax.f32 %v493_v26, %v525_v30  ;;  %v573_v35 = vmax.f32 %v509_v27, %v541_v31  ;;  %v307_v36 = vadd.f32 %v994_v4, %v306_v32  ;;  %v355_v37 = vadd.f32 %v994_v4, %v354_v33 }
  0x9b   :  { %v589_v38 = vmax.f32 %v557_v34, %v573_v35  ;;  %v494_v41 = vmax.f32 %v307_v36, 0.0  ;;  %v510_v42 = vmax.f32 %v355_v37, 0.0 }
  0x9c   :  { %v402_v39 = vpop.f32.mrf.mxu2  ;;  %v450_v40 = vpop.f32.mrf.mxu3 }
  0x9d   :  { %606 = vst.msk [vmem:[%s1127_s3 + $0x8] sm:$0xff] %vm604_vm2, %v589_v38  ;;  %v403_v43 = vadd.f32 %v994_v4, %v402_v39  ;;  %v451_v44 = vadd.f32 %v994_v4, %v450_v40 }
  0x9f   :  { %v526_v45 = vmax.f32 %v403_v43, 0.0  ;;  %v542_v46 = vmax.f32 %v451_v44, 0.0 }
  0xa0   :  { %v309_v47 = vpop.f32.mrf.mxu0  ;;  %v357_v48 = vpop.f32.mrf.mxu1 }
  0xa1   :  { %v558_v49 = vmax.f32 %v494_v41, %v526_v45  ;;  %v574_v50 = vmax.f32 %v510_v42, %v542_v46  ;;  %v310_v51 = vadd.f32 %v994_v4, %v309_v47  ;;  %v358_v52 = vadd.f32 %v994_v4, %v357_v48 }
  0xa3   :  { %v590_v53 = vmax.f32 %v558_v49, %v574_v50  ;;  %v495_v56 = vmax.f32 %v310_v51, 0.0  ;;  %v511_v57 = vmax.f32 %v358_v52, 0.0 }
  0xa4   :  { %v405_v54 = vpop.f32.mrf.mxu2  ;;  %v453_v55 = vpop.f32.mrf.mxu3 }
  0xa5   :  { %607 = vst.msk [vmem:[%s1127_s3 + $0x10] sm:$0xff] %vm604_vm2, %v590_v53  ;;  %v406_v58 = vadd.f32 %v994_v4, %v405_v54  ;;  %v454_v59 = vadd.f32 %v994_v4, %v453_v55 }
  0xa7   :  { %v527_v60 = vmax.f32 %v406_v58, 0.0  ;;  %v543_v61 = vmax.f32 %v454_v59, 0.0 }
  0xa8   :  { %v312_v62 = vpop.f32.mrf.mxu0  ;;  %v360_v63 = vpop.f32.mrf.mxu1 }
  0xa9   :  { %v559_v0 = vmax.f32 %v495_v56, %v527_v60  ;;  %v575_v1 = vmax.f32 %v511_v57, %v543_v61  ;;  %v313_v2 = vadd.f32 %v994_v4, %v312_v62  ;;  %v361_v3 = vadd.f32 %v994_v4, %v360_v63 }
  0xab   :  { %v591_v5 = vmax.f32 %v559_v0, %v575_v1  ;;  %v496_v8 = vmax.f32 %v313_v2, 0.0  ;;  %v512_v9 = vmax.f32 %v361_v3, 0.0 }
  0xac   :  { %v408_v6 = vpop.f32.mrf.mxu2  ;;  %v456_v7 = vpop.f32.mrf.mxu3 }
  0xad   :  { %608 = vst.msk [vmem:[%s1127_s3 + $0x18] sm:$0xff] %vm604_vm2, %v591_v5  ;;  %v409_v10 = vadd.f32 %v994_v4, %v408_v6  ;;  %v457_v11 = vadd.f32 %v994_v4, %v456_v7 }
  0xaf   :  { %v528_v12 = vmax.f32 %v409_v10, 0.0  ;;  %v544_v13 = vmax.f32 %v457_v11, 0.0 }
  0xb0   :  { %v315_v14 = vpop.f32.mrf.mxu0  ;;  %v363_v15 = vpop.f32.mrf.mxu1 }
  0xb1   :  { %v560_v16 = vmax.f32 %v496_v8, %v528_v12  ;;  %v576_v17 = vmax.f32 %v512_v9, %v544_v13  ;;  %v316_v18 = vadd.f32 %v994_v4, %v315_v14  ;;  %v364_v19 = vadd.f32 %v994_v4, %v363_v15 }
  0xb3   :  { %v592_v20 = vmax.f32 %v560_v16, %v576_v17  ;;  %v497_v23 = vmax.f32 %v316_v18, 0.0  ;;  %v513_v24 = vmax.f32 %v364_v19, 0.0 }
  0xb4   :  { %v411_v21 = vpop.f32.mrf.mxu2  ;;  %v459_v22 = vpop.f32.mrf.mxu3 }
  0xb5   :  { %609 = vst.msk [vmem:[%s1127_s3 + $0x20] sm:$0xff] %vm604_vm2, %v592_v20  ;;  %v412_v25 = vadd.f32 %v994_v4, %v411_v21  ;;  %v460_v26 = vadd.f32 %v994_v4, %v459_v22 }
  0xb7   :  { %v529_v27 = vmax.f32 %v412_v25, 0.0  ;;  %v545_v28 = vmax.f32 %v460_v26, 0.0 }
  0xb8   :  { %v318_v29 = vpop.f32.mrf.mxu0  ;;  %v366_v30 = vpop.f32.mrf.mxu1 }
  0xb9   :  { %v561_v31 = vmax.f32 %v497_v23, %v529_v27  ;;  %v577_v32 = vmax.f32 %v513_v24, %v545_v28  ;;  %v319_v33 = vadd.f32 %v994_v4, %v318_v29  ;;  %v367_v34 = vadd.f32 %v994_v4, %v366_v30 }
  0xbb   :  { %v593_v35 = vmax.f32 %v561_v31, %v577_v32  ;;  %v498_v38 = vmax.f32 %v319_v33, 0.0  ;;  %v514_v39 = vmax.f32 %v367_v34, 0.0 }
  0xbc   :  { %v414_v36 = vpop.f32.mrf.mxu2  ;;  %v462_v37 = vpop.f32.mrf.mxu3 }
  0xbd   :  { %610 = vst.msk [vmem:[%s1127_s3 + $0x28] sm:$0xff] %vm604_vm2, %v593_v35  ;;  %v415_v40 = vadd.f32 %v994_v4, %v414_v36  ;;  %v463_v41 = vadd.f32 %v994_v4, %v462_v37 }
  0xbf   :  { %v530_v42 = vmax.f32 %v415_v40, 0.0  ;;  %v546_v43 = vmax.f32 %v463_v41, 0.0 }
  0xc0   :  { %v321_v44 = vpop.f32.mrf.mxu0  ;;  %v369_v45 = vpop.f32.mrf.mxu1 }
  0xc1   :  { %v562_v46 = vmax.f32 %v498_v38, %v530_v42  ;;  %v578_v47 = vmax.f32 %v514_v39, %v546_v43  ;;  %v322_v48 = vadd.f32 %v994_v4, %v321_v44  ;;  %v370_v49 = vadd.f32 %v994_v4, %v369_v45 }
  0xc3   :  { %v594_v50 = vmax.f32 %v562_v46, %v578_v47  ;;  %v499_v53 = vmax.f32 %v322_v48, 0.0  ;;  %v515_v54 = vmax.f32 %v370_v49, 0.0 }
  0xc4   :  { %v417_v51 = vpop.f32.mrf.mxu2  ;;  %v465_v52 = vpop.f32.mrf.mxu3 }
  0xc5   :  { %611 = vst.msk [vmem:[%s1127_s3 + $0x30] sm:$0xff] %vm604_vm2, %v594_v50  ;;  %v418_v55 = vadd.f32 %v994_v4, %v417_v51  ;;  %v466_v56 = vadd.f32 %v994_v4, %v465_v52 }
  0xc7   :  { %v531_v57 = vmax.f32 %v418_v55, 0.0  ;;  %v547_v58 = vmax.f32 %v466_v56, 0.0 }
  0xc8   :  { %v324_v59 = vpop.f32.mrf.mxu0  ;;  %v372_v60 = vpop.f32.mrf.mxu1 }
  0xc9   :  { %v563_v61 = vmax.f32 %v499_v53, %v531_v57  ;;  %v579_v62 = vmax.f32 %v515_v54, %v547_v58  ;;  %v325_v63 = vadd.f32 %v994_v4, %v324_v59  ;;  %v373_v0 = vadd.f32 %v994_v4, %v372_v60 }
  0xcb   :  { %v595_v1 = vmax.f32 %v563_v61, %v579_v62  ;;  %v500_v5 = vmax.f32 %v325_v63, 0.0  ;;  %v516_v6 = vmax.f32 %v373_v0, 0.0 }
  0xcc   :  { %v420_v2 = vpop.f32.mrf.mxu2  ;;  %v468_v3 = vpop.f32.mrf.mxu3 }
  0xcd   :  { %612 = vst.msk [vmem:[%s1127_s3 + $0x38] sm:$0xff] %vm604_vm2, %v595_v1  ;;  %v421_v7 = vadd.f32 %v994_v4, %v420_v2  ;;  %v469_v8 = vadd.f32 %v994_v4, %v468_v3 }
  0xcf   :  { %v532_v9 = vmax.f32 %v421_v7, 0.0  ;;  %v548_v10 = vmax.f32 %v469_v8, 0.0 }
  0xd0   :  { %v327_v11 = vpop.f32.mrf.mxu0  ;;  %v375_v12 = vpop.f32.mrf.mxu1 }
  0xd1   :  { %v564_v13 = vmax.f32 %v500_v5, %v532_v9  ;;  %v580_v14 = vmax.f32 %v516_v6, %v548_v10  ;;  %v328_v15 = vadd.f32 %v994_v4, %v327_v11  ;;  %v376_v16 = vadd.f32 %v994_v4, %v375_v12 }
  0xd3   :  { %v596_v17 = vmax.f32 %v564_v13, %v580_v14  ;;  %v501_v20 = vmax.f32 %v328_v15, 0.0  ;;  %v517_v21 = vmax.f32 %v376_v16, 0.0 }
  0xd4   :  { %v423_v18 = vpop.f32.mrf.mxu2  ;;  %v471_v19 = vpop.f32.mrf.mxu3 }
  0xd5   :  { %613 = vst.msk [vmem:[%s1127_s3 + $0x40] sm:$0xff] %vm604_vm2, %v596_v17  ;;  %v424_v22 = vadd.f32 %v994_v4, %v423_v18  ;;  %v472_v23 = vadd.f32 %v994_v4, %v471_v19 }
  0xd7   :  { %v533_v24 = vmax.f32 %v424_v22, 0.0  ;;  %v549_v25 = vmax.f32 %v472_v23, 0.0 }
  0xd8   :  { %v330_v26 = vpop.f32.mrf.mxu0  ;;  %v378_v27 = vpop.f32.mrf.mxu1 }
  0xd9   :  { %v565_v28 = vmax.f32 %v501_v20, %v533_v24  ;;  %v581_v29 = vmax.f32 %v517_v21, %v549_v25  ;;  %v331_v30 = vadd.f32 %v994_v4, %v330_v26  ;;  %v379_v31 = vadd.f32 %v994_v4, %v378_v27 }
  0xdb   :  { %v597_v32 = vmax.f32 %v565_v28, %v581_v29  ;;  %v502_v35 = vmax.f32 %v331_v30, 0.0  ;;  %v518_v36 = vmax.f32 %v379_v31, 0.0 }
  0xdc   :  { %v426_v33 = vpop.f32.mrf.mxu2  ;;  %v474_v34 = vpop.f32.mrf.mxu3 }
  0xdd   :  { %614 = vst.msk [vmem:[%s1127_s3 + $0x48] sm:$0xff] %vm604_vm2, %v597_v32  ;;  %v427_v37 = vadd.f32 %v994_v4, %v426_v33  ;;  %v475_v38 = vadd.f32 %v994_v4, %v474_v34 }
  0xdf   :  { %v534_v39 = vmax.f32 %v427_v37, 0.0  ;;  %v550_v40 = vmax.f32 %v475_v38, 0.0 }
  0xe0   :  { %v333_v41 = vpop.f32.mrf.mxu0  ;;  %v381_v42 = vpop.f32.mrf.mxu1 }
  0xe1   :  { %v566_v43 = vmax.f32 %v502_v35, %v534_v39  ;;  %v582_v44 = vmax.f32 %v518_v36, %v550_v40  ;;  %v334_v45 = vadd.f32 %v994_v4, %v333_v41  ;;  %v382_v46 = vadd.f32 %v994_v4, %v381_v42 }
  0xe3   :  { %v598_v47 = vmax.f32 %v566_v43, %v582_v44  ;;  %v503_v50 = vmax.f32 %v334_v45, 0.0  ;;  %v519_v51 = vmax.f32 %v382_v46, 0.0 }
  0xe4   :  { %v429_v48 = vpop.f32.mrf.mxu2  ;;  %v477_v49 = vpop.f32.mrf.mxu3 }
  0xe5   :  { %615 = vst.msk [vmem:[%s1127_s3 + $0x50] sm:$0xff] %vm604_vm2, %v598_v47  ;;  %v430_v52 = vadd.f32 %v994_v4, %v429_v48  ;;  %v478_v53 = vadd.f32 %v994_v4, %v477_v49 }
  0xe7   :  { %v535_v54 = vmax.f32 %v430_v52, 0.0  ;;  %v551_v55 = vmax.f32 %v478_v53, 0.0 }
  0xe8   :  { %v336_v56 = vpop.f32.mrf.mxu0  ;;  %v384_v57 = vpop.f32.mrf.mxu1 }
  0xe9   :  { %v567_v58 = vmax.f32 %v503_v50, %v535_v54  ;;  %v583_v59 = vmax.f32 %v519_v51, %v551_v55  ;;  %v337_v60 = vadd.f32 %v994_v4, %v336_v56  ;;  %v385_v61 = vadd.f32 %v994_v4, %v384_v57 }
  0xeb   :  { %v599_v62 = vmax.f32 %v567_v58, %v583_v59  ;;  %v504_v1 = vmax.f32 %v337_v60, 0.0  ;;  %v520_v2 = vmax.f32 %v385_v61, 0.0 }
  0xec   :  { %v432_v63 = vpop.f32.mrf.mxu2  ;;  %v480_v0 = vpop.f32.mrf.mxu3 }
  0xed   :  { %616 = vst.msk [vmem:[%s1127_s3 + $0x58] sm:$0xff] %vm604_vm2, %v599_v62  ;;  %v433_v3 = vadd.f32 %v994_v4, %v432_v63  ;;  %v481_v5 = vadd.f32 %v994_v4, %v480_v0 }
  0xef   :  { %v536_v6 = vmax.f32 %v433_v3, 0.0  ;;  %v552_v7 = vmax.f32 %v481_v5, 0.0 }
  0xf0   :  { %v339_v8 = vpop.f32.mrf.mxu0  ;;  %v387_v9 = vpop.f32.mrf.mxu1 }
  0xf1   :  { %v568_v10 = vmax.f32 %v504_v1, %v536_v6  ;;  %v584_v11 = vmax.f32 %v520_v2, %v552_v7  ;;  %v340_v12 = vadd.f32 %v994_v4, %v339_v8  ;;  %v388_v13 = vadd.f32 %v994_v4, %v387_v9 }
  0xf3   :  { %v600_v14 = vmax.f32 %v568_v10, %v584_v11  ;;  %v505_v17 = vmax.f32 %v340_v12, 0.0  ;;  %v521_v18 = vmax.f32 %v388_v13, 0.0 }
  0xf4   :  { %v435_v15 = vpop.f32.mrf.mxu2  ;;  %v483_v16 = vpop.f32.mrf.mxu3 }
  0xf5   :  { %617 = vst.msk [vmem:[%s1127_s3 + $0x60] sm:$0xff] %vm604_vm2, %v600_v14  ;;  %v436_v19 = vadd.f32 %v994_v4, %v435_v15  ;;  %v484_v20 = vadd.f32 %v994_v4, %v483_v16 }
  0xf7   :  { %v537_v21 = vmax.f32 %v436_v19, 0.0  ;;  %v553_v22 = vmax.f32 %v484_v20, 0.0 }
  0xf8   :  { %v342_v23 = vpop.f32.mrf.mxu0  ;;  %v390_v24 = vpop.f32.mrf.mxu1 }
  0xf9   :  { %v569_v25 = vmax.f32 %v505_v17, %v537_v21  ;;  %v585_v26 = vmax.f32 %v521_v18, %v553_v22  ;;  %v343_v27 = vadd.f32 %v994_v4, %v342_v23  ;;  %v391_v28 = vadd.f32 %v994_v4, %v390_v24 }
  0xfb   :  { %v601_v29 = vmax.f32 %v569_v25, %v585_v26  ;;  %v506_v32 = vmax.f32 %v343_v27, 0.0  ;;  %v522_v33 = vmax.f32 %v391_v28, 0.0 }
  0xfc   :  { %v438_v30 = vpop.f32.mrf.mxu2  ;;  %v486_v31 = vpop.f32.mrf.mxu3 }
  0xfd   :  { %618 = vst.msk [vmem:[%s1127_s3 + $0x68] sm:$0xff] %vm604_vm2, %v601_v29  ;;  %v439_v34 = vadd.f32 %v994_v4, %v438_v30  ;;  %v487_v35 = vadd.f32 %v994_v4, %v486_v31 }
  0xff   :  { %v538_v36 = vmax.f32 %v439_v34, 0.0  ;;  %v554_v37 = vmax.f32 %v487_v35, 0.0 }
 0x100   :  { %v345_v38 = vpop.f32.mrf.mxu0  ;;  %v393_v39 = vpop.f32.mrf.mxu1 }
 0x101   :  { %v570_v40 = vmax.f32 %v506_v32, %v538_v36  ;;  %v586_v41 = vmax.f32 %v522_v33, %v554_v37  ;;  %v346_v42 = vadd.f32 %v994_v4, %v345_v38  ;;  %v394_v43 = vadd.f32 %v994_v4, %v393_v39 }
 0x103   :  { %v602_v44 = vmax.f32 %v570_v40, %v586_v41  ;;  %v507_v47 = vmax.f32 %v346_v42, 0.0  ;;  %v523_v48 = vmax.f32 %v394_v43, 0.0 }
 0x104   :  { %v441_v45 = vpop.f32.mrf.mxu2  ;;  %v489_v46 = vpop.f32.mrf.mxu3 }
 0x105   :  { %619 = vst.msk [vmem:[%s1127_s3 + $0x70] sm:$0xff] %vm604_vm2, %v602_v44  ;;  %v442_v49 = vadd.f32 %v994_v4, %v441_v45  ;;  %v490_v50 = vadd.f32 %v994_v4, %v489_v46 }
 0x107   :  { %v539_v51 = vmax.f32 %v442_v49, 0.0  ;;  %v555_v52 = vmax.f32 %v490_v50, 0.0 }
 0x109   :  { %v571_v53 = vmax.f32 %v507_v47, %v539_v51  ;;  %v587_v54 = vmax.f32 %v523_v48, %v555_v52 }
 0x10b   :  { %v603_v55 = vmax.f32 %v571_v53, %v587_v54 }
 0x10d   :  { %620 = vst.msk [vmem:[%s1127_s3 + $0x78] sm:$0xff] %vm604_vm2, %v603_v55 }

// kernel: vgg_forward.4
= control target key start
LH: loop header
LB: loop body
LE: loop exit
PB: predicated region body
PF: predicated region fallthrough
CT: control target
= control target key end

     0   :  { %vm102_vm0 = vcmask 261120   ;;  %vm374_vm1 = vcmask 523264   ;;  %s850_s1 = inlined_call_operand.vmem [shape: f32[288,64], index: 1, kind: input, shape index: {}]   ;;  %s851_s0 = inlined_call_operand.vmem [shape: f32[128,288], index: 0, kind: input, shape index: {}]   ;;  %s852_s2 = inlined_call_operand.vmem [shape: f32[1,64], index: 2, kind: input, shape index: {}]   ;;  %s853_s3 = inlined_call_operand.vmem [shape: f32[32,64], index: 3, kind: output, shape index: {}]  }
   0x1   :  { %v77_v0 = vld [vmem:[%s850_s1 + $0x78] sm:$0xff]  ;;  %v76_v2 = vld [vmem:[%s850_s1 + $0x70] sm:$0xff]  ;;  %v75_v5 = vld [vmem:[%s850_s1 + $0x68] sm:$0xff] }
   0x2   :  { %v462_v1 = vld [vmem:[%s850_s1 + $0x118] sm:$0xff]  ;;  %151 = vmatpush.msra.mxu0 %v77_v0  ;;  %399 = vmatpush.msra.mxu3 %v77_v0  ;;  %v475_v4 = vld [vmem:[%s850_s1 + $0x110] sm:$0xff]  ;;  %v490_v7 = vld [vmem:[%s850_s1 + $0x108] sm:$0xff] }
   0x3   :  { %v470_v3 = vld [vmem:[%s850_s1 + $0xf8] sm:$0xff]  ;;  %293 = vmatpush.msra.mxu2 %v462_v1  ;;  %v485_v6 = vld [vmem:[%s850_s1 + $0xf0] sm:$0xff]  ;;  %v495_v8 = vld [vmem:[%s850_s1 + $0xe8] sm:$0xff] }
   0x4   :  { %216 = vmatpush.msra.mxu1 %v470_v3  ;;  %152 = vmatpush.msra.mxu0 %v76_v2  ;;  %v74_v9 = vld [vmem:[%s850_s1 + $0x60] sm:$0xff]  ;;  %v16_v12 = vld [vmem:[%s851_s0 + $0x10] sm:$0xff]  ;;  %v73_v13 = vld [vmem:[%s850_s1 + $0x58] sm:$0xff] }
   0x5   :  { %400 = vmatpush.msra.mxu3 %v76_v2  ;;  %294 = vmatpush.msra.mxu2 %v475_v4  ;;  %v505_v10 = vld [vmem:[%s850_s1 + $0x100] sm:$0xff]  ;;  %v523_v14 = vld [vmem:[%s850_s1 + $0xd8] sm:$0xff]  ;;  %v72_v15 = vld [vmem:[%s850_s1 + $0x50] sm:$0xff] }
   0x6   :  { %217 = vmatpush.msra.mxu1 %v485_v6  ;;  %153 = vmatpush.msra.mxu0 %v75_v5  ;;  %v510_v11 = vld [vmem:[%s850_s1 + $0xe0] sm:$0xff]  ;;  %v534_v16 = vld [vmem:[%s850_s1 + $0xd0] sm:$0xff]  ;;  %v71_v17 = vld [vmem:[%s850_s1 + $0x48] sm:$0xff] }
   0x7   :  { %401 = vmatpush.msra.mxu3 %v75_v5  ;;  %295 = vmatpush.msra.mxu2 %v490_v7  ;;  %v543_v18 = vld [vmem:[%s850_s1 + $0xc8] sm:$0xff]  ;;  %v70_v19 = vld [vmem:[%s850_s1 + $0x40] sm:$0xff]  ;;  %v69_v22 = vld [vmem:[%s850_s1 + $0x38] sm:$0xff] }
   0x8   :  { %218 = vmatpush.msra.mxu1 %v495_v8  ;;  %154 = vmatpush.msra.mxu0 %v74_v9  ;;  %v552_v20 = vld [vmem:[%s850_s1 + $0xc0] sm:$0xff]  ;;  %v19_v21 = vld [vmem:[%s851_s0 + $0x28] sm:$0xff]  ;;  %v564_v23 = vld [vmem:[%s850_s1 + $0xb8] sm:$0xff] }
   0x9   :  { %402 = vmatpush.msra.mxu3 %v74_v9  ;;  %296 = vmatpush.msra.mxu2 %v505_v10  ;;  %v68_v24 = vld [vmem:[%s850_s1 + $0x30] sm:$0xff]  ;;  %v67_v26 = vld [vmem:[%s850_s1 + $0x28] sm:$0xff]  ;;  %v66_v28 = vld [vmem:[%s850_s1 + $0x20] sm:$0xff] }
   0xa   :  { %219 = vmatpush.msra.mxu1 %v510_v11  ;;  %383 = vmatmul.msk.f32.vlgmr.msra.gmra.mxu2 %vm102_vm0, %v16_v12  ;;  %v574_v25 = vld [vmem:[%s850_s1 + $0xb0] sm:$0xff]  ;;  %v583_v27 = vld [vmem:[%s850_s1 + $0xa8] sm:$0xff]  ;;  %v592_v29 = vld [vmem:[%s850_s1 + $0xa0] sm:$0xff] }
   0xb   :  { %155 = vmatpush.msra.mxu0 %v73_v13  ;;  %403 = vmatpush.msra.mxu3 %v73_v13  ;;  %v22_v30 = vld [vmem:[%s851_s0 + $0x40] sm:$0xff]  ;;  %v65_v31 = vld [vmem:[%s850_s1 + $0x18] sm:$0xff]  ;;  %v64_v33 = vld [vmem:[%s850_s1 + $0x10] sm:$0xff] }
   0xc   :  { %220 = vmatpush.msra.mxu1 %v523_v14  ;;  %v604_v32 = vld [vmem:[%s850_s1 + $0x98] sm:$0xff]  ;;  %v80_v34 = vld [vmem:[%s850_s1 + $0x90] sm:$0xff]  ;;  %v63_v35 = vld [vmem:[%s850_s1 + $0x8] sm:$0xff] }
   0xd   :  { %156 = vmatpush.msra.mxu0 %v72_v15  ;;  %404 = vmatpush.msra.mxu3 %v72_v15  ;;  %v79_v36 = vld [vmem:[%s850_s1 + $0x88] sm:$0xff]  ;;  %v62_v37 = vld [vmem:[%s850_s1] sm:$0xff]  ;;  %v25_v40 = vld [vmem:[%s851_s0 + $0x58] sm:$0xff] }
   0xe   :  { %221 = vmatpush.msra.mxu1 %v534_v16  ;;  %v14_v38 = vld [vmem:[%s851_s0] sm:$0xff]  ;;  %v15_v42 = vld [vmem:[%s851_s0 + $0x8] sm:$0xff]  ;;  %v17_v43 = vld [vmem:[%s851_s0 + $0x18] sm:$0xff] }
   0xf   :  { %157 = vmatpush.msra.mxu0 %v71_v17  ;;  %405 = vmatpush.msra.mxu3 %v71_v17  ;;  %v50_v39 = vld [vmem:[%s851_s0 + $0x120] sm:$0xff]  ;;  %v53_v44 = vld [vmem:[%s851_s0 + $0x138] sm:$0xff]  ;;  %v28_v45 = vld [vmem:[%s851_s0 + $0x70] sm:$0xff] }
  0x10   :  { %222 = vmatpush.msra.mxu1 %v543_v18  ;;  %v78_v41 = vld [vmem:[%s850_s1 + $0x80] sm:$0xff]  ;;  %v20_v47 = vld [vmem:[%s851_s0 + $0x30] sm:$0xff]  ;;  %v31_v49 = vld [vmem:[%s851_s0 + $0x88] sm:$0xff] }
  0x11   :  { %158 = vmatpush.msra.mxu0 %v70_v19  ;;  %406 = vmatpush.msra.mxu3 %v70_v19  ;;  %v18_v46 = vld [vmem:[%s851_s0 + $0x20] sm:$0xff]  ;;  %v56_v48 = vld [vmem:[%s851_s0 + $0x150] sm:$0xff]  ;;  %v21_v50 = vld [vmem:[%s851_s0 + $0x38] sm:$0xff] }
  0x12   :  { %223 = vmatpush.msra.mxu1 %v552_v20  ;;  %384 = vmatmul.msk.f32.gmra.mxu2 %vm102_vm0, %v19_v21  ;;  %v23_v51 = vld [vmem:[%s851_s0 + $0x48] sm:$0xff]  ;;  %v34_v53 = vld [vmem:[%s851_s0 + $0xa0] sm:$0xff]  ;;  %v24_v54 = vld [vmem:[%s851_s0 + $0x50] sm:$0xff] }
  0x13   :  { %159 = vmatpush.msra.mxu0 %v69_v22  ;;  %407 = vmatpush.msra.mxu3 %v69_v22  ;;  %v59_v52 = vld [vmem:[%s851_s0 + $0x168] sm:$0xff]  ;;  %v26_v55 = vld [vmem:[%s851_s0 + $0x60] sm:$0xff]  ;;  %v37_v57 = vld [vmem:[%s851_s0 + $0xb8] sm:$0xff] }
  0x14   :  { %224 = vmatpush.msra.mxu1 %v564_v23  ;;  %v51_v56 = vld [vmem:[%s851_s0 + $0x128] sm:$0xff]  ;;  %v29_v59 = vld [vmem:[%s851_s0 + $0x78] sm:$0xff]  ;;  %v54_v60 = vld [vmem:[%s851_s0 + $0x140] sm:$0xff] }
  0x15   :  { %160 = vmatpush.msra.mxu0 %v68_v24  ;;  %408 = vmatpush.msra.mxu3 %v68_v24  ;;  %v27_v58 = vld [vmem:[%s851_s0 + $0x68] sm:$0xff]  ;;  %v40_v61 = vld [vmem:[%s851_s0 + $0xd0] sm:$0xff]  ;;  %v30_v62 = vld [vmem:[%s851_s0 + $0x80] sm:$0xff] }
  0x16   :  { %225 = vmatpush.msra.mxu1 %v574_v25  ;;  %v32_v63 = vld [vmem:[%s851_s0 + $0x90] sm:$0xff]  ;;  %v57_v0 = vld [vmem:[%s851_s0 + $0x158] sm:$0xff]  ;;  %v46_v5 = vld [vmem:[%s851_s0 + $0x100] sm:$0xff] }
  0x17   :  { %161 = vmatpush.msra.mxu0 %v67_v26  ;;  %409 = vmatpush.msra.mxu3 %v67_v26  ;;  %v33_v2 = vld [vmem:[%s851_s0 + $0x98] sm:$0xff]  ;;  %v52_v12 = vld [vmem:[%s851_s0 + $0x130] sm:$0xff]  ;;  %v42_v13 = vld [vmem:[%s851_s0 + $0xe0] sm:$0xff] }
  0x18   :  { %226 = vmatpush.msra.mxu1 %v583_v27  ;;  %v61_v9 = vld [vmem:[%s851_s0 + $0x178] sm:$0xff]  ;;  %v55_v15 = vld [vmem:[%s851_s0 + $0x148] sm:$0xff]  ;;  %v48_v19 = vld [vmem:[%s851_s0 + $0x110] sm:$0xff] }
  0x19   :  { %162 = vmatpush.msra.mxu0 %v66_v28  ;;  %410 = vmatpush.msra.mxu3 %v66_v28  ;;  %v47_v17 = vld [vmem:[%s851_s0 + $0x108] sm:$0xff]  ;;  %v795_v22 = vld [vmem:[%s852_s2] ss:$0 sm:$0xff] }
  0x1a   :  { %227 = vmatpush.msra.mxu1 %v592_v29  ;;  %385 = vmatmul.msk.f32.gmra.mxu2 %vm102_vm0, %v22_v30 }
  0x1b   :  { %163 = vmatpush.msra.mxu0 %v65_v31  ;;  %411 = vmatpush.msra.mxu3 %v65_v31 }
  0x1c   :  { %228 = vmatpush.msra.mxu1 %v604_v32 }
  0x1d   :  { %164 = vmatpush.msra.mxu0 %v64_v33  ;;  %412 = vmatpush.msra.mxu3 %v64_v33 }
  0x1e   :  { %229 = vmatpush.msra.mxu1 %v80_v34 }
  0x1f   :  { %165 = vmatpush.msra.mxu0 %v63_v35  ;;  %413 = vmatpush.msra.mxu3 %v63_v35 }
  0x20   :  { %230 = vmatpush.msra.mxu1 %v79_v36 }
  0x21   :  { %166 = vmatpush.msra.mxu0 %v62_v37  ;;  %414 = vmatpush.msra.mxu3 %v62_v37 }
  0x22   :  { %167 = vmatmul.f32.vlgmr.msra.gmra.mxu0 %v14_v38  ;;  %203 = vmatmul.f32.vlgmr.msra.gmra.mxu3 %v50_v39 }
  0x23   :  { %386 = vmatmul.msk.f32.gmra.mxu2 %vm102_vm0, %v25_v40  ;;  %415 = vmatpush.msrb.mxu3 %v470_v3  ;;  %v35_v3 = vld [vmem:[%s851_s0 + $0xa8] sm:$0xff] }
  0x24   :  { %231 = vmatpush.msra.mxu1 %v78_v41 }
  0x25   :  { %232 = vmatmul.f32.vlgmr.msra.gmra.mxu1 %v15_v42  ;;  %416 = vmatpush.msrb.mxu3 %v485_v6  ;;  %v36_v6 = vld [vmem:[%s851_s0 + $0xb0] sm:$0xff] }
  0x27   :  { %417 = vmatpush.msrb.mxu3 %v495_v8  ;;  %v49_v8 = vld [vmem:[%s851_s0 + $0x118] sm:$0xff] }
  0x29   :  { %418 = vmatpush.msrb.mxu3 %v510_v11  ;;  %v41_v11 = vld [vmem:[%s851_s0 + $0xd8] sm:$0xff] }
  0x2a   :  { %170 = vmatmul.f32.gmra.mxu0 %v17_v43  ;;  %206 = vmatmul.f32.gmra.mxu3 %v53_v44 }
  0x2b   :  { %387 = vmatmul.msk.f32.gmra.mxu2 %vm102_vm0, %v28_v45  ;;  %419 = vmatpush.msrb.mxu3 %v523_v14  ;;  %v44_v14 = vld [vmem:[%s851_s0 + $0xf0] sm:$0xff] }
  0x2d   :  { %235 = vmatmul.f32.gmra.mxu1 %v18_v46  ;;  %420 = vmatpush.msrb.mxu3 %v534_v16  ;;  %v45_v16 = vld [vmem:[%s851_s0 + $0xf8] sm:$0xff] }
  0x2f   :  { %421 = vmatpush.msrb.mxu3 %v543_v18  ;;  %v58_v18 = vld [vmem:[%s851_s0 + $0x160] sm:$0xff] }
  0x31   :  { %422 = vmatpush.msrb.mxu3 %v552_v20 }
  0x32   :  { %173 = vmatmul.f32.gmra.mxu0 %v20_v47  ;;  %209 = vmatmul.f32.gmra.mxu3 %v56_v48 }
  0x33   :  { %388 = vmatmul.msk.f32.gmra.mxu2 %vm102_vm0, %v31_v49  ;;  %423 = vmatpush.msrb.mxu3 %v564_v23 }
  0x35   :  { %238 = vmatmul.f32.gmra.mxu1 %v21_v50  ;;  %424 = vmatpush.msrb.mxu3 %v574_v25 }
  0x37   :  { %425 = vmatpush.msrb.mxu3 %v583_v27 }
  0x39   :  { %426 = vmatpush.msrb.mxu3 %v592_v29 }
  0x3a   :  { %176 = vmatmul.f32.gmra.mxu0 %v23_v51  ;;  %212 = vmatmul.f32.gmra.mxu3 %v59_v52 }
  0x3b   :  { %389 = vmatmul.msk.f32.gmra.mxu2 %vm102_vm0, %v34_v53  ;;  %427 = vmatpush.msrb.mxu3 %v604_v32 }
  0x3d   :  { %241 = vmatmul.f32.gmra.mxu1 %v24_v54  ;;  %428 = vmatpush.msrb.mxu3 %v80_v34 }
  0x3f   :  { %429 = vmatpush.msrb.mxu3 %v79_v36 }
  0x41   :  { %430 = vmatpush.msrb.mxu3 %v78_v41 }
  0x42   :  { %179 = vmatmul.f32.gmra.mxu0 %v26_v55  ;;  %268 = vmatmul.f32.vlgmr.msrb.gmra.mxu3 %v51_v56 }
  0x43   :  { %390 = vmatmul.msk.f32.gmra.mxu2 %vm102_vm0, %v37_v57  ;;  %431 = vmatpush.msra.mxu3 %v462_v1  ;;  %v43_v1 = vld [vmem:[%s851_s0 + $0xe8] sm:$0xff] }
  0x45   :  { %244 = vmatmul.f32.gmra.mxu1 %v27_v58  ;;  %432 = vmatpush.msra.mxu3 %v475_v4  ;;  %v60_v4 = vld [vmem:[%s851_s0 + $0x170] sm:$0xff] }
  0x47   :  { %433 = vmatpush.msra.mxu3 %v490_v7  ;;  %v38_v7 = vld [vmem:[%s851_s0 + $0xc0] sm:$0xff] }
  0x49   :  { %434 = vmatpush.msra.mxu3 %v505_v10  ;;  %v39_v10 = vld [vmem:[%s851_s0 + $0xc8] sm:$0xff] }
  0x4a   :  { %182 = vmatmul.f32.gmra.mxu0 %v29_v59  ;;  %271 = vmatmul.f32.gmra.mxu3 %v54_v60 }
  0x4b   :  { %391 = vmatmul.msk.f32.gmra.mxu2 %vm102_vm0, %v40_v61 }
  0x4d   :  { %247 = vmatmul.f32.gmra.mxu1 %v30_v62 }
  0x52   :  { %185 = vmatmul.f32.gmra.mxu0 %v32_v63  ;;  %274 = vmatmul.f32.gmra.mxu3 %v57_v0 }
  0x53   :  { %392 = vmatmul.msk.f32.gmra.mxu2 %vm102_vm0, %v43_v1 }
  0x55   :  { %250 = vmatmul.f32.gmra.mxu1 %v33_v2 }
  0x5a   :  { %188 = vmatmul.f32.gmra.mxu0 %v35_v3  ;;  %277 = vmatmul.f32.gmra.mxu3 %v60_v4 }
  0x5b   :  { %393 = vmatmul.msk.f32.gmra.mxu2 %vm102_vm0, %v46_v5 }
  0x5d   :  { %253 = vmatmul.f32.gmra.mxu1 %v36_v6 }
  0x62   :  { %191 = vmatmul.f32.gmra.mxu0 %v38_v7  ;;  %398 = vmatmul.msk.f32.vlgmr.msra.gmra.mxu3 %vm102_vm0, %v61_v9 }
  0x63   :  { %394 = vmatmul.msk.f32.gmra.mxu2 %vm102_vm0, %v49_v8 }
  0x65   :  { %256 = vmatmul.f32.gmra.mxu1 %v39_v10 }
  0x6a   :  { %194 = vmatmul.f32.gmra.mxu0 %v41_v11 }
  0x6b   :  { %395 = vmatmul.msk.f32.gmra.mxu2 %vm102_vm0, %v52_v12 }
  0x6d   :  { %259 = vmatmul.f32.gmra.mxu1 %v42_v13 }
  0x72   :  { %197 = vmatmul.f32.gmra.mxu0 %v44_v14 }
  0x73   :  { %396 = vmatmul.msk.f32.gmra.mxu2 %vm102_vm0, %v55_v15 }
  0x75   :  { %262 = vmatmul.f32.gmra.mxu1 %v45_v16 }
  0x7a   :  { %200 = vmatmul.f32.gmra.mxu0 %v47_v17 }
  0x7b   :  { %397 = vmatmul.msk.f32.gmra.mxu2 %vm102_vm0, %v58_v18 }
  0x7d   :  { %265 = vmatmul.f32.gmra.mxu1 %v48_v19 }
  0x8d   :  { %v298_v20 = vpop.f32.mrf.mxu2 }
  0x95   :  { %v301_v21 = vpop.f32.mrf.mxu2 }
  0x9d   :  { %v304_v23 = vpop.f32.mrf.mxu2 }
  0x9f   :  { %v168_v24 = vpop.f32.mrf.mxu0 }
  0xa0   :  { %v169_v25 = vadd.f32 %v795_v22, %v168_v24 }
  0xa2   :  { %v233_v26 = vpop.f32.mrf.mxu1 }
  0xa3   :  { %v234_v27 = vadd.f32 %v233_v26, %v169_v25 }
  0xa5   :  { %v798_v28 = vadd.f32 %v298_v20, %v234_v27  ;;  %v204_v29 = vpop.f32.mrf.mxu3 }
  0xa6   :  { %v307_v30 = vpop.f32.mrf.mxu2  ;;  %v205_v12 = vadd.f32 %v795_v22, %v204_v29 }
  0xa7   :  { %v171_v31 = vpop.f32.mrf.mxu0  ;;  %v346_v25 = vmax.f32 %v798_v28, 0.0 }
  0xa8   :  { %v172_v32 = vadd.f32 %v795_v22, %v171_v31 }
  0xaa   :  { %v236_v33 = vpop.f32.mrf.mxu1 }
  0xab   :  { %v237_v34 = vadd.f32 %v236_v33, %v172_v32 }
  0xad   :  { %v801_v35 = vadd.f32 %v301_v21, %v237_v34  ;;  %v207_v38 = vpop.f32.mrf.mxu3 }
  0xae   :  { %v310_v36 = vpop.f32.mrf.mxu2  ;;  %v208_v29 = vadd.f32 %v795_v22, %v207_v38 }
  0xaf   :  { %v174_v37 = vpop.f32.mrf.mxu0 }
  0xb0   :  { %v175_v39 = vadd.f32 %v795_v22, %v174_v37 }
  0xb2   :  { %v239_v40 = vpop.f32.mrf.mxu1 }
  0xb3   :  { %v240_v41 = vadd.f32 %v239_v40, %v175_v39 }
  0xb5   :  { %v804_v42 = vadd.f32 %v304_v23, %v240_v41  ;;  %v807_v46 = vpop.f32.mrf.mxu3 }
  0xb6   :  { %v313_v43 = vpop.f32.mrf.mxu2 }
  0xb7   :  { %v177_v44 = vpop.f32.mrf.mxu0 }
  0xb8   :  { %v178_v45 = vadd.f32 %v795_v22, %v177_v44 }
  0xba   :  { %v242_v47 = vpop.f32.mrf.mxu1 }
  0xbb   :  { %v243_v48 = vadd.f32 %v242_v47, %v178_v45 }
  0xbd   :  { %v809_v49 = vadd.f32 %v307_v30, %v243_v48  ;;  %v213_v53 = vpop.f32.mrf.mxu3 }
  0xbe   :  { %v811_v50 = vpop.f32.mrf.mxu2  ;;  %v214_v40 = vadd.f32 %v795_v22, %v213_v53 }
  0xbf   :  { %v180_v51 = vpop.f32.mrf.mxu0 }
  0xc0   :  { %v181_v6 = vadd.f32 %v795_v22, %v180_v51 }
  0xc2   :  { %v245_v52 = vpop.f32.mrf.mxu1 }
  0xc3   :  { %v246_v10 = vadd.f32 %v245_v52, %v181_v6 }
  0xc5   :  { %v269_v57 = vpop.f32.mrf.mxu3  ;;  %v311_v16 = vadd.f32 %v310_v36, %v246_v10 }
  0xc6   :  { %v813_v54 = vpop.f32.mrf.mxu2  ;;  %v270_v17 = vadd.f32 %v269_v57, %v205_v12 }
  0xc7   :  { %v183_v55 = vpop.f32.mrf.mxu0  ;;  %v350_v26 = vmax.f32 %v311_v16, 0.0 }
  0xc8   :  { %v184_v18 = vadd.f32 %v795_v22, %v183_v55 }
  0xca   :  { %v248_v56 = vpop.f32.mrf.mxu1 }
  0xcb   :  { %v249_v27 = vadd.f32 %v248_v56, %v184_v18 }
  0xcd   :  { %v272_v63 = vpop.f32.mrf.mxu3  ;;  %v314_v41 = vadd.f32 %v313_v43, %v249_v27  ;;  %v347_v43 = vmax.f32 %v801_v35, 0.0  ;;  %v349_v35 = vmax.f32 %v809_v49, 0.0 }
  0xce   :  { %v322_v58 = vpop.f32.mrf.mxu2  ;;  %v273_v28 = vadd.f32 %v272_v63, %v208_v29 }
  0xcf   :  { %v186_v59 = vpop.f32.mrf.mxu0  ;;  %v351_v53 = vmax.f32 %v314_v41, 0.0 }
  0xd0   :  { %v187_v39 = vadd.f32 %v795_v22, %v186_v59 }
  0xd2   :  { %v251_v60 = vpop.f32.mrf.mxu1 }
  0xd3   :  { %v252_v57 = vadd.f32 %v251_v60, %v187_v39 }
  0xd5   :  { %v275_v3 = vpop.f32.mrf.mxu3 }
  0xd6   :  { %v325_v61 = vpop.f32.mrf.mxu2 }
  0xd7   :  { %v189_v62 = vpop.f32.mrf.mxu0 }
  0xd8   :  { %v190_v31 = vadd.f32 %v795_v22, %v189_v62  ;;  %v211_v62 = vadd.f32 %v795_v22, %v807_v46 }
  0xda   :  { %v254_v0 = vpop.f32.mrf.mxu1  ;;  %v276_v60 = vadd.f32 %v275_v3, %v211_v62 }
  0xdb   :  { %v255_v45 = vadd.f32 %v254_v0, %v190_v31 }
  0xdd   :  { %v278_v15 = vpop.f32.mrf.mxu3  ;;  %v320_v63 = vadd.f32 %v813_v54, %v255_v45  ;;  %v348_v54 = vmax.f32 %v804_v42, 0.0 }
  0xde   :  { %v328_v1 = vpop.f32.mrf.mxu2  ;;  %v279_v38 = vadd.f32 %v278_v15, %v214_v40 }
  0xdf   :  { %v192_v2 = vpop.f32.mrf.mxu0 }
  0xe0   :  { %v193_v5 = vadd.f32 %v795_v22, %v192_v2 }
  0xe2   :  { %v257_v4 = vpop.f32.mrf.mxu1 }
  0xe3   :  { %v258_v8 = vadd.f32 %v257_v4, %v193_v5 }
  0xe5   :  { %v323_v13 = vadd.f32 %v322_v58, %v258_v8  ;;  %v343_v47 = vpop.f32.mrf.mxu3  ;;  %v317_v8 = vadd.f32 %v811_v50, %v252_v57 }
  0xe6   :  { %v331_v7 = vpop.f32.mrf.mxu2  ;;  %v344_v59 = vadd.f32 %v343_v47, %v279_v38 }
  0xe7   :  { %v195_v9 = vpop.f32.mrf.mxu0  ;;  %v354_v20 = vmax.f32 %v323_v13, 0.0  ;;  %v353_v13 = vmax.f32 %v320_v63, 0.0 }
  0xe8   :  { %v196_v14 = vadd.f32 %v795_v22, %v195_v9  ;;  %v361_v9 = vmax.f32 %v344_v59, 0.0 }
  0xe9   :  { %v362_v33 = vmax.f32 %v346_v25, %v354_v20 }
  0xea   :  { %v260_v11 = vpop.f32.mrf.mxu1  ;;  %v369_v50 = vmax.f32 %v353_v13, %v361_v9 }
  0xeb   :  { %v261_v21 = vadd.f32 %v260_v11, %v196_v14 }
  0xed   :  { %v326_v34 = vadd.f32 %v325_v61, %v261_v21 }
  0xee   :  { %v334_v19 = vpop.f32.mrf.mxu2 }
  0xef   :  { %v335_v23 = vadd.f32 %v334_v19, %v270_v17  ;;  %v198_v24 = vpop.f32.mrf.mxu0  ;;  %v355_v51 = vmax.f32 %v326_v34, 0.0 }
  0xf0   :  { %v199_v37 = vadd.f32 %v795_v22, %v198_v24 }
  0xf1   :  { %v358_v30 = vmax.f32 %v335_v23, 0.0  ;;  %v363_v2 = vmax.f32 %v347_v43, %v355_v51 }
  0xf2   :  { %v263_v32 = vpop.f32.mrf.mxu1 }
  0xf3   :  { %v366_v36 = vmax.f32 %v350_v26, %v358_v30  ;;  %v264_v52 = vadd.f32 %v263_v32, %v199_v37 }
  0xf5   :  { %v370_v44 = vmax.f32 %v362_v33, %v366_v36  ;;  %v329_v4 = vadd.f32 %v328_v1, %v264_v52  ;;  %v352_v1 = vmax.f32 %v317_v8, 0.0 }
  0xf6   :  { %v337_v48 = vpop.f32.mrf.mxu2 }
  0xf7   :  { %375 = vst.msk [vmem:[%s853_s3] sm:$0xff] %vm374_vm1, %v370_v44  ;;  %v338_v55 = vadd.f32 %v337_v48, %v273_v28  ;;  %v201_v56 = vpop.f32.mrf.mxu0  ;;  %v356_v14 = vmax.f32 %v329_v4, 0.0 }
  0xf8   :  { %v202_v58 = vadd.f32 %v795_v22, %v201_v56 }
  0xf9   :  { %v359_v61 = vmax.f32 %v338_v55, 0.0  ;;  %v364_v16 = vmax.f32 %v348_v54, %v356_v14 }
  0xfa   :  { %v266_v0 = vpop.f32.mrf.mxu1 }
  0xfb   :  { %v367_v5 = vmax.f32 %v351_v53, %v359_v61  ;;  %v267_v6 = vadd.f32 %v266_v0, %v202_v58 }
  0xfd   :  { %v371_v10 = vmax.f32 %v363_v2, %v367_v5  ;;  %v332_v11 = vadd.f32 %v331_v7, %v267_v6 }
  0xfe   :  { %v340_v12 = vpop.f32.mrf.mxu2 }
  0xff   :  { %376 = vst.msk [vmem:[%s853_s3 + $0x8] sm:$0xff] %vm374_vm1, %v371_v10  ;;  %v357_v22 = vmax.f32 %v332_v11, 0.0  ;;  %v341_v46 = vadd.f32 %v340_v12, %v276_v60 }
 0x101   :  { %v365_v3 = vmax.f32 %v349_v35, %v357_v22  ;;  %v360_v15 = vmax.f32 %v341_v46, 0.0 }
 0x103   :  { %v373_v7 = vmax.f32 %v365_v3, %v369_v50  ;;  %v368_v17 = vmax.f32 %v352_v1, %v360_v15 }
 0x105   :  { %378 = vst.msk [vmem:[%s853_s3 + $0x18] sm:$0xff] %vm374_vm1, %v373_v7  ;;  %v372_v49 = vmax.f32 %v364_v16, %v368_v17 }
 0x107   :  { %377 = vst.msk [vmem:[%s853_s3 + $0x10] sm:$0xff] %vm374_vm1, %v372_v49 }

// kernel: vgg_forward.5
= control target key start
LH: loop header
LB: loop body
LE: loop exit
PB: predicated region body
PF: predicated region fallthrough
CT: control target
= control target key end

     0   :  { %s20822_s0 = inlined_call_operand.vmem [shape: f32[2,1024], index: 0, kind: input, shape index: {}]   ;;  %s20823_s1 = inlined_call_operand.vmem [shape: bf16[1024,1024], index: 1, kind: input, shape index: {}]   ;;  %s20824_s2 = inlined_call_operand.vmem [shape: f32[1,1024], index: 2, kind: input, shape index: {}]   ;;  %s20825_s3 = inlined_call_operand.vmem [shape: bf16[1024,1024], index: 3, kind: input, shape index: {}]   ;;  %s20826_s4 = inlined_call_operand.vmem [shape: f32[1,1024], index: 4, kind: input, shape index: {}]   ;;  %s20827_s5 = inlined_call_operand.vmem [shape: bf16[1024,10], index: 5, kind: input, shape index: {}]   ;;  %s20828_s6 = inlined_call_operand.vmem [shape: f32[1,10], index: 6, kind: input, shape index: {}]   ;;  %s20829_s7 = inlined_call_operand.hbm [shape: f32[2,10], index: 7, kind: output, shape index: {}]  }
   0x1   :  { %v8798_v0 = vld [vmem:[%s20823_s1 + $0x1c0] sm:$0xf] }
   0x2   :  { %v12984_v1 = vld [vmem:[%s20823_s1 + $0x1dc] sm:$0xf0] }
   0x3   :  { %v9054_v2 = vld [vmem:[%s20823_s1 + $0x3c0] sm:$0xf]  ;;  %v8799_v3 = vor.u32 %v12984_v1, %v8798_v0 }
   0x4   :  { %v13048_v4 = vld [vmem:[%s20823_s1 + $0x3dc] sm:$0xf0] }
   0x5   :  { %v9310_v5 = vld [vmem:[%s20823_s1 + $0x5c0] sm:$0xf]  ;;  %v9055_v7 = vor.u32 %v13048_v4, %v9054_v2  ;;  %3148 = vmatpush.bf16.msra.mxu0 %v8799_v3 }
   0x6   :  { %v13112_v6 = vld [vmem:[%s20823_s1 + $0x5dc] sm:$0xf0] }
   0x7   :  { %v9311_v8 = vor.u32 %v13112_v6, %v9310_v5  ;;  %v9566_v9 = vld [vmem:[%s20823_s1 + $0x7c0] sm:$0xf]  ;;  %3161 = vmatpush.bf16.msra.mxu1 %v9055_v7 }
   0x8   :  { %v13176_v10 = vld [vmem:[%s20823_s1 + $0x7dc] sm:$0xf0] }
   0x9   :  { %v8766_v11 = vld [vmem:[%s20823_s1 + $0x180] sm:$0xf]  ;;  %v9567_v12 = vor.u32 %v13176_v10, %v9566_v9  ;;  %3174 = vmatpush.bf16.msra.mxu2 %v9311_v8 }
   0xa   :  { %v12976_v13 = vld [vmem:[%s20823_s1 + $0x19c] sm:$0xf0] }
   0xb   :  { %v9022_v14 = vld [vmem:[%s20823_s1 + $0x380] sm:$0xf]  ;;  %v8767_v16 = vor.u32 %v12976_v13, %v8766_v11  ;;  %3187 = vmatpush.bf16.msra.mxu3 %v9567_v12 }
   0xc   :  { %v13040_v15 = vld [vmem:[%s20823_s1 + $0x39c] sm:$0xf0] }
   0xd   :  { %v9023_v17 = vor.u32 %v13040_v15, %v9022_v14  ;;  %v9278_v18 = vld [vmem:[%s20823_s1 + $0x580] sm:$0xf]  ;;  %3149 = vmatpush.bf16.msra.mxu0 %v8767_v16 }
   0xe   :  { %v13104_v19 = vld [vmem:[%s20823_s1 + $0x59c] sm:$0xf0] }
   0xf   :  { %v9534_v20 = vld [vmem:[%s20823_s1 + $0x780] sm:$0xf]  ;;  %v9279_v21 = vor.u32 %v13104_v19, %v9278_v18  ;;  %3162 = vmatpush.bf16.msra.mxu1 %v9023_v17 }
  0x10   :  { %v13168_v22 = vld [vmem:[%s20823_s1 + $0x79c] sm:$0xf0] }
  0x11   :  { %v8734_v23 = vld [vmem:[%s20823_s1 + $0x140] sm:$0xf]  ;;  %v9535_v25 = vor.u32 %v13168_v22, %v9534_v20  ;;  %3175 = vmatpush.bf16.msra.mxu2 %v9279_v21 }
  0x12   :  { %v12968_v24 = vld [vmem:[%s20823_s1 + $0x15c] sm:$0xf0] }
  0x13   :  { %v8990_v26 = vld [vmem:[%s20823_s1 + $0x340] sm:$0xf]  ;;  %v8735_v29 = vor.u32 %v12968_v24, %v8734_v23  ;;  %3188 = vmatpush.bf16.msra.mxu3 %v9535_v25 }
  0x14   :  { %v13032_v27 = vld [vmem:[%s20823_s1 + $0x35c] sm:$0xf0] }
  0x15   :  { %v9246_v28 = vld [vmem:[%s20823_s1 + $0x540] sm:$0xf]  ;;  %v8991_v33 = vor.u32 %v13032_v27, %v8990_v26  ;;  %3150 = vmatpush.bf16.msra.mxu0 %v8735_v29 }
  0x16   :  { %v13096_v30 = vld [vmem:[%s20823_s1 + $0x55c] sm:$0xf0] }
  0x17   :  { %v9502_v31 = vld [vmem:[%s20823_s1 + $0x740] sm:$0xf]  ;;  %v9247_v34 = vor.u32 %v13096_v30, %v9246_v28  ;;  %3163 = vmatpush.bf16.msra.mxu1 %v8991_v33 }
  0x18   :  { %v13160_v32 = vld [vmem:[%s20823_s1 + $0x75c] sm:$0xf0] }
  0x19   :  { %v8702_v35 = vld [vmem:[%s20823_s1 + $0x100] sm:$0xf]  ;;  %v9503_v38 = vor.u32 %v13160_v32, %v9502_v31  ;;  %3176 = vmatpush.bf16.msra.mxu2 %v9247_v34 }
  0x1a   :  { %v12960_v36 = vld [vmem:[%s20823_s1 + $0x11c] sm:$0xf0] }
  0x1b   :  { %v8958_v37 = vld [vmem:[%s20823_s1 + $0x300] sm:$0xf]  ;;  %v8703_v44 = vor.u32 %v12960_v36, %v8702_v35  ;;  %3189 = vmatpush.bf16.msra.mxu3 %v9503_v38 }
  0x1c   :  { %v13024_v39 = vld [vmem:[%s20823_s1 + $0x31c] sm:$0xf0] }
  0x1d   :  { %v9214_v40 = vld [vmem:[%s20823_s1 + $0x500] sm:$0xf]  ;;  %v8959_v45 = vor.u32 %v13024_v39, %v8958_v37  ;;  %3151 = vmatpush.bf16.msra.mxu0 %v8703_v44 }
  0x1e   :  { %v13088_v41 = vld [vmem:[%s20823_s1 + $0x51c] sm:$0xf0] }
  0x1f   :  { %v9470_v42 = vld [vmem:[%s20823_s1 + $0x700] sm:$0xf]  ;;  %v9215_v46 = vor.u32 %v13088_v41, %v9214_v40  ;;  %3164 = vmatpush.bf16.msra.mxu1 %v8959_v45 }
  0x20   :  { %v13152_v43 = vld [vmem:[%s20823_s1 + $0x71c] sm:$0xf0] }
  0x21   :  { %v8670_v47 = vld [vmem:[%s20823_s1 + $0xc0] sm:$0xf]  ;;  %v9471_v50 = vor.u32 %v13152_v43, %v9470_v42  ;;  %3177 = vmatpush.bf16.msra.mxu2 %v9215_v46 }
  0x22   :  { %v12952_v48 = vld [vmem:[%s20823_s1 + $0xdc] sm:$0xf0] }
  0x23   :  { %v8926_v49 = vld [vmem:[%s20823_s1 + $0x2c0] sm:$0xf]  ;;  %v8671_v56 = vor.u32 %v12952_v48, %v8670_v47  ;;  %3190 = vmatpush.bf16.msra.mxu3 %v9471_v50 }
  0x24   :  { %v13016_v51 = vld [vmem:[%s20823_s1 + $0x2dc] sm:$0xf0] }
  0x25   :  { %v9182_v52 = vld [vmem:[%s20823_s1 + $0x4c0] sm:$0xf]  ;;  %v8927_v57 = vor.u32 %v13016_v51, %v8926_v49  ;;  %3152 = vmatpush.bf16.msra.mxu0 %v8671_v56 }
  0x26   :  { %v13080_v53 = vld [vmem:[%s20823_s1 + $0x4dc] sm:$0xf0] }
  0x27   :  { %v9438_v54 = vld [vmem:[%s20823_s1 + $0x6c0] sm:$0xf]  ;;  %v9183_v58 = vor.u32 %v13080_v53, %v9182_v52  ;;  %3165 = vmatpush.bf16.msra.mxu1 %v8927_v57 }
  0x28   :  { %v13144_v55 = vld [vmem:[%s20823_s1 + $0x6dc] sm:$0xf0] }
  0x29   :  { %v8638_v59 = vld [vmem:[%s20823_s1 + $0x80] sm:$0xf]  ;;  %v9439_v62 = vor.u32 %v13144_v55, %v9438_v54  ;;  %3178 = vmatpush.bf16.msra.mxu2 %v9183_v58 }
  0x2a   :  { %v12944_v60 = vld [vmem:[%s20823_s1 + $0x9c] sm:$0xf0] }
  0x2b   :  { %v8894_v61 = vld [vmem:[%s20823_s1 + $0x280] sm:$0xf]  ;;  %v8639_v4 = vor.u32 %v12944_v60, %v8638_v59  ;;  %3191 = vmatpush.bf16.msra.mxu3 %v9439_v62 }
  0x2c   :  { %v13008_v63 = vld [vmem:[%s20823_s1 + $0x29c] sm:$0xf0] }
  0x2d   :  { %v9150_v0 = vld [vmem:[%s20823_s1 + $0x480] sm:$0xf]  ;;  %v8895_v5 = vor.u32 %v13008_v63, %v8894_v61  ;;  %3153 = vmatpush.bf16.msra.mxu0 %v8639_v4 }
  0x2e   :  { %v13072_v1 = vld [vmem:[%s20823_s1 + $0x49c] sm:$0xf0] }
  0x2f   :  { %v9406_v2 = vld [vmem:[%s20823_s1 + $0x680] sm:$0xf]  ;;  %v9151_v6 = vor.u32 %v13072_v1, %v9150_v0  ;;  %3166 = vmatpush.bf16.msra.mxu1 %v8895_v5 }
  0x30   :  { %v13136_v3 = vld [vmem:[%s20823_s1 + $0x69c] sm:$0xf0] }
  0x31   :  { %v8606_v7 = vld [vmem:[%s20823_s1 + $0x40] sm:$0xf]  ;;  %v9407_v10 = vor.u32 %v13136_v3, %v9406_v2  ;;  %3179 = vmatpush.bf16.msra.mxu2 %v9151_v6 }
  0x32   :  { %v12936_v8 = vld [vmem:[%s20823_s1 + $0x5c] sm:$0xf0] }
  0x33   :  { %v8862_v9 = vld [vmem:[%s20823_s1 + $0x240] sm:$0xf]  ;;  %v8607_v16 = vor.u32 %v12936_v8, %v8606_v7  ;;  %3192 = vmatpush.bf16.msra.mxu3 %v9407_v10 }
  0x34   :  { %v13000_v11 = vld [vmem:[%s20823_s1 + $0x25c] sm:$0xf0] }
  0x35   :  { %v9118_v12 = vld [vmem:[%s20823_s1 + $0x440] sm:$0xf]  ;;  %v8863_v19 = vor.u32 %v13000_v11, %v8862_v9  ;;  %3154 = vmatpush.bf16.msra.mxu0 %v8607_v16 }
  0x36   :  { %v13064_v13 = vld [vmem:[%s20823_s1 + $0x45c] sm:$0xf0] }
  0x37   :  { %v9374_v14 = vld [vmem:[%s20823_s1 + $0x640] sm:$0xf]  ;;  %v9119_v20 = vor.u32 %v13064_v13, %v9118_v12  ;;  %3167 = vmatpush.bf16.msra.mxu1 %v8863_v19 }
  0x38   :  { %v13128_v15 = vld [vmem:[%s20823_s1 + $0x65c] sm:$0xf0] }
  0x39   :  { %v8574_v17 = vld [vmem:[%s20823_s1] sm:$0xf]  ;;  %v9375_v24 = vor.u32 %v13128_v15, %v9374_v14  ;;  %3180 = vmatpush.bf16.msra.mxu2 %v9119_v20 }
  0x3a   :  { %v12928_v18 = vld [vmem:[%s20823_s1 + $0x1c] sm:$0xf0] }
  0x3b   :  { %v8830_v21 = vld [vmem:[%s20823_s1 + $0x200] sm:$0xf]  ;;  %v8575_v31 = vor.u32 %v12928_v18, %v8574_v17  ;;  %3193 = vmatpush.bf16.msra.mxu3 %v9375_v24 }
  0x3c   :  { %v12992_v22 = vld [vmem:[%s20823_s1 + $0x21c] sm:$0xf0] }
  0x3d   :  { %v9086_v23 = vld [vmem:[%s20823_s1 + $0x400] sm:$0xf]  ;;  %v8831_v35 = vor.u32 %v12992_v22, %v8830_v21  ;;  %3155 = vmatpush.bf16.msra.mxu0 %v8575_v31 }
  0x3e   :  { %v13056_v25 = vld [vmem:[%s20823_s1 + $0x41c] sm:$0xf0] }
  0x3f   :  { %v9342_v26 = vld [vmem:[%s20823_s1 + $0x600] sm:$0xf]  ;;  %v9087_v36 = vor.u32 %v13056_v25, %v9086_v23  ;;  %3168 = vmatpush.bf16.msra.mxu1 %v8831_v35 }
  0x40   :  { %v13120_v27 = vld [vmem:[%s20823_s1 + $0x61c] sm:$0xf0] }
  0x41   :  { %v9822_v28 = vld [vmem:[%s20823_s1 + $0x9c0] sm:$0xf]  ;;  %v9343_v39 = vor.u32 %v13120_v27, %v9342_v26  ;;  %3181 = vmatpush.bf16.msra.mxu2 %v9087_v36 }
  0x42   :  { %v13240_v29 = vld [vmem:[%s20823_s1 + $0x9dc] sm:$0xf0] }
  0x43   :  { %v10078_v30 = vld [vmem:[%s20823_s1 + $0xbc0] sm:$0xf]  ;;  %v9823_v40 = vor.u32 %v13240_v29, %v9822_v28  ;;  %3194 = vmatpush.bf16.msra.mxu3 %v9343_v39 }
  0x44   :  { %v13304_v32 = vld [vmem:[%s20823_s1 + $0xbdc] sm:$0xf0] }
  0x45   :  { %v10334_v33 = vld [vmem:[%s20823_s1 + $0xdc0] sm:$0xf]  ;;  %v10079_v41 = vor.u32 %v13304_v32, %v10078_v30  ;;  %3200 = vmatpush.bf16.msrb.mxu0 %v9823_v40 }
  0x46   :  { %v13368_v34 = vld [vmem:[%s20823_s1 + $0xddc] sm:$0xf0] }
  0x47   :  { %v10590_v37 = vld [vmem:[%s20823_s1 + $0xfc0] sm:$0xf]  ;;  %v10335_v42 = vor.u32 %v13368_v34, %v10334_v33  ;;  %3213 = vmatpush.bf16.msrb.mxu1 %v10079_v41 }
  0x48   :  { %v13432_v38 = vld [vmem:[%s20823_s1 + $0xfdc] sm:$0xf0] }
  0x49   :  { %v9790_v43 = vld [vmem:[%s20823_s1 + $0x980] sm:$0xf]  ;;  %v10591_v46 = vor.u32 %v13432_v38, %v10590_v37  ;;  %3226 = vmatpush.bf16.msrb.mxu2 %v10335_v42 }
  0x4a   :  { %v13232_v44 = vld [vmem:[%s20823_s1 + $0x99c] sm:$0xf0] }
  0x4b   :  { %v10046_v45 = vld [vmem:[%s20823_s1 + $0xb80] sm:$0xf]  ;;  %v9791_v52 = vor.u32 %v13232_v44, %v9790_v43  ;;  %3239 = vmatpush.bf16.msrb.mxu3 %v10591_v46 }
  0x4c   :  { %v13296_v47 = vld [vmem:[%s20823_s1 + $0xb9c] sm:$0xf0] }
  0x4d   :  { %v10302_v48 = vld [vmem:[%s20823_s1 + $0xd80] sm:$0xf]  ;;  %v10047_v53 = vor.u32 %v13296_v47, %v10046_v45  ;;  %3201 = vmatpush.bf16.msrb.mxu0 %v9791_v52  ;;  %v28_v52 = vld [vmem:[%s20822_s0 + $0x8] sm:$0xff] }
  0x4e   :  { %v13360_v49 = vld [vmem:[%s20823_s1 + $0xd9c] sm:$0xf0]  ;;  %33 = vst [vmem:[#allocation1 + $0x20] ss:$4 sm:$0xff] %v28_v52  ;;  %v13156_v52 = vld [vmem:[%s20823_s1 + $0x744] sm:$0xf] }
  0x4f   :  { %v10558_v50 = vld [vmem:[%s20823_s1 + $0xf80] sm:$0xf]  ;;  %v10303_v54 = vor.u32 %v13360_v49, %v10302_v48  ;;  %3214 = vmatpush.bf16.msrb.mxu1 %v10047_v53 }
  0x50   :  { %v13424_v51 = vld [vmem:[%s20823_s1 + $0xf9c] sm:$0xf0] }
  0x51   :  { %v9758_v55 = vld [vmem:[%s20823_s1 + $0x940] sm:$0xf]  ;;  %v10559_v58 = vor.u32 %v13424_v51, %v10558_v50  ;;  %3227 = vmatpush.bf16.msrb.mxu2 %v10303_v54 }
  0x52   :  { %v13224_v56 = vld [vmem:[%s20823_s1 + $0x95c] sm:$0xf0] }
  0x53   :  { %v10014_v57 = vld [vmem:[%s20823_s1 + $0xb40] sm:$0xf]  ;;  %v9759_v0 = vor.u32 %v13224_v56, %v9758_v55  ;;  %3240 = vmatpush.bf16.msrb.mxu3 %v10559_v58 }
  0x54   :  { %v13288_v59 = vld [vmem:[%s20823_s1 + $0xb5c] sm:$0xf0] }
  0x55   :  { %v10270_v60 = vld [vmem:[%s20823_s1 + $0xd40] sm:$0xf]  ;;  %v10015_v3 = vor.u32 %v13288_v59, %v10014_v57  ;;  %3202 = vmatpush.bf16.msrb.mxu0 %v9759_v0 }
  0x56   :  { %v13352_v61 = vld [vmem:[%s20823_s1 + $0xd5c] sm:$0xf0] }
  0x57   :  { %v10526_v62 = vld [vmem:[%s20823_s1 + $0xf40] sm:$0xf]  ;;  %v10271_v4 = vor.u32 %v13352_v61, %v10270_v60  ;;  %3215 = vmatpush.bf16.msrb.mxu1 %v10015_v3 }
  0x58   :  { %v13416_v63 = vld [vmem:[%s20823_s1 + $0xf5c] sm:$0xf0] }
  0x59   :  { %v9726_v1 = vld [vmem:[%s20823_s1 + $0x900] sm:$0xf]  ;;  %v10527_v7 = vor.u32 %v13416_v63, %v10526_v62  ;;  %3228 = vmatpush.bf16.msrb.mxu2 %v10271_v4 }
  0x5a   :  { %v27_v2 = vld [vmem:[%s20822_s0] sm:$0xff] }
  0x5b   :  { %v13216_v5 = vld [vmem:[%s20823_s1 + $0x91c] sm:$0xf0]  ;;  %31 = vst [vmem:[#allocation1] ss:$4 sm:$0xff] %v27_v2  ;;  %3241 = vmatpush.bf16.msrb.mxu3 %v10527_v7  ;;  %v8800_v7 = vld [vmem:[%s20823_s1 + $0x1e0] sm:$0xf0] }
  0x5c   :  { %v9982_v6 = vld [vmem:[%s20823_s1 + $0xb00] sm:$0xf]  ;;  %v9727_v13 = vor.u32 %v13216_v5, %v9726_v1 }
  0x5d   :  { %v13280_v8 = vld [vmem:[%s20823_s1 + $0xb1c] sm:$0xf0] }
  0x5e   :  { %v10238_v9 = vld [vmem:[%s20823_s1 + $0xd00] sm:$0xf]  ;;  %v9983_v15 = vor.u32 %v13280_v8, %v9982_v6  ;;  %3203 = vmatpush.bf16.msrb.mxu0 %v9727_v13  ;;  %v12980_v6 = vld [vmem:[%s20823_s1 + $0x1c4] sm:$0xf] }
  0x5f   :  { %v13344_v10 = vld [vmem:[%s20823_s1 + $0xd1c] sm:$0xf0]  ;;  %v13044_v8 = vld [vmem:[%s20823_s1 + $0x3c4] sm:$0xf] }
  0x60   :  { %v10494_v11 = vld [vmem:[%s20823_s1 + $0xf00] sm:$0xf]  ;;  %v10239_v16 = vor.u32 %v13344_v10, %v10238_v9  ;;  %3216 = vmatpush.bf16.msrb.mxu1 %v9983_v15  ;;  %v9056_v9 = vld [vmem:[%s20823_s1 + $0x3e0] sm:$0xf0] }
  0x61   :  { %v13408_v12 = vld [vmem:[%s20823_s1 + $0xf1c] sm:$0xf0]  ;;  %v13108_v10 = vld [vmem:[%s20823_s1 + $0x5c4] sm:$0xf] }
  0x62   :  { %v9694_v14 = vld [vmem:[%s20823_s1 + $0x8c0] sm:$0xf]  ;;  %v10495_v20 = vor.u32 %v13408_v12, %v10494_v11  ;;  %v36_v30 = vld.sshfl [vmem:[#allocation1 + $0x10] sm:$0xff pattern:$0x73625140]  ;;  %3229 = vmatpush.bf16.msrb.mxu2 %v10239_v16 }
  0x63   :  { %v13208_v17 = vld [vmem:[%s20823_s1 + $0x8dc] sm:$0xf0]  ;;  %v14411_v33 = vpack.c.bf16 %v36_v30, %v36_v30  ;;  %v37_v35 = vld.sshfl [vmem:[#allocation1 + $0x18] sm:$0xff pattern:$0x73625140] }
  0x64   :  { %v9950_v18 = vld [vmem:[%s20823_s1 + $0xac0] sm:$0xf]  ;;  %v9695_v27 = vor.u32 %v13208_v17, %v9694_v14  ;;  %v35_v36 = vld.sshfl [vmem:[#allocation1 + $0x8] sm:$0xff pattern:$0x73625140]  ;;  %3242 = vmatpush.bf16.msrb.mxu3 %v10495_v20  ;;  %v14424_v41 = vpack.c.bf16 %v37_v35, %v37_v35 }
  0x65   :  { %v13272_v19 = vld [vmem:[%s20823_s1 + $0xadc] sm:$0xf0]  ;;  %v14426_v42 = vpack.c.bf16 %v35_v36, %v35_v36  ;;  %3182 = vmatmul.bf16.vlgmr.msra.gmra.mxu2 %v14411_v33  ;;  %v9312_v12 = vld [vmem:[%s20823_s1 + $0x5e0] sm:$0xf0] }
  0x66   :  { %v10206_v21 = vld [vmem:[%s20823_s1 + $0xcc0] sm:$0xf]  ;;  %v9951_v28 = vor.u32 %v13272_v19, %v9950_v18  ;;  %3204 = vmatpush.bf16.msrb.mxu0 %v9695_v27  ;;  %3195 = vmatmul.bf16.vlgmr.msra.gmra.mxu3 %v14424_v41  ;;  %v13172_v13 = vld [vmem:[%s20823_s1 + $0x7c4] sm:$0xf] }
  0x67   :  { %v13336_v22 = vld [vmem:[%s20823_s1 + $0xcdc] sm:$0xf0]  ;;  %3169 = vmatmul.bf16.vlgmr.msra.gmra.mxu1 %v14426_v42  ;;  %v9568_v14 = vld [vmem:[%s20823_s1 + $0x7e0] sm:$0xf0] }
  0x68   :  { %v10462_v23 = vld [vmem:[%s20823_s1 + $0xec0] sm:$0xf]  ;;  %v10207_v32 = vor.u32 %v13336_v22, %v10206_v21  ;;  %3217 = vmatpush.bf16.msrb.mxu1 %v9951_v28  ;;  %v12972_v17 = vld [vmem:[%s20823_s1 + $0x184] sm:$0xf]  ;;  %v8803_v21 = vor.u32 %v12980_v6, %v8800_v7  ;;  %v9571_v28 = vor.u32 %v13172_v13, %v9568_v14 }
  0x69   :  { %v13400_v24 = vld [vmem:[%s20823_s1 + $0xedc] sm:$0xf0]  ;;  %v8768_v18 = vld [vmem:[%s20823_s1 + $0x1a0] sm:$0xf0] }
  0x6a   :  { %v9662_v25 = vld [vmem:[%s20823_s1 + $0x880] sm:$0xf]  ;;  %v10463_v37 = vor.u32 %v13400_v24, %v10462_v23  ;;  %3230 = vmatpush.bf16.msrb.mxu2 %v10207_v32  ;;  %v40_v19 = vld.sshfl [vmem:[#allocation1 + $0x30] sm:$0xff pattern:$0x73625140]  ;;  %v9059_v24 = vor.u32 %v13044_v8, %v9056_v9 }
  0x6b   :  { %v13200_v26 = vld [vmem:[%s20823_s1 + $0x89c] sm:$0xf0]  ;;  %v41_v23 = vld.sshfl [vmem:[#allocation1 + $0x38] sm:$0xff pattern:$0x73625140]  ;;  %v14531_v32 = vpack.c.bf16 %v40_v19, %v40_v19 }
  0x6c   :  { %v9918_v29 = vld [vmem:[%s20823_s1 + $0xa80] sm:$0xf]  ;;  %v9663_v45 = vor.u32 %v13200_v26, %v9662_v25  ;;  %3243 = vmatpush.bf16.msrb.mxu3 %v10463_v37  ;;  %v9315_v25 = vor.u32 %v13108_v10, %v9312_v12  ;;  %v13036_v26 = vld [vmem:[%s20823_s1 + $0x384] sm:$0xf] }
  0x6d   :  { %v34_v31 = vld.sshfl [vmem:[#allocation1] sm:$0xff pattern:$0x73625140]  ;;  %v39_v27 = vld.sshfl [vmem:[#allocation1 + $0x28] sm:$0xff pattern:$0x73625140] }
  0x6e   :  { %v14413_v34 = vpack.c.bf16 %v34_v31, %v34_v31  ;;  %v13264_v38 = vld [vmem:[%s20823_s1 + $0xa9c] sm:$0xf0]  ;;  %3205 = vmatpush.bf16.msrb.mxu0 %v9663_v45  ;;  %v13100_v30 = vld [vmem:[%s20823_s1 + $0x584] sm:$0xf] }
  0x6f   :  { %v10174_v39 = vld [vmem:[%s20823_s1 + $0xc80] sm:$0xf]  ;;  %v9919_v48 = vor.u32 %v13264_v38, %v9918_v29  ;;  %v9024_v29 = vld [vmem:[%s20823_s1 + $0x3a0] sm:$0xf0]  ;;  %v14541_v38 = vpack.c.bf16 %v41_v23, %v41_v23 }
  0x70   :  { %v13328_v40 = vld [vmem:[%s20823_s1 + $0xc9c] sm:$0xf0]  ;;  %3156 = vmatmul.bf16.vlgmr.msra.gmra.mxu0 %v14413_v34  ;;  %v9280_v31 = vld [vmem:[%s20823_s1 + $0x5a0] sm:$0xf0] }
  0x71   :  { %v10430_v43 = vld [vmem:[%s20823_s1 + $0xe80] sm:$0xf]  ;;  %v10175_v49 = vor.u32 %v13328_v40, %v10174_v39  ;;  %3218 = vmatpush.bf16.msrb.mxu1 %v9919_v48  ;;  %v13164_v35 = vld [vmem:[%s20823_s1 + $0x784] sm:$0xf]  ;;  %v8771_v39 = vor.u32 %v12972_v17, %v8768_v18  ;;  %v14543_v40 = vpack.c.bf16 %v39_v27, %v39_v27 }
  0x72   :  { %v13392_v44 = vld [vmem:[%s20823_s1 + $0xe9c] sm:$0xf0]  ;;  %v9536_v36 = vld [vmem:[%s20823_s1 + $0x7a0] sm:$0xf0] }
  0x73   :  { %v9630_v46 = vld [vmem:[%s20823_s1 + $0x840] sm:$0xf]  ;;  %v10431_v53 = vor.u32 %v13392_v44, %v10430_v43  ;;  %3231 = vmatpush.bf16.msrb.mxu2 %v10175_v49  ;;  %v9027_v43 = vor.u32 %v13036_v26, %v9024_v29  ;;  %v9283_v44 = vor.u32 %v13100_v30, %v9280_v31  ;;  %v12964_v45 = vld [vmem:[%s20823_s1 + $0x144] sm:$0xf]  ;;  %v9539_v48 = vor.u32 %v13164_v35, %v9536_v36 }
  0x74   :  { %v13192_v47 = vld [vmem:[%s20823_s1 + $0x85c] sm:$0xf0]  ;;  %v8992_v49 = vld [vmem:[%s20823_s1 + $0x360] sm:$0xf0] }
  0x75   :  { %v9886_v50 = vld [vmem:[%s20823_s1 + $0xa40] sm:$0xf]  ;;  %v9631_v59 = vor.u32 %v13192_v47, %v9630_v46  ;;  %3244 = vmatpush.bf16.msrb.mxu3 %v10431_v53  ;;  %v8736_v46 = vld [vmem:[%s20823_s1 + $0x160] sm:$0xf0] }
  0x76   :  { %v13256_v51 = vld [vmem:[%s20823_s1 + $0xa5c] sm:$0xf0]  ;;  %v13028_v47 = vld [vmem:[%s20823_s1 + $0x344] sm:$0xf] }
  0x77   :  { %v10142_v54 = vld [vmem:[%s20823_s1 + $0xc40] sm:$0xf]  ;;  %v9887_v63 = vor.u32 %v13256_v51, %v9886_v50  ;;  %3206 = vmatpush.bf16.msrb.mxu0 %v9631_v59  ;;  %v13092_v50 = vld [vmem:[%s20823_s1 + $0x544] sm:$0xf] }
  0x78   :  { %v13320_v55 = vld [vmem:[%s20823_s1 + $0xc5c] sm:$0xf0]  ;;  %v9248_v51 = vld [vmem:[%s20823_s1 + $0x560] sm:$0xf0] }
  0x79   :  { %v10398_v56 = vld [vmem:[%s20823_s1 + $0xe40] sm:$0xf]  ;;  %v10143_v0 = vor.u32 %v13320_v55, %v10142_v54  ;;  %3219 = vmatpush.bf16.msrb.mxu1 %v9887_v63  ;;  %v9504_v53 = vld [vmem:[%s20823_s1 + $0x760] sm:$0xf0]  ;;  %v8739_v54 = vor.u32 %v12964_v45, %v8736_v46  ;;  %v8995_v55 = vor.u32 %v13028_v47, %v8992_v49 }
  0x7a   :  { %v13384_v57 = vld [vmem:[%s20823_s1 + $0xe5c] sm:$0xf0]  ;;  %v13020_v59 = vld [vmem:[%s20823_s1 + $0x304] sm:$0xf] }
  0x7b   :  { %v9598_v58 = vld [vmem:[%s20823_s1 + $0x800] sm:$0xf]  ;;  %v10399_v4 = vor.u32 %v13384_v57, %v10398_v56  ;;  %3232 = vmatpush.bf16.msrb.mxu2 %v10143_v0  ;;  %v9251_v56 = vor.u32 %v13092_v50, %v9248_v51  ;;  %v12956_v57 = vld [vmem:[%s20823_s1 + $0x104] sm:$0xf] }
  0x7c   :  { %v13184_v60 = vld [vmem:[%s20823_s1 + $0x81c] sm:$0xf0]  ;;  %v9216_v63 = vld [vmem:[%s20823_s1 + $0x520] sm:$0xf0] }
  0x7d   :  { %v9854_v61 = vld [vmem:[%s20823_s1 + $0xa00] sm:$0xf]  ;;  %v9599_v11 = vor.u32 %v13184_v60, %v9598_v58  ;;  %3245 = vmatpush.bf16.msrb.mxu3 %v10399_v4  ;;  %v8704_v58 = vld [vmem:[%s20823_s1 + $0x120] sm:$0xf0]  ;;  %v9507_v60 = vor.u32 %v13156_v52, %v9504_v53 }
  0x7e   :  { %v13248_v62 = vld [vmem:[%s20823_s1 + $0xa1c] sm:$0xf0]  ;;  %v13148_v0 = vld [vmem:[%s20823_s1 + $0x704] sm:$0xf] }
  0x7f   :  { %v10110_v1 = vld [vmem:[%s20823_s1 + $0xc00] sm:$0xf]  ;;  %v9855_v15 = vor.u32 %v13248_v62, %v9854_v61  ;;  %3207 = vmatpush.bf16.msrb.mxu0 %v9599_v11  ;;  %v8960_v61 = vld [vmem:[%s20823_s1 + $0x320] sm:$0xf0] }
  0x80   :  { %v13312_v2 = vld [vmem:[%s20823_s1 + $0xc1c] sm:$0xf0]  ;;  %v13084_v62 = vld [vmem:[%s20823_s1 + $0x504] sm:$0xf] }
  0x81   :  { %v10366_v3 = vld [vmem:[%s20823_s1 + $0xe00] sm:$0xf]  ;;  %v10111_v16 = vor.u32 %v13312_v2, %v10110_v1  ;;  %3220 = vmatpush.bf16.msrb.mxu1 %v9855_v15  ;;  %v9472_v1 = vld [vmem:[%s20823_s1 + $0x720] sm:$0xf0]  ;;  %v8707_v2 = vor.u32 %v12956_v57, %v8704_v58  ;;  %v9219_v4 = vor.u32 %v13084_v62, %v9216_v63 }
  0x82   :  { %v13376_v5 = vld [vmem:[%s20823_s1 + $0xe1c] sm:$0xf0]  ;;  %v8672_v6 = vld [vmem:[%s20823_s1 + $0xe0] sm:$0xf0]  ;;  %v9475_v8 = vor.u32 %v13148_v0, %v9472_v1 }
  0x83   :  { %v10367_v20 = vor.u32 %v13376_v5, %v10366_v3  ;;  %v38_v22 = vld.sshfl [vmem:[#allocation1 + $0x20] sm:$0xff pattern:$0x73625140]  ;;  %3233 = vmatpush.bf16.msrb.mxu2 %v10111_v16  ;;  %3252 = vmatpush.bf16.msra.mxu0 %v8803_v21  ;;  %v8963_v3 = vor.u32 %v13020_v59, %v8960_v61 }
  0x84   :  { %v14539_v37 = vpack.c.bf16 %v38_v22, %v38_v22  ;;  %3221 = vmatmul.bf16.vlgmr.msrb.gmra.mxu1 %v14543_v40  ;;  %v12948_v5 = vld [vmem:[%s20823_s1 + $0xc4] sm:$0xf] }
  0x85   :  { %3246 = vmatpush.bf16.msrb.mxu3 %v10367_v20  ;;  %3265 = vmatpush.bf16.msra.mxu1 %v9059_v24  ;;  %v13012_v7 = vld [vmem:[%s20823_s1 + $0x2c4] sm:$0xf]  ;;  %v8675_v14 = vor.u32 %v12948_v5, %v8672_v6 }
  0x86   :  { %3234 = vmatmul.bf16.vlgmr.msrb.gmra.mxu2 %v14531_v32  ;;  %3208 = vmatmul.bf16.vlgmr.msrb.gmra.mxu0 %v14539_v37  ;;  %v8928_v9 = vld [vmem:[%s20823_s1 + $0x2e0] sm:$0xf0] }
  0x87   :  { %3278 = vmatpush.bf16.msra.mxu2 %v9315_v25  ;;  %3253 = vmatpush.bf16.msra.mxu0 %v8771_v39  ;;  %v13076_v10 = vld [vmem:[%s20823_s1 + $0x4c4] sm:$0xf]  ;;  %v8931_v15 = vor.u32 %v13012_v7, %v8928_v9 }
  0x88   :  { %3247 = vmatmul.bf16.vlgmr.msrb.gmra.mxu3 %v14541_v38  ;;  %v9184_v11 = vld [vmem:[%s20823_s1 + $0x4e0] sm:$0xf0] }
  0x89   :  { %3291 = vmatpush.bf16.msra.mxu3 %v9571_v28  ;;  %3266 = vmatpush.bf16.msra.mxu1 %v9027_v43  ;;  %v13140_v12 = vld [vmem:[%s20823_s1 + $0x6c4] sm:$0xf]  ;;  %v9187_v16 = vor.u32 %v13076_v10, %v9184_v11 }
  0x8a   :  { %v9440_v13 = vld [vmem:[%s20823_s1 + $0x6e0] sm:$0xf0] }
  0x8b   :  { %3279 = vmatpush.bf16.msra.mxu2 %v9283_v44  ;;  %3254 = vmatpush.bf16.msra.mxu0 %v8739_v54  ;;  %v12940_v17 = vld [vmem:[%s20823_s1 + $0x84] sm:$0xf]  ;;  %v9443_v20 = vor.u32 %v13140_v12, %v9440_v13 }
  0x8c   :  { %v8640_v18 = vld [vmem:[%s20823_s1 + $0xa0] sm:$0xf0] }
  0x8d   :  { %3292 = vmatpush.bf16.msra.mxu3 %v9539_v48  ;;  %3267 = vmatpush.bf16.msra.mxu1 %v8995_v55  ;;  %v13004_v19 = vld [vmem:[%s20823_s1 + $0x284] sm:$0xf]  ;;  %v8643_v26 = vor.u32 %v12940_v17, %v8640_v18 }
  0x8e   :  { %v8896_v21 = vld [vmem:[%s20823_s1 + $0x2a0] sm:$0xf0] }
  0x8f   :  { %3280 = vmatpush.bf16.msra.mxu2 %v9251_v56  ;;  %3255 = vmatpush.bf16.msra.mxu0 %v8707_v2  ;;  %v13068_v22 = vld [vmem:[%s20823_s1 + $0x484] sm:$0xf]  ;;  %v8899_v27 = vor.u32 %v13004_v19, %v8896_v21 }
  0x90   :  { %v9152_v23 = vld [vmem:[%s20823_s1 + $0x4a0] sm:$0xf0] }
  0x91   :  { %3293 = vmatpush.bf16.msra.mxu3 %v9507_v60  ;;  %3268 = vmatpush.bf16.msra.mxu1 %v8963_v3  ;;  %v13132_v24 = vld [vmem:[%s20823_s1 + $0x684] sm:$0xf]  ;;  %v9155_v28 = vor.u32 %v13068_v22, %v9152_v23 }
  0x92   :  { %v9408_v25 = vld [vmem:[%s20823_s1 + $0x6a0] sm:$0xf0] }
  0x93   :  { %3281 = vmatpush.bf16.msra.mxu2 %v9219_v4  ;;  %3256 = vmatpush.bf16.msra.mxu0 %v8675_v14  ;;  %v12932_v29 = vld [vmem:[%s20823_s1 + $0x44] sm:$0xf]  ;;  %v9411_v35 = vor.u32 %v13132_v24, %v9408_v25 }
  0x94   :  { %v8608_v30 = vld [vmem:[%s20823_s1 + $0x60] sm:$0xf0] }
  0x95   :  { %3294 = vmatpush.bf16.msra.mxu3 %v9475_v8  ;;  %3269 = vmatpush.bf16.msra.mxu1 %v8931_v15  ;;  %v12996_v31 = vld [vmem:[%s20823_s1 + $0x244] sm:$0xf]  ;;  %v8611_v46 = vor.u32 %v12932_v29, %v8608_v30 }
  0x96   :  { %v8864_v36 = vld [vmem:[%s20823_s1 + $0x260] sm:$0xf0] }
  0x97   :  { %3282 = vmatpush.bf16.msra.mxu2 %v9187_v16  ;;  %v13060_v39 = vld [vmem:[%s20823_s1 + $0x444] sm:$0xf]  ;;  %3257 = vmatpush.bf16.msra.mxu0 %v8643_v26  ;;  %v8867_v49 = vor.u32 %v12996_v31, %v8864_v36 }
  0x98   :  { %v9120_v43 = vld [vmem:[%s20823_s1 + $0x460] sm:$0xf0] }
  0x99   :  { %3295 = vmatpush.bf16.msra.mxu3 %v9443_v20  ;;  %v13124_v44 = vld [vmem:[%s20823_s1 + $0x644] sm:$0xf]  ;;  %3270 = vmatpush.bf16.msra.mxu1 %v8899_v27  ;;  %v9123_v50 = vor.u32 %v13060_v39, %v9120_v43 }
  0x9a   :  { %v9376_v45 = vld [vmem:[%s20823_s1 + $0x660] sm:$0xf0] }
  0x9b   :  { %v12924_v47 = vld [vmem:[%s20823_s1 + $0x4] sm:$0xf]  ;;  %3283 = vmatpush.bf16.msra.mxu2 %v9155_v28  ;;  %v9379_v54 = vor.u32 %v13124_v44, %v9376_v45  ;;  %3258 = vmatpush.bf16.msra.mxu0 %v8611_v46 }
  0x9c   :  { %v8576_v48 = vld [vmem:[%s20823_s1 + $0x20] sm:$0xf0] }
  0x9d   :  { %v12988_v51 = vld [vmem:[%s20823_s1 + $0x204] sm:$0xf]  ;;  %3296 = vmatpush.bf16.msra.mxu3 %v9411_v35  ;;  %v8579_v61 = vor.u32 %v12924_v47, %v8576_v48  ;;  %3271 = vmatpush.bf16.msra.mxu1 %v8867_v49 }
  0x9e   :  { %v8832_v52 = vld [vmem:[%s20823_s1 + $0x220] sm:$0xf0] }
  0x9f   :  { %v13052_v53 = vld [vmem:[%s20823_s1 + $0x404] sm:$0xf]  ;;  %3284 = vmatpush.bf16.msra.mxu2 %v9123_v50  ;;  %v8835_v1 = vor.u32 %v12988_v51, %v8832_v52  ;;  %3259 = vmatpush.bf16.msra.mxu0 %v8579_v61 }
  0xa0   :  { %v9088_v55 = vld [vmem:[%s20823_s1 + $0x420] sm:$0xf0] }
  0xa1   :  { %v13116_v56 = vld [vmem:[%s20823_s1 + $0x604] sm:$0xf]  ;;  %v9091_v2 = vor.u32 %v13052_v53, %v9088_v55  ;;  %3297 = vmatpush.bf16.msra.mxu3 %v9379_v54  ;;  %3272 = vmatpush.bf16.msra.mxu1 %v8835_v1 }
  0xa2   :  { %v9344_v57 = vld [vmem:[%s20823_s1 + $0x620] sm:$0xf0]  ;;  %3260 = vmatmul.bf16.vlgmr.msra.gmra.mxu0 %v14413_v34 }
  0xa3   :  { %v13236_v58 = vld [vmem:[%s20823_s1 + $0x9c4] sm:$0xf]  ;;  %v9347_v5 = vor.u32 %v13116_v56, %v9344_v57  ;;  %3285 = vmatpush.bf16.msra.mxu2 %v9091_v2 }
  0xa4   :  { %v9824_v59 = vld [vmem:[%s20823_s1 + $0x9e0] sm:$0xf0] }
  0xa5   :  { %v13300_v60 = vld [vmem:[%s20823_s1 + $0xbc4] sm:$0xf]  ;;  %v9827_v6 = vor.u32 %v13236_v58, %v9824_v59  ;;  %3298 = vmatpush.bf16.msra.mxu3 %v9347_v5 }
  0xa6   :  { %v10080_v62 = vld [vmem:[%s20823_s1 + $0xbe0] sm:$0xf0]  ;;  %3286 = vmatmul.bf16.vlgmr.msra.gmra.mxu2 %v14411_v33 }
  0xa7   :  { %v13364_v63 = vld [vmem:[%s20823_s1 + $0xdc4] sm:$0xf]  ;;  %v10083_v7 = vor.u32 %v13300_v60, %v10080_v62  ;;  %3304 = vmatpush.bf16.msrb.mxu0 %v9827_v6 }
  0xa8   :  { %v10336_v0 = vld [vmem:[%s20823_s1 + $0xde0] sm:$0xf0]  ;;  %3299 = vmatmul.bf16.vlgmr.msra.gmra.mxu3 %v14424_v41 }
  0xa9   :  { %v13428_v3 = vld [vmem:[%s20823_s1 + $0xfc4] sm:$0xf]  ;;  %v10339_v8 = vor.u32 %v13364_v63, %v10336_v0  ;;  %3317 = vmatpush.bf16.msrb.mxu1 %v10083_v7 }
  0xaa   :  { %v10592_v4 = vld [vmem:[%s20823_s1 + $0xfe0] sm:$0xf0] }
  0xab   :  { %v13228_v9 = vld [vmem:[%s20823_s1 + $0x984] sm:$0xf]  ;;  %v10595_v12 = vor.u32 %v13428_v3, %v10592_v4  ;;  %3330 = vmatpush.bf16.msrb.mxu2 %v10339_v8 }
  0xac   :  { %v9792_v10 = vld [vmem:[%s20823_s1 + $0x9a0] sm:$0xf0] }
  0xad   :  { %v13292_v11 = vld [vmem:[%s20823_s1 + $0xb84] sm:$0xf]  ;;  %v9795_v18 = vor.u32 %v13228_v9, %v9792_v10  ;;  %3343 = vmatpush.bf16.msrb.mxu3 %v10595_v12 }
  0xae   :  { %v10048_v13 = vld [vmem:[%s20823_s1 + $0xba0] sm:$0xf0] }
  0xaf   :  { %v13356_v14 = vld [vmem:[%s20823_s1 + $0xd84] sm:$0xf]  ;;  %v10051_v20 = vor.u32 %v13292_v11, %v10048_v13 }
  0xb0   :  { %v10304_v15 = vld [vmem:[%s20823_s1 + $0xda0] sm:$0xf0] }
  0xb1   :  { %v13420_v16 = vld [vmem:[%s20823_s1 + $0xf84] sm:$0xf]  ;;  %v10307_v21 = vor.u32 %v13356_v14, %v10304_v15 }
  0xb2   :  { %v10560_v17 = vld [vmem:[%s20823_s1 + $0xfa0] sm:$0xf0] }
  0xb3   :  { %v13220_v19 = vld [vmem:[%s20823_s1 + $0x944] sm:$0xf]  ;;  %v10563_v25 = vor.u32 %v13420_v16, %v10560_v17 }
  0xb4   :  { %v9760_v22 = vld [vmem:[%s20823_s1 + $0x960] sm:$0xf0] }
  0xb5   :  { %v13284_v23 = vld [vmem:[%s20823_s1 + $0xb44] sm:$0xf] }
  0xb6   :  { %v10016_v24 = vld [vmem:[%s20823_s1 + $0xb60] sm:$0xf0] }
  0xb7   :  { %v13348_v26 = vld [vmem:[%s20823_s1 + $0xd44] sm:$0xf] }
  0xb8   :  { %v10272_v27 = vld [vmem:[%s20823_s1 + $0xd60] sm:$0xf0] }
  0xb9   :  { %v13412_v28 = vld [vmem:[%s20823_s1 + $0xf44] sm:$0xf] }
  0xba   :  { %v10528_v29 = vld [vmem:[%s20823_s1 + $0xf60] sm:$0xf0] }
  0xbb   :  { %12 = vsyncpa [#allocation3], 0  ;;  %3305 = vmatpush.bf16.msrb.mxu0 %v9795_v18  ;;  %v9763_v30 = vor.u32 %v13220_v19, %v9760_v22  ;;  %3273 = vmatmul.bf16.vlgmr.msra.gmra.mxu1 %v14426_v42  ;;  %v10019_v31 = vor.u32 %v13284_v23, %v10016_v24  ;;  %v10275_v35 = vor.u32 %v13348_v26, %v10272_v27  ;;  %v13212_v36 = vld [vmem:[%s20823_s1 + $0x904] sm:$0xf]  ;;  %vm8554_vm0 = vcmask 74752  }
  0xbc   :  { %3318 = vmatpush.bf16.msrb.mxu1 %v10051_v20  ;;  %3331 = vmatpush.bf16.msrb.mxu2 %v10307_v21  ;;  %v9728_v39 = vld [vmem:[%s20823_s1 + $0x920] sm:$0xf0]  ;;  %v10531_v44 = vor.u32 %v13412_v28, %v10528_v29 }
  0xbd   :  { %v13276_v43 = vld [vmem:[%s20823_s1 + $0xb04] sm:$0xf]  ;;  %3344 = vmatpush.bf16.msrb.mxu3 %v10563_v25  ;;  %v9731_v50 = vor.u32 %v13212_v36, %v9728_v39  ;;  %v8806_v39 = vld [vmem:[%s20823_s1 + $0x1c8] sm:$0xf] }
  0xbe   :  { %v9984_v45 = vld [vmem:[%s20823_s1 + $0xb20] sm:$0xf0] }
  0xbf   :  { %v13340_v46 = vld [vmem:[%s20823_s1 + $0xd04] sm:$0xf]  ;;  %3306 = vmatpush.bf16.msrb.mxu0 %v9763_v30  ;;  %v9987_v51 = vor.u32 %v13276_v43, %v9984_v45  ;;  %v12985_v43 = vld [vmem:[%s20823_s1 + $0x1e4] sm:$0xf0] }
  0xc0   :  { %v10240_v47 = vld [vmem:[%s20823_s1 + $0xd20] sm:$0xf0]  ;;  %3319 = vmatpush.bf16.msrb.mxu1 %v10019_v31  ;;  %3332 = vmatpush.bf16.msrb.mxu2 %v10275_v35 }
  0xc1   :  { %v13404_v48 = vld [vmem:[%s20823_s1 + $0xf04] sm:$0xf]  ;;  %v10243_v52 = vor.u32 %v13340_v46, %v10240_v47  ;;  %3345 = vmatpush.bf16.msrb.mxu3 %v10531_v44  ;;  %v9062_v44 = vld [vmem:[%s20823_s1 + $0x3c8] sm:$0xf] }
  0xc2   :  { %v10496_v49 = vld [vmem:[%s20823_s1 + $0xf20] sm:$0xf0]  ;;  %v13049_v46 = vld [vmem:[%s20823_s1 + $0x3e4] sm:$0xf0] }
  0xc3   :  { %v13204_v53 = vld [vmem:[%s20823_s1 + $0x8c4] sm:$0xf]  ;;  %v10499_v56 = vor.u32 %v13404_v48, %v10496_v49  ;;  %3307 = vmatpush.bf16.msrb.mxu0 %v9731_v50  ;;  %v9318_v47 = vld [vmem:[%s20823_s1 + $0x5c8] sm:$0xf] }
  0xc4   :  { %v9696_v54 = vld [vmem:[%s20823_s1 + $0x8e0] sm:$0xf0]  ;;  %3320 = vmatpush.bf16.msrb.mxu1 %v9987_v51  ;;  %3333 = vmatpush.bf16.msrb.mxu2 %v10243_v52  ;;  %v13113_v48 = vld [vmem:[%s20823_s1 + $0x5e4] sm:$0xf0] }
  0xc5   :  { %v13268_v55 = vld [vmem:[%s20823_s1 + $0xac4] sm:$0xf]  ;;  %v9699_v62 = vor.u32 %v13204_v53, %v9696_v54  ;;  %3346 = vmatpush.bf16.msrb.mxu3 %v10499_v56  ;;  %v9574_v51 = vld [vmem:[%s20823_s1 + $0x7c8] sm:$0xf]  ;;  %v8807_v54 = vor.u32 %v12985_v43, %v8806_v39  ;;  %v9319_v56 = vor.u32 %v13113_v48, %v9318_v47 }
  0xc6   :  { %v9952_v57 = vld [vmem:[%s20823_s1 + $0xae0] sm:$0xf0]  ;;  %v13177_v52 = vld [vmem:[%s20823_s1 + $0x7e4] sm:$0xf0] }
  0xc7   :  { %v13332_v58 = vld [vmem:[%s20823_s1 + $0xcc4] sm:$0xf]  ;;  %v9955_v63 = vor.u32 %v13268_v55, %v9952_v57  ;;  %3308 = vmatpush.bf16.msrb.mxu0 %v9699_v62  ;;  %v9063_v55 = vor.u32 %v13049_v46, %v9062_v44  ;;  %v8774_v57 = vld [vmem:[%s20823_s1 + $0x188] sm:$0xf] }
  0xc8   :  { %v10208_v59 = vld [vmem:[%s20823_s1 + $0xce0] sm:$0xf0]  ;;  %v9286_v62 = vld [vmem:[%s20823_s1 + $0x588] sm:$0xf] }
  0xc9   :  { %v13396_v60 = vld [vmem:[%s20823_s1 + $0xec4] sm:$0xf]  ;;  %v10211_v0 = vor.u32 %v13332_v58, %v10208_v59  ;;  %3321 = vmatpush.bf16.msrb.mxu1 %v9955_v63  ;;  %v12977_v58 = vld [vmem:[%s20823_s1 + $0x1a4] sm:$0xf0] }
  0xca   :  { %v10464_v61 = vld [vmem:[%s20823_s1 + $0xee0] sm:$0xf0]  ;;  %v9030_v59 = vld [vmem:[%s20823_s1 + $0x388] sm:$0xf] }
  0xcb   :  { %v13196_v1 = vld [vmem:[%s20823_s1 + $0x884] sm:$0xf]  ;;  %v10467_v4 = vor.u32 %v13396_v60, %v10464_v61  ;;  %3334 = vmatpush.bf16.msrb.mxu2 %v10211_v0  ;;  %v9575_v60 = vor.u32 %v13177_v52, %v9574_v51  ;;  %v13041_v61 = vld [vmem:[%s20823_s1 + $0x3a4] sm:$0xf0] }
  0xcc   :  { %v9664_v2 = vld [vmem:[%s20823_s1 + $0x8a0] sm:$0xf0]  ;;  %v13105_v63 = vld [vmem:[%s20823_s1 + $0x5a4] sm:$0xf0] }
  0xcd   :  { %v13260_v3 = vld [vmem:[%s20823_s1 + $0xa84] sm:$0xf]  ;;  %v9667_v10 = vor.u32 %v13196_v1, %v9664_v2  ;;  %3347 = vmatpush.bf16.msrb.mxu3 %v10467_v4  ;;  %v9542_v0 = vld [vmem:[%s20823_s1 + $0x788] sm:$0xf]  ;;  %v8775_v2 = vor.u32 %v12977_v58, %v8774_v57  ;;  %v9287_v4 = vor.u32 %v13105_v63, %v9286_v62 }
  0xce   :  { %v9920_v5 = vld [vmem:[%s20823_s1 + $0xaa0] sm:$0xf0]  ;;  %v13169_v1 = vld [vmem:[%s20823_s1 + $0x7a4] sm:$0xf0] }
  0xcf   :  { %v13324_v6 = vld [vmem:[%s20823_s1 + $0xc84] sm:$0xf]  ;;  %v9923_v11 = vor.u32 %v13260_v3, %v9920_v5  ;;  %3309 = vmatpush.bf16.msrb.mxu0 %v9667_v10  ;;  %v9031_v3 = vor.u32 %v13041_v61, %v9030_v59  ;;  %v8742_v5 = vld [vmem:[%s20823_s1 + $0x148] sm:$0xf] }
  0xd0   :  { %v10176_v7 = vld [vmem:[%s20823_s1 + $0xca0] sm:$0xf0]  ;;  %v9254_v10 = vld [vmem:[%s20823_s1 + $0x548] sm:$0xf] }
  0xd1   :  { %v13388_v8 = vld [vmem:[%s20823_s1 + $0xe84] sm:$0xf]  ;;  %v10179_v12 = vor.u32 %v13324_v6, %v10176_v7  ;;  %3322 = vmatpush.bf16.msrb.mxu1 %v9923_v11  ;;  %v12969_v6 = vld [vmem:[%s20823_s1 + $0x164] sm:$0xf0] }
  0xd2   :  { %v10432_v9 = vld [vmem:[%s20823_s1 + $0xea0] sm:$0xf0]  ;;  %v8998_v7 = vld [vmem:[%s20823_s1 + $0x348] sm:$0xf] }
  0xd3   :  { %v13188_v13 = vld [vmem:[%s20823_s1 + $0x844] sm:$0xf]  ;;  %v10435_v16 = vor.u32 %v13388_v8, %v10432_v9  ;;  %3335 = vmatpush.bf16.msrb.mxu2 %v10179_v12  ;;  %v9543_v8 = vor.u32 %v13169_v1, %v9542_v0  ;;  %v13033_v9 = vld [vmem:[%s20823_s1 + $0x364] sm:$0xf0] }
  0xd4   :  { %v9632_v14 = vld [vmem:[%s20823_s1 + $0x860] sm:$0xf0]  ;;  %v13097_v11 = vld [vmem:[%s20823_s1 + $0x564] sm:$0xf0] }
  0xd5   :  { %v13252_v15 = vld [vmem:[%s20823_s1 + $0xa44] sm:$0xf]  ;;  %v9635_v22 = vor.u32 %v13188_v13, %v9632_v14  ;;  %3348 = vmatpush.bf16.msrb.mxu3 %v10435_v16  ;;  %v9510_v12 = vld [vmem:[%s20823_s1 + $0x748] sm:$0xf]  ;;  %v8743_v14 = vor.u32 %v12969_v6, %v8742_v5  ;;  %v9255_v16 = vor.u32 %v13097_v11, %v9254_v10 }
  0xd6   :  { %v9888_v17 = vld [vmem:[%s20823_s1 + $0xa60] sm:$0xf0]  ;;  %v13161_v13 = vld [vmem:[%s20823_s1 + $0x764] sm:$0xf0] }
  0xd7   :  { %v13316_v18 = vld [vmem:[%s20823_s1 + $0xc44] sm:$0xf]  ;;  %v9891_v25 = vor.u32 %v13252_v15, %v9888_v17  ;;  %3310 = vmatpush.bf16.msrb.mxu0 %v9635_v22  ;;  %v8999_v15 = vor.u32 %v13033_v9, %v8998_v7  ;;  %v8710_v17 = vld [vmem:[%s20823_s1 + $0x108] sm:$0xf] }
  0xd8   :  { %v10144_v19 = vld [vmem:[%s20823_s1 + $0xc60] sm:$0xf0]  ;;  %v9222_v22 = vld [vmem:[%s20823_s1 + $0x508] sm:$0xf] }
  0xd9   :  { %v13380_v20 = vld [vmem:[%s20823_s1 + $0xe44] sm:$0xf]  ;;  %v10147_v26 = vor.u32 %v13316_v18, %v10144_v19  ;;  %3323 = vmatpush.bf16.msrb.mxu1 %v9891_v25  ;;  %v12961_v18 = vld [vmem:[%s20823_s1 + $0x124] sm:$0xf0] }
  0xda   :  { %v10400_v21 = vld [vmem:[%s20823_s1 + $0xe60] sm:$0xf0]  ;;  %v8966_v19 = vld [vmem:[%s20823_s1 + $0x308] sm:$0xf] }
  0xdb   :  { %v13180_v23 = vld [vmem:[%s20823_s1 + $0x804] sm:$0xf]  ;;  %v10403_v30 = vor.u32 %v13380_v20, %v10400_v21  ;;  %3336 = vmatpush.bf16.msrb.mxu2 %v10147_v26  ;;  %v9511_v20 = vor.u32 %v13161_v13, %v9510_v12  ;;  %v13025_v21 = vld [vmem:[%s20823_s1 + $0x324] sm:$0xf0]  ;;  %v8711_v26 = vor.u32 %v12961_v18, %v8710_v17 }
  0xdc   :  { %v9600_v24 = vld [vmem:[%s20823_s1 + $0x820] sm:$0xf0]  ;;  %v13153_v25 = vld [vmem:[%s20823_s1 + $0x724] sm:$0xf0] }
  0xdd   :  { %v13244_v27 = vld [vmem:[%s20823_s1 + $0xa04] sm:$0xf]  ;;  %v9603_v45 = vor.u32 %v13180_v23, %v9600_v24  ;;  %3349 = vmatpush.bf16.msrb.mxu3 %v10403_v30  ;;  %v13089_v23 = vld [vmem:[%s20823_s1 + $0x524] sm:$0xf0] }
  0xde   :  { %v9856_v28 = vld [vmem:[%s20823_s1 + $0xa20] sm:$0xf0]  ;;  %v9478_v24 = vld [vmem:[%s20823_s1 + $0x708] sm:$0xf] }
  0xdf   :  { %v13308_v29 = vld [vmem:[%s20823_s1 + $0xc04] sm:$0xf]  ;;  %v9859_v49 = vor.u32 %v13244_v27, %v9856_v28  ;;  %3311 = vmatpush.bf16.msrb.mxu0 %v9603_v45  ;;  %v8967_v27 = vor.u32 %v13025_v21, %v8966_v19  ;;  %v9223_v28 = vor.u32 %v13089_v23, %v9222_v22  ;;  %v12953_v30 = vld [vmem:[%s20823_s1 + $0xe4] sm:$0xf0] }
  0xe0   :  { %v10112_v31 = vld [vmem:[%s20823_s1 + $0xc20] sm:$0xf0]  ;;  %v9190_v39 = vld [vmem:[%s20823_s1 + $0x4c8] sm:$0xf] }
  0xe1   :  { %v13372_v35 = vld [vmem:[%s20823_s1 + $0xe04] sm:$0xf]  ;;  %v10115_v50 = vor.u32 %v13308_v29, %v10112_v31  ;;  %3324 = vmatpush.bf16.msrb.mxu1 %v9859_v49  ;;  %v8678_v29 = vld [vmem:[%s20823_s1 + $0xc8] sm:$0xf] }
  0xe2   :  { %v10368_v36 = vld [vmem:[%s20823_s1 + $0xe20] sm:$0xf0]  ;;  %3312 = vmatmul.bf16.vlgmr.msrb.gmra.mxu0 %v14539_v37  ;;  %v8934_v31 = vld [vmem:[%s20823_s1 + $0x2c8] sm:$0xf]  ;;  %v8679_v46 = vor.u32 %v12953_v30, %v8678_v29 }
  0xe3   :  { %v10371_v53 = vor.u32 %v13372_v35, %v10368_v36  ;;  %3337 = vmatpush.bf16.msrb.mxu2 %v10115_v50  ;;  %3356 = vmatpush.bf16.msra.mxu0 %v8807_v54  ;;  %v9479_v35 = vor.u32 %v13153_v25, %v9478_v24  ;;  %v13017_v36 = vld [vmem:[%s20823_s1 + $0x2e4] sm:$0xf0] }
  0xe4   :  { %3325 = vmatmul.bf16.vlgmr.msrb.gmra.mxu1 %v14543_v40  ;;  %v13081_v43 = vld [vmem:[%s20823_s1 + $0x4e4] sm:$0xf0]  ;;  %v8935_v47 = vor.u32 %v13017_v36, %v8934_v31 }
  0xe5   :  { %3350 = vmatpush.bf16.msrb.mxu3 %v10371_v53  ;;  %3369 = vmatpush.bf16.msra.mxu1 %v9063_v55  ;;  %v9446_v44 = vld [vmem:[%s20823_s1 + $0x6c8] sm:$0xf]  ;;  %v9191_v48 = vor.u32 %v13081_v43, %v9190_v39 }
  0xe6   :  { %3338 = vmatmul.bf16.vlgmr.msrb.gmra.mxu2 %v14531_v32  ;;  %v13145_v45 = vld [vmem:[%s20823_s1 + $0x6e4] sm:$0xf0] }
  0xe7   :  { %3382 = vmatpush.bf16.msra.mxu2 %v9319_v56  ;;  %3357 = vmatpush.bf16.msra.mxu0 %v8775_v2  ;;  %v8646_v49 = vld [vmem:[%s20823_s1 + $0x88] sm:$0xf]  ;;  %v9447_v52 = vor.u32 %v13145_v45, %v9446_v44 }
  0xe8   :  { %3351 = vmatmul.bf16.vlgmr.msrb.gmra.mxu3 %v14541_v38  ;;  %v12945_v50 = vld [vmem:[%s20823_s1 + $0xa4] sm:$0xf0] }
  0xe9   :  { %3395 = vmatpush.bf16.msra.mxu3 %v9575_v60  ;;  %3370 = vmatpush.bf16.msra.mxu1 %v9031_v3  ;;  %v8902_v51 = vld [vmem:[%s20823_s1 + $0x288] sm:$0xf]  ;;  %v8647_v58 = vor.u32 %v12945_v50, %v8646_v49 }
  0xea   :  { %v13009_v53 = vld [vmem:[%s20823_s1 + $0x2a4] sm:$0xf0] }
  0xeb   :  { %3383 = vmatpush.bf16.msra.mxu2 %v9287_v4  ;;  %3358 = vmatpush.bf16.msra.mxu0 %v8743_v14  ;;  %v9158_v54 = vld [vmem:[%s20823_s1 + $0x488] sm:$0xf]  ;;  %v8903_v59 = vor.u32 %v13009_v53, %v8902_v51 }
  0xec   :  { %v13073_v55 = vld [vmem:[%s20823_s1 + $0x4a4] sm:$0xf0] }
  0xed   :  { %3396 = vmatpush.bf16.msra.mxu3 %v9543_v8  ;;  %3371 = vmatpush.bf16.msra.mxu1 %v8999_v15  ;;  %v9414_v56 = vld [vmem:[%s20823_s1 + $0x688] sm:$0xf]  ;;  %v9159_v60 = vor.u32 %v13073_v55, %v9158_v54 }
  0xee   :  { %v13137_v57 = vld [vmem:[%s20823_s1 + $0x6a4] sm:$0xf0] }
  0xef   :  { %3384 = vmatpush.bf16.msra.mxu2 %v9255_v16  ;;  %3359 = vmatpush.bf16.msra.mxu0 %v8711_v26  ;;  %v8614_v61 = vld [vmem:[%s20823_s1 + $0x48] sm:$0xf]  ;;  %v9415_v0 = vor.u32 %v13137_v57, %v9414_v56 }
  0xf0   :  { %v12937_v62 = vld [vmem:[%s20823_s1 + $0x64] sm:$0xf0] }
  0xf1   :  { %3397 = vmatpush.bf16.msra.mxu3 %v9511_v20  ;;  %3372 = vmatpush.bf16.msra.mxu1 %v8967_v27  ;;  %v8870_v63 = vld [vmem:[%s20823_s1 + $0x248] sm:$0xf]  ;;  %v8615_v6 = vor.u32 %v12937_v62, %v8614_v61 }
  0xf2   :  { %v13001_v1 = vld [vmem:[%s20823_s1 + $0x264] sm:$0xf0] }
  0xf3   :  { %3385 = vmatpush.bf16.msra.mxu2 %v9223_v28  ;;  %3360 = vmatpush.bf16.msra.mxu0 %v8679_v46  ;;  %v9126_v2 = vld [vmem:[%s20823_s1 + $0x448] sm:$0xf]  ;;  %v8871_v9 = vor.u32 %v13001_v1, %v8870_v63 }
  0xf4   :  { %v13065_v3 = vld [vmem:[%s20823_s1 + $0x464] sm:$0xf0] }
  0xf5   :  { %3398 = vmatpush.bf16.msra.mxu3 %v9479_v35  ;;  %3373 = vmatpush.bf16.msra.mxu1 %v8935_v47  ;;  %v9382_v4 = vld [vmem:[%s20823_s1 + $0x648] sm:$0xf]  ;;  %v9127_v10 = vor.u32 %v13065_v3, %v9126_v2 }
  0xf6   :  { %v13129_v5 = vld [vmem:[%s20823_s1 + $0x664] sm:$0xf0] }
  0xf7   :  { %3386 = vmatpush.bf16.msra.mxu2 %v9191_v48  ;;  %3361 = vmatpush.bf16.msra.mxu0 %v8647_v58  ;;  %v8582_v7 = vld [vmem:[%s20823_s1 + $0x8] sm:$0xf]  ;;  %v9383_v14 = vor.u32 %v13129_v5, %v9382_v4 }
  0xf8   :  { %v12929_v8 = vld [vmem:[%s20823_s1 + $0x24] sm:$0xf0] }
  0xf9   :  { %3399 = vmatpush.bf16.msra.mxu3 %v9447_v52  ;;  %3374 = vmatpush.bf16.msra.mxu1 %v8903_v59  ;;  %v8838_v11 = vld [vmem:[%s20823_s1 + $0x208] sm:$0xf]  ;;  %v8583_v21 = vor.u32 %v12929_v8, %v8582_v7 }
  0xfa   :  { %v12993_v12 = vld [vmem:[%s20823_s1 + $0x224] sm:$0xf0] }
  0xfb   :  { %3387 = vmatpush.bf16.msra.mxu2 %v9159_v60  ;;  %v9094_v13 = vld [vmem:[%s20823_s1 + $0x408] sm:$0xf]  ;;  %3362 = vmatpush.bf16.msra.mxu0 %v8615_v6  ;;  %v8839_v25 = vor.u32 %v12993_v12, %v8838_v11 }
  0xfc   :  { %v13057_v15 = vld [vmem:[%s20823_s1 + $0x424] sm:$0xf0] }
  0xfd   :  { %3400 = vmatpush.bf16.msra.mxu3 %v9415_v0  ;;  %v9350_v16 = vld [vmem:[%s20823_s1 + $0x608] sm:$0xf]  ;;  %3375 = vmatpush.bf16.msra.mxu1 %v8871_v9  ;;  %v9095_v26 = vor.u32 %v13057_v15, %v9094_v13 }
  0xfe   :  { %v13121_v17 = vld [vmem:[%s20823_s1 + $0x624] sm:$0xf0] }
  0xff   :  { %v9830_v18 = vld [vmem:[%s20823_s1 + $0x9c8] sm:$0xf]  ;;  %3388 = vmatpush.bf16.msra.mxu2 %v9127_v10  ;;  %v9351_v29 = vor.u32 %v13121_v17, %v9350_v16  ;;  %3363 = vmatpush.bf16.msra.mxu0 %v8583_v21 }
 0x100   :  { %v13241_v19 = vld [vmem:[%s20823_s1 + $0x9e4] sm:$0xf0] }
 0x101   :  { %v10086_v20 = vld [vmem:[%s20823_s1 + $0xbc8] sm:$0xf]  ;;  %3401 = vmatpush.bf16.msra.mxu3 %v9383_v14  ;;  %v9831_v30 = vor.u32 %v13241_v19, %v9830_v18  ;;  %3376 = vmatpush.bf16.msra.mxu1 %v8839_v25 }
 0x102   :  { %v13305_v22 = vld [vmem:[%s20823_s1 + $0xbe4] sm:$0xf0]  ;;  %3364 = vmatmul.bf16.vlgmr.msra.gmra.mxu0 %v14413_v34 }
 0x103   :  { %v10342_v23 = vld [vmem:[%s20823_s1 + $0xdc8] sm:$0xf]  ;;  %v10087_v31 = vor.u32 %v13305_v22, %v10086_v20  ;;  %3389 = vmatpush.bf16.msra.mxu2 %v9095_v26  ;;  %3408 = vmatpush.bf16.msrb.mxu0 %v9831_v30 }
 0x104   :  { %v13369_v24 = vld [vmem:[%s20823_s1 + $0xde4] sm:$0xf0]  ;;  %3377 = vmatmul.bf16.vlgmr.msra.gmra.mxu1 %v14426_v42 }
 0x105   :  { %v10598_v27 = vld [vmem:[%s20823_s1 + $0xfc8] sm:$0xf]  ;;  %v10343_v35 = vor.u32 %v13369_v24, %v10342_v23  ;;  %3402 = vmatpush.bf16.msra.mxu3 %v9351_v29  ;;  %3421 = vmatpush.bf16.msrb.mxu1 %v10087_v31 }
 0x106   :  { %v13433_v28 = vld [vmem:[%s20823_s1 + $0xfe4] sm:$0xf0]  ;;  %3390 = vmatmul.bf16.vlgmr.msra.gmra.mxu2 %v14411_v33 }
 0x107   :  { %v9798_v36 = vld [vmem:[%s20823_s1 + $0x988] sm:$0xf]  ;;  %v10599_v44 = vor.u32 %v13433_v28, %v10598_v27  ;;  %3434 = vmatpush.bf16.msrb.mxu2 %v10343_v35  ;;  %v15230_v35 = vld [vmem:[%s20824_s2] sm:$0xff] }
 0x108   :  { %v13233_v39 = vld [vmem:[%s20823_s1 + $0x9a4] sm:$0xf0]  ;;  %3403 = vmatmul.bf16.vlgmr.msra.gmra.mxu3 %v14424_v41 }
 0x109   :  { %v10054_v43 = vld [vmem:[%s20823_s1 + $0xb88] sm:$0xf]  ;;  %v9799_v50 = vor.u32 %v13233_v39, %v9798_v36  ;;  %3447 = vmatpush.bf16.msrb.mxu3 %v10599_v44 }
 0x10a   :  { %v13297_v45 = vld [vmem:[%s20823_s1 + $0xba4] sm:$0xf0] }
 0x10b   :  { %v10310_v46 = vld [vmem:[%s20823_s1 + $0xd88] sm:$0xf]  ;;  %v10055_v51 = vor.u32 %v13297_v45, %v10054_v43  ;;  %3409 = vmatpush.bf16.msrb.mxu0 %v9799_v50 }
 0x10c   :  { %v13361_v47 = vld [vmem:[%s20823_s1 + $0xda4] sm:$0xf0] }
 0x10d   :  { %v10566_v48 = vld [vmem:[%s20823_s1 + $0xf88] sm:$0xf]  ;;  %v10311_v52 = vor.u32 %v13361_v47, %v10310_v46  ;;  %3422 = vmatpush.bf16.msrb.mxu1 %v10055_v51 }
 0x10e   :  { %v13425_v49 = vld [vmem:[%s20823_s1 + $0xfa4] sm:$0xf0] }
 0x10f   :  { %v9766_v53 = vld [vmem:[%s20823_s1 + $0x948] sm:$0xf]  ;;  %v10567_v56 = vor.u32 %v13425_v49, %v10566_v48  ;;  %3435 = vmatpush.bf16.msrb.mxu2 %v10311_v52  ;;  %v572_v49 = vperm.slane %v15230_v35, 0 }
 0x110   :  { %v13225_v54 = vld [vmem:[%s20823_s1 + $0x964] sm:$0xf0] }
 0x111   :  { %v10022_v55 = vld [vmem:[%s20823_s1 + $0xb48] sm:$0xf]  ;;  %v9767_v62 = vor.u32 %v13225_v54, %v9766_v53  ;;  %3448 = vmatpush.bf16.msrb.mxu3 %v10567_v56 }
 0x112   :  { %v13289_v57 = vld [vmem:[%s20823_s1 + $0xb64] sm:$0xf0] }
 0x113   :  { %v10278_v58 = vld [vmem:[%s20823_s1 + $0xd48] sm:$0xf]  ;;  %v10023_v63 = vor.u32 %v13289_v57, %v10022_v55  ;;  %3410 = vmatpush.bf16.msrb.mxu0 %v9767_v62 }
 0x114   :  { %v13353_v59 = vld [vmem:[%s20823_s1 + $0xd64] sm:$0xf0] }
 0x115   :  { %v10534_v60 = vld [vmem:[%s20823_s1 + $0xf48] sm:$0xf]  ;;  %v10279_v0 = vor.u32 %v13353_v59, %v10278_v58  ;;  %3423 = vmatpush.bf16.msrb.mxu1 %v10023_v63  ;;  %v3157_v59 = vpop.f32.mrf.mxu0 }
 0x116   :  { %v13417_v61 = vld [vmem:[%s20823_s1 + $0xf64] sm:$0xf0] }
 0x117   :  { %v9734_v1 = vld [vmem:[%s20823_s1 + $0x908] sm:$0xf]  ;;  %v10535_v4 = vor.u32 %v13417_v61, %v10534_v60  ;;  %3436 = vmatpush.bf16.msrb.mxu2 %v10279_v0 }
 0x118   :  { %v13217_v2 = vld [vmem:[%s20823_s1 + $0x924] sm:$0xf0] }
 0x119   :  { %v9990_v3 = vld [vmem:[%s20823_s1 + $0xb08] sm:$0xf]  ;;  %v9735_v10 = vor.u32 %v13217_v2, %v9734_v1  ;;  %3449 = vmatpush.bf16.msrb.mxu3 %v10535_v4  ;;  %v3158_v1 = vadd.f32 %v3157_v59, %v572_v49  ;;  %v12965_v49 = vld [vmem:[%s20823_s1 + $0x14c] sm:$0xf] }
 0x11a   :  { %v13281_v5 = vld [vmem:[%s20823_s1 + $0xb24] sm:$0xf0] }
 0x11b   :  { %v10246_v6 = vld [vmem:[%s20823_s1 + $0xd08] sm:$0xf]  ;;  %v9991_v11 = vor.u32 %v13281_v5, %v9990_v3  ;;  %3411 = vmatpush.bf16.msrb.mxu0 %v9735_v10 }
 0x11c   :  { %v13345_v7 = vld [vmem:[%s20823_s1 + $0xd24] sm:$0xf0] }
 0x11d   :  { %v10502_v8 = vld [vmem:[%s20823_s1 + $0xf08] sm:$0xf]  ;;  %v10247_v12 = vor.u32 %v13345_v7, %v10246_v6  ;;  %3424 = vmatpush.bf16.msrb.mxu1 %v9991_v11  ;;  %v12981_v6 = vld [vmem:[%s20823_s1 + $0x1cc] sm:$0xf] }
 0x11e   :  { %v13409_v9 = vld [vmem:[%s20823_s1 + $0xf24] sm:$0xf0]  ;;  %v8808_v7 = vld [vmem:[%s20823_s1 + $0x1e8] sm:$0xf0] }
 0x11f   :  { %v9702_v13 = vld [vmem:[%s20823_s1 + $0x8c8] sm:$0xf]  ;;  %v10503_v16 = vor.u32 %v13409_v9, %v10502_v8  ;;  %3437 = vmatpush.bf16.msrb.mxu2 %v10247_v12  ;;  %v13045_v8 = vld [vmem:[%s20823_s1 + $0x3cc] sm:$0xf]  ;;  %v3170_v9 = vpop.f32.mrf.mxu1 }
 0x120   :  { %v13209_v14 = vld [vmem:[%s20823_s1 + $0x8e4] sm:$0xf0]  ;;  %v9064_v11 = vld [vmem:[%s20823_s1 + $0x3e8] sm:$0xf0] }
 0x121   :  { %v9958_v15 = vld [vmem:[%s20823_s1 + $0xac8] sm:$0xf]  ;;  %v9703_v22 = vor.u32 %v13209_v14, %v9702_v13  ;;  %3450 = vmatpush.bf16.msrb.mxu3 %v10503_v16  ;;  %v13109_v12 = vld [vmem:[%s20823_s1 + $0x5cc] sm:$0xf]  ;;  %v3171_v14 = vadd.f32 %v3170_v9, %v3158_v1 }
 0x122   :  { %v13273_v17 = vld [vmem:[%s20823_s1 + $0xae4] sm:$0xf0]  ;;  %v9320_v13 = vld [vmem:[%s20823_s1 + $0x5e8] sm:$0xf0] }
 0x123   :  { %v10214_v18 = vld [vmem:[%s20823_s1 + $0xcc8] sm:$0xf]  ;;  %v9959_v24 = vor.u32 %v13273_v17, %v9958_v15  ;;  %3412 = vmatpush.bf16.msrb.mxu0 %v9703_v22  ;;  %v13173_v17 = vld [vmem:[%s20823_s1 + $0x7cc] sm:$0xf]  ;;  %v9067_v22 = vor.u32 %v13045_v8, %v9064_v11 }
 0x124   :  { %v13337_v19 = vld [vmem:[%s20823_s1 + $0xce4] sm:$0xf0]  ;;  %v13021_v1 = vld [vmem:[%s20823_s1 + $0x30c] sm:$0xf] }
 0x125   :  { %v10470_v20 = vld [vmem:[%s20823_s1 + $0xec8] sm:$0xf]  ;;  %v10215_v25 = vor.u32 %v13337_v19, %v10214_v18  ;;  %3425 = vmatpush.bf16.msrb.mxu1 %v9959_v24  ;;  %v9576_v18 = vld [vmem:[%s20823_s1 + $0x7e8] sm:$0xf0] }
 0x126   :  { %v13401_v21 = vld [vmem:[%s20823_s1 + $0xee4] sm:$0xf0]  ;;  %v12973_v24 = vld [vmem:[%s20823_s1 + $0x18c] sm:$0xf] }
 0x127   :  { %v9670_v23 = vld [vmem:[%s20823_s1 + $0x888] sm:$0xf]  ;;  %v10471_v29 = vor.u32 %v13401_v21, %v10470_v20  ;;  %3438 = vmatpush.bf16.msrb.mxu2 %v10215_v25  ;;  %v8811_v20 = vor.u32 %v12981_v6, %v8808_v7  ;;  %v3183_v21 = vpop.f32.mrf.mxu2  ;;  %v8776_v25 = vld [vmem:[%s20823_s1 + $0x1a8] sm:$0xf0] }
 0x128   :  { %v13201_v26 = vld [vmem:[%s20823_s1 + $0x8a4] sm:$0xf0]  ;;  %v9224_v6 = vld [vmem:[%s20823_s1 + $0x528] sm:$0xf0] }
 0x129   :  { %v9926_v27 = vld [vmem:[%s20823_s1 + $0xa88] sm:$0xf]  ;;  %v9671_v43 = vor.u32 %v13201_v26, %v9670_v23  ;;  %3451 = vmatpush.bf16.msrb.mxu3 %v10471_v29  ;;  %v9323_v23 = vor.u32 %v13109_v12, %v9320_v13  ;;  %v13037_v26 = vld [vmem:[%s20823_s1 + $0x38c] sm:$0xf]  ;;  %v9579_v29 = vor.u32 %v13173_v17, %v9576_v18 }
 0x12a   :  { %v13265_v28 = vld [vmem:[%s20823_s1 + $0xaa4] sm:$0xf0]  ;;  %v13149_v7 = vld [vmem:[%s20823_s1 + $0x70c] sm:$0xf] }
 0x12b   :  { %v10182_v30 = vld [vmem:[%s20823_s1 + $0xc88] sm:$0xf]  ;;  %v9927_v45 = vor.u32 %v13265_v28, %v9926_v27  ;;  %3413 = vmatpush.bf16.msrb.mxu0 %v9671_v43  ;;  %v3184_v27 = vadd.f32 %v3183_v21, %v3171_v14  ;;  %v3196_v28 = vpop.f32.mrf.mxu3  ;;  %v13165_v43 = vld [vmem:[%s20823_s1 + $0x78c] sm:$0xf] }
 0x12c   :  { %v13329_v31 = vld [vmem:[%s20823_s1 + $0xca4] sm:$0xf0]  ;;  %v9480_v8 = vld [vmem:[%s20823_s1 + $0x728] sm:$0xf0] }
 0x12d   :  { %v10438_v36 = vld [vmem:[%s20823_s1 + $0xe88] sm:$0xf]  ;;  %v10183_v46 = vor.u32 %v13329_v31, %v10182_v30  ;;  %3426 = vmatpush.bf16.msrb.mxu1 %v9927_v45  ;;  %v9032_v30 = vld [vmem:[%s20823_s1 + $0x3a8] sm:$0xf0]  ;;  %v3197_v45 = vadd.f32 %v3196_v28, %v3184_v27  ;;  %v9483_v18 = vor.u32 %v13149_v7, %v9480_v8 }
 0x12e   :  { %v13393_v39 = vld [vmem:[%s20823_s1 + $0xea4] sm:$0xf0]  ;;  %v13101_v31 = vld [vmem:[%s20823_s1 + $0x58c] sm:$0xf] }
 0x12f   :  { %v9638_v44 = vld [vmem:[%s20823_s1 + $0x848] sm:$0xf]  ;;  %v10439_v50 = vor.u32 %v13393_v39, %v10438_v36  ;;  %3439 = vmatpush.bf16.msrb.mxu2 %v10183_v46  ;;  %v9288_v36 = vld [vmem:[%s20823_s1 + $0x5a8] sm:$0xf0]  ;;  %v3159_v39 = vpop.f32.mrf.mxu0  ;;  %v8779_v46 = vor.u32 %v12973_v24, %v8776_v25 }
 0x130   :  { %v13193_v47 = vld [vmem:[%s20823_s1 + $0x864] sm:$0xf0]  ;;  %v12949_v13 = vld [vmem:[%s20823_s1 + $0xcc] sm:$0xf] }
 0x131   :  { %v9894_v48 = vld [vmem:[%s20823_s1 + $0xa48] sm:$0xf]  ;;  %v9639_v56 = vor.u32 %v13193_v47, %v9638_v44  ;;  %3452 = vmatpush.bf16.msrb.mxu3 %v10439_v50  ;;  %v9544_v44 = vld [vmem:[%s20823_s1 + $0x7a8] sm:$0xf0]  ;;  %v9035_v47 = vor.u32 %v13037_v26, %v9032_v30 }
 0x132   :  { %v13257_v51 = vld [vmem:[%s20823_s1 + $0xa64] sm:$0xf0]  ;;  %v8744_v50 = vld [vmem:[%s20823_s1 + $0x168] sm:$0xf0] }
 0x133   :  { %v10150_v52 = vld [vmem:[%s20823_s1 + $0xc48] sm:$0xf]  ;;  %v9895_v60 = vor.u32 %v13257_v51, %v9894_v48  ;;  %3414 = vmatpush.bf16.msrb.mxu0 %v9639_v56  ;;  %v9291_v48 = vor.u32 %v13101_v31, %v9288_v36  ;;  %v13029_v51 = vld [vmem:[%s20823_s1 + $0x34c] sm:$0xf]  ;;  %v8747_v59 = vor.u32 %v12965_v49, %v8744_v50 }
 0x134   :  { %v13321_v53 = vld [vmem:[%s20823_s1 + $0xc64] sm:$0xf0]  ;;  %v9256_v56 = vld [vmem:[%s20823_s1 + $0x568] sm:$0xf0] }
 0x135   :  { %v10406_v54 = vld [vmem:[%s20823_s1 + $0xe48] sm:$0xf]  ;;  %v10151_v61 = vor.u32 %v13321_v53, %v10150_v52  ;;  %3427 = vmatpush.bf16.msrb.mxu1 %v9895_v60  ;;  %v3172_v52 = vpop.f32.mrf.mxu1  ;;  %v9547_v53 = vor.u32 %v13165_v43, %v9544_v44  ;;  %v3185_v60 = vpop.f32.mrf.mxu2  ;;  %v8680_v14 = vld [vmem:[%s20823_s1 + $0xe8] sm:$0xf0] }
 0x136   :  { %v13385_v55 = vld [vmem:[%s20823_s1 + $0xe64] sm:$0xf0]  ;;  %v9192_v21 = vld [vmem:[%s20823_s1 + $0x4e8] sm:$0xf0]  ;;  %v8683_v25 = vor.u32 %v12949_v13, %v8680_v14 }
 0x137   :  { %v9606_v57 = vld [vmem:[%s20823_s1 + $0x808] sm:$0xf]  ;;  %v10407_v2 = vor.u32 %v13385_v55, %v10406_v54  ;;  %3440 = vmatpush.bf16.msrb.mxu2 %v10151_v61  ;;  %v9000_v54 = vld [vmem:[%s20823_s1 + $0x368] sm:$0xf0] }
 0x138   :  { %v13185_v58 = vld [vmem:[%s20823_s1 + $0x824] sm:$0xf0]  ;;  %v13093_v55 = vld [vmem:[%s20823_s1 + $0x54c] sm:$0xf]  ;;  %v9003_v61 = vor.u32 %v13029_v51, %v9000_v54 }
 0x139   :  { %v9862_v62 = vld [vmem:[%s20823_s1 + $0xa08] sm:$0xf]  ;;  %v9607_v10 = vor.u32 %v13185_v58, %v9606_v57  ;;  %3453 = vmatpush.bf16.msrb.mxu3 %v10407_v2  ;;  %v13157_v57 = vld [vmem:[%s20823_s1 + $0x74c] sm:$0xf]  ;;  %v3198_v2 = vpop.f32.mrf.mxu3 }
 0x13a   :  { %v13249_v63 = vld [vmem:[%s20823_s1 + $0xa24] sm:$0xf0]  ;;  %v9512_v58 = vld [vmem:[%s20823_s1 + $0x768] sm:$0xf0] }
 0x13b   :  { %v10118_v0 = vld [vmem:[%s20823_s1 + $0xc08] sm:$0xf]  ;;  %v9863_v15 = vor.u32 %v13249_v63, %v9862_v62  ;;  %3415 = vmatpush.bf16.msrb.mxu0 %v9607_v10  ;;  %v9259_v62 = vor.u32 %v13093_v55, %v9256_v56  ;;  %v12957_v63 = vld [vmem:[%s20823_s1 + $0x10c] sm:$0xf]  ;;  %v3209_v10 = vpop.f32.mrf.mxu0 }
 0x13c   :  { %v13313_v3 = vld [vmem:[%s20823_s1 + $0xc24] sm:$0xf0]  ;;  %v12941_v28 = vld [vmem:[%s20823_s1 + $0x8c] sm:$0xf] }
 0x13d   :  { %v10374_v4 = vld [vmem:[%s20823_s1 + $0xe08] sm:$0xf]  ;;  %v10119_v16 = vor.u32 %v13313_v3, %v10118_v0  ;;  %3428 = vmatpush.bf16.msrb.mxu1 %v9863_v15  ;;  %v8712_v0 = vld [vmem:[%s20823_s1 + $0x128] sm:$0xf0]  ;;  %v9515_v3 = vor.u32 %v13157_v57, %v9512_v58  ;;  %v3222_v17 = vpop.f32.mrf.mxu1  ;;  %v3235_v31 = vpop.f32.mrf.mxu2 }
 0x13e   :  { %v13377_v5 = vld [vmem:[%s20823_s1 + $0xe24] sm:$0xf0]  ;;  %3416 = vmatmul.bf16.vlgmr.msrb.gmra.mxu0 %v14539_v37  ;;  %v8715_v9 = vor.u32 %v12957_v63, %v8712_v0  ;;  %v13013_v15 = vld [vmem:[%s20823_s1 + $0x2cc] sm:$0xf] }
 0x13f   :  { %v10375_v19 = vor.u32 %v13377_v5, %v10374_v4  ;;  %3441 = vmatpush.bf16.msrb.mxu2 %v10119_v16  ;;  %3460 = vmatpush.bf16.msra.mxu0 %v8811_v20  ;;  %v8968_v4 = vld [vmem:[%s20823_s1 + $0x328] sm:$0xf0]  ;;  %v3210_v16 = vadd.f32 %v3209_v10, %v3197_v45 }
 0x140   :  { %3429 = vmatmul.bf16.vlgmr.msrb.gmra.mxu1 %v14543_v40  ;;  %v13085_v5 = vld [vmem:[%s20823_s1 + $0x50c] sm:$0xf]  ;;  %v8971_v11 = vor.u32 %v13021_v1, %v8968_v4 }
 0x141   :  { %3454 = vmatpush.bf16.msrb.mxu3 %v10375_v19  ;;  %3473 = vmatpush.bf16.msra.mxu1 %v9067_v22  ;;  %v9227_v12 = vor.u32 %v13085_v5, %v9224_v6  ;;  %v8936_v19 = vld [vmem:[%s20823_s1 + $0x2e8] sm:$0xf0]  ;;  %v3223_v24 = vadd.f32 %v3222_v17, %v3210_v16 }
 0x142   :  { %3442 = vmatmul.bf16.vlgmr.msrb.gmra.mxu2 %v14531_v32  ;;  %v13077_v20 = vld [vmem:[%s20823_s1 + $0x4cc] sm:$0xf]  ;;  %v8939_v26 = vor.u32 %v13013_v15, %v8936_v19 }
 0x143   :  { %3486 = vmatpush.bf16.msra.mxu2 %v9323_v23  ;;  %3461 = vmatpush.bf16.msra.mxu0 %v8779_v46  ;;  %v13141_v22 = vld [vmem:[%s20823_s1 + $0x6cc] sm:$0xf]  ;;  %v9195_v27 = vor.u32 %v13077_v20, %v9192_v21  ;;  %v3236_v45 = vadd.f32 %v3235_v31, %v3223_v24  ;;  %v3248_v46 = vpop.f32.mrf.mxu3  ;;  %v3211_v51 = vpop.f32.mrf.mxu0 }
 0x144   :  { %3455 = vmatmul.bf16.vlgmr.msrb.gmra.mxu3 %v14541_v38  ;;  %v9448_v23 = vld [vmem:[%s20823_s1 + $0x6e8] sm:$0xf0] }
 0x145   :  { %3499 = vmatpush.bf16.msra.mxu3 %v9579_v29  ;;  %3474 = vmatpush.bf16.msra.mxu1 %v9035_v47  ;;  %v8648_v29 = vld [vmem:[%s20823_s1 + $0xa8] sm:$0xf0]  ;;  %v9451_v36 = vor.u32 %v13141_v22, %v9448_v23  ;;  %v15435_v50 = vadd.f32 %v3248_v46, %v3236_v45  ;;  %v3224_v57 = vpop.f32.mrf.mxu1  ;;  %v3237_v8 = vpop.f32.mrf.mxu2 }
 0x146   :  { %v13005_v30 = vld [vmem:[%s20823_s1 + $0x28c] sm:$0xf]  ;;  %v8651_v49 = vor.u32 %v12941_v28, %v8648_v29 }
 0x147   :  { %3487 = vmatpush.bf16.msra.mxu2 %v9291_v48  ;;  %3462 = vmatpush.bf16.msra.mxu0 %v8747_v59  ;;  %v8904_v39 = vld [vmem:[%s20823_s1 + $0x2a8] sm:$0xf0] }
 0x148   :  { %v13069_v43 = vld [vmem:[%s20823_s1 + $0x48c] sm:$0xf]  ;;  %v8907_v52 = vor.u32 %v13005_v30, %v8904_v39 }
 0x149   :  { %3500 = vmatpush.bf16.msra.mxu3 %v9547_v53  ;;  %3475 = vmatpush.bf16.msra.mxu1 %v9003_v61  ;;  %v9160_v44 = vld [vmem:[%s20823_s1 + $0x4a8] sm:$0xf0] }
 0x14a   :  { %v13133_v47 = vld [vmem:[%s20823_s1 + $0x68c] sm:$0xf]  ;;  %v9163_v53 = vor.u32 %v13069_v43, %v9160_v44 }
 0x14b   :  { %3488 = vmatpush.bf16.msra.mxu2 %v9259_v62  ;;  %3463 = vmatpush.bf16.msra.mxu0 %v8715_v9  ;;  %v9416_v48 = vld [vmem:[%s20823_s1 + $0x6a8] sm:$0xf0]  ;;  %v3250_v13 = vpop.f32.mrf.mxu3 }
 0x14c   :  { %v12933_v54 = vld [vmem:[%s20823_s1 + $0x4c] sm:$0xf]  ;;  %v9419_v58 = vor.u32 %v13133_v47, %v9416_v48 }
 0x14d   :  { %3501 = vmatpush.bf16.msra.mxu3 %v9515_v3  ;;  %3476 = vmatpush.bf16.msra.mxu1 %v8971_v11  ;;  %v8616_v55 = vld [vmem:[%s20823_s1 + $0x68] sm:$0xf0] }
 0x14e   :  { %v12997_v56 = vld [vmem:[%s20823_s1 + $0x24c] sm:$0xf]  ;;  %v8619_v0 = vor.u32 %v12933_v54, %v8616_v55 }
 0x14f   :  { %3489 = vmatpush.bf16.msra.mxu2 %v9227_v12  ;;  %3464 = vmatpush.bf16.msra.mxu0 %v8683_v25  ;;  %v8872_v59 = vld [vmem:[%s20823_s1 + $0x268] sm:$0xf0] }
 0x150   :  { %v13061_v60 = vld [vmem:[%s20823_s1 + $0x44c] sm:$0xf]  ;;  %v8875_v3 = vor.u32 %v12997_v56, %v8872_v59 }
 0x151   :  { %3502 = vmatpush.bf16.msra.mxu3 %v9483_v18  ;;  %3477 = vmatpush.bf16.msra.mxu1 %v8939_v26  ;;  %v9128_v61 = vld [vmem:[%s20823_s1 + $0x468] sm:$0xf0] }
 0x152   :  { %v13125_v62 = vld [vmem:[%s20823_s1 + $0x64c] sm:$0xf]  ;;  %v9131_v4 = vor.u32 %v13061_v60, %v9128_v61 }
 0x153   :  { %3490 = vmatpush.bf16.msra.mxu2 %v9195_v27  ;;  %v9384_v63 = vld [vmem:[%s20823_s1 + $0x668] sm:$0xf0]  ;;  %3465 = vmatpush.bf16.msra.mxu0 %v8651_v49 }
 0x154   :  { %v12925_v1 = vld [vmem:[%s20823_s1 + $0xc] sm:$0xf]  ;;  %v9387_v9 = vor.u32 %v13125_v62, %v9384_v63 }
 0x155   :  { %3503 = vmatpush.bf16.msra.mxu3 %v9451_v36  ;;  %v8584_v2 = vld [vmem:[%s20823_s1 + $0x28] sm:$0xf0]  ;;  %3478 = vmatpush.bf16.msra.mxu1 %v8907_v52 }
 0x156   :  { %v12989_v5 = vld [vmem:[%s20823_s1 + $0x20c] sm:$0xf]  ;;  %v8587_v17 = vor.u32 %v12925_v1, %v8584_v2  ;;  %v573_v2 = vperm.slane %v15230_v35, 1 }
 0x157   :  { %3491 = vmatpush.bf16.msra.mxu2 %v9163_v53  ;;  %v8840_v6 = vld [vmem:[%s20823_s1 + $0x228] sm:$0xf0]  ;;  %3466 = vmatpush.bf16.msra.mxu0 %v8619_v0 }
 0x158   :  { %v13053_v7 = vld [vmem:[%s20823_s1 + $0x40c] sm:$0xf]  ;;  %v8843_v21 = vor.u32 %v12989_v5, %v8840_v6 }
 0x159   :  { %3504 = vmatpush.bf16.msra.mxu3 %v9419_v58  ;;  %v9096_v10 = vld [vmem:[%s20823_s1 + $0x428] sm:$0xf0]  ;;  %3479 = vmatpush.bf16.msra.mxu1 %v8875_v3 }
 0x15a   :  { %v13117_v11 = vld [vmem:[%s20823_s1 + $0x60c] sm:$0xf]  ;;  %v9099_v22 = vor.u32 %v13053_v7, %v9096_v10 }
 0x15b   :  { %v9352_v12 = vld [vmem:[%s20823_s1 + $0x628] sm:$0xf0]  ;;  %3492 = vmatpush.bf16.msra.mxu2 %v9131_v4  ;;  %3467 = vmatpush.bf16.msra.mxu0 %v8587_v17 }
 0x15c   :  { %v13237_v14 = vld [vmem:[%s20823_s1 + $0x9cc] sm:$0xf]  ;;  %v9355_v25 = vor.u32 %v13117_v11, %v9352_v12 }
 0x15d   :  { %v9832_v15 = vld [vmem:[%s20823_s1 + $0x9e8] sm:$0xf0]  ;;  %3505 = vmatpush.bf16.msra.mxu3 %v9387_v9  ;;  %3480 = vmatpush.bf16.msra.mxu1 %v8843_v21  ;;  %v3261_v9 = vpop.f32.mrf.mxu0 }
 0x15e   :  { %v13301_v16 = vld [vmem:[%s20823_s1 + $0xbcc] sm:$0xf]  ;;  %v9835_v26 = vor.u32 %v13237_v14, %v9832_v15  ;;  %3468 = vmatmul.bf16.vlgmr.msra.gmra.mxu0 %v14413_v34  ;;  %v3262_v15 = vadd.f32 %v3261_v9, %v573_v2 }
 0x15f   :  { %v10088_v18 = vld [vmem:[%s20823_s1 + $0xbe8] sm:$0xf0]  ;;  %3493 = vmatpush.bf16.msra.mxu2 %v9099_v22 }
 0x160   :  { %v13365_v19 = vld [vmem:[%s20823_s1 + $0xdcc] sm:$0xf]  ;;  %v10091_v27 = vor.u32 %v13301_v16, %v10088_v18  ;;  %3512 = vmatpush.bf16.msrb.mxu0 %v9835_v26  ;;  %3481 = vmatmul.bf16.vlgmr.msra.gmra.mxu1 %v14426_v42  ;;  %v3274_v16 = vpop.f32.mrf.mxu1 }
 0x161   :  { %v10344_v20 = vld [vmem:[%s20823_s1 + $0xde8] sm:$0xf0]  ;;  %3506 = vmatpush.bf16.msra.mxu3 %v9355_v25 }
 0x162   :  { %v13429_v23 = vld [vmem:[%s20823_s1 + $0xfcc] sm:$0xf]  ;;  %v10347_v28 = vor.u32 %v13365_v19, %v10344_v20  ;;  %3525 = vmatpush.bf16.msrb.mxu1 %v10091_v27  ;;  %3494 = vmatmul.bf16.vlgmr.msra.gmra.mxu2 %v14411_v33 }
 0x163   :  { %v10600_v24 = vld [vmem:[%s20823_s1 + $0xfe8] sm:$0xf0] }
 0x164   :  { %v13229_v29 = vld [vmem:[%s20823_s1 + $0x98c] sm:$0xf]  ;;  %v10603_v36 = vor.u32 %v13429_v23, %v10600_v24  ;;  %3538 = vmatpush.bf16.msrb.mxu2 %v10347_v28  ;;  %3507 = vmatmul.bf16.vlgmr.msra.gmra.mxu3 %v14424_v41  ;;  %v3275_v23 = vadd.f32 %v3274_v16, %v3262_v15  ;;  %v9070_v15 = vld [vmem:[%s20823_s1 + $0x3d0] sm:$0xf] }
 0x165   :  { %v9800_v30 = vld [vmem:[%s20823_s1 + $0x9a8] sm:$0xf0] }
 0x166   :  { %v13293_v31 = vld [vmem:[%s20823_s1 + $0xb8c] sm:$0xf]  ;;  %v9803_v47 = vor.u32 %v13229_v29, %v9800_v30  ;;  %3551 = vmatpush.bf16.msrb.mxu3 %v10603_v36  ;;  %v3287_v30 = vpop.f32.mrf.mxu2 }
 0x167   :  { %v10056_v39 = vld [vmem:[%s20823_s1 + $0xba8] sm:$0xf0] }
 0x168   :  { %v13357_v43 = vld [vmem:[%s20823_s1 + $0xd8c] sm:$0xf]  ;;  %v10059_v48 = vor.u32 %v13293_v31, %v10056_v39  ;;  %3513 = vmatpush.bf16.msrb.mxu0 %v9803_v47 }
 0x169   :  { %v10312_v44 = vld [vmem:[%s20823_s1 + $0xda8] sm:$0xf0] }
 0x16a   :  { %v13421_v45 = vld [vmem:[%s20823_s1 + $0xf8c] sm:$0xf]  ;;  %v10315_v49 = vor.u32 %v13357_v43, %v10312_v44  ;;  %3526 = vmatpush.bf16.msrb.mxu1 %v10059_v48  ;;  %v3288_v44 = vadd.f32 %v3287_v30, %v3275_v23  ;;  %v13178_v23 = vld [vmem:[%s20823_s1 + $0x7ec] sm:$0xf0] }
 0x16b   :  { %v10568_v46 = vld [vmem:[%s20823_s1 + $0xfa8] sm:$0xf0]  ;;  %v9038_v30 = vld [vmem:[%s20823_s1 + $0x390] sm:$0xf] }
 0x16c   :  { %v13221_v51 = vld [vmem:[%s20823_s1 + $0x94c] sm:$0xf]  ;;  %v10571_v54 = vor.u32 %v13421_v45, %v10568_v46  ;;  %3539 = vmatpush.bf16.msrb.mxu2 %v10315_v49  ;;  %v3300_v45 = vpop.f32.mrf.mxu3 }
 0x16d   :  { %v9768_v52 = vld [vmem:[%s20823_s1 + $0x968] sm:$0xf0]  ;;  %v15634_v49 = vadd.f32 %v3300_v45, %v3288_v44  ;;  %v9550_v44 = vld [vmem:[%s20823_s1 + $0x790] sm:$0xf] }
 0x16e   :  { %v13285_v53 = vld [vmem:[%s20823_s1 + $0xb4c] sm:$0xf]  ;;  %v9771_v60 = vor.u32 %v13221_v51, %v9768_v52  ;;  %3552 = vmatpush.bf16.msrb.mxu3 %v10571_v54  ;;  %v3263_v51 = vpop.f32.mrf.mxu0  ;;  %v13170_v45 = vld [vmem:[%s20823_s1 + $0x7ac] sm:$0xf0] }
 0x16f   :  { %v10024_v55 = vld [vmem:[%s20823_s1 + $0xb68] sm:$0xf0]  ;;  %v8750_v51 = vld [vmem:[%s20823_s1 + $0x150] sm:$0xf] }
 0x170   :  { %v13349_v56 = vld [vmem:[%s20823_s1 + $0xd4c] sm:$0xf]  ;;  %v10027_v62 = vor.u32 %v13285_v53, %v10024_v55  ;;  %3514 = vmatpush.bf16.msrb.mxu0 %v9771_v60 }
 0x171   :  { %v10280_v57 = vld [vmem:[%s20823_s1 + $0xd68] sm:$0xf0] }
 0x172   :  { %v13413_v58 = vld [vmem:[%s20823_s1 + $0xf4c] sm:$0xf]  ;;  %v10283_v63 = vor.u32 %v13349_v56, %v10280_v57  ;;  %3527 = vmatpush.bf16.msrb.mxu1 %v10027_v62  ;;  %v3276_v57 = vpop.f32.mrf.mxu1 }
 0x173   :  { %v10536_v59 = vld [vmem:[%s20823_s1 + $0xf68] sm:$0xf0]  ;;  %v13098_v57 = vld [vmem:[%s20823_s1 + $0x56c] sm:$0xf0] }
 0x174   :  { %v13213_v61 = vld [vmem:[%s20823_s1 + $0x90c] sm:$0xf]  ;;  %v10539_v3 = vor.u32 %v13413_v58, %v10536_v59  ;;  %3540 = vmatpush.bf16.msrb.mxu2 %v10283_v63 }
 0x175   :  { %v9736_v0 = vld [vmem:[%s20823_s1 + $0x928] sm:$0xf0] }
 0x176   :  { %v13277_v1 = vld [vmem:[%s20823_s1 + $0xb0c] sm:$0xf]  ;;  %v9739_v8 = vor.u32 %v13213_v61, %v9736_v0  ;;  %3553 = vmatpush.bf16.msrb.mxu3 %v10539_v3 }
 0x177   :  { %v9992_v4 = vld [vmem:[%s20823_s1 + $0xb28] sm:$0xf0] }
 0x178   :  { %v13341_v5 = vld [vmem:[%s20823_s1 + $0xd0c] sm:$0xf]  ;;  %v9995_v10 = vor.u32 %v13277_v1, %v9992_v4  ;;  %3515 = vmatpush.bf16.msrb.mxu0 %v9739_v8 }
 0x179   :  { %v10248_v6 = vld [vmem:[%s20823_s1 + $0xd28] sm:$0xf0] }
 0x17a   :  { %v13405_v7 = vld [vmem:[%s20823_s1 + $0xf0c] sm:$0xf]  ;;  %v10251_v11 = vor.u32 %v13341_v5, %v10248_v6  ;;  %3528 = vmatpush.bf16.msrb.mxu1 %v9995_v10 }
 0x17b   :  { %v10504_v35 = vld [vmem:[%s20823_s1 + $0xf28] sm:$0xf0] }
 0x17c   :  { %v13205_v12 = vld [vmem:[%s20823_s1 + $0x8cc] sm:$0xf]  ;;  %v10507_v17 = vor.u32 %v13405_v7, %v10504_v35  ;;  %3541 = vmatpush.bf16.msrb.mxu2 %v10251_v11  ;;  %v3289_v35 = vpop.f32.mrf.mxu2 }
 0x17d   :  { %v9704_v13 = vld [vmem:[%s20823_s1 + $0x8e8] sm:$0xf0] }
 0x17e   :  { %v13269_v14 = vld [vmem:[%s20823_s1 + $0xacc] sm:$0xf]  ;;  %v9707_v24 = vor.u32 %v13205_v12, %v9704_v13  ;;  %3554 = vmatpush.bf16.msrb.mxu3 %v10507_v17  ;;  %v3302_v12 = vpop.f32.mrf.mxu3  ;;  %v8814_v13 = vld [vmem:[%s20823_s1 + $0x1d0] sm:$0xf] }
 0x17f   :  { %v9960_v18 = vld [vmem:[%s20823_s1 + $0xae8] sm:$0xf0]  ;;  %v13050_v17 = vld [vmem:[%s20823_s1 + $0x3ec] sm:$0xf0] }
 0x180   :  { %v13333_v19 = vld [vmem:[%s20823_s1 + $0xccc] sm:$0xf]  ;;  %v9963_v25 = vor.u32 %v13269_v14, %v9960_v18  ;;  %3516 = vmatpush.bf16.msrb.mxu0 %v9707_v24  ;;  %v12986_v14 = vld [vmem:[%s20823_s1 + $0x1ec] sm:$0xf0] }
 0x181   :  { %v10216_v20 = vld [vmem:[%s20823_s1 + $0xce8] sm:$0xf0]  ;;  %v9326_v18 = vld [vmem:[%s20823_s1 + $0x5d0] sm:$0xf] }
 0x182   :  { %v13397_v21 = vld [vmem:[%s20823_s1 + $0xecc] sm:$0xf]  ;;  %v10219_v26 = vor.u32 %v13333_v19, %v10216_v20  ;;  %3529 = vmatpush.bf16.msrb.mxu1 %v9963_v25  ;;  %v13114_v19 = vld [vmem:[%s20823_s1 + $0x5ec] sm:$0xf0]  ;;  %v8815_v25 = vor.u32 %v12986_v14, %v8814_v13 }
 0x183   :  { %v10472_v22 = vld [vmem:[%s20823_s1 + $0xee8] sm:$0xf0]  ;;  %v12954_v12 = vld [vmem:[%s20823_s1 + $0xec] sm:$0xf0] }
 0x184   :  { %v13197_v27 = vld [vmem:[%s20823_s1 + $0x88c] sm:$0xf]  ;;  %v10475_v31 = vor.u32 %v13397_v21, %v10472_v22  ;;  %3542 = vmatpush.bf16.msrb.mxu2 %v10219_v26  ;;  %v9582_v22 = vld [vmem:[%s20823_s1 + $0x7d0] sm:$0xf]  ;;  %v9071_v26 = vor.u32 %v13050_v17, %v9070_v15  ;;  %v3326_v15 = vpop.f32.mrf.mxu1 }
 0x185   :  { %v9672_v28 = vld [vmem:[%s20823_s1 + $0x8a8] sm:$0xf0]  ;;  %v8942_v13 = vld [vmem:[%s20823_s1 + $0x2d0] sm:$0xf] }
 0x186   :  { %v13261_v29 = vld [vmem:[%s20823_s1 + $0xa8c] sm:$0xf]  ;;  %v9675_v48 = vor.u32 %v13197_v27, %v9672_v28  ;;  %3555 = vmatpush.bf16.msrb.mxu3 %v10475_v31  ;;  %v9327_v27 = vor.u32 %v13114_v19, %v9326_v18  ;;  %v8782_v28 = vld [vmem:[%s20823_s1 + $0x190] sm:$0xf]  ;;  %v9583_v31 = vor.u32 %v13178_v23, %v9582_v22 }
 0x187   :  { %v9928_v36 = vld [vmem:[%s20823_s1 + $0xaa8] sm:$0xf0]  ;;  %v13018_v17 = vld [vmem:[%s20823_s1 + $0x2ec] sm:$0xf0] }
 0x188   :  { %v13325_v39 = vld [vmem:[%s20823_s1 + $0xc8c] sm:$0xf]  ;;  %v9931_v52 = vor.u32 %v13261_v29, %v9928_v36  ;;  %3517 = vmatpush.bf16.msrb.mxu0 %v9675_v48  ;;  %v12978_v29 = vld [vmem:[%s20823_s1 + $0x1ac] sm:$0xf0]  ;;  %v8943_v23 = vor.u32 %v13018_v17, %v8942_v13 }
 0x189   :  { %v10184_v43 = vld [vmem:[%s20823_s1 + $0xca8] sm:$0xf0]  ;;  %v13042_v36 = vld [vmem:[%s20823_s1 + $0x3ac] sm:$0xf0] }
 0x18a   :  { %v13389_v46 = vld [vmem:[%s20823_s1 + $0xe8c] sm:$0xf]  ;;  %v10187_v53 = vor.u32 %v13325_v39, %v10184_v43  ;;  %3530 = vmatpush.bf16.msrb.mxu1 %v9931_v52  ;;  %v9294_v39 = vld [vmem:[%s20823_s1 + $0x590] sm:$0xf] }
 0x18b   :  { %v10440_v47 = vld [vmem:[%s20823_s1 + $0xea8] sm:$0xf0]  ;;  %v13106_v43 = vld [vmem:[%s20823_s1 + $0x5ac] sm:$0xf0] }
 0x18c   :  { %v13189_v54 = vld [vmem:[%s20823_s1 + $0x84c] sm:$0xf]  ;;  %v10443_v58 = vor.u32 %v13389_v46, %v10440_v47  ;;  %3543 = vmatpush.bf16.msrb.mxu2 %v10187_v53  ;;  %v8783_v46 = vor.u32 %v12978_v29, %v8782_v28  ;;  %v9039_v47 = vor.u32 %v13042_v36, %v9038_v30  ;;  %v9295_v48 = vor.u32 %v13106_v43, %v9294_v39  ;;  %v12970_v52 = vld [vmem:[%s20823_s1 + $0x16c] sm:$0xf0]  ;;  %v3339_v28 = vpop.f32.mrf.mxu2  ;;  %v3352_v43 = vpop.f32.mrf.mxu3 }
 0x18d   :  { %v9640_v55 = vld [vmem:[%s20823_s1 + $0x868] sm:$0xf0]  ;;  %v9006_v53 = vld [vmem:[%s20823_s1 + $0x350] sm:$0xf] }
 0x18e   :  { %v13253_v56 = vld [vmem:[%s20823_s1 + $0xa4c] sm:$0xf]  ;;  %v9643_v0 = vor.u32 %v13189_v54, %v9640_v55  ;;  %3556 = vmatpush.bf16.msrb.mxu3 %v10443_v58  ;;  %v9551_v54 = vor.u32 %v13170_v45, %v9550_v44  ;;  %v13034_v55 = vld [vmem:[%s20823_s1 + $0x36c] sm:$0xf0] }
 0x18f   :  { %v9896_v59 = vld [vmem:[%s20823_s1 + $0xa68] sm:$0xf0]  ;;  %v9518_v58 = vld [vmem:[%s20823_s1 + $0x750] sm:$0xf] }
 0x190   :  { %v13317_v60 = vld [vmem:[%s20823_s1 + $0xc4c] sm:$0xf]  ;;  %v9899_v3 = vor.u32 %v13253_v56, %v9896_v59  ;;  %3518 = vmatpush.bf16.msrb.mxu0 %v9643_v0  ;;  %v9262_v56 = vld [vmem:[%s20823_s1 + $0x550] sm:$0xf] }
 0x191   :  { %v10152_v61 = vld [vmem:[%s20823_s1 + $0xc68] sm:$0xf0]  ;;  %v13162_v59 = vld [vmem:[%s20823_s1 + $0x76c] sm:$0xf0] }
 0x192   :  { %v13381_v62 = vld [vmem:[%s20823_s1 + $0xe4c] sm:$0xf]  ;;  %v10155_v4 = vor.u32 %v13317_v60, %v10152_v61  ;;  %3531 = vmatpush.bf16.msrb.mxu1 %v9899_v3  ;;  %v8751_v60 = vor.u32 %v12970_v52, %v8750_v51  ;;  %v9007_v61 = vor.u32 %v13034_v55, %v9006_v53  ;;  %v12962_v0 = vld [vmem:[%s20823_s1 + $0x12c] sm:$0xf0] }
 0x193   :  { %v10408_v63 = vld [vmem:[%s20823_s1 + $0xe68] sm:$0xf0]  ;;  %v13026_v3 = vld [vmem:[%s20823_s1 + $0x32c] sm:$0xf0] }
 0x194   :  { %v13181_v1 = vld [vmem:[%s20823_s1 + $0x80c] sm:$0xf]  ;;  %v10411_v8 = vor.u32 %v13381_v62, %v10408_v63  ;;  %3544 = vmatpush.bf16.msrb.mxu2 %v10155_v4  ;;  %v9263_v62 = vor.u32 %v13098_v57, %v9262_v56  ;;  %v8718_v63 = vld [vmem:[%s20823_s1 + $0x110] sm:$0xf]  ;;  %v3328_v56 = vpop.f32.mrf.mxu1 }
 0x195   :  { %v9608_v2 = vld [vmem:[%s20823_s1 + $0x828] sm:$0xf0]  ;;  %v9230_v4 = vld [vmem:[%s20823_s1 + $0x510] sm:$0xf]  ;;  %v8719_v35 = vor.u32 %v12962_v0, %v8718_v63 }
 0x196   :  { %v13245_v5 = vld [vmem:[%s20823_s1 + $0xa0c] sm:$0xf]  ;;  %v9611_v16 = vor.u32 %v13181_v1, %v9608_v2  ;;  %3557 = vmatpush.bf16.msrb.mxu3 %v10411_v8  ;;  %v8974_v1 = vld [vmem:[%s20823_s1 + $0x310] sm:$0xf]  ;;  %v9519_v2 = vor.u32 %v13162_v59, %v9518_v58  ;;  %v3313_v8 = vpop.f32.mrf.mxu0 }
 0x197   :  { %v9864_v6 = vld [vmem:[%s20823_s1 + $0xa28] sm:$0xf0]  ;;  %v3314_v14 = vadd.f32 %v3313_v8, %v15634_v49  ;;  %v9198_v18 = vld [vmem:[%s20823_s1 + $0x4d0] sm:$0xf] }
 0x198   :  { %v13309_v7 = vld [vmem:[%s20823_s1 + $0xc0c] sm:$0xf]  ;;  %v9867_v20 = vor.u32 %v13245_v5, %v9864_v6  ;;  %3519 = vmatpush.bf16.msrb.mxu0 %v9611_v16  ;;  %v13090_v5 = vld [vmem:[%s20823_s1 + $0x52c] sm:$0xf0] }
 0x199   :  { %v10120_v9 = vld [vmem:[%s20823_s1 + $0xc28] sm:$0xf0]  ;;  %v9486_v6 = vld [vmem:[%s20823_s1 + $0x710] sm:$0xf] }
 0x19a   :  { %v13373_v10 = vld [vmem:[%s20823_s1 + $0xe0c] sm:$0xf]  ;;  %v10123_v21 = vor.u32 %v13309_v7, %v10120_v9  ;;  %3532 = vmatpush.bf16.msrb.mxu1 %v9867_v20  ;;  %v13154_v7 = vld [vmem:[%s20823_s1 + $0x72c] sm:$0xf0]  ;;  %v8975_v9 = vor.u32 %v13026_v3, %v8974_v1 }
 0x19b   :  { %v10376_v11 = vld [vmem:[%s20823_s1 + $0xe28] sm:$0xf0]  ;;  %3520 = vmatmul.bf16.vlgmr.msrb.gmra.mxu0 %v14539_v37  ;;  %v9487_v16 = vor.u32 %v13154_v7, %v9486_v6  ;;  %v13082_v19 = vld [vmem:[%s20823_s1 + $0x4ec] sm:$0xf0]  ;;  %v3341_v7 = vpop.f32.mrf.mxu2 }
 0x19c   :  { %v10379_v24 = vor.u32 %v13373_v10, %v10376_v11  ;;  %3545 = vmatpush.bf16.msrb.mxu2 %v10123_v21  ;;  %3564 = vmatpush.bf16.msra.mxu0 %v8815_v25  ;;  %v9231_v10 = vor.u32 %v13090_v5, %v9230_v4  ;;  %v8686_v11 = vld [vmem:[%s20823_s1 + $0xd0] sm:$0xf]  ;;  %v3327_v21 = vadd.f32 %v3326_v15, %v3314_v14 }
 0x19d   :  { %3533 = vmatmul.bf16.vlgmr.msrb.gmra.mxu1 %v14543_v40  ;;  %v9454_v20 = vld [vmem:[%s20823_s1 + $0x6d0] sm:$0xf]  ;;  %v8687_v22 = vor.u32 %v12954_v12, %v8686_v11  ;;  %v3354_v11 = vpop.f32.mrf.mxu3 }
 0x19e   :  { %3558 = vmatpush.bf16.msrb.mxu3 %v10379_v24  ;;  %3577 = vmatpush.bf16.msra.mxu1 %v9071_v26  ;;  %v13146_v49 = vld [vmem:[%s20823_s1 + $0x6ec] sm:$0xf0]  ;;  %v9199_v24 = vor.u32 %v13082_v19, %v9198_v18  ;;  %v3340_v39 = vadd.f32 %v3339_v28, %v3327_v21 }
 0x19f   :  { %3546 = vmatmul.bf16.vlgmr.msrb.gmra.mxu2 %v14531_v32  ;;  %v8654_v25 = vld [vmem:[%s20823_s1 + $0x90] sm:$0xf]  ;;  %v9455_v29 = vor.u32 %v13146_v49, %v9454_v20 }
 0x1a0   :  { %3590 = vmatpush.bf16.msra.mxu2 %v9327_v27  ;;  %3565 = vmatpush.bf16.msra.mxu0 %v8783_v46  ;;  %v12946_v26 = vld [vmem:[%s20823_s1 + $0xac] sm:$0xf0] }
 0x1a1   :  { %3559 = vmatmul.bf16.vlgmr.msrb.gmra.mxu3 %v14541_v38  ;;  %v8910_v27 = vld [vmem:[%s20823_s1 + $0x290] sm:$0xf]  ;;  %v8655_v46 = vor.u32 %v12946_v26, %v8654_v25 }
 0x1a2   :  { %3603 = vmatpush.bf16.msra.mxu3 %v9583_v31  ;;  %3578 = vmatpush.bf16.msra.mxu1 %v9039_v47  ;;  %v13010_v30 = vld [vmem:[%s20823_s1 + $0x2ac] sm:$0xf0]  ;;  %v15833_v47 = vadd.f32 %v3352_v43, %v3340_v39 }
 0x1a3   :  { %v9166_v31 = vld [vmem:[%s20823_s1 + $0x490] sm:$0xf]  ;;  %v8911_v51 = vor.u32 %v13010_v30, %v8910_v27 }
 0x1a4   :  { %3591 = vmatpush.bf16.msra.mxu2 %v9295_v48  ;;  %3566 = vmatpush.bf16.msra.mxu0 %v8751_v60  ;;  %v13074_v36 = vld [vmem:[%s20823_s1 + $0x4ac] sm:$0xf0]  ;;  %v3315_v48 = vpop.f32.mrf.mxu0 }
 0x1a5   :  { %v9422_v44 = vld [vmem:[%s20823_s1 + $0x690] sm:$0xf]  ;;  %v9167_v52 = vor.u32 %v13074_v36, %v9166_v31 }
 0x1a6   :  { %3604 = vmatpush.bf16.msra.mxu3 %v9551_v54  ;;  %3579 = vmatpush.bf16.msra.mxu1 %v9007_v61  ;;  %v13138_v45 = vld [vmem:[%s20823_s1 + $0x6ac] sm:$0xf0] }
 0x1a7   :  { %v8622_v53 = vld [vmem:[%s20823_s1 + $0x50] sm:$0xf]  ;;  %v9423_v57 = vor.u32 %v13138_v45, %v9422_v44 }
 0x1a8   :  { %3592 = vmatpush.bf16.msra.mxu2 %v9263_v62  ;;  %3567 = vmatpush.bf16.msra.mxu0 %v8719_v35  ;;  %v12938_v54 = vld [vmem:[%s20823_s1 + $0x6c] sm:$0xf0] }
 0x1a9   :  { %v8878_v55 = vld [vmem:[%s20823_s1 + $0x250] sm:$0xf]  ;;  %v8623_v63 = vor.u32 %v12938_v54, %v8622_v53 }
 0x1aa   :  { %3605 = vmatpush.bf16.msra.mxu3 %v9519_v2  ;;  %3580 = vmatpush.bf16.msra.mxu1 %v8975_v9  ;;  %v13002_v58 = vld [vmem:[%s20823_s1 + $0x26c] sm:$0xf0] }
 0x1ab   :  { %v9134_v59 = vld [vmem:[%s20823_s1 + $0x450] sm:$0xf]  ;;  %v8879_v2 = vor.u32 %v13002_v58, %v8878_v55 }
 0x1ac   :  { %3593 = vmatpush.bf16.msra.mxu2 %v9231_v10  ;;  %3568 = vmatpush.bf16.msra.mxu0 %v8687_v22  ;;  %v13066_v60 = vld [vmem:[%s20823_s1 + $0x46c] sm:$0xf0] }
 0x1ad   :  { %v9390_v61 = vld [vmem:[%s20823_s1 + $0x650] sm:$0xf]  ;;  %v9135_v3 = vor.u32 %v13066_v60, %v9134_v59 }
 0x1ae   :  { %3606 = vmatpush.bf16.msra.mxu3 %v9487_v16  ;;  %3581 = vmatpush.bf16.msra.mxu1 %v8943_v23  ;;  %v13130_v62 = vld [vmem:[%s20823_s1 + $0x66c] sm:$0xf0] }
 0x1af   :  { %v8590_v0 = vld [vmem:[%s20823_s1 + $0x10] sm:$0xf]  ;;  %v9391_v35 = vor.u32 %v13130_v62, %v9390_v61 }
 0x1b0   :  { %3594 = vmatpush.bf16.msra.mxu2 %v9199_v24  ;;  %3569 = vmatpush.bf16.msra.mxu0 %v8655_v46  ;;  %v12930_v1 = vld [vmem:[%s20823_s1 + $0x2c] sm:$0xf0] }
 0x1b1   :  { %v8846_v4 = vld [vmem:[%s20823_s1 + $0x210] sm:$0xf]  ;;  %v8591_v15 = vor.u32 %v12930_v1, %v8590_v0  ;;  %v15971_v1 = vld [vmem:[%s20824_s2] sm:$0xff] }
 0x1b2   :  { %3607 = vmatpush.bf16.msra.mxu3 %v9455_v29  ;;  %3582 = vmatpush.bf16.msra.mxu1 %v8911_v51  ;;  %v12994_v5 = vld [vmem:[%s20823_s1 + $0x22c] sm:$0xf0] }
 0x1b3   :  { %v9102_v6 = vld [vmem:[%s20823_s1 + $0x410] sm:$0xf]  ;;  %v8847_v19 = vor.u32 %v12994_v5, %v8846_v4 }
 0x1b4   :  { %3595 = vmatpush.bf16.msra.mxu2 %v9167_v52  ;;  %v13058_v8 = vld [vmem:[%s20823_s1 + $0x42c] sm:$0xf0]  ;;  %3570 = vmatpush.bf16.msra.mxu0 %v8623_v63 }
 0x1b5   :  { %v9358_v9 = vld [vmem:[%s20823_s1 + $0x610] sm:$0xf]  ;;  %v9103_v20 = vor.u32 %v13058_v8, %v9102_v6 }
 0x1b6   :  { %3608 = vmatpush.bf16.msra.mxu3 %v9423_v57  ;;  %v13122_v10 = vld [vmem:[%s20823_s1 + $0x62c] sm:$0xf0]  ;;  %3583 = vmatpush.bf16.msra.mxu1 %v8879_v2  ;;  %v574_v2 = vperm.slane %v15971_v1, 2 }
 0x1b7   :  { %v9838_v12 = vld [vmem:[%s20823_s1 + $0x9d0] sm:$0xf]  ;;  %v9359_v22 = vor.u32 %v13122_v10, %v9358_v9  ;;  %v3365_v9 = vpop.f32.mrf.mxu0 }
 0x1b8   :  { %v13242_v13 = vld [vmem:[%s20823_s1 + $0x9ec] sm:$0xf0]  ;;  %3596 = vmatpush.bf16.msra.mxu2 %v9135_v3  ;;  %3571 = vmatpush.bf16.msra.mxu0 %v8591_v15  ;;  %v3366_v15 = vadd.f32 %v3365_v9, %v574_v2 }
 0x1b9   :  { %v10094_v14 = vld [vmem:[%s20823_s1 + $0xbd0] sm:$0xf]  ;;  %v9839_v23 = vor.u32 %v13242_v13, %v9838_v12 }
 0x1ba   :  { %v13306_v16 = vld [vmem:[%s20823_s1 + $0xbec] sm:$0xf0]  ;;  %3609 = vmatpush.bf16.msra.mxu3 %v9391_v35  ;;  %3584 = vmatpush.bf16.msra.mxu1 %v8847_v19 }
 0x1bb   :  { %v10350_v17 = vld [vmem:[%s20823_s1 + $0xdd0] sm:$0xf]  ;;  %v10095_v24 = vor.u32 %v13306_v16, %v10094_v14  ;;  %3572 = vmatmul.bf16.vlgmr.msra.gmra.mxu0 %v14413_v34  ;;  %v3378_v16 = vpop.f32.mrf.mxu1 }
 0x1bc   :  { %v13370_v18 = vld [vmem:[%s20823_s1 + $0xdec] sm:$0xf0]  ;;  %3597 = vmatpush.bf16.msra.mxu2 %v9103_v20  ;;  %3616 = vmatpush.bf16.msrb.mxu0 %v9839_v23 }
 0x1bd   :  { %v10606_v49 = vld [vmem:[%s20823_s1 + $0xfd0] sm:$0xf]  ;;  %v10351_v25 = vor.u32 %v13370_v18, %v10350_v17  ;;  %3585 = vmatmul.bf16.vlgmr.msra.gmra.mxu1 %v14426_v42 }
 0x1be   :  { %v13434_v21 = vld [vmem:[%s20823_s1 + $0xfec] sm:$0xf0]  ;;  %3610 = vmatpush.bf16.msra.mxu3 %v9359_v22  ;;  %3629 = vmatpush.bf16.msrb.mxu1 %v10095_v24  ;;  %v3379_v22 = vadd.f32 %v3378_v16, %v3366_v15  ;;  %v12982_v15 = vld [vmem:[%s20823_s1 + $0x1d4] sm:$0xf] }
 0x1bf   :  { %v9806_v26 = vld [vmem:[%s20823_s1 + $0x990] sm:$0xf]  ;;  %v10607_v29 = vor.u32 %v13434_v21, %v10606_v49  ;;  %3598 = vmatmul.bf16.vlgmr.msra.gmra.mxu2 %v14411_v33  ;;  %v8816_v16 = vld [vmem:[%s20823_s1 + $0x1f0] sm:$0xf0] }
 0x1c0   :  { %v13234_v27 = vld [vmem:[%s20823_s1 + $0x9ac] sm:$0xf0]  ;;  %3642 = vmatpush.bf16.msrb.mxu2 %v10351_v25 }
 0x1c1   :  { %v10062_v28 = vld [vmem:[%s20823_s1 + $0xb90] sm:$0xf]  ;;  %v9807_v44 = vor.u32 %v13234_v27, %v9806_v26  ;;  %3611 = vmatmul.bf16.vlgmr.msra.gmra.mxu3 %v14424_v41 }
 0x1c2   :  { %v13298_v30 = vld [vmem:[%s20823_s1 + $0xbac] sm:$0xf0]  ;;  %3655 = vmatpush.bf16.msrb.mxu3 %v10607_v29  ;;  %v3391_v29 = vpop.f32.mrf.mxu2 }
 0x1c3   :  { %v10318_v31 = vld [vmem:[%s20823_s1 + $0xd90] sm:$0xf]  ;;  %v10063_v45 = vor.u32 %v13298_v30, %v10062_v28  ;;  %3617 = vmatpush.bf16.msrb.mxu0 %v9807_v44  ;;  %v3404_v44 = vpop.f32.mrf.mxu3 }
 0x1c4   :  { %v13362_v36 = vld [vmem:[%s20823_s1 + $0xdac] sm:$0xf0] }
 0x1c5   :  { %v10574_v39 = vld [vmem:[%s20823_s1 + $0xf90] sm:$0xf]  ;;  %v10319_v46 = vor.u32 %v13362_v36, %v10318_v31  ;;  %3630 = vmatpush.bf16.msrb.mxu1 %v10063_v45 }
 0x1c6   :  { %v13426_v43 = vld [vmem:[%s20823_s1 + $0xfac] sm:$0xf0] }
 0x1c7   :  { %v9774_v48 = vld [vmem:[%s20823_s1 + $0x950] sm:$0xf]  ;;  %v10575_v53 = vor.u32 %v13426_v43, %v10574_v39  ;;  %3643 = vmatpush.bf16.msrb.mxu2 %v10319_v46  ;;  %v3392_v43 = vadd.f32 %v3391_v29, %v3379_v22  ;;  %v12974_v29 = vld [vmem:[%s20823_s1 + $0x194] sm:$0xf] }
 0x1c8   :  { %v13226_v51 = vld [vmem:[%s20823_s1 + $0x96c] sm:$0xf0] }
 0x1c9   :  { %v10030_v52 = vld [vmem:[%s20823_s1 + $0xb50] sm:$0xf]  ;;  %v9775_v59 = vor.u32 %v13226_v51, %v9774_v48  ;;  %3656 = vmatpush.bf16.msrb.mxu3 %v10575_v53  ;;  %v16037_v51 = vadd.f32 %v3404_v44, %v3392_v43  ;;  %v13102_v43 = vld [vmem:[%s20823_s1 + $0x594] sm:$0xf] }
 0x1ca   :  { %v13290_v54 = vld [vmem:[%s20823_s1 + $0xb6c] sm:$0xf0]  ;;  %v3393_v9 = vpop.f32.mrf.mxu2  ;;  %v9296_v44 = vld [vmem:[%s20823_s1 + $0x5b0] sm:$0xf0] }
 0x1cb   :  { %v10286_v55 = vld [vmem:[%s20823_s1 + $0xd50] sm:$0xf]  ;;  %v10031_v61 = vor.u32 %v13290_v54, %v10030_v52  ;;  %3618 = vmatpush.bf16.msrb.mxu0 %v9775_v59  ;;  %v3367_v52 = vpop.f32.mrf.mxu0  ;;  %v13150_v9 = vld [vmem:[%s20823_s1 + $0x714] sm:$0xf] }
 0x1cc   :  { %v13354_v56 = vld [vmem:[%s20823_s1 + $0xd6c] sm:$0xf0] }
 0x1cd   :  { %v10542_v57 = vld [vmem:[%s20823_s1 + $0xf50] sm:$0xf]  ;;  %v10287_v62 = vor.u32 %v13354_v56, %v10286_v55  ;;  %3631 = vmatpush.bf16.msrb.mxu1 %v10031_v61 }
 0x1ce   :  { %v13418_v58 = vld [vmem:[%s20823_s1 + $0xf6c] sm:$0xf0] }
 0x1cf   :  { %v9742_v60 = vld [vmem:[%s20823_s1 + $0x910] sm:$0xf]  ;;  %v10543_v3 = vor.u32 %v13418_v58, %v10542_v57  ;;  %3644 = vmatpush.bf16.msrb.mxu2 %v10287_v62  ;;  %v3380_v58 = vpop.f32.mrf.mxu1 }
 0x1d0   :  { %v13218_v63 = vld [vmem:[%s20823_s1 + $0x92c] sm:$0xf0]  ;;  %v9008_v58 = vld [vmem:[%s20823_s1 + $0x370] sm:$0xf0] }
 0x1d1   :  { %v9998_v0 = vld [vmem:[%s20823_s1 + $0xb10] sm:$0xf]  ;;  %v9743_v8 = vor.u32 %v13218_v63, %v9742_v60  ;;  %3657 = vmatpush.bf16.msrb.mxu3 %v10543_v3 }
 0x1d2   :  { %v13282_v4 = vld [vmem:[%s20823_s1 + $0xb2c] sm:$0xf0] }
 0x1d3   :  { %v10254_v5 = vld [vmem:[%s20823_s1 + $0xd10] sm:$0xf]  ;;  %v9999_v10 = vor.u32 %v13282_v4, %v9998_v0  ;;  %3619 = vmatpush.bf16.msrb.mxu0 %v9743_v8 }
 0x1d4   :  { %v13346_v6 = vld [vmem:[%s20823_s1 + $0xd2c] sm:$0xf0] }
 0x1d5   :  { %v10510_v7 = vld [vmem:[%s20823_s1 + $0xf10] sm:$0xf]  ;;  %v10255_v11 = vor.u32 %v13346_v6, %v10254_v5  ;;  %3632 = vmatpush.bf16.msrb.mxu1 %v9999_v10 }
 0x1d6   :  { %v13410_v35 = vld [vmem:[%s20823_s1 + $0xf2c] sm:$0xf0] }
 0x1d7   :  { %v9710_v12 = vld [vmem:[%s20823_s1 + $0x8d0] sm:$0xf]  ;;  %v10511_v17 = vor.u32 %v13410_v35, %v10510_v7  ;;  %3645 = vmatpush.bf16.msrb.mxu2 %v10255_v11 }
 0x1d8   :  { %v13210_v13 = vld [vmem:[%s20823_s1 + $0x8ec] sm:$0xf0] }
 0x1d9   :  { %v9966_v14 = vld [vmem:[%s20823_s1 + $0xad0] sm:$0xf]  ;;  %v9711_v23 = vor.u32 %v13210_v13, %v9710_v12  ;;  %3658 = vmatpush.bf16.msrb.mxu3 %v10511_v17  ;;  %v13046_v17 = vld [vmem:[%s20823_s1 + $0x3d4] sm:$0xf] }
 0x1da   :  { %v13274_v18 = vld [vmem:[%s20823_s1 + $0xaec] sm:$0xf0] }
 0x1db   :  { %v10222_v19 = vld [vmem:[%s20823_s1 + $0xcd0] sm:$0xf]  ;;  %v9967_v24 = vor.u32 %v13274_v18, %v9966_v14  ;;  %3620 = vmatpush.bf16.msrb.mxu0 %v9711_v23  ;;  %v3406_v14 = vpop.f32.mrf.mxu3  ;;  %v13174_v23 = vld [vmem:[%s20823_s1 + $0x7d4] sm:$0xf] }
 0x1dc   :  { %v13338_v20 = vld [vmem:[%s20823_s1 + $0xcec] sm:$0xf0] }
 0x1dd   :  { %v10478_v49 = vld [vmem:[%s20823_s1 + $0xed0] sm:$0xf]  ;;  %v10223_v25 = vor.u32 %v13338_v20, %v10222_v19  ;;  %3633 = vmatpush.bf16.msrb.mxu1 %v9967_v24  ;;  %v9072_v19 = vld [vmem:[%s20823_s1 + $0x3f0] sm:$0xf0] }
 0x1de   :  { %v13402_v21 = vld [vmem:[%s20823_s1 + $0xeec] sm:$0xf0]  ;;  %v13110_v20 = vld [vmem:[%s20823_s1 + $0x5d4] sm:$0xf] }
 0x1df   :  { %v9678_v26 = vld [vmem:[%s20823_s1 + $0x890] sm:$0xf]  ;;  %v10479_v30 = vor.u32 %v13402_v21, %v10478_v49  ;;  %3646 = vmatpush.bf16.msrb.mxu2 %v10223_v25  ;;  %v9328_v49 = vld [vmem:[%s20823_s1 + $0x5f0] sm:$0xf0] }
 0x1e0   :  { %v13202_v27 = vld [vmem:[%s20823_s1 + $0x8ac] sm:$0xf0]  ;;  %v9584_v24 = vld [vmem:[%s20823_s1 + $0x7f0] sm:$0xf0] }
 0x1e1   :  { %v9934_v28 = vld [vmem:[%s20823_s1 + $0xa90] sm:$0xf]  ;;  %v9679_v48 = vor.u32 %v13202_v27, %v9678_v26  ;;  %3659 = vmatpush.bf16.msrb.mxu3 %v10479_v30  ;;  %v8819_v26 = vor.u32 %v12982_v15, %v8816_v16  ;;  %v9075_v27 = vor.u32 %v13046_v17, %v9072_v19  ;;  %v8784_v30 = vld [vmem:[%s20823_s1 + $0x1b0] sm:$0xf0]  ;;  %v3430_v19 = vpop.f32.mrf.mxu1 }
 0x1e2   :  { %v13266_v31 = vld [vmem:[%s20823_s1 + $0xaac] sm:$0xf0]  ;;  %v12950_v15 = vld [vmem:[%s20823_s1 + $0xd4] sm:$0xf] }
 0x1e3   :  { %v10190_v36 = vld [vmem:[%s20823_s1 + $0xc90] sm:$0xf]  ;;  %v9935_v53 = vor.u32 %v13266_v31, %v9934_v28  ;;  %3621 = vmatpush.bf16.msrb.mxu0 %v9679_v48  ;;  %v9331_v28 = vor.u32 %v13110_v20, %v9328_v49  ;;  %v13038_v31 = vld [vmem:[%s20823_s1 + $0x394] sm:$0xf]  ;;  %v8787_v48 = vor.u32 %v12974_v29, %v8784_v30 }
 0x1e4   :  { %v13330_v39 = vld [vmem:[%s20823_s1 + $0xcac] sm:$0xf0]  ;;  %v8688_v16 = vld [vmem:[%s20823_s1 + $0xf0] sm:$0xf0] }
 0x1e5   :  { %v10446_v45 = vld [vmem:[%s20823_s1 + $0xe90] sm:$0xf]  ;;  %v10191_v54 = vor.u32 %v13330_v39, %v10190_v36  ;;  %3634 = vmatpush.bf16.msrb.mxu1 %v9935_v53  ;;  %v9587_v36 = vor.u32 %v13174_v23, %v9584_v24  ;;  %v9040_v39 = vld [vmem:[%s20823_s1 + $0x3b0] sm:$0xf0]  ;;  %v9299_v53 = vor.u32 %v13102_v43, %v9296_v44 }
 0x1e6   :  { %v13394_v46 = vld [vmem:[%s20823_s1 + $0xeac] sm:$0xf0]  ;;  %v9043_v52 = vor.u32 %v13038_v31, %v9040_v39  ;;  %v13014_v17 = vld [vmem:[%s20823_s1 + $0x2d4] sm:$0xf]  ;;  %v3443_v31 = vpop.f32.mrf.mxu2 }
 0x1e7   :  { %v9646_v55 = vld [vmem:[%s20823_s1 + $0x850] sm:$0xf]  ;;  %v10447_v59 = vor.u32 %v13394_v46, %v10446_v45  ;;  %3647 = vmatpush.bf16.msrb.mxu2 %v10191_v54  ;;  %v13166_v45 = vld [vmem:[%s20823_s1 + $0x794] sm:$0xf] }
 0x1e8   :  { %v13194_v56 = vld [vmem:[%s20823_s1 + $0x86c] sm:$0xf0]  ;;  %v9552_v46 = vld [vmem:[%s20823_s1 + $0x7b0] sm:$0xf0] }
 0x1e9   :  { %v9902_v57 = vld [vmem:[%s20823_s1 + $0xa50] sm:$0xf]  ;;  %v9647_v2 = vor.u32 %v13194_v56, %v9646_v55  ;;  %3660 = vmatpush.bf16.msrb.mxu3 %v10447_v59  ;;  %v12966_v54 = vld [vmem:[%s20823_s1 + $0x154] sm:$0xf] }
 0x1ea   :  { %v13258_v60 = vld [vmem:[%s20823_s1 + $0xa6c] sm:$0xf0]  ;;  %v8752_v55 = vld [vmem:[%s20823_s1 + $0x170] sm:$0xf0] }
 0x1eb   :  { %v10158_v61 = vld [vmem:[%s20823_s1 + $0xc50] sm:$0xf]  ;;  %v9903_v5 = vor.u32 %v13258_v60, %v9902_v57  ;;  %3622 = vmatpush.bf16.msrb.mxu0 %v9647_v2  ;;  %v13030_v56 = vld [vmem:[%s20823_s1 + $0x354] sm:$0xf]  ;;  %v9555_v57 = vor.u32 %v13166_v45, %v9552_v46  ;;  %v3456_v46 = vpop.f32.mrf.mxu3 }
 0x1ec   :  { %v13322_v62 = vld [vmem:[%s20823_s1 + $0xc6c] sm:$0xf0]  ;;  %v13094_v59 = vld [vmem:[%s20823_s1 + $0x554] sm:$0xf] }
 0x1ed   :  { %v10414_v63 = vld [vmem:[%s20823_s1 + $0xe50] sm:$0xf]  ;;  %v10159_v6 = vor.u32 %v13322_v62, %v10158_v61  ;;  %3635 = vmatpush.bf16.msrb.mxu1 %v9903_v5  ;;  %v9264_v60 = vld [vmem:[%s20823_s1 + $0x570] sm:$0xf0] }
 0x1ee   :  { %v13386_v0 = vld [vmem:[%s20823_s1 + $0xe6c] sm:$0xf0]  ;;  %v13158_v61 = vld [vmem:[%s20823_s1 + $0x754] sm:$0xf]  ;;  %v9267_v2 = vor.u32 %v13094_v59, %v9264_v60 }
 0x1ef   :  { %v9614_v3 = vld [vmem:[%s20823_s1 + $0x810] sm:$0xf]  ;;  %v10415_v10 = vor.u32 %v13386_v0, %v10414_v63  ;;  %3648 = vmatpush.bf16.msrb.mxu2 %v10159_v6  ;;  %v9520_v62 = vld [vmem:[%s20823_s1 + $0x770] sm:$0xf0]  ;;  %v8755_v63 = vor.u32 %v12966_v54, %v8752_v55  ;;  %v9011_v0 = vor.u32 %v13030_v56, %v9008_v58 }
 0x1f0   :  { %v13186_v4 = vld [vmem:[%s20823_s1 + $0x82c] sm:$0xf0]  ;;  %v13022_v5 = vld [vmem:[%s20823_s1 + $0x314] sm:$0xf]  ;;  %v9523_v6 = vor.u32 %v13158_v61, %v9520_v62  ;;  %v3432_v61 = vpop.f32.mrf.mxu1 }
 0x1f1   :  { %v9870_v7 = vld [vmem:[%s20823_s1 + $0xa10] sm:$0xf]  ;;  %v9615_v18 = vor.u32 %v13186_v4, %v9614_v3  ;;  %3661 = vmatpush.bf16.msrb.mxu3 %v10415_v10  ;;  %v12958_v3 = vld [vmem:[%s20823_s1 + $0x114] sm:$0xf] }
 0x1f2   :  { %v13250_v35 = vld [vmem:[%s20823_s1 + $0xa2c] sm:$0xf0]  ;;  %v8720_v4 = vld [vmem:[%s20823_s1 + $0x130] sm:$0xf0] }
 0x1f3   :  { %v10126_v8 = vld [vmem:[%s20823_s1 + $0xc10] sm:$0xf]  ;;  %v9871_v21 = vor.u32 %v13250_v35, %v9870_v7  ;;  %3623 = vmatpush.bf16.msrb.mxu0 %v9615_v18  ;;  %v8976_v7 = vld [vmem:[%s20823_s1 + $0x330] sm:$0xf0] }
 0x1f4   :  { %v13314_v11 = vld [vmem:[%s20823_s1 + $0xc2c] sm:$0xf0]  ;;  %v13086_v35 = vld [vmem:[%s20823_s1 + $0x514] sm:$0xf] }
 0x1f5   :  { %v10382_v12 = vld [vmem:[%s20823_s1 + $0xe10] sm:$0xf]  ;;  %v10127_v22 = vor.u32 %v13314_v11, %v10126_v8  ;;  %3636 = vmatpush.bf16.msrb.mxu1 %v9871_v21  ;;  %v9232_v8 = vld [vmem:[%s20823_s1 + $0x530] sm:$0xf0]  ;;  %v8723_v11 = vor.u32 %v12958_v3, %v8720_v4 }
 0x1f6   :  { %v13378_v13 = vld [vmem:[%s20823_s1 + $0xe2c] sm:$0xf0]  ;;  %3624 = vmatmul.bf16.vlgmr.msrb.gmra.mxu0 %v14539_v37  ;;  %v9488_v10 = vld [vmem:[%s20823_s1 + $0x730] sm:$0xf0]  ;;  %v9235_v14 = vor.u32 %v13086_v35, %v9232_v8 }
 0x1f7   :  { %v10383_v25 = vor.u32 %v13378_v13, %v10382_v12  ;;  %3649 = vmatpush.bf16.msrb.mxu2 %v10127_v22  ;;  %3668 = vmatpush.bf16.msra.mxu0 %v8819_v26  ;;  %v3417_v12 = vpop.f32.mrf.mxu0  ;;  %v8979_v13 = vor.u32 %v13022_v5, %v8976_v7  ;;  %v9491_v20 = vor.u32 %v13150_v9, %v9488_v10  ;;  %v8944_v49 = vld [vmem:[%s20823_s1 + $0x2f0] sm:$0xf0] }
 0x1f8   :  { %3637 = vmatmul.bf16.vlgmr.msrb.gmra.mxu1 %v14543_v40  ;;  %v3418_v18 = vadd.f32 %v3417_v12, %v16037_v51  ;;  %v13078_v21 = vld [vmem:[%s20823_s1 + $0x4d4] sm:$0xf]  ;;  %v8947_v26 = vor.u32 %v13014_v17, %v8944_v49  ;;  %v3445_v12 = vpop.f32.mrf.mxu2  ;;  %v3458_v17 = vpop.f32.mrf.mxu3 }
 0x1f9   :  { %3662 = vmatpush.bf16.msrb.mxu3 %v10383_v25  ;;  %3681 = vmatpush.bf16.msra.mxu1 %v9075_v27  ;;  %v9200_v22 = vld [vmem:[%s20823_s1 + $0x4f0] sm:$0xf0]  ;;  %v8691_v25 = vor.u32 %v12950_v15, %v8688_v16 }
 0x1fa   :  { %3650 = vmatmul.bf16.vlgmr.msrb.gmra.mxu2 %v14531_v32  ;;  %v13142_v23 = vld [vmem:[%s20823_s1 + $0x6d4] sm:$0xf]  ;;  %v3431_v24 = vadd.f32 %v3430_v19, %v3418_v18  ;;  %v9203_v27 = vor.u32 %v13078_v21, %v9200_v22 }
 0x1fb   :  { %3694 = vmatpush.bf16.msra.mxu2 %v9331_v28  ;;  %3669 = vmatpush.bf16.msra.mxu0 %v8787_v48  ;;  %v9456_v51 = vld [vmem:[%s20823_s1 + $0x6f0] sm:$0xf0] }
 0x1fc   :  { %3663 = vmatmul.bf16.vlgmr.msrb.gmra.mxu3 %v14541_v38  ;;  %v12942_v28 = vld [vmem:[%s20823_s1 + $0x94] sm:$0xf]  ;;  %v3444_v45 = vadd.f32 %v3443_v31, %v3431_v24 }
 0x1fd   :  { %3707 = vmatpush.bf16.msra.mxu3 %v9587_v36  ;;  %3682 = vmatpush.bf16.msra.mxu1 %v9043_v52  ;;  %v8656_v29 = vld [vmem:[%s20823_s1 + $0xb0] sm:$0xf0]  ;;  %v9459_v36 = vor.u32 %v13142_v23, %v9456_v51 }
 0x1fe   :  { %v13006_v30 = vld [vmem:[%s20823_s1 + $0x294] sm:$0xf]  ;;  %v16236_v54 = vadd.f32 %v3456_v46, %v3444_v45 }
 0x1ff   :  { %3695 = vmatpush.bf16.msra.mxu2 %v9299_v53  ;;  %3670 = vmatpush.bf16.msra.mxu0 %v8755_v63  ;;  %v8912_v39 = vld [vmem:[%s20823_s1 + $0x2b0] sm:$0xf0]  ;;  %v8659_v53 = vor.u32 %v12942_v28, %v8656_v29  ;;  %v3419_v55 = vpop.f32.mrf.mxu0 }
 0x200   :  { %v13070_v43 = vld [vmem:[%s20823_s1 + $0x494] sm:$0xf]  ;;  %v8915_v56 = vor.u32 %v13006_v30, %v8912_v39 }
 0x201   :  { %3708 = vmatpush.bf16.msra.mxu3 %v9555_v57  ;;  %3683 = vmatpush.bf16.msra.mxu1 %v9011_v0  ;;  %v9168_v44 = vld [vmem:[%s20823_s1 + $0x4b0] sm:$0xf0] }
 0x202   :  { %v13134_v48 = vld [vmem:[%s20823_s1 + $0x694] sm:$0xf]  ;;  %v9171_v57 = vor.u32 %v13070_v43, %v9168_v44 }
 0x203   :  { %3696 = vmatpush.bf16.msra.mxu2 %v9267_v2  ;;  %3671 = vmatpush.bf16.msra.mxu0 %v8723_v11  ;;  %v9424_v52 = vld [vmem:[%s20823_s1 + $0x6b0] sm:$0xf0] }
 0x204   :  { %v12934_v58 = vld [vmem:[%s20823_s1 + $0x54] sm:$0xf]  ;;  %v9427_v62 = vor.u32 %v13134_v48, %v9424_v52 }
 0x205   :  { %3709 = vmatpush.bf16.msra.mxu3 %v9523_v6  ;;  %3684 = vmatpush.bf16.msra.mxu1 %v8979_v13  ;;  %v8624_v59 = vld [vmem:[%s20823_s1 + $0x70] sm:$0xf0] }
 0x206   :  { %v12998_v60 = vld [vmem:[%s20823_s1 + $0x254] sm:$0xf]  ;;  %v8627_v5 = vor.u32 %v12934_v58, %v8624_v59 }
 0x207   :  { %3697 = vmatpush.bf16.msra.mxu2 %v9235_v14  ;;  %3672 = vmatpush.bf16.msra.mxu0 %v8691_v25  ;;  %v8880_v63 = vld [vmem:[%s20823_s1 + $0x270] sm:$0xf0] }
 0x208   :  { %v13062_v0 = vld [vmem:[%s20823_s1 + $0x454] sm:$0xf]  ;;  %v8883_v35 = vor.u32 %v12998_v60, %v8880_v63 }
 0x209   :  { %3710 = vmatpush.bf16.msra.mxu3 %v9491_v20  ;;  %3685 = vmatpush.bf16.msra.mxu1 %v8947_v26  ;;  %v9136_v2 = vld [vmem:[%s20823_s1 + $0x470] sm:$0xf0] }
 0x20a   :  { %v13126_v3 = vld [vmem:[%s20823_s1 + $0x654] sm:$0xf]  ;;  %v9139_v8 = vor.u32 %v13062_v0, %v9136_v2 }
 0x20b   :  { %3698 = vmatpush.bf16.msra.mxu2 %v9203_v27  ;;  %v9392_v4 = vld [vmem:[%s20823_s1 + $0x670] sm:$0xf0]  ;;  %3673 = vmatpush.bf16.msra.mxu0 %v8659_v53 }
 0x20c   :  { %v12926_v6 = vld [vmem:[%s20823_s1 + $0x14] sm:$0xf]  ;;  %v9395_v13 = vor.u32 %v13126_v3, %v9392_v4 }
 0x20d   :  { %3711 = vmatpush.bf16.msra.mxu3 %v9459_v36  ;;  %v8592_v7 = vld [vmem:[%s20823_s1 + $0x30] sm:$0xf0]  ;;  %3686 = vmatpush.bf16.msra.mxu1 %v8915_v56 }
 0x20e   :  { %v12990_v9 = vld [vmem:[%s20823_s1 + $0x214] sm:$0xf]  ;;  %v8595_v49 = vor.u32 %v12926_v6, %v8592_v7 }
 0x20f   :  { %3699 = vmatpush.bf16.msra.mxu2 %v9171_v57  ;;  %v8848_v10 = vld [vmem:[%s20823_s1 + $0x230] sm:$0xf0]  ;;  %3674 = vmatpush.bf16.msra.mxu0 %v8627_v5 }
 0x210   :  { %v13054_v11 = vld [vmem:[%s20823_s1 + $0x414] sm:$0xf]  ;;  %v8851_v51 = vor.u32 %v12990_v9, %v8848_v10 }
 0x211   :  { %3712 = vmatpush.bf16.msra.mxu3 %v9427_v62  ;;  %v9104_v14 = vld [vmem:[%s20823_s1 + $0x430] sm:$0xf0]  ;;  %3687 = vmatpush.bf16.msra.mxu1 %v8883_v35 }
 0x212   :  { %v13118_v15 = vld [vmem:[%s20823_s1 + $0x614] sm:$0xf]  ;;  %v9107_v24 = vor.u32 %v13054_v11, %v9104_v14 }
 0x213   :  { %v9360_v16 = vld [vmem:[%s20823_s1 + $0x630] sm:$0xf0]  ;;  %3700 = vmatpush.bf16.msra.mxu2 %v9139_v8  ;;  %3675 = vmatpush.bf16.msra.mxu0 %v8595_v49  ;;  %v575_v8 = vperm.slane %v15971_v1, 3 }
 0x214   :  { %v13238_v18 = vld [vmem:[%s20823_s1 + $0x9d4] sm:$0xf]  ;;  %v9363_v27 = vor.u32 %v13118_v15, %v9360_v16  ;;  %v3469_v15 = vpop.f32.mrf.mxu0 }
 0x215   :  { %v9840_v19 = vld [vmem:[%s20823_s1 + $0x9f0] sm:$0xf0]  ;;  %3713 = vmatpush.bf16.msra.mxu3 %v9395_v13  ;;  %3688 = vmatpush.bf16.msra.mxu1 %v8851_v51  ;;  %v3470_v49 = vadd.f32 %v3469_v15, %v575_v8 }
 0x216   :  { %v13302_v20 = vld [vmem:[%s20823_s1 + $0xbd4] sm:$0xf]  ;;  %v9843_v28 = vor.u32 %v13238_v18, %v9840_v19  ;;  %3676 = vmatmul.bf16.vlgmr.msra.gmra.mxu0 %v14413_v34 }
 0x217   :  { %v10096_v21 = vld [vmem:[%s20823_s1 + $0xbf0] sm:$0xf0]  ;;  %3701 = vmatpush.bf16.msra.mxu2 %v9107_v24 }
 0x218   :  { %v13366_v22 = vld [vmem:[%s20823_s1 + $0xdd4] sm:$0xf]  ;;  %v10099_v29 = vor.u32 %v13302_v20, %v10096_v21  ;;  %3720 = vmatpush.bf16.msrb.mxu0 %v9843_v28  ;;  %3689 = vmatmul.bf16.vlgmr.msra.gmra.mxu1 %v14426_v42  ;;  %v3482_v21 = vpop.f32.mrf.mxu1 }
 0x219   :  { %v10352_v23 = vld [vmem:[%s20823_s1 + $0xdf0] sm:$0xf0]  ;;  %3714 = vmatpush.bf16.msra.mxu3 %v9363_v27  ;;  %v3483_v27 = vadd.f32 %v3482_v21, %v3470_v49  ;;  %v8822_v49 = vld [vmem:[%s20823_s1 + $0x1d8] sm:$0xf] }
 0x21a   :  { %v13430_v25 = vld [vmem:[%s20823_s1 + $0xfd4] sm:$0xf]  ;;  %v10355_v30 = vor.u32 %v13366_v22, %v10352_v23  ;;  %3733 = vmatpush.bf16.msrb.mxu1 %v10099_v29  ;;  %3702 = vmatmul.bf16.vlgmr.msra.gmra.mxu2 %v14411_v33  ;;  %v12987_v21 = vld [vmem:[%s20823_s1 + $0x1f4] sm:$0xf0] }
 0x21b   :  { %v10608_v26 = vld [vmem:[%s20823_s1 + $0xff0] sm:$0xf0] }
 0x21c   :  { %v13230_v31 = vld [vmem:[%s20823_s1 + $0x994] sm:$0xf]  ;;  %v10611_v43 = vor.u32 %v13430_v25, %v10608_v26  ;;  %3746 = vmatpush.bf16.msrb.mxu2 %v10355_v30  ;;  %3715 = vmatmul.bf16.vlgmr.msra.gmra.mxu3 %v14424_v41 }
 0x21d   :  { %v9808_v36 = vld [vmem:[%s20823_s1 + $0x9b0] sm:$0xf0] }
 0x21e   :  { %v13294_v39 = vld [vmem:[%s20823_s1 + $0xb94] sm:$0xf]  ;;  %v9811_v53 = vor.u32 %v13230_v31, %v9808_v36  ;;  %3759 = vmatpush.bf16.msrb.mxu3 %v10611_v43  ;;  %v3495_v43 = vpop.f32.mrf.mxu2 }
 0x21f   :  { %v10064_v44 = vld [vmem:[%s20823_s1 + $0xbb0] sm:$0xf0] }
 0x220   :  { %v13358_v45 = vld [vmem:[%s20823_s1 + $0xd94] sm:$0xf]  ;;  %v10067_v55 = vor.u32 %v13294_v39, %v10064_v44  ;;  %3721 = vmatpush.bf16.msrb.mxu0 %v9811_v53  ;;  %v3508_v53 = vpop.f32.mrf.mxu3 }
 0x221   :  { %v10320_v46 = vld [vmem:[%s20823_s1 + $0xdb0] sm:$0xf0] }
 0x222   :  { %v13422_v48 = vld [vmem:[%s20823_s1 + $0xf94] sm:$0xf]  ;;  %v10323_v56 = vor.u32 %v13358_v45, %v10320_v46  ;;  %3734 = vmatpush.bf16.msrb.mxu1 %v10067_v55 }
 0x223   :  { %v10576_v52 = vld [vmem:[%s20823_s1 + $0xfb0] sm:$0xf0] }
 0x224   :  { %v13222_v57 = vld [vmem:[%s20823_s1 + $0x954] sm:$0xf]  ;;  %v10579_v60 = vor.u32 %v13422_v48, %v10576_v52  ;;  %3747 = vmatpush.bf16.msrb.mxu2 %v10323_v56  ;;  %v3496_v52 = vadd.f32 %v3495_v43, %v3483_v27  ;;  %v8790_v43 = vld [vmem:[%s20823_s1 + $0x198] sm:$0xf] }
 0x225   :  { %v9776_v58 = vld [vmem:[%s20823_s1 + $0x970] sm:$0xf0] }
 0x226   :  { %v13286_v59 = vld [vmem:[%s20823_s1 + $0xb54] sm:$0xf]  ;;  %v9779_v3 = vor.u32 %v13222_v57, %v9776_v58  ;;  %3760 = vmatpush.bf16.msrb.mxu3 %v10579_v60  ;;  %v16435_v58 = vadd.f32 %v3508_v53, %v3496_v52  ;;  %v3497_v15 = vpop.f32.mrf.mxu2  ;;  %v9302_v52 = vld [vmem:[%s20823_s1 + $0x598] sm:$0xf] }
 0x227   :  { %v10032_v61 = vld [vmem:[%s20823_s1 + $0xb70] sm:$0xf0]  ;;  %v13107_v53 = vld [vmem:[%s20823_s1 + $0x5b4] sm:$0xf0] }
 0x228   :  { %v13350_v62 = vld [vmem:[%s20823_s1 + $0xd54] sm:$0xf]  ;;  %v10035_v5 = vor.u32 %v13286_v59, %v10032_v61  ;;  %3722 = vmatpush.bf16.msrb.mxu0 %v9779_v3  ;;  %v3471_v59 = vpop.f32.mrf.mxu0  ;;  %v9494_v15 = vld [vmem:[%s20823_s1 + $0x718] sm:$0xf] }
 0x229   :  { %v10288_v63 = vld [vmem:[%s20823_s1 + $0xd70] sm:$0xf0] }
 0x22a   :  { %v13414_v0 = vld [vmem:[%s20823_s1 + $0xf54] sm:$0xf]  ;;  %v10291_v6 = vor.u32 %v13350_v62, %v10288_v63  ;;  %3735 = vmatpush.bf16.msrb.mxu1 %v10035_v5 }
 0x22b   :  { %v10544_v2 = vld [vmem:[%s20823_s1 + $0xf70] sm:$0xf0] }
 0x22c   :  { %v13214_v4 = vld [vmem:[%s20823_s1 + $0x914] sm:$0xf]  ;;  %v10547_v9 = vor.u32 %v13414_v0, %v10544_v2  ;;  %3748 = vmatpush.bf16.msrb.mxu2 %v10291_v6  ;;  %v3484_v2 = vpop.f32.mrf.mxu1 }
 0x22d   :  { %v9744_v7 = vld [vmem:[%s20823_s1 + $0x930] sm:$0xf0]  ;;  %v13035_v2 = vld [vmem:[%s20823_s1 + $0x374] sm:$0xf0] }
 0x22e   :  { %v13278_v35 = vld [vmem:[%s20823_s1 + $0xb14] sm:$0xf]  ;;  %v9747_v14 = vor.u32 %v13214_v4, %v9744_v7  ;;  %3761 = vmatpush.bf16.msrb.mxu3 %v10547_v9 }
 0x22f   :  { %v10000_v10 = vld [vmem:[%s20823_s1 + $0xb30] sm:$0xf0] }
 0x230   :  { %v13342_v11 = vld [vmem:[%s20823_s1 + $0xd14] sm:$0xf]  ;;  %v10003_v16 = vor.u32 %v13278_v35, %v10000_v10  ;;  %3723 = vmatpush.bf16.msrb.mxu0 %v9747_v14 }
 0x231   :  { %v10256_v12 = vld [vmem:[%s20823_s1 + $0xd30] sm:$0xf0] }
 0x232   :  { %v13406_v13 = vld [vmem:[%s20823_s1 + $0xf14] sm:$0xf]  ;;  %v10259_v17 = vor.u32 %v13342_v11, %v10256_v12  ;;  %3736 = vmatpush.bf16.msrb.mxu1 %v10003_v16 }
 0x233   :  { %v10512_v1 = vld [vmem:[%s20823_s1 + $0xf30] sm:$0xf0] }
 0x234   :  { %v13206_v18 = vld [vmem:[%s20823_s1 + $0x8d4] sm:$0xf]  ;;  %v10515_v22 = vor.u32 %v13406_v13, %v10512_v1  ;;  %3749 = vmatpush.bf16.msrb.mxu2 %v10259_v17 }
 0x235   :  { %v9712_v19 = vld [vmem:[%s20823_s1 + $0x8f0] sm:$0xf0] }
 0x236   :  { %v13270_v20 = vld [vmem:[%s20823_s1 + $0xad4] sm:$0xf]  ;;  %v9715_v28 = vor.u32 %v13206_v18, %v9712_v19  ;;  %3762 = vmatpush.bf16.msrb.mxu3 %v10515_v22  ;;  %v9078_v22 = vld [vmem:[%s20823_s1 + $0x3d8] sm:$0xf] }
 0x237   :  { %v9968_v23 = vld [vmem:[%s20823_s1 + $0xaf0] sm:$0xf0] }
 0x238   :  { %v13334_v51 = vld [vmem:[%s20823_s1 + $0xcd4] sm:$0xf]  ;;  %v9971_v29 = vor.u32 %v13270_v20, %v9968_v23  ;;  %3724 = vmatpush.bf16.msrb.mxu0 %v9715_v28  ;;  %v3510_v20 = vpop.f32.mrf.mxu3  ;;  %v9590_v28 = vld [vmem:[%s20823_s1 + $0x7d8] sm:$0xf] }
 0x239   :  { %v10224_v24 = vld [vmem:[%s20823_s1 + $0xcf0] sm:$0xf0] }
 0x23a   :  { %v13398_v25 = vld [vmem:[%s20823_s1 + $0xed4] sm:$0xf]  ;;  %v10227_v30 = vor.u32 %v13334_v51, %v10224_v24  ;;  %3737 = vmatpush.bf16.msrb.mxu1 %v9971_v29  ;;  %v13051_v51 = vld [vmem:[%s20823_s1 + $0x3f4] sm:$0xf0] }
 0x23b   :  { %v10480_v26 = vld [vmem:[%s20823_s1 + $0xef0] sm:$0xf0]  ;;  %v9334_v24 = vld [vmem:[%s20823_s1 + $0x5d8] sm:$0xf] }
 0x23c   :  { %v13198_v31 = vld [vmem:[%s20823_s1 + $0x894] sm:$0xf]  ;;  %v10483_v44 = vor.u32 %v13398_v25, %v10480_v26  ;;  %3750 = vmatpush.bf16.msrb.mxu2 %v10227_v30  ;;  %v13115_v25 = vld [vmem:[%s20823_s1 + $0x5f4] sm:$0xf0] }
 0x23d   :  { %v9680_v36 = vld [vmem:[%s20823_s1 + $0x8b0] sm:$0xf0]  ;;  %v13179_v29 = vld [vmem:[%s20823_s1 + $0x7f4] sm:$0xf0] }
 0x23e   :  { %v13262_v39 = vld [vmem:[%s20823_s1 + $0xa94] sm:$0xf]  ;;  %v9683_v57 = vor.u32 %v13198_v31, %v9680_v36  ;;  %3763 = vmatpush.bf16.msrb.mxu3 %v10483_v44  ;;  %v8823_v31 = vor.u32 %v12987_v21, %v8822_v49  ;;  %v9079_v36 = vor.u32 %v13051_v51, %v9078_v22  ;;  %v12979_v44 = vld [vmem:[%s20823_s1 + $0x1b4] sm:$0xf0]  ;;  %v3534_v51 = vpop.f32.mrf.mxu1 }
 0x23f   :  { %v9936_v45 = vld [vmem:[%s20823_s1 + $0xab0] sm:$0xf0]  ;;  %v8694_v49 = vld [vmem:[%s20823_s1 + $0xd8] sm:$0xf] }
 0x240   :  { %v13326_v46 = vld [vmem:[%s20823_s1 + $0xc94] sm:$0xf]  ;;  %v9939_v60 = vor.u32 %v13262_v39, %v9936_v45  ;;  %3725 = vmatpush.bf16.msrb.mxu0 %v9683_v57  ;;  %v9335_v39 = vor.u32 %v13115_v25, %v9334_v24  ;;  %v9046_v45 = vld [vmem:[%s20823_s1 + $0x398] sm:$0xf]  ;;  %v8791_v57 = vor.u32 %v12979_v44, %v8790_v43 }
 0x241   :  { %v10192_v48 = vld [vmem:[%s20823_s1 + $0xcb0] sm:$0xf0]  ;;  %v12955_v21 = vld [vmem:[%s20823_s1 + $0xf4] sm:$0xf0] }
 0x242   :  { %v13390_v55 = vld [vmem:[%s20823_s1 + $0xe94] sm:$0xf]  ;;  %v10195_v61 = vor.u32 %v13326_v46, %v10192_v48  ;;  %3738 = vmatpush.bf16.msrb.mxu1 %v9939_v60  ;;  %v9591_v46 = vor.u32 %v13179_v29, %v9590_v28  ;;  %v13043_v48 = vld [vmem:[%s20823_s1 + $0x3b4] sm:$0xf0]  ;;  %v9303_v60 = vor.u32 %v13107_v53, %v9302_v52 }
 0x243   :  { %v10448_v56 = vld [vmem:[%s20823_s1 + $0xeb0] sm:$0xf0]  ;;  %v9047_v59 = vor.u32 %v13043_v48, %v9046_v45  ;;  %v8950_v22 = vld [vmem:[%s20823_s1 + $0x2d8] sm:$0xf]  ;;  %v3547_v45 = vpop.f32.mrf.mxu2 }
 0x244   :  { %v13190_v62 = vld [vmem:[%s20823_s1 + $0x854] sm:$0xf]  ;;  %v10451_v3 = vor.u32 %v13390_v55, %v10448_v56  ;;  %3751 = vmatpush.bf16.msrb.mxu2 %v10195_v61  ;;  %v9558_v55 = vld [vmem:[%s20823_s1 + $0x798] sm:$0xf] }
 0x245   :  { %v9648_v63 = vld [vmem:[%s20823_s1 + $0x870] sm:$0xf0]  ;;  %v13171_v56 = vld [vmem:[%s20823_s1 + $0x7b4] sm:$0xf0] }
 0x246   :  { %v13254_v0 = vld [vmem:[%s20823_s1 + $0xa54] sm:$0xf]  ;;  %v9651_v8 = vor.u32 %v13190_v62, %v9648_v63  ;;  %3764 = vmatpush.bf16.msrb.mxu3 %v10451_v3  ;;  %v8758_v61 = vld [vmem:[%s20823_s1 + $0x158] sm:$0xf] }
 0x247   :  { %v9904_v4 = vld [vmem:[%s20823_s1 + $0xa70] sm:$0xf0]  ;;  %v12971_v62 = vld [vmem:[%s20823_s1 + $0x174] sm:$0xf0] }
 0x248   :  { %v13318_v5 = vld [vmem:[%s20823_s1 + $0xc54] sm:$0xf]  ;;  %v9907_v11 = vor.u32 %v13254_v0, %v9904_v4  ;;  %3726 = vmatpush.bf16.msrb.mxu0 %v9651_v8  ;;  %v9014_v63 = vld [vmem:[%s20823_s1 + $0x358] sm:$0xf]  ;;  %v9559_v0 = vor.u32 %v13171_v56, %v9558_v55  ;;  %v3560_v56 = vpop.f32.mrf.mxu3 }
 0x249   :  { %v10160_v6 = vld [vmem:[%s20823_s1 + $0xc70] sm:$0xf0]  ;;  %v9270_v3 = vld [vmem:[%s20823_s1 + $0x558] sm:$0xf] }
 0x24a   :  { %v13382_v7 = vld [vmem:[%s20823_s1 + $0xe54] sm:$0xf]  ;;  %v10163_v12 = vor.u32 %v13318_v5, %v10160_v6  ;;  %3739 = vmatpush.bf16.msrb.mxu1 %v9907_v11  ;;  %v13099_v4 = vld [vmem:[%s20823_s1 + $0x574] sm:$0xf0] }
 0x24b   :  { %v10416_v35 = vld [vmem:[%s20823_s1 + $0xe70] sm:$0xf0]  ;;  %v9526_v5 = vld [vmem:[%s20823_s1 + $0x758] sm:$0xf]  ;;  %v9271_v8 = vor.u32 %v13099_v4, %v9270_v3 }
 0x24c   :  { %v13182_v9 = vld [vmem:[%s20823_s1 + $0x814] sm:$0xf]  ;;  %v10419_v16 = vor.u32 %v13382_v7, %v10416_v35  ;;  %3752 = vmatpush.bf16.msrb.mxu2 %v10163_v12  ;;  %v13163_v6 = vld [vmem:[%s20823_s1 + $0x774] sm:$0xf0]  ;;  %v8759_v7 = vor.u32 %v12971_v62, %v8758_v61  ;;  %v9015_v35 = vor.u32 %v13035_v2, %v9014_v63 }
 0x24d   :  { %v9616_v10 = vld [vmem:[%s20823_s1 + $0x830] sm:$0xf0]  ;;  %v8982_v11 = vld [vmem:[%s20823_s1 + $0x318] sm:$0xf]  ;;  %v9527_v12 = vor.u32 %v13163_v6, %v9526_v5  ;;  %v3536_v5 = vpop.f32.mrf.mxu1 }
 0x24e   :  { %v13246_v13 = vld [vmem:[%s20823_s1 + $0xa14] sm:$0xf]  ;;  %v9619_v23 = vor.u32 %v13182_v9, %v9616_v10  ;;  %3765 = vmatpush.bf16.msrb.mxu3 %v10419_v16  ;;  %v8726_v9 = vld [vmem:[%s20823_s1 + $0x118] sm:$0xf] }
 0x24f   :  { %v9872_v1 = vld [vmem:[%s20823_s1 + $0xa30] sm:$0xf0]  ;;  %v12963_v10 = vld [vmem:[%s20823_s1 + $0x134] sm:$0xf0] }
 0x250   :  { %v13310_v14 = vld [vmem:[%s20823_s1 + $0xc14] sm:$0xf]  ;;  %v9875_v26 = vor.u32 %v13246_v13, %v9872_v1  ;;  %3727 = vmatpush.bf16.msrb.mxu0 %v9619_v23  ;;  %v13027_v13 = vld [vmem:[%s20823_s1 + $0x334] sm:$0xf0] }
 0x251   :  { %v10128_v17 = vld [vmem:[%s20823_s1 + $0xc30] sm:$0xf0]  ;;  %v9238_v1 = vld [vmem:[%s20823_s1 + $0x518] sm:$0xf] }
 0x252   :  { %v13374_v18 = vld [vmem:[%s20823_s1 + $0xe14] sm:$0xf]  ;;  %v10131_v27 = vor.u32 %v13310_v14, %v10128_v17  ;;  %3740 = vmatpush.bf16.msrb.mxu1 %v9875_v26  ;;  %v13091_v14 = vld [vmem:[%s20823_s1 + $0x534] sm:$0xf0]  ;;  %v8727_v17 = vor.u32 %v12963_v10, %v8726_v9 }
 0x253   :  { %v10384_v19 = vld [vmem:[%s20823_s1 + $0xe30] sm:$0xf0]  ;;  %3728 = vmatmul.bf16.vlgmr.msrb.gmra.mxu0 %v14539_v37  ;;  %v13155_v16 = vld [vmem:[%s20823_s1 + $0x734] sm:$0xf0]  ;;  %v9239_v20 = vor.u32 %v13091_v14, %v9238_v1 }
 0x254   :  { %v10387_v30 = vor.u32 %v13374_v18, %v10384_v19  ;;  %3753 = vmatpush.bf16.msrb.mxu2 %v10131_v27  ;;  %3772 = vmatpush.bf16.msra.mxu0 %v8823_v31  ;;  %v3521_v18 = vpop.f32.mrf.mxu0  ;;  %v8983_v19 = vor.u32 %v13027_v13, %v8982_v11  ;;  %v9495_v24 = vor.u32 %v13155_v16, %v9494_v15  ;;  %v13019_v25 = vld [vmem:[%s20823_s1 + $0x2f4] sm:$0xf0] }
 0x255   :  { %3741 = vmatmul.bf16.vlgmr.msrb.gmra.mxu1 %v14543_v40  ;;  %v3522_v23 = vadd.f32 %v3521_v18, %v16435_v58  ;;  %v9206_v26 = vld [vmem:[%s20823_s1 + $0x4d8] sm:$0xf]  ;;  %v8951_v31 = vor.u32 %v13019_v25, %v8950_v22  ;;  %v3549_v18 = vpop.f32.mrf.mxu2  ;;  %v3562_v22 = vpop.f32.mrf.mxu3 }
 0x256   :  { %3766 = vmatpush.bf16.msrb.mxu3 %v10387_v30  ;;  %3785 = vmatpush.bf16.msra.mxu1 %v9079_v36  ;;  %v13083_v27 = vld [vmem:[%s20823_s1 + $0x4f4] sm:$0xf0]  ;;  %v8695_v30 = vor.u32 %v12955_v21, %v8694_v49 }
 0x257   :  { %3754 = vmatmul.bf16.vlgmr.msrb.gmra.mxu2 %v14531_v32  ;;  %v9462_v28 = vld [vmem:[%s20823_s1 + $0x6d8] sm:$0xf]  ;;  %v3535_v29 = vadd.f32 %v3534_v51, %v3522_v23  ;;  %v9207_v36 = vor.u32 %v13083_v27, %v9206_v26 }
 0x258   :  { %3798 = vmatpush.bf16.msra.mxu2 %v9335_v39  ;;  %3773 = vmatpush.bf16.msra.mxu0 %v8791_v57  ;;  %v13147_v58 = vld [vmem:[%s20823_s1 + $0x6f4] sm:$0xf0] }
 0x259   :  { %3767 = vmatmul.bf16.vlgmr.msrb.gmra.mxu3 %v14541_v38  ;;  %v8662_v39 = vld [vmem:[%s20823_s1 + $0x98] sm:$0xf]  ;;  %v3548_v55 = vadd.f32 %v3547_v45, %v3535_v29 }
 0x25a   :  { %3811 = vmatpush.bf16.msra.mxu3 %v9591_v46  ;;  %3786 = vmatpush.bf16.msra.mxu1 %v9047_v59  ;;  %v12947_v43 = vld [vmem:[%s20823_s1 + $0xb4] sm:$0xf0]  ;;  %v9463_v46 = vor.u32 %v13147_v58, %v9462_v28 }
 0x25b   :  { %v8918_v44 = vld [vmem:[%s20823_s1 + $0x298] sm:$0xf]  ;;  %v16634_v61 = vadd.f32 %v3560_v56, %v3548_v55 }
 0x25c   :  { %3799 = vmatpush.bf16.msra.mxu2 %v9303_v60  ;;  %3774 = vmatpush.bf16.msra.mxu0 %v8759_v7  ;;  %v13011_v48 = vld [vmem:[%s20823_s1 + $0x2b4] sm:$0xf0]  ;;  %v8663_v60 = vor.u32 %v12947_v43, %v8662_v39  ;;  %v3523_v62 = vpop.f32.mrf.mxu0 }
 0x25d   :  { %v9174_v52 = vld [vmem:[%s20823_s1 + $0x498] sm:$0xf]  ;;  %v8919_v63 = vor.u32 %v13011_v48, %v8918_v44 }
 0x25e   :  { %3812 = vmatpush.bf16.msra.mxu3 %v9559_v0  ;;  %3787 = vmatpush.bf16.msra.mxu1 %v9015_v35  ;;  %v13075_v53 = vld [vmem:[%s20823_s1 + $0x4b4] sm:$0xf0] }
 0x25f   :  { %v9430_v57 = vld [vmem:[%s20823_s1 + $0x698] sm:$0xf]  ;;  %v9175_v0 = vor.u32 %v13075_v53, %v9174_v52 }
 0x260   :  { %3800 = vmatpush.bf16.msra.mxu2 %v9271_v8  ;;  %3775 = vmatpush.bf16.msra.mxu0 %v8727_v17  ;;  %v13139_v59 = vld [vmem:[%s20823_s1 + $0x6b4] sm:$0xf0] }
 0x261   :  { %v8630_v2 = vld [vmem:[%s20823_s1 + $0x58] sm:$0xf]  ;;  %v9431_v6 = vor.u32 %v13139_v59, %v9430_v57 }
 0x262   :  { %3813 = vmatpush.bf16.msra.mxu3 %v9527_v12  ;;  %3788 = vmatpush.bf16.msra.mxu1 %v8983_v19  ;;  %v12939_v3 = vld [vmem:[%s20823_s1 + $0x74] sm:$0xf0] }
 0x263   :  { %v8886_v4 = vld [vmem:[%s20823_s1 + $0x258] sm:$0xf]  ;;  %v8631_v11 = vor.u32 %v12939_v3, %v8630_v2 }
 0x264   :  { %3801 = vmatpush.bf16.msra.mxu2 %v9239_v20  ;;  %3776 = vmatpush.bf16.msra.mxu0 %v8695_v30  ;;  %v13003_v7 = vld [vmem:[%s20823_s1 + $0x274] sm:$0xf0]  ;;  %v3573_v22 = vpop.f32.mrf.mxu0 }
 0x265   :  { %v9142_v35 = vld [vmem:[%s20823_s1 + $0x458] sm:$0xf]  ;;  %v8887_v1 = vor.u32 %v13003_v7, %v8886_v4 }
 0x266   :  { %3814 = vmatpush.bf16.msra.mxu3 %v9495_v24  ;;  %3789 = vmatpush.bf16.msra.mxu1 %v8951_v31  ;;  %v13067_v8 = vld [vmem:[%s20823_s1 + $0x474] sm:$0xf0] }
 0x267   :  { %v9398_v9 = vld [vmem:[%s20823_s1 + $0x658] sm:$0xf]  ;;  %v9143_v14 = vor.u32 %v13067_v8, %v9142_v35 }
 0x268   :  { %3802 = vmatpush.bf16.msra.mxu2 %v9207_v36  ;;  %v13131_v10 = vld [vmem:[%s20823_s1 + $0x674] sm:$0xf0]  ;;  %3777 = vmatpush.bf16.msra.mxu0 %v8663_v60 }
 0x269   :  { %v8598_v12 = vld [vmem:[%s20823_s1 + $0x18] sm:$0xf]  ;;  %v9399_v19 = vor.u32 %v13131_v10, %v9398_v9 }
 0x26a   :  { %3815 = vmatpush.bf16.msra.mxu3 %v9463_v46  ;;  %v12931_v13 = vld [vmem:[%s20823_s1 + $0x34] sm:$0xf0]  ;;  %3790 = vmatpush.bf16.msra.mxu1 %v8919_v63 }
 0x26b   :  { %v8854_v15 = vld [vmem:[%s20823_s1 + $0x218] sm:$0xf]  ;;  %v8599_v25 = vor.u32 %v12931_v13, %v8598_v12 }
 0x26c   :  { %3803 = vmatpush.bf16.msra.mxu2 %v9175_v0  ;;  %v12995_v16 = vld [vmem:[%s20823_s1 + $0x234] sm:$0xf0]  ;;  %3778 = vmatpush.bf16.msra.mxu0 %v8631_v11 }
 0x26d   :  { %v9110_v17 = vld [vmem:[%s20823_s1 + $0x418] sm:$0xf]  ;;  %v8855_v58 = vor.u32 %v12995_v16, %v8854_v15 }
 0x26e   :  { %3816 = vmatpush.bf16.msra.mxu3 %v9431_v6  ;;  %v13059_v20 = vld [vmem:[%s20823_s1 + $0x434] sm:$0xf0]  ;;  %3791 = vmatpush.bf16.msra.mxu1 %v8887_v1 }
 0x26f   :  { %v9366_v49 = vld [vmem:[%s20823_s1 + $0x618] sm:$0xf]  ;;  %v9111_v29 = vor.u32 %v13059_v20, %v9110_v17 }
 0x270   :  { %v13123_v21 = vld [vmem:[%s20823_s1 + $0x634] sm:$0xf0]  ;;  %3804 = vmatpush.bf16.msra.mxu2 %v9143_v14  ;;  %3779 = vmatpush.bf16.msra.mxu0 %v8599_v25  ;;  %v16772_v14 = vld [vmem:[%s20824_s2] sm:$0xff] }
 0x271   :  { %v9846_v23 = vld [vmem:[%s20823_s1 + $0x9d8] sm:$0xf]  ;;  %v9367_v36 = vor.u32 %v13123_v21, %v9366_v49  ;;  %v576_v15 = vperm.slane %v16772_v14, 4 }
 0x272   :  { %v13243_v51 = vld [vmem:[%s20823_s1 + $0x9f4] sm:$0xf0]  ;;  %3817 = vmatpush.bf16.msra.mxu3 %v9399_v19  ;;  %3792 = vmatpush.bf16.msra.mxu1 %v8855_v58 }
 0x273   :  { %v10102_v24 = vld [vmem:[%s20823_s1 + $0xbd8] sm:$0xf]  ;;  %v9847_v39 = vor.u32 %v13243_v51, %v9846_v23  ;;  %3780 = vmatmul.bf16.vlgmr.msra.gmra.mxu0 %v14413_v34 }
 0x274   :  { %v13307_v26 = vld [vmem:[%s20823_s1 + $0xbf4] sm:$0xf0]  ;;  %3805 = vmatpush.bf16.msra.mxu2 %v9111_v29 }
 0x275   :  { %v10358_v27 = vld [vmem:[%s20823_s1 + $0xdd8] sm:$0xf]  ;;  %v10103_v43 = vor.u32 %v13307_v26, %v10102_v24  ;;  %3824 = vmatpush.bf16.msrb.mxu0 %v9847_v39  ;;  %3793 = vmatmul.bf16.vlgmr.msra.gmra.mxu1 %v14426_v42 }
 0x276   :  { %v13371_v28 = vld [vmem:[%s20823_s1 + $0xdf4] sm:$0xf0]  ;;  %3818 = vmatpush.bf16.msra.mxu3 %v9367_v36 }
 0x277   :  { %v10614_v30 = vld [vmem:[%s20823_s1 + $0xfd8] sm:$0xf]  ;;  %v10359_v44 = vor.u32 %v13371_v28, %v10358_v27  ;;  %3837 = vmatpush.bf16.msrb.mxu1 %v10103_v43  ;;  %3806 = vmatmul.bf16.vlgmr.msra.gmra.mxu2 %v14411_v33  ;;  %v3574_v27 = vadd.f32 %v3573_v22, %v576_v15  ;;  %v3586_v28 = vpop.f32.mrf.mxu1 }
 0x278   :  { %v13435_v31 = vld [vmem:[%s20823_s1 + $0xff4] sm:$0xf0] }
 0x279   :  { %v9814_v45 = vld [vmem:[%s20823_s1 + $0x998] sm:$0xf]  ;;  %v10615_v52 = vor.u32 %v13435_v31, %v10614_v30  ;;  %3850 = vmatpush.bf16.msrb.mxu2 %v10359_v44  ;;  %3819 = vmatmul.bf16.vlgmr.msra.gmra.mxu3 %v14424_v41  ;;  %v3587_v43 = vadd.f32 %v3586_v28, %v3574_v27 }
 0x27a   :  { %v13235_v46 = vld [vmem:[%s20823_s1 + $0x9b4] sm:$0xf0] }
 0x27b   :  { %v10070_v48 = vld [vmem:[%s20823_s1 + $0xb98] sm:$0xf]  ;;  %v9815_v60 = vor.u32 %v13235_v46, %v9814_v45  ;;  %3863 = vmatpush.bf16.msrb.mxu3 %v10615_v52 }
 0x27c   :  { %v13299_v53 = vld [vmem:[%s20823_s1 + $0xbb4] sm:$0xf0] }
 0x27d   :  { %v10326_v55 = vld [vmem:[%s20823_s1 + $0xd98] sm:$0xf]  ;;  %v10071_v62 = vor.u32 %v13299_v53, %v10070_v48  ;;  %3825 = vmatpush.bf16.msrb.mxu0 %v9815_v60 }
 0x27e   :  { %v13363_v56 = vld [vmem:[%s20823_s1 + $0xdb4] sm:$0xf0] }
 0x27f   :  { %v10582_v57 = vld [vmem:[%s20823_s1 + $0xf98] sm:$0xf]  ;;  %v10327_v63 = vor.u32 %v13363_v56, %v10326_v55  ;;  %3838 = vmatpush.bf16.msrb.mxu1 %v10071_v62  ;;  %v3599_v55 = vpop.f32.mrf.mxu2 }
 0x280   :  { %v13427_v59 = vld [vmem:[%s20823_s1 + $0xfb4] sm:$0xf0]  ;;  %v3600_v62 = vadd.f32 %v3599_v55, %v3587_v43  ;;  %v9336_v43 = vld [vmem:[%s20823_s1 + $0x5f8] sm:$0xf0] }
 0x281   :  { %v9782_v0 = vld [vmem:[%s20823_s1 + $0x958] sm:$0xf]  ;;  %v10583_v4 = vor.u32 %v13427_v59, %v10582_v57  ;;  %3851 = vmatpush.bf16.msrb.mxu2 %v10327_v63  ;;  %v3612_v63 = vpop.f32.mrf.mxu3 }
 0x282   :  { %v13227_v2 = vld [vmem:[%s20823_s1 + $0x974] sm:$0xf0] }
 0x283   :  { %v10038_v3 = vld [vmem:[%s20823_s1 + $0xb58] sm:$0xf]  ;;  %v9783_v9 = vor.u32 %v13227_v2, %v9782_v0  ;;  %3864 = vmatpush.bf16.msrb.mxu3 %v10583_v4  ;;  %v16838_v4 = vadd.f32 %v3612_v63, %v3600_v62  ;;  %v9048_v63 = vld [vmem:[%s20823_s1 + $0x3b8] sm:$0xf0] }
 0x284   :  { %v13291_v5 = vld [vmem:[%s20823_s1 + $0xb74] sm:$0xf0] }
 0x285   :  { %v10294_v6 = vld [vmem:[%s20823_s1 + $0xd58] sm:$0xf]  ;;  %v10039_v11 = vor.u32 %v13291_v5, %v10038_v3  ;;  %3826 = vmatpush.bf16.msrb.mxu0 %v9783_v9  ;;  %v3575_v5 = vpop.f32.mrf.mxu0 }
 0x286   :  { %v13355_v7 = vld [vmem:[%s20823_s1 + $0xd74] sm:$0xf0]  ;;  %v9560_v5 = vld [vmem:[%s20823_s1 + $0x7b8] sm:$0xf0] }
 0x287   :  { %v10550_v35 = vld [vmem:[%s20823_s1 + $0xf58] sm:$0xf]  ;;  %v10295_v12 = vor.u32 %v13355_v7, %v10294_v6  ;;  %3839 = vmatpush.bf16.msrb.mxu1 %v10039_v11 }
 0x288   :  { %v13419_v8 = vld [vmem:[%s20823_s1 + $0xf74] sm:$0xf0] }
 0x289   :  { %v9750_v10 = vld [vmem:[%s20823_s1 + $0x918] sm:$0xf]  ;;  %v10551_v16 = vor.u32 %v13419_v8, %v10550_v35  ;;  %3852 = vmatpush.bf16.msrb.mxu2 %v10295_v12  ;;  %v3614_v28 = vpop.f32.mrf.mxu3 }
 0x28a   :  { %v13219_v13 = vld [vmem:[%s20823_s1 + $0x934] sm:$0xf0] }
 0x28b   :  { %v10006_v1 = vld [vmem:[%s20823_s1 + $0xb18] sm:$0xf]  ;;  %v9751_v21 = vor.u32 %v13219_v13, %v9750_v10  ;;  %3865 = vmatpush.bf16.msrb.mxu3 %v10551_v16  ;;  %v3588_v10 = vpop.f32.mrf.mxu1 }
 0x28c   :  { %v13283_v17 = vld [vmem:[%s20823_s1 + $0xb34] sm:$0xf0]  ;;  %v13031_v10 = vld [vmem:[%s20823_s1 + $0x35c] sm:$0xf] }
 0x28d   :  { %v10262_v18 = vld [vmem:[%s20823_s1 + $0xd18] sm:$0xf]  ;;  %v10007_v23 = vor.u32 %v13283_v17, %v10006_v1  ;;  %3827 = vmatpush.bf16.msrb.mxu0 %v9751_v21  ;;  %v3625_v28 = vpop.f32.mrf.mxu0 }
 0x28e   :  { %v13347_v19 = vld [vmem:[%s20823_s1 + $0xd34] sm:$0xf0] }
 0x28f   :  { %v10518_v20 = vld [vmem:[%s20823_s1 + $0xf18] sm:$0xf]  ;;  %v10263_v51 = vor.u32 %v13347_v19, %v10262_v18  ;;  %3840 = vmatpush.bf16.msrb.mxu1 %v10007_v23 }
 0x290   :  { %v13411_v49 = vld [vmem:[%s20823_s1 + $0xf34] sm:$0xf0] }
 0x291   :  { %v9718_v24 = vld [vmem:[%s20823_s1 + $0x8d8] sm:$0xf]  ;;  %v10519_v58 = vor.u32 %v13411_v49, %v10518_v20  ;;  %3853 = vmatpush.bf16.msrb.mxu2 %v10263_v51  ;;  %v3601_v51 = vpop.f32.mrf.mxu2 }
 0x292   :  { %v13211_v25 = vld [vmem:[%s20823_s1 + $0x8f4] sm:$0xf0]  ;;  %v13087_v51 = vld [vmem:[%s20823_s1 + $0x51c] sm:$0xf] }
 0x293   :  { %v9974_v26 = vld [vmem:[%s20823_s1 + $0xad8] sm:$0xf]  ;;  %v9719_v44 = vor.u32 %v13211_v25, %v9718_v24  ;;  %3866 = vmatpush.bf16.msrb.mxu3 %v10519_v58  ;;  %v12983_v58 = vld [vmem:[%s20823_s1 + $0x1dc] sm:$0xf] }
 0x294   :  { %v13275_v29 = vld [vmem:[%s20823_s1 + $0xaf4] sm:$0xf0] }
 0x295   :  { %v10230_v30 = vld [vmem:[%s20823_s1 + $0xcd8] sm:$0xf]  ;;  %v9975_v45 = vor.u32 %v13275_v29, %v9974_v26  ;;  %3828 = vmatpush.bf16.msrb.mxu0 %v9719_v44  ;;  %v8824_v29 = vld [vmem:[%s20823_s1 + $0x1f8] sm:$0xf0] }
 0x296   :  { %v13339_v31 = vld [vmem:[%s20823_s1 + $0xcf4] sm:$0xf0] }
 0x297   :  { %v10486_v36 = vld [vmem:[%s20823_s1 + $0xed8] sm:$0xf]  ;;  %v10231_v46 = vor.u32 %v13339_v31, %v10230_v30  ;;  %3841 = vmatpush.bf16.msrb.mxu1 %v9975_v45  ;;  %v13047_v30 = vld [vmem:[%s20823_s1 + $0x3dc] sm:$0xf] }
 0x298   :  { %v13403_v39 = vld [vmem:[%s20823_s1 + $0xef4] sm:$0xf0] }
 0x299   :  { %v9686_v48 = vld [vmem:[%s20823_s1 + $0x898] sm:$0xf]  ;;  %v10487_v56 = vor.u32 %v13403_v39, %v10486_v36  ;;  %3854 = vmatpush.bf16.msrb.mxu2 %v10231_v46  ;;  %v9080_v36 = vld [vmem:[%s20823_s1 + $0x3f8] sm:$0xf0] }
 0x29a   :  { %v13203_v52 = vld [vmem:[%s20823_s1 + $0x8b4] sm:$0xf0]  ;;  %v13111_v39 = vld [vmem:[%s20823_s1 + $0x5dc] sm:$0xf]  ;;  %v9083_v55 = vor.u32 %v13047_v30, %v9080_v36 }
 0x29b   :  { %v9942_v53 = vld [vmem:[%s20823_s1 + $0xa98] sm:$0xf]  ;;  %v9687_v3 = vor.u32 %v13203_v52, %v9686_v48  ;;  %3867 = vmatpush.bf16.msrb.mxu3 %v10487_v56  ;;  %v13175_v46 = vld [vmem:[%s20823_s1 + $0x7dc] sm:$0xf]  ;;  %v9339_v56 = vor.u32 %v13111_v39, %v9336_v43  ;;  %v3626_v39 = vadd.f32 %v3625_v28, %v16838_v4  ;;  %v3638_v43 = vpop.f32.mrf.mxu1 }
 0x29c   :  { %v13267_v57 = vld [vmem:[%s20823_s1 + $0xab4] sm:$0xf0]  ;;  %v9592_v48 = vld [vmem:[%s20823_s1 + $0x7f8] sm:$0xf0] }
 0x29d   :  { %v10198_v59 = vld [vmem:[%s20823_s1 + $0xc98] sm:$0xf]  ;;  %v9943_v6 = vor.u32 %v13267_v57, %v9942_v53  ;;  %3829 = vmatpush.bf16.msrb.mxu0 %v9687_v3  ;;  %v8827_v53 = vor.u32 %v12983_v58, %v8824_v29  ;;  %v12975_v57 = vld [vmem:[%s20823_s1 + $0x19c] sm:$0xf]  ;;  %v9595_v62 = vor.u32 %v13175_v46, %v9592_v48 }
 0x29e   :  { %v13331_v60 = vld [vmem:[%s20823_s1 + $0xcb4] sm:$0xf0]  ;;  %v13167_v3 = vld [vmem:[%s20823_s1 + $0x79c] sm:$0xf] }
 0x29f   :  { %v10454_v0 = vld [vmem:[%s20823_s1 + $0xe98] sm:$0xf]  ;;  %v10199_v7 = vor.u32 %v13331_v60, %v10198_v59  ;;  %3842 = vmatpush.bf16.msrb.mxu1 %v9943_v6  ;;  %v8792_v59 = vld [vmem:[%s20823_s1 + $0x1b8] sm:$0xf0] }
 0x2a0   :  { %v13395_v2 = vld [vmem:[%s20823_s1 + $0xeb4] sm:$0xf0]  ;;  %v13039_v60 = vld [vmem:[%s20823_s1 + $0x39c] sm:$0xf]  ;;  %v8795_v6 = vor.u32 %v12975_v57, %v8792_v59 }
 0x2a1   :  { %v9654_v35 = vld [vmem:[%s20823_s1 + $0x858] sm:$0xf]  ;;  %v10455_v11 = vor.u32 %v13395_v2, %v10454_v0  ;;  %3855 = vmatpush.bf16.msrb.mxu2 %v10199_v7  ;;  %v13103_v0 = vld [vmem:[%s20823_s1 + $0x59c] sm:$0xf]  ;;  %v9051_v7 = vor.u32 %v13039_v60, %v9048_v63  ;;  %v3651_v63 = vpop.f32.mrf.mxu2 }
 0x2a2   :  { %v13195_v8 = vld [vmem:[%s20823_s1 + $0x874] sm:$0xf0]  ;;  %v9304_v2 = vld [vmem:[%s20823_s1 + $0x5b8] sm:$0xf0] }
 0x2a3   :  { %v9910_v9 = vld [vmem:[%s20823_s1 + $0xa58] sm:$0xf]  ;;  %v9655_v17 = vor.u32 %v13195_v8, %v9654_v35  ;;  %3868 = vmatpush.bf16.msrb.mxu3 %v10455_v11  ;;  %v9307_v35 = vor.u32 %v13103_v0, %v9304_v2  ;;  %v12967_v8 = vld [vmem:[%s20823_s1 + $0x15c] sm:$0xf]  ;;  %v9563_v11 = vor.u32 %v13167_v3, %v9560_v5 }
 0x2a4   :  { %v13259_v12 = vld [vmem:[%s20823_s1 + $0xa74] sm:$0xf0]  ;;  %v12951_v30 = vld [vmem:[%s20823_s1 + $0xdc] sm:$0xf] }
 0x2a5   :  { %v10166_v13 = vld [vmem:[%s20823_s1 + $0xc58] sm:$0xf]  ;;  %v9911_v20 = vor.u32 %v13259_v12, %v9910_v9  ;;  %3830 = vmatpush.bf16.msrb.mxu0 %v9655_v17  ;;  %v8760_v9 = vld [vmem:[%s20823_s1 + $0x178] sm:$0xf0] }
 0x2a6   :  { %v13323_v1 = vld [vmem:[%s20823_s1 + $0xc74] sm:$0xf0]  ;;  %v9016_v12 = vld [vmem:[%s20823_s1 + $0x378] sm:$0xf0]  ;;  %v8763_v17 = vor.u32 %v12967_v8, %v8760_v9 }
 0x2a7   :  { %v10422_v15 = vld [vmem:[%s20823_s1 + $0xe58] sm:$0xf]  ;;  %v10167_v49 = vor.u32 %v13323_v1, %v10166_v13  ;;  %3843 = vmatpush.bf16.msrb.mxu1 %v9911_v20  ;;  %v13095_v13 = vld [vmem:[%s20823_s1 + $0x55c] sm:$0xf] }
 0x2a8   :  { %v13387_v16 = vld [vmem:[%s20823_s1 + $0xe74] sm:$0xf0]  ;;  %v9272_v1 = vld [vmem:[%s20823_s1 + $0x578] sm:$0xf0] }
 0x2a9   :  { %v9622_v18 = vld [vmem:[%s20823_s1 + $0x818] sm:$0xf]  ;;  %v10423_v24 = vor.u32 %v13387_v16, %v10422_v15  ;;  %3856 = vmatpush.bf16.msrb.mxu2 %v10167_v49  ;;  %v13159_v15 = vld [vmem:[%s20823_s1 + $0x75c] sm:$0xf] }
 0x2aa   :  { %v13187_v19 = vld [vmem:[%s20823_s1 + $0x834] sm:$0xf0]  ;;  %v9528_v16 = vld [vmem:[%s20823_s1 + $0x778] sm:$0xf0] }
 0x2ab   :  { %v9878_v21 = vld [vmem:[%s20823_s1 + $0xa18] sm:$0xf]  ;;  %v9623_v31 = vor.u32 %v13187_v19, %v9622_v18  ;;  %3869 = vmatpush.bf16.msrb.mxu3 %v10423_v24  ;;  %v9019_v18 = vor.u32 %v13031_v10, %v9016_v12  ;;  %v9275_v19 = vor.u32 %v13095_v13, %v9272_v1  ;;  %v12959_v20 = vld [vmem:[%s20823_s1 + $0x11c] sm:$0xf] }
 0x2ac   :  { %v13251_v22 = vld [vmem:[%s20823_s1 + $0xa34] sm:$0xf0]  ;;  %v8728_v49 = vld [vmem:[%s20823_s1 + $0x138] sm:$0xf0] }
 0x2ad   :  { %v10134_v23 = vld [vmem:[%s20823_s1 + $0xc18] sm:$0xf]  ;;  %v9879_v44 = vor.u32 %v13251_v22, %v9878_v21  ;;  %3831 = vmatpush.bf16.msrb.mxu0 %v9623_v31  ;;  %v13023_v21 = vld [vmem:[%s20823_s1 + $0x31c] sm:$0xf]  ;;  %v9531_v22 = vor.u32 %v13159_v15, %v9528_v16 }
 0x2ae   :  { %v13315_v25 = vld [vmem:[%s20823_s1 + $0xc34] sm:$0xf0]  ;;  %v9240_v24 = vld [vmem:[%s20823_s1 + $0x538] sm:$0xf0] }
 0x2af   :  { %v10390_v26 = vld [vmem:[%s20823_s1 + $0xe18] sm:$0xf]  ;;  %v10135_v45 = vor.u32 %v13315_v25, %v10134_v23  ;;  %3844 = vmatpush.bf16.msrb.mxu1 %v9879_v44  ;;  %v8984_v23 = vld [vmem:[%s20823_s1 + $0x338] sm:$0xf0]  ;;  %v9243_v29 = vor.u32 %v13087_v51, %v9240_v24 }
 0x2b0   :  { %v13379_v27 = vld [vmem:[%s20823_s1 + $0xe34] sm:$0xf0]  ;;  %3832 = vmatmul.bf16.vlgmr.msrb.gmra.mxu0 %v14539_v37  ;;  %v13151_v25 = vld [vmem:[%s20823_s1 + $0x71c] sm:$0xf]  ;;  %v8987_v58 = vor.u32 %v13023_v21, %v8984_v23 }
 0x2b1   :  { %v10391_v52 = vor.u32 %v13379_v27, %v10390_v26  ;;  %3857 = vmatpush.bf16.msrb.mxu2 %v10135_v45  ;;  %3876 = vmatpush.bf16.msra.mxu0 %v8827_v53  ;;  %v9496_v26 = vld [vmem:[%s20823_s1 + $0x738] sm:$0xf0]  ;;  %v8731_v27 = vor.u32 %v12959_v20, %v8728_v49  ;;  %v3639_v53 = vadd.f32 %v3638_v43, %v3626_v39 }
 0x2b2   :  { %3845 = vmatmul.bf16.vlgmr.msrb.gmra.mxu1 %v14543_v40  ;;  %v8696_v31 = vld [vmem:[%s20823_s1 + $0xf8] sm:$0xf0]  ;;  %v9499_v44 = vor.u32 %v13151_v25, %v9496_v26 }
 0x2b3   :  { %3870 = vmatpush.bf16.msrb.mxu3 %v10391_v52  ;;  %3889 = vmatpush.bf16.msra.mxu1 %v9083_v55  ;;  %v13015_v36 = vld [vmem:[%s20823_s1 + $0x2dc] sm:$0xf]  ;;  %v8699_v55 = vor.u32 %v12951_v30, %v8696_v31 }
 0x2b4   :  { %3858 = vmatmul.bf16.vlgmr.msrb.gmra.mxu2 %v14531_v32  ;;  %v8952_v45 = vld [vmem:[%s20823_s1 + $0x2f8] sm:$0xf0] }
 0x2b5   :  { %3902 = vmatpush.bf16.msra.mxu2 %v9339_v56  ;;  %3877 = vmatpush.bf16.msra.mxu0 %v8795_v6  ;;  %v13079_v46 = vld [vmem:[%s20823_s1 + $0x4dc] sm:$0xf]  ;;  %v8955_v56 = vor.u32 %v13015_v36, %v8952_v45  ;;  %v3652_v6 = vadd.f32 %v3651_v63, %v3639_v53 }
 0x2b6   :  { %3871 = vmatmul.bf16.vlgmr.msrb.gmra.mxu3 %v14541_v38  ;;  %v9208_v48 = vld [vmem:[%s20823_s1 + $0x4f8] sm:$0xf0] }
 0x2b7   :  { %3915 = vmatpush.bf16.msra.mxu3 %v9595_v62  ;;  %3890 = vmatpush.bf16.msra.mxu1 %v9051_v7  ;;  %v13143_v52 = vld [vmem:[%s20823_s1 + $0x6dc] sm:$0xf]  ;;  %v9211_v57 = vor.u32 %v13079_v46, %v9208_v48  ;;  %v3664_v7 = vpop.f32.mrf.mxu3 }
 0x2b8   :  { %v9464_v4 = vld [vmem:[%s20823_s1 + $0x6f8] sm:$0xf0]  ;;  %v17037_v10 = vadd.f32 %v3664_v7, %v3652_v6 }
 0x2b9   :  { %3903 = vmatpush.bf16.msra.mxu2 %v9307_v35  ;;  %3878 = vmatpush.bf16.msra.mxu0 %v8763_v17  ;;  %v12943_v59 = vld [vmem:[%s20823_s1 + $0x9c] sm:$0xf]  ;;  %v9467_v0 = vor.u32 %v13143_v52, %v9464_v4  ;;  %v3640_v17 = vpop.f32.mrf.mxu1 }
 0x2ba   :  { %v8664_v60 = vld [vmem:[%s20823_s1 + $0xb8] sm:$0xf0] }
 0x2bb   :  { %3916 = vmatpush.bf16.msra.mxu3 %v9563_v11  ;;  %3891 = vmatpush.bf16.msra.mxu1 %v9019_v18  ;;  %v13007_v62 = vld [vmem:[%s20823_s1 + $0x29c] sm:$0xf]  ;;  %v8667_v9 = vor.u32 %v12943_v59, %v8664_v60  ;;  %v3627_v11 = vpop.f32.mrf.mxu0 }
 0x2bc   :  { %v8920_v2 = vld [vmem:[%s20823_s1 + $0x2b8] sm:$0xf0] }
 0x2bd   :  { %3904 = vmatpush.bf16.msra.mxu2 %v9275_v19  ;;  %3879 = vmatpush.bf16.msra.mxu0 %v8731_v27  ;;  %v13071_v3 = vld [vmem:[%s20823_s1 + $0x49c] sm:$0xf]  ;;  %v8923_v12 = vor.u32 %v13007_v62, %v8920_v2 }
 0x2be   :  { %v9176_v5 = vld [vmem:[%s20823_s1 + $0x4b8] sm:$0xf0] }
 0x2bf   :  { %3917 = vmatpush.bf16.msra.mxu3 %v9531_v22  ;;  %3892 = vmatpush.bf16.msra.mxu1 %v8987_v58  ;;  %v13135_v35 = vld [vmem:[%s20823_s1 + $0x69c] sm:$0xf]  ;;  %v9179_v13 = vor.u32 %v13071_v3, %v9176_v5  ;;  %v3666_v43 = vpop.f32.mrf.mxu3 }
 0x2c0   :  { %v9432_v8 = vld [vmem:[%s20823_s1 + $0x6b8] sm:$0xf0] }
 0x2c1   :  { %3905 = vmatpush.bf16.msra.mxu2 %v9243_v29  ;;  %3880 = vmatpush.bf16.msra.mxu0 %v8699_v55  ;;  %v12935_v1 = vld [vmem:[%s20823_s1 + $0x5c] sm:$0xf]  ;;  %v9435_v18 = vor.u32 %v13135_v35, %v9432_v8  ;;  %v3653_v29 = vpop.f32.mrf.mxu2 }
 0x2c2   :  { %v8632_v15 = vld [vmem:[%s20823_s1 + $0x78] sm:$0xf0] }
 0x2c3   :  { %3918 = vmatpush.bf16.msra.mxu3 %v9499_v44  ;;  %3893 = vmatpush.bf16.msra.mxu1 %v8955_v56  ;;  %v12999_v16 = vld [vmem:[%s20823_s1 + $0x25c] sm:$0xf]  ;;  %v8635_v23 = vor.u32 %v12935_v1, %v8632_v15 }
 0x2c4   :  { %v8888_v19 = vld [vmem:[%s20823_s1 + $0x278] sm:$0xf0] }
 0x2c5   :  { %3906 = vmatpush.bf16.msra.mxu2 %v9211_v57  ;;  %v13063_v20 = vld [vmem:[%s20823_s1 + $0x45c] sm:$0xf]  ;;  %3881 = vmatpush.bf16.msra.mxu0 %v8667_v9  ;;  %v8891_v25 = vor.u32 %v12999_v16, %v8888_v19 }
 0x2c6   :  { %v9144_v49 = vld [vmem:[%s20823_s1 + $0x478] sm:$0xf0] }
 0x2c7   :  { %3919 = vmatpush.bf16.msra.mxu3 %v9467_v0  ;;  %v13127_v21 = vld [vmem:[%s20823_s1 + $0x65c] sm:$0xf]  ;;  %3894 = vmatpush.bf16.msra.mxu1 %v8923_v12  ;;  %v9147_v26 = vor.u32 %v13063_v20, %v9144_v49 }
 0x2c8   :  { %v9400_v22 = vld [vmem:[%s20823_s1 + $0x678] sm:$0xf0] }
 0x2c9   :  { %v12927_v51 = vld [vmem:[%s20823_s1 + $0x1c] sm:$0xf]  ;;  %3907 = vmatpush.bf16.msra.mxu2 %v9179_v13  ;;  %v9403_v30 = vor.u32 %v13127_v21, %v9400_v22  ;;  %3882 = vmatpush.bf16.msra.mxu0 %v8635_v23 }
 0x2ca   :  { %v8600_v24 = vld [vmem:[%s20823_s1 + $0x38] sm:$0xf0] }
 0x2cb   :  { %v12991_v27 = vld [vmem:[%s20823_s1 + $0x21c] sm:$0xf]  ;;  %3920 = vmatpush.bf16.msra.mxu3 %v9435_v18  ;;  %v8603_v48 = vor.u32 %v12927_v51, %v8600_v24  ;;  %3895 = vmatpush.bf16.msra.mxu1 %v8891_v25 }
 0x2cc   :  { %v8856_v28 = vld [vmem:[%s20823_s1 + $0x238] sm:$0xf0] }
 0x2cd   :  { %v13055_v58 = vld [vmem:[%s20823_s1 + $0x41c] sm:$0xf]  ;;  %3908 = vmatpush.bf16.msra.mxu2 %v9147_v26  ;;  %v8859_v55 = vor.u32 %v12991_v27, %v8856_v28  ;;  %3883 = vmatpush.bf16.msra.mxu0 %v8603_v48 }
 0x2ce   :  { %v9112_v31 = vld [vmem:[%s20823_s1 + $0x438] sm:$0xf0] }
 0x2cf   :  { %v13119_v36 = vld [vmem:[%s20823_s1 + $0x61c] sm:$0xf]  ;;  %v9115_v56 = vor.u32 %v13055_v58, %v9112_v31  ;;  %3921 = vmatpush.bf16.msra.mxu3 %v9403_v30  ;;  %3896 = vmatpush.bf16.msra.mxu1 %v8859_v55  ;;  %v17187_v30 = vpop.f32.mrf.mxu0 }
 0x2d0   :  { %v9368_v39 = vld [vmem:[%s20823_s1 + $0x638] sm:$0xf0]  ;;  %3884 = vmatmul.bf16.vlgmr.msra.gmra.mxu0 %v14413_v34 }
 0x2d1   :  { %v13239_v44 = vld [vmem:[%s20823_s1 + $0x9dc] sm:$0xf]  ;;  %v9371_v60 = vor.u32 %v13119_v36, %v9368_v39  ;;  %3909 = vmatpush.bf16.msra.mxu2 %v9115_v56 }
 0x2d2   :  { %v9848_v45 = vld [vmem:[%s20823_s1 + $0x9f8] sm:$0xf0]  ;;  %3897 = vmatmul.bf16.vlgmr.msra.gmra.mxu1 %v14426_v42 }
 0x2d3   :  { %v13303_v46 = vld [vmem:[%s20823_s1 + $0xbdc] sm:$0xf]  ;;  %v9851_v62 = vor.u32 %v13239_v44, %v9848_v45  ;;  %3922 = vmatpush.bf16.msra.mxu3 %v9371_v60  ;;  %v17198_v45 = vpop.f32.mrf.mxu1 }
 0x2d4   :  { %v10104_v52 = vld [vmem:[%s20823_s1 + $0xbf8] sm:$0xf0]  ;;  %3910 = vmatmul.bf16.vlgmr.msra.gmra.mxu2 %v14411_v33 }
 0x2d5   :  { %v13367_v4 = vld [vmem:[%s20823_s1 + $0xddc] sm:$0xf]  ;;  %v10107_v63 = vor.u32 %v13303_v46, %v10104_v52  ;;  %3928 = vmatpush.bf16.msrb.mxu0 %v9851_v62 }
 0x2d6   :  { %v10360_v53 = vld [vmem:[%s20823_s1 + $0xdf8] sm:$0xf0]  ;;  %3923 = vmatmul.bf16.vlgmr.msra.gmra.mxu3 %v14424_v41 }
 0x2d7   :  { %v13431_v57 = vld [vmem:[%s20823_s1 + $0xfdc] sm:$0xf]  ;;  %v10363_v0 = vor.u32 %v13367_v4, %v10360_v53  ;;  %3941 = vmatpush.bf16.msrb.mxu1 %v10107_v63 }
 0x2d8   :  { %v10616_v59 = vld [vmem:[%s20823_s1 + $0xff8] sm:$0xf0] }
 0x2d9   :  { %v13231_v2 = vld [vmem:[%s20823_s1 + $0x99c] sm:$0xf]  ;;  %v10619_v6 = vor.u32 %v13431_v57, %v10616_v59  ;;  %3954 = vmatpush.bf16.msrb.mxu2 %v10363_v0  ;;  %v17224_v0 = vpop.f32.mrf.mxu2 }
 0x2da   :  { %v9816_v3 = vld [vmem:[%s20823_s1 + $0x9b8] sm:$0xf0] }
 0x2db   :  { %v13295_v5 = vld [vmem:[%s20823_s1 + $0xb9c] sm:$0xf]  ;;  %v9819_v12 = vor.u32 %v13231_v2, %v9816_v3  ;;  %3967 = vmatpush.bf16.msrb.mxu3 %v10619_v6 }
 0x2dc   :  { %v10072_v7 = vld [vmem:[%s20823_s1 + $0xbb8] sm:$0xf0] }
 0x2dd   :  { %v13359_v35 = vld [vmem:[%s20823_s1 + $0xd9c] sm:$0xf]  ;;  %v10075_v13 = vor.u32 %v13295_v5, %v10072_v7  ;;  %3929 = vmatpush.bf16.msrb.mxu0 %v9819_v12  ;;  %v17235_v7 = vpop.f32.mrf.mxu3 }
 0x2de   :  { %v10328_v8 = vld [vmem:[%s20823_s1 + $0xdb8] sm:$0xf0] }
 0x2df   :  { %v13423_v9 = vld [vmem:[%s20823_s1 + $0xf9c] sm:$0xf]  ;;  %v10331_v1 = vor.u32 %v13359_v35, %v10328_v8  ;;  %3942 = vmatpush.bf16.msrb.mxu1 %v10075_v13 }
 0x2e0   :  { %v10584_v11 = vld [vmem:[%s20823_s1 + $0xfb8] sm:$0xf0] }
 0x2e1   :  { %v13223_v15 = vld [vmem:[%s20823_s1 + $0x95c] sm:$0xf]  ;;  %v10587_v18 = vor.u32 %v13423_v9, %v10584_v11  ;;  %3955 = vmatpush.bf16.msrb.mxu2 %v10331_v1  ;;  %v3679_v11 = vpop.f32.mrf.mxu0 }
 0x2e2   :  { %v9784_v16 = vld [vmem:[%s20823_s1 + $0x978] sm:$0xf0]  ;;  %v13680_v11 = vld [vmem:[%s20825_s3 + $0x79c] sm:$0xf0] }
 0x2e3   :  { %v13287_v17 = vld [vmem:[%s20823_s1 + $0xb5c] sm:$0xf]  ;;  %v9787_v22 = vor.u32 %v13223_v15, %v9784_v16  ;;  %3968 = vmatpush.bf16.msrb.mxu3 %v10587_v18 }
 0x2e4   :  { %v10040_v19 = vld [vmem:[%s20823_s1 + $0xb78] sm:$0xf0] }
 0x2e5   :  { %v13351_v20 = vld [vmem:[%s20823_s1 + $0xd5c] sm:$0xf]  ;;  %v10043_v23 = vor.u32 %v13287_v17, %v10040_v19  ;;  %3930 = vmatpush.bf16.msrb.mxu0 %v9787_v22  ;;  %v3692_v17 = vpop.f32.mrf.mxu1 }
 0x2e6   :  { %v10296_v49 = vld [vmem:[%s20823_s1 + $0xd78] sm:$0xf0]  ;;  %v11038_v17 = vld [vmem:[%s20825_s3 + $0x340] sm:$0xf] }
 0x2e7   :  { %v13415_v21 = vld [vmem:[%s20823_s1 + $0xf5c] sm:$0xf]  ;;  %v10299_v51 = vor.u32 %v13351_v20, %v10296_v49  ;;  %3943 = vmatpush.bf16.msrb.mxu1 %v10043_v23 }
 0x2e8   :  { %v10552_v33 = vld [vmem:[%s20823_s1 + $0xf78] sm:$0xf0] }
 0x2e9   :  { %v13215_v24 = vld [vmem:[%s20823_s1 + $0x91c] sm:$0xf]  ;;  %v10555_v41 = vor.u32 %v13415_v21, %v10552_v33  ;;  %3956 = vmatpush.bf16.msrb.mxu2 %v10299_v51 }
 0x2ea   :  { %v9752_v25 = vld [vmem:[%s20823_s1 + $0x938] sm:$0xf0] }
 0x2eb   :  { %v13279_v34 = vld [vmem:[%s20823_s1 + $0xb1c] sm:$0xf]  ;;  %v9755_v29 = vor.u32 %v13215_v24, %v9752_v25  ;;  %3969 = vmatpush.bf16.msrb.mxu3 %v10555_v41 }
 0x2ec   :  { %v10008_v42 = vld [vmem:[%s20823_s1 + $0xb38] sm:$0xf0] }
 0x2ed   :  { %v13343_v26 = vld [vmem:[%s20823_s1 + $0xd1c] sm:$0xf]  ;;  %v10011_v31 = vor.u32 %v13279_v34, %v10008_v42  ;;  %3931 = vmatpush.bf16.msrb.mxu0 %v9755_v29 }
 0x2ee   :  { %v10264_v27 = vld [vmem:[%s20823_s1 + $0xd38] sm:$0xf0] }
 0x2ef   :  { %v13407_v28 = vld [vmem:[%s20823_s1 + $0xf1c] sm:$0xf]  ;;  %v10267_v36 = vor.u32 %v13343_v26, %v10264_v27  ;;  %3944 = vmatpush.bf16.msrb.mxu1 %v10011_v31  ;;  %v3705_v26 = vpop.f32.mrf.mxu2  ;;  %v3718_v31 = vpop.f32.mrf.mxu3 }
 0x2f0   :  { %v10520_v58 = vld [vmem:[%s20823_s1 + $0xf38] sm:$0xf0]  ;;  %v13464_v31 = vld [vmem:[%s20825_s3 + $0xdc] sm:$0xf0] }
 0x2f1   :  { %v13207_v39 = vld [vmem:[%s20823_s1 + $0x8dc] sm:$0xf]  ;;  %v10523_v46 = vor.u32 %v13407_v28, %v10520_v58  ;;  %3957 = vmatpush.bf16.msrb.mxu2 %v10267_v36  ;;  %v10846_v36 = vld [vmem:[%s20825_s3 + $0x1c0] sm:$0xf] }
 0x2f2   :  { %v9720_v43 = vld [vmem:[%s20823_s1 + $0x8f8] sm:$0xf0] }
 0x2f3   :  { %v13271_v44 = vld [vmem:[%s20823_s1 + $0xadc] sm:$0xf]  ;;  %v9723_v56 = vor.u32 %v13207_v39, %v9720_v43  ;;  %3970 = vmatpush.bf16.msrb.mxu3 %v10523_v46  ;;  %v13496_v39 = vld [vmem:[%s20825_s3 + $0x1dc] sm:$0xf0] }
 0x2f4   :  { %v9976_v48 = vld [vmem:[%s20823_s1 + $0xaf8] sm:$0xf0]  ;;  %v11102_v43 = vld [vmem:[%s20825_s3 + $0x3c0] sm:$0xf] }
 0x2f5   :  { %v13335_v52 = vld [vmem:[%s20823_s1 + $0xcdc] sm:$0xf]  ;;  %v9979_v57 = vor.u32 %v13271_v44, %v9976_v48  ;;  %3932 = vmatpush.bf16.msrb.mxu0 %v9723_v56  ;;  %v13560_v46 = vld [vmem:[%s20825_s3 + $0x3dc] sm:$0xf0] }
 0x2f6   :  { %v10232_v4 = vld [vmem:[%s20823_s1 + $0xcf8] sm:$0xf0]  ;;  %v11358_v48 = vld [vmem:[%s20825_s3 + $0x5c0] sm:$0xf] }
 0x2f7   :  { %v13399_v53 = vld [vmem:[%s20823_s1 + $0xedc] sm:$0xf]  ;;  %v10235_v59 = vor.u32 %v13335_v52, %v10232_v4  ;;  %3945 = vmatpush.bf16.msrb.mxu1 %v9979_v57  ;;  %v13624_v52 = vld [vmem:[%s20825_s3 + $0x5dc] sm:$0xf0] }
 0x2f8   :  { %v10488_v55 = vld [vmem:[%s20823_s1 + $0xef8] sm:$0xf0]  ;;  %v13688_v56 = vld [vmem:[%s20825_s3 + $0x7dc] sm:$0xf0] }
 0x2f9   :  { %v13199_v60 = vld [vmem:[%s20823_s1 + $0x89c] sm:$0xf]  ;;  %v10491_v2 = vor.u32 %v13399_v53, %v10488_v55  ;;  %3958 = vmatpush.bf16.msrb.mxu2 %v10235_v59  ;;  %v11614_v55 = vld [vmem:[%s20825_s3 + $0x7c0] sm:$0xf]  ;;  %v10847_v59 = vor.u32 %v13496_v39, %v10846_v36  ;;  %v17402_v39 = vpop.f32.mrf.mxu1 }
 0x2fa   :  { %v9688_v62 = vld [vmem:[%s20823_s1 + $0x8b8] sm:$0xf0]  ;;  %v10974_v36 = vld [vmem:[%s20825_s3 + $0x2c0] sm:$0xf] }
 0x2fb   :  { %v13263_v63 = vld [vmem:[%s20823_s1 + $0xa9c] sm:$0xf]  ;;  %v9691_v9 = vor.u32 %v13199_v60, %v9688_v62  ;;  %3971 = vmatpush.bf16.msrb.mxu3 %v10491_v2  ;;  %v11103_v60 = vor.u32 %v13560_v46, %v11102_v43  ;;  %v11359_v62 = vor.u32 %v13624_v52, %v11358_v48  ;;  %v13488_v2 = vld [vmem:[%s20825_s3 + $0x19c] sm:$0xf0] }
 0x2fc   :  { %v9944_v3 = vld [vmem:[%s20823_s1 + $0xab8] sm:$0xf0]  ;;  %v11230_v46 = vld [vmem:[%s20825_s3 + $0x4c0] sm:$0xf] }
 0x2fd   :  { %v13327_v5 = vld [vmem:[%s20823_s1 + $0xc9c] sm:$0xf]  ;;  %v9947_v12 = vor.u32 %v13263_v63, %v9944_v3  ;;  %3933 = vmatpush.bf16.msrb.mxu0 %v9691_v9  ;;  %v10814_v63 = vld [vmem:[%s20825_s3 + $0x180] sm:$0xf] }
 0x2fe   :  { %v10200_v6 = vld [vmem:[%s20823_s1 + $0xcb8] sm:$0xf0]  ;;  %v11070_v3 = vld [vmem:[%s20825_s3 + $0x380] sm:$0xf] }
 0x2ff   :  { %v13391_v35 = vld [vmem:[%s20823_s1 + $0xe9c] sm:$0xf]  ;;  %v10203_v13 = vor.u32 %v13327_v5, %v10200_v6  ;;  %3946 = vmatpush.bf16.msrb.mxu1 %v9947_v12  ;;  %v11615_v5 = vor.u32 %v13688_v56, %v11614_v55  ;;  %v13552_v6 = vld [vmem:[%s20825_s3 + $0x39c] sm:$0xf0]  ;;  %v10815_v12 = vor.u32 %v13488_v2, %v10814_v63 }
 0x300   :  { %v10456_v8 = vld [vmem:[%s20823_s1 + $0xeb8] sm:$0xf0]  ;;  %v11582_v9 = vld [vmem:[%s20825_s3 + $0x780] sm:$0xf] }
 0x301   :  { %v13191_v1 = vld [vmem:[%s20823_s1 + $0x85c] sm:$0xf]  ;;  %v10459_v18 = vor.u32 %v13391_v35, %v10456_v8  ;;  %3959 = vmatpush.bf16.msrb.mxu2 %v10203_v13  ;;  %v11326_v35 = vld [vmem:[%s20825_s3 + $0x580] sm:$0xf]  ;;  %v11071_v13 = vor.u32 %v13552_v6, %v11070_v3  ;;  %v17439_v6 = vpop.f32.mrf.mxu3 }
 0x302   :  { %v9656_v15 = vld [vmem:[%s20823_s1 + $0x878] sm:$0xf0]  ;;  %v13616_v8 = vld [vmem:[%s20825_s3 + $0x59c] sm:$0xf0] }
 0x303   :  { %v13255_v16 = vld [vmem:[%s20823_s1 + $0xa5c] sm:$0xf]  ;;  %v9659_v22 = vor.u32 %v13191_v1, %v9656_v15  ;;  %3972 = vmatpush.bf16.msrb.mxu3 %v10459_v18  ;;  %v11327_v1 = vor.u32 %v13616_v8, %v11326_v35  ;;  %v10782_v15 = vld [vmem:[%s20825_s3 + $0x140] sm:$0xf]  ;;  %v11583_v18 = vor.u32 %v13680_v11, %v11582_v9 }
 0x304   :  { %v9912_v19 = vld [vmem:[%s20823_s1 + $0xa78] sm:$0xf0]  ;;  %v13592_v48 = vld [vmem:[%s20825_s3 + $0x4dc] sm:$0xf0] }
 0x305   :  { %v13319_v20 = vld [vmem:[%s20823_s1 + $0xc5c] sm:$0xf]  ;;  %v9915_v24 = vor.u32 %v13255_v16, %v9912_v19  ;;  %3934 = vmatpush.bf16.msrb.mxu0 %v9659_v22  ;;  %v13480_v16 = vld [vmem:[%s20825_s3 + $0x15c] sm:$0xf0]  ;;  %v11231_v56 = vor.u32 %v13592_v48, %v11230_v46  ;;  %v3980_v48 = vmax.f32 %v15435_v50, 0.0 }
 0x306   :  { %v10168_v49 = vld [vmem:[%s20823_s1 + $0xc78] sm:$0xf0]  ;;  %v13544_v19 = vld [vmem:[%s20825_s3 + $0x35c] sm:$0xf0] }
 0x307   :  { %v13383_v21 = vld [vmem:[%s20823_s1 + $0xe5c] sm:$0xf]  ;;  %v10171_v25 = vor.u32 %v13319_v20, %v10168_v49  ;;  %3947 = vmatpush.bf16.msrb.mxu1 %v9915_v24  ;;  %v11294_v20 = vld [vmem:[%s20825_s3 + $0x540] sm:$0xf]  ;;  %v11039_v22 = vor.u32 %v13544_v19, %v11038_v17  ;;  %v3744_v17 = vpop.f32.mrf.mxu1 }
 0x308   :  { %v10424_v33 = vld [vmem:[%s20823_s1 + $0xe78] sm:$0xf0]  ;;  %v13608_v49 = vld [vmem:[%s20825_s3 + $0x55c] sm:$0xf0] }
 0x309   :  { %v13183_v23 = vld [vmem:[%s20823_s1 + $0x81c] sm:$0xf]  ;;  %v10427_v27 = vor.u32 %v13383_v21, %v10424_v33  ;;  %3960 = vmatpush.bf16.msrb.mxu2 %v10171_v25  ;;  %v13672_v21 = vld [vmem:[%s20825_s3 + $0x75c] sm:$0xf0]  ;;  %v10783_v33 = vor.u32 %v13480_v16, %v10782_v15 }
 0x30a   :  { %v9624_v51 = vld [vmem:[%s20823_s1 + $0x838] sm:$0xf0]  ;;  %v13536_v24 = vld [vmem:[%s20825_s3 + $0x31c] sm:$0xf0] }
 0x30b   :  { %v13247_v34 = vld [vmem:[%s20823_s1 + $0xa1c] sm:$0xf]  ;;  %v9627_v44 = vor.u32 %v13183_v23, %v9624_v51  ;;  %3973 = vmatpush.bf16.msrb.mxu3 %v10427_v27  ;;  %v11295_v23 = vor.u32 %v13608_v49, %v11294_v20  ;;  %v11006_v51 = vld [vmem:[%s20825_s3 + $0x300] sm:$0xf]  ;;  %v17391_v27 = vpop.f32.mrf.mxu0 }
 0x30c   :  { %v9880_v41 = vld [vmem:[%s20823_s1 + $0xa38] sm:$0xf0]  ;;  %v11262_v25 = vld [vmem:[%s20825_s3 + $0x500] sm:$0xf] }
 0x30d   :  { %v13311_v42 = vld [vmem:[%s20823_s1 + $0xc1c] sm:$0xf]  ;;  %v9883_v4 = vor.u32 %v13247_v34, %v9880_v41  ;;  %3935 = vmatpush.bf16.msrb.mxu0 %v9627_v44  ;;  %v13600_v34 = vld [vmem:[%s20825_s3 + $0x51c] sm:$0xf0] }
 0x30e   :  { %v10136_v28 = vld [vmem:[%s20823_s1 + $0xc38] sm:$0xf0]  ;;  %v11518_v41 = vld [vmem:[%s20825_s3 + $0x700] sm:$0xf] }
 0x30f   :  { %v13375_v58 = vld [vmem:[%s20823_s1 + $0xe1c] sm:$0xf]  ;;  %v10139_v53 = vor.u32 %v13311_v42, %v10136_v28  ;;  %3948 = vmatpush.bf16.msrb.mxu1 %v9883_v4  ;;  %v13664_v42 = vld [vmem:[%s20825_s3 + $0x71c] sm:$0xf0]  ;;  %v11007_v28 = vor.u32 %v13536_v24, %v11006_v51 }
 0x310   :  { %v10392_v29 = vld [vmem:[%s20823_s1 + $0xe38] sm:$0xf0]  ;;  %3936 = vmatmul.bf16.vlgmr.msrb.gmra.mxu0 %v14539_v37  ;;  %v11550_v37 = vld [vmem:[%s20825_s3 + $0x740] sm:$0xf]  ;;  %v11519_v43 = vor.u32 %v13664_v42, %v11518_v41 }
 0x311   :  { %v10395_v57 = vor.u32 %v13375_v58, %v10392_v29  ;;  %3961 = vmatpush.bf16.msrb.mxu2 %v10139_v53  ;;  %7086 = vmatpush.bf16.msra.mxu0 %v10847_v59  ;;  %v11263_v58 = vor.u32 %v13600_v34, %v11262_v25  ;;  %v10718_v29 = vld [vmem:[%s20825_s3 + $0xc0] sm:$0xf] }
 0x312   :  { %3949 = vmatmul.bf16.vlgmr.msrb.gmra.mxu1 %v14543_v40  ;;  %v13472_v40 = vld [vmem:[%s20825_s3 + $0x11c] sm:$0xf0]  ;;  %v10719_v53 = vor.u32 %v13464_v31, %v10718_v29 }
 0x313   :  { %3974 = vmatpush.bf16.msrb.mxu3 %v10395_v57  ;;  %7099 = vmatpush.bf16.msra.mxu1 %v11103_v60  ;;  %v13528_v44 = vld [vmem:[%s20825_s3 + $0x2dc] sm:$0xf0]  ;;  %v3731_v11 = vpop.f32.mrf.mxu0 }
 0x314   :  { %3962 = vmatmul.bf16.vlgmr.msrb.gmra.mxu2 %v14531_v32  ;;  %v10750_v32 = vld [vmem:[%s20825_s3 + $0x100] sm:$0xf]  ;;  %v10975_v55 = vor.u32 %v13528_v44, %v10974_v36 }
 0x315   :  { %7112 = vmatpush.bf16.msra.mxu2 %v11359_v62  ;;  %7087 = vmatpush.bf16.msra.mxu0 %v10815_v12  ;;  %v10751_v26 = vor.u32 %v13472_v40, %v10750_v32  ;;  %v11486_v52 = vld [vmem:[%s20825_s3 + $0x6c0] sm:$0xf]  ;;  %v17428_v62 = vpop.f32.mrf.mxu2 }
 0x316   :  { %3975 = vmatmul.bf16.vlgmr.msrb.gmra.mxu3 %v14541_v38  ;;  %v11551_v38 = vor.u32 %v13672_v21, %v11550_v37  ;;  %v13656_v4 = vld [vmem:[%s20825_s3 + $0x6dc] sm:$0xf0]  ;;  %v577_v37 = vperm.slane %v16772_v14, 5 }
 0x317   :  { %7125 = vmatpush.bf16.msra.mxu3 %v11615_v5  ;;  %7100 = vmatpush.bf16.msra.mxu1 %v11071_v13  ;;  %v10686_v57 = vld [vmem:[%s20825_s3 + $0x80] sm:$0xf]  ;;  %v11487_v63 = vor.u32 %v13656_v4, %v11486_v52  ;;  %v3981_v52 = vmax.f32 %v15833_v47, 0.0 }
 0x318   :  { %v13456_v59 = vld [vmem:[%s20825_s3 + $0x9c] sm:$0xf0] }
 0x319   :  { %7113 = vmatpush.bf16.msra.mxu2 %v11327_v1  ;;  %7088 = vmatpush.bf16.msra.mxu0 %v10783_v33  ;;  %v10942_v60 = vld [vmem:[%s20825_s3 + $0x280] sm:$0xf]  ;;  %v10687_v9 = vor.u32 %v13456_v59, %v10686_v57 }
 0x31a   :  { %v13520_v2 = vld [vmem:[%s20825_s3 + $0x29c] sm:$0xf0] }
 0x31b   :  { %7126 = vmatpush.bf16.msra.mxu3 %v11583_v18  ;;  %7101 = vmatpush.bf16.msra.mxu1 %v11039_v22  ;;  %v11198_v3 = vld [vmem:[%s20825_s3 + $0x480] sm:$0xf]  ;;  %v10943_v12 = vor.u32 %v13520_v2, %v10942_v60 }
 0x31c   :  { %v13584_v5 = vld [vmem:[%s20825_s3 + $0x49c] sm:$0xf0] }
 0x31d   :  { %7114 = vmatpush.bf16.msra.mxu2 %v11295_v23  ;;  %7089 = vmatpush.bf16.msra.mxu0 %v10751_v26  ;;  %v11454_v35 = vld [vmem:[%s20825_s3 + $0x680] sm:$0xf]  ;;  %v11199_v13 = vor.u32 %v13584_v5, %v11198_v3  ;;  %v3757_v25 = vpop.f32.mrf.mxu2  ;;  %v17538_v5 = vpack.c.bf16 %v3980_v48, %v3980_v48 }
 0x31e   :  { %v13648_v8 = vld [vmem:[%s20825_s3 + $0x69c] sm:$0xf0] }
 0x31f   :  { %7127 = vmatpush.bf16.msra.mxu3 %v11551_v38  ;;  %7102 = vmatpush.bf16.msra.mxu1 %v11007_v28  ;;  %v10654_v1 = vld [vmem:[%s20825_s3 + $0x40] sm:$0xf]  ;;  %v11455_v18 = vor.u32 %v13648_v8, %v11454_v35  ;;  %v3770_v28 = vpop.f32.mrf.mxu3  ;;  %v17540_v35 = vpack.c.bf16 %v3981_v52, %v3981_v52 }
 0x320   :  { %v13448_v15 = vld [vmem:[%s20825_s3 + $0x5c] sm:$0xf0] }
 0x321   :  { %7115 = vmatpush.bf16.msra.mxu2 %v11263_v58  ;;  %7090 = vmatpush.bf16.msra.mxu0 %v10719_v53  ;;  %v10910_v16 = vld [vmem:[%s20825_s3 + $0x240] sm:$0xf]  ;;  %v10655_v22 = vor.u32 %v13448_v15, %v10654_v1  ;;  %v3678_v58 = vadd.f32 %v17187_v30, %v577_v37 }
 0x322   :  { %v13512_v19 = vld [vmem:[%s20825_s3 + $0x25c] sm:$0xf0] }
 0x323   :  { %7128 = vmatpush.bf16.msra.mxu3 %v11519_v43  ;;  %7103 = vmatpush.bf16.msra.mxu1 %v10975_v55  ;;  %v11166_v20 = vld [vmem:[%s20825_s3 + $0x440] sm:$0xf]  ;;  %v10911_v14 = vor.u32 %v13512_v19, %v10910_v16  ;;  %v3982_v55 = vmax.f32 %v16236_v54, 0.0  ;;  %v3691_v60 = vadd.f32 %v17198_v45, %v3678_v58 }
 0x324   :  { %v13576_v49 = vld [vmem:[%s20825_s3 + $0x45c] sm:$0xf0] }
 0x325   :  { %7116 = vmatpush.bf16.msra.mxu2 %v11231_v56  ;;  %v11422_v21 = vld [vmem:[%s20825_s3 + $0x640] sm:$0xf]  ;;  %7091 = vmatpush.bf16.msra.mxu0 %v10687_v9  ;;  %v11167_v40 = vor.u32 %v13576_v49, %v11166_v20  ;;  %v3983_v56 = vmax.f32 %v16634_v61, 0.0  ;;  %v17542_v8 = vpack.c.bf16 %v3982_v55, %v3982_v55  ;;  %v17621_v48 = vpop.f32.mrf.mxu2 }
 0x326   :  { %v13640_v33 = vld [vmem:[%s20825_s3 + $0x65c] sm:$0xf0] }
 0x327   :  { %7129 = vmatpush.bf16.msra.mxu3 %v11487_v63  ;;  %v10622_v23 = vld [vmem:[%s20825_s3] sm:$0xf]  ;;  %7104 = vmatpush.bf16.msra.mxu1 %v10943_v12  ;;  %v11423_v34 = vor.u32 %v13640_v33, %v11422_v21  ;;  %v17544_v9 = vpack.c.bf16 %v3983_v56, %v3983_v56  ;;  %v3704_v12 = vadd.f32 %v17224_v0, %v3691_v60 }
 0x328   :  { %v13440_v32 = vld [vmem:[%s20825_s3 + $0x1c] sm:$0xf0] }
 0x329   :  { %7117 = vmatpush.bf16.msra.mxu2 %v11199_v13  ;;  %v10878_v51 = vld [vmem:[%s20825_s3 + $0x200] sm:$0xf]  ;;  %7092 = vmatpush.bf16.msra.mxu0 %v10655_v22  ;;  %v10623_v43 = vor.u32 %v13440_v32, %v10622_v23  ;;  %v3717_v49 = vadd.f32 %v17235_v7, %v3704_v12 }
 0x32a   :  { %v13504_v38 = vld [vmem:[%s20825_s3 + $0x21c] sm:$0xf0] }
 0x32b   :  { %v11134_v24 = vld [vmem:[%s20825_s3 + $0x400] sm:$0xf]  ;;  %7130 = vmatpush.bf16.msra.mxu3 %v11455_v18  ;;  %7105 = vmatpush.bf16.msra.mxu1 %v10911_v14  ;;  %v10879_v4 = vor.u32 %v13504_v38, %v10878_v51  ;;  %v17588_v51 = vpop.f32.mrf.mxu0  ;;  %v3730_v38 = vadd.f32 %v17391_v27, %v3717_v49 }
 0x32c   :  { %v13568_v41 = vld [vmem:[%s20825_s3 + $0x41c] sm:$0xf0] }
 0x32d   :  { %v11390_v42 = vld [vmem:[%s20825_s3 + $0x600] sm:$0xf]  ;;  %7118 = vmatpush.bf16.msra.mxu2 %v11167_v40  ;;  %v11135_v53 = vor.u32 %v13568_v41, %v11134_v24  ;;  %7093 = vmatpush.bf16.msra.mxu0 %v10623_v43 }
 0x32e   :  { %v13632_v26 = vld [vmem:[%s20825_s3 + $0x61c] sm:$0xf0] }
 0x32f   :  { %v11870_v29 = vld [vmem:[%s20825_s3 + $0x9c0] sm:$0xf]  ;;  %7131 = vmatpush.bf16.msra.mxu3 %v11423_v34  ;;  %v11391_v57 = vor.u32 %v13632_v26, %v11390_v42  ;;  %7106 = vmatpush.bf16.msra.mxu1 %v10879_v4  ;;  %v17600_v26 = vpop.f32.mrf.mxu1 }
 0x330   :  { %v13752_v31 = vld [vmem:[%s20825_s3 + $0x9dc] sm:$0xf0]  ;;  %7094 = vmatmul.bf16.vlgmr.msra.gmra.mxu0 %v17538_v5 }
 0x331   :  { %v12126_v36 = vld [vmem:[%s20825_s3 + $0xbc0] sm:$0xf]  ;;  %v11871_v59 = vor.u32 %v13752_v31, %v11870_v29  ;;  %7119 = vmatpush.bf16.msra.mxu2 %v11135_v53  ;;  %v3743_v31 = vadd.f32 %v17402_v39, %v3730_v38  ;;  %v17632_v53 = vpop.f32.mrf.mxu3  ;;  %v3984_v38 = vmax.f32 %v17037_v10, 0.0 }
 0x332   :  { %v13816_v44 = vld [vmem:[%s20825_s3 + $0xbdc] sm:$0xf0]  ;;  %7107 = vmatmul.bf16.vlgmr.msra.gmra.mxu1 %v17540_v35 }
 0x333   :  { %v12382_v30 = vld [vmem:[%s20825_s3 + $0xdc0] sm:$0xf]  ;;  %v12127_v63 = vor.u32 %v13816_v44, %v12126_v36  ;;  %7132 = vmatpush.bf16.msra.mxu3 %v11391_v57  ;;  %7138 = vmatpush.bf16.msrb.mxu0 %v11871_v59  ;;  %v3783_v56 = vpop.f32.mrf.mxu0  ;;  %v3756_v57 = vadd.f32 %v17428_v62, %v3743_v31  ;;  %v11072_v31 = vld [vmem:[%s20825_s3 + $0x3a0] sm:$0xf0] }
 0x334   :  { %v13880_v46 = vld [vmem:[%s20825_s3 + $0xddc] sm:$0xf0]  ;;  %7120 = vmatmul.bf16.vlgmr.msra.gmra.mxu2 %v17542_v8  ;;  %v10784_v56 = vld [vmem:[%s20825_s3 + $0x160] sm:$0xf0] }
 0x335   :  { %v12383_v2 = vor.u32 %v13880_v46, %v12382_v30  ;;  %v11838_v50 = vld [vmem:[%s20825_s3 + $0x980] sm:$0xf]  ;;  %7151 = vmatpush.bf16.msrb.mxu1 %v12127_v63 }
 0x336   :  { %v13744_v47 = vld [vmem:[%s20825_s3 + $0x99c] sm:$0xf0]  ;;  %7133 = vmatmul.bf16.vlgmr.msra.gmra.mxu3 %v17544_v9 }
 0x337   :  { %v12094_v54 = vld [vmem:[%s20825_s3 + $0xb80] sm:$0xf]  ;;  %v11839_v11 = vor.u32 %v13744_v47, %v11838_v50  ;;  %7164 = vmatpush.bf16.msrb.mxu2 %v12383_v2  ;;  %v3796_v47 = vpop.f32.mrf.mxu1 }
 0x338   :  { %v13808_v61 = vld [vmem:[%s20825_s3 + $0xb9c] sm:$0xf0]  ;;  %v11296_v47 = vld [vmem:[%s20825_s3 + $0x560] sm:$0xf0] }
 0x339   :  { %v12350_v45 = vld [vmem:[%s20825_s3 + $0xd80] sm:$0xf]  ;;  %v12095_v13 = vor.u32 %v13808_v61, %v12094_v54  ;;  %7139 = vmatpush.bf16.msrb.mxu0 %v11839_v11  ;;  %v3822_v49 = vpop.f32.mrf.mxu3 }
 0x33a   :  { %v13872_v3 = vld [vmem:[%s20825_s3 + $0xd9c] sm:$0xf0]  ;;  %v13460_v49 = vld [vmem:[%s20825_s3 + $0xc4] sm:$0xf] }
 0x33b   :  { %v12351_v1 = vor.u32 %v13872_v3, %v12350_v45  ;;  %v11806_v15 = vld [vmem:[%s20825_s3 + $0x940] sm:$0xf]  ;;  %7152 = vmatpush.bf16.msrb.mxu1 %v12095_v13 }
 0x33c   :  { %v13736_v16 = vld [vmem:[%s20825_s3 + $0x95c] sm:$0xf0] }
 0x33d   :  { %v12062_v17 = vld [vmem:[%s20825_s3 + $0xb40] sm:$0xf]  ;;  %v11807_v20 = vor.u32 %v13736_v16, %v11806_v15  ;;  %7165 = vmatpush.bf16.msrb.mxu2 %v12351_v1  ;;  %v3769_v15 = vadd.f32 %v17439_v6, %v3756_v57  ;;  %v13492_v6 = vld [vmem:[%s20825_s3 + $0x1c4] sm:$0xf] }
 0x33e   :  { %v13800_v0 = vld [vmem:[%s20825_s3 + $0xb5c] sm:$0xf0]  ;;  %v13540_v57 = vld [vmem:[%s20825_s3 + $0x344] sm:$0xf] }
 0x33f   :  { %v12318_v18 = vld [vmem:[%s20825_s3 + $0xd40] sm:$0xf]  ;;  %v12063_v37 = vor.u32 %v13800_v0, %v12062_v17  ;;  %7140 = vmatpush.bf16.msrb.mxu0 %v11807_v20  ;;  %v3809_v20 = vpop.f32.mrf.mxu2 }
 0x340   :  { %v13864_v19 = vld [vmem:[%s20825_s3 + $0xd5c] sm:$0xf0] }
 0x341   :  { %v12319_v21 = vor.u32 %v13864_v19, %v12318_v18  ;;  %v11774_v33 = vld [vmem:[%s20825_s3 + $0x900] sm:$0xf]  ;;  %7153 = vmatpush.bf16.msrb.mxu1 %v12063_v37 }
 0x342   :  { %v13728_v22 = vld [vmem:[%s20825_s3 + $0x91c] sm:$0xf0] }
 0x343   :  { %v12030_v23 = vld [vmem:[%s20825_s3 + $0xb00] sm:$0xf]  ;;  %v11775_v40 = vor.u32 %v13728_v22, %v11774_v33  ;;  %7166 = vmatpush.bf16.msrb.mxu2 %v12319_v21  ;;  %v10848_v22 = vld [vmem:[%s20825_s3 + $0x1e0] sm:$0xf0] }
 0x344   :  { %v13792_v7 = vld [vmem:[%s20825_s3 + $0xb1c] sm:$0xf0] }
 0x345   :  { %v12286_v32 = vld [vmem:[%s20825_s3 + $0xd00] sm:$0xf]  ;;  %v12031_v24 = vor.u32 %v13792_v7, %v12030_v23  ;;  %7141 = vmatpush.bf16.msrb.mxu0 %v11775_v40  ;;  %v13556_v23 = vld [vmem:[%s20825_s3 + $0x3c4] sm:$0xf] }
 0x346   :  { %v13856_v14 = vld [vmem:[%s20825_s3 + $0xd1c] sm:$0xf0]  ;;  %v11104_v7 = vld [vmem:[%s20825_s3 + $0x3e0] sm:$0xf0] }
 0x347   :  { %v12287_v25 = vor.u32 %v13856_v14, %v12286_v32  ;;  %v11742_v34 = vld [vmem:[%s20825_s3 + $0x8c0] sm:$0xf]  ;;  %7154 = vmatpush.bf16.msrb.mxu1 %v12031_v24  ;;  %v13620_v40 = vld [vmem:[%s20825_s3 + $0x5c4] sm:$0xf]  ;;  %v3985_v24 = vmax.f32 %v3769_v15, 0.0 }
 0x348   :  { %v13720_v41 = vld [vmem:[%s20825_s3 + $0x8dc] sm:$0xf0]  ;;  %v10752_v15 = vld [vmem:[%s20825_s3 + $0x120] sm:$0xf0] }
 0x349   :  { %v11998_v42 = vld [vmem:[%s20825_s3 + $0xac0] sm:$0xf]  ;;  %v11743_v29 = vor.u32 %v13720_v41, %v11742_v34  ;;  %7167 = vmatpush.bf16.msrb.mxu2 %v12287_v25  ;;  %v10851_v41 = vor.u32 %v13492_v6, %v10848_v22  ;;  %v3833_v6 = vpop.f32.mrf.mxu0 }
 0x34a   :  { %v13784_v27 = vld [vmem:[%s20825_s3 + $0xadc] sm:$0xf0] }
 0x34b   :  { %v12254_v28 = vld [vmem:[%s20825_s3 + $0xcc0] sm:$0xf]  ;;  %v11999_v36 = vor.u32 %v13784_v27, %v11998_v42  ;;  %7142 = vmatpush.bf16.msrb.mxu0 %v11743_v29  ;;  %v11107_v42 = vor.u32 %v13556_v23, %v11104_v7  ;;  %v13484_v27 = vld [vmem:[%s20825_s3 + $0x184] sm:$0xf]  ;;  %v3846_v23 = vpop.f32.mrf.mxu1 }
 0x34c   :  { %v13848_v58 = vld [vmem:[%s20825_s3 + $0xcdc] sm:$0xf0]  ;;  %v10720_v7 = vld [vmem:[%s20825_s3 + $0xe0] sm:$0xf0] }
 0x34d   :  { %v12255_v43 = vor.u32 %v13848_v58, %v12254_v28  ;;  %v11710_v44 = vld [vmem:[%s20825_s3 + $0x880] sm:$0xf]  ;;  %7155 = vmatpush.bf16.msrb.mxu1 %v11999_v36  ;;  %v10816_v28 = vld [vmem:[%s20825_s3 + $0x1a0] sm:$0xf0] }
 0x34e   :  { %v13712_v30 = vld [vmem:[%s20825_s3 + $0x89c] sm:$0xf0]  ;;  %v13548_v58 = vld [vmem:[%s20825_s3 + $0x384] sm:$0xf] }
 0x34f   :  { %v11966_v46 = vld [vmem:[%s20825_s3 + $0xa80] sm:$0xf]  ;;  %v11711_v55 = vor.u32 %v13712_v30, %v11710_v44  ;;  %7168 = vmatpush.bf16.msrb.mxu2 %v12255_v43  ;;  %v13612_v44 = vld [vmem:[%s20825_s3 + $0x584] sm:$0xf] }
 0x350   :  { %v13776_v39 = vld [vmem:[%s20825_s3 + $0xa9c] sm:$0xf0] }
 0x351   :  { %v12222_v52 = vld [vmem:[%s20825_s3 + $0xc80] sm:$0xf]  ;;  %v11967_v59 = vor.u32 %v13776_v39, %v11966_v46  ;;  %7143 = vmatpush.bf16.msrb.mxu0 %v11711_v55  ;;  %v17729_v46 = vpack.c.bf16 %v3984_v38, %v3984_v38  ;;  %v17731_v39 = vpack.c.bf16 %v3985_v24, %v3985_v24  ;;  %v13476_v55 = vld [vmem:[%s20825_s3 + $0x144] sm:$0xf] }
 0x352   :  { %v13840_v4 = vld [vmem:[%s20825_s3 + $0xc9c] sm:$0xf0] }
 0x353   :  { %v12223_v60 = vor.u32 %v13840_v4, %v12222_v52  ;;  %v11678_v63 = vld [vmem:[%s20825_s3 + $0x840] sm:$0xf]  ;;  %7156 = vmatpush.bf16.msrb.mxu1 %v11967_v59  ;;  %v10819_v52 = vor.u32 %v13484_v27, %v10816_v28  ;;  %v11075_v4 = vor.u32 %v13548_v58, %v11072_v31  ;;  %v3859_v58 = vpop.f32.mrf.mxu2  ;;  %v10944_v31 = vld [vmem:[%s20825_s3 + $0x2a0] sm:$0xf0] }
 0x354   :  { %v13704_v2 = vld [vmem:[%s20825_s3 + $0x85c] sm:$0xf0] }
 0x355   :  { %v11934_v50 = vld [vmem:[%s20825_s3 + $0xa40] sm:$0xf]  ;;  %v11679_v11 = vor.u32 %v13704_v2, %v11678_v63  ;;  %7169 = vmatpush.bf16.msrb.mxu2 %v12223_v60  ;;  %v11040_v63 = vld [vmem:[%s20825_s3 + $0x360] sm:$0xf0] }
 0x356   :  { %v13768_v62 = vld [vmem:[%s20825_s3 + $0xa5c] sm:$0xf0] }
 0x357   :  { %v12190_v54 = vld [vmem:[%s20825_s3 + $0xc40] sm:$0xf]  ;;  %v11935_v16 = vor.u32 %v13768_v62, %v11934_v50  ;;  %7144 = vmatpush.bf16.msrb.mxu0 %v11679_v11 }
 0x358   :  { %v13832_v61 = vld [vmem:[%s20825_s3 + $0xc5c] sm:$0xf0] }
 0x359   :  { %v17656_v45 = vld [vmem:[%s20824_s2] sm:$0xff]  ;;  %v12191_v17 = vor.u32 %v13832_v61, %v12190_v54  ;;  %7157 = vmatpush.bf16.msrb.mxu1 %v11935_v16  ;;  %v10787_v54 = vor.u32 %v13476_v55, %v10784_v56  ;;  %v11043_v61 = vor.u32 %v13540_v57, %v11040_v63  ;;  %v3835_v57 = vpop.f32.mrf.mxu0 }
 0x35a   :  { %v578_v3 = vperm.slane %v17656_v45, 6  ;;  %v11646_v12 = vld [vmem:[%s20825_s3 + $0x800] sm:$0xf]  ;;  %v13532_v16 = vld [vmem:[%s20825_s3 + $0x304] sm:$0xf] }
 0x35b   :  { %v13696_v13 = vld [vmem:[%s20825_s3 + $0x81c] sm:$0xf0]  ;;  %7170 = vmatpush.bf16.msrb.mxu2 %v12191_v17  ;;  %v11008_v17 = vld [vmem:[%s20825_s3 + $0x320] sm:$0xf0] }
 0x35c   :  { %v11902_v1 = vld [vmem:[%s20825_s3 + $0xa00] sm:$0xf]  ;;  %v3782_v33 = vadd.f32 %v17588_v51, %v578_v3  ;;  %v11647_v14 = vor.u32 %v13696_v13, %v11646_v12  ;;  %v11360_v51 = vld [vmem:[%s20825_s3 + $0x5e0] sm:$0xf0]  ;;  %v11011_v20 = vor.u32 %v13532_v16, %v11008_v17 }
 0x35d   :  { %v13760_v0 = vld [vmem:[%s20825_s3 + $0xa1c] sm:$0xf0]  ;;  %v11363_v29 = vor.u32 %v13620_v40, %v11360_v51  ;;  %v13468_v3 = vld [vmem:[%s20825_s3 + $0x104] sm:$0xf] }
 0x35e   :  { %v12158_v18 = vld [vmem:[%s20825_s3 + $0xc00] sm:$0xf]  ;;  %v11903_v25 = vor.u32 %v13760_v0, %v11902_v1  ;;  %v3795_v10 = vadd.f32 %v17600_v26, %v3782_v33  ;;  %7145 = vmatpush.bf16.msrb.mxu0 %v11647_v14  ;;  %v11328_v26 = vld [vmem:[%s20825_s3 + $0x5a0] sm:$0xf0] }
 0x35f   :  { %v13824_v19 = vld [vmem:[%s20825_s3 + $0xc1c] sm:$0xf0]  ;;  %v11331_v60 = vor.u32 %v13612_v44, %v11328_v26  ;;  %v13596_v0 = vld [vmem:[%s20825_s3 + $0x504] sm:$0xf] }
 0x360   :  { %v12638_v37 = vld [vmem:[%s20825_s3 + $0xfc0] sm:$0xf]  ;;  %v12159_v34 = vor.u32 %v13824_v19, %v12158_v18  ;;  %7158 = vmatpush.bf16.msrb.mxu1 %v11903_v25  ;;  %v3808_v59 = vadd.f32 %v17621_v48, %v3795_v10  ;;  %v13604_v48 = vld [vmem:[%s20825_s3 + $0x544] sm:$0xf]  ;;  %v10755_v19 = vor.u32 %v13468_v3, %v10752_v15  ;;  %v10723_v25 = vor.u32 %v13460_v49, %v10720_v7 }
 0x361   :  { %v13944_v21 = vld [vmem:[%s20825_s3 + $0xfdc] sm:$0xf0]  ;;  %7146 = vmatmul.bf16.vlgmr.msrb.gmra.mxu0 %v17729_v46  ;;  %v11299_v1 = vor.u32 %v13604_v48, %v11296_v47  ;;  %v10976_v14 = vld [vmem:[%s20825_s3 + $0x2e0] sm:$0xf0]  ;;  %v3848_v47 = vpop.f32.mrf.mxu1 }
 0x362   :  { %v12639_v32 = vor.u32 %v13944_v21, %v12638_v37  ;;  %v12606_v36 = vld [vmem:[%s20825_s3 + $0xf80] sm:$0xf]  ;;  %7171 = vmatpush.bf16.msrb.mxu2 %v12159_v34  ;;  %7190 = vmatpush.bf16.msra.mxu0 %v10851_v41  ;;  %v3821_v13 = vadd.f32 %v17632_v53, %v3808_v59  ;;  %v11264_v53 = vld [vmem:[%s20825_s3 + $0x520] sm:$0xf0] }
 0x363   :  { %v13936_v43 = vld [vmem:[%s20825_s3 + $0xf9c] sm:$0xf0]  ;;  %7159 = vmatmul.bf16.vlgmr.msrb.gmra.mxu1 %v17731_v39  ;;  %v11267_v33 = vor.u32 %v13596_v0, %v11264_v53  ;;  %v13588_v40 = vld [vmem:[%s20825_s3 + $0x4c4] sm:$0xf] }
 0x364   :  { %7177 = vmatpush.bf16.msrb.mxu3 %v12639_v32  ;;  %v12607_v30 = vor.u32 %v13936_v43, %v12606_v36  ;;  %7203 = vmatpush.bf16.msra.mxu1 %v11107_v42  ;;  %v12574_v2 = vld [vmem:[%s20825_s3 + $0xf40] sm:$0xf]  ;;  %v3834_v22 = vadd.f32 %v3833_v6, %v3821_v13  ;;  %v13524_v32 = vld [vmem:[%s20825_s3 + $0x2c4] sm:$0xf]  ;;  %v3872_v43 = vpop.f32.mrf.mxu3  ;;  %v3861_v6 = vpop.f32.mrf.mxu2 }
 0x365   :  { %v13928_v50 = vld [vmem:[%s20825_s3 + $0xf5c] sm:$0xf0]  ;;  %v11232_v51 = vld [vmem:[%s20825_s3 + $0x4e0] sm:$0xf0]  ;;  %v10979_v34 = vor.u32 %v13524_v32, %v10976_v14 }
 0x366   :  { %7216 = vmatpush.bf16.msra.mxu2 %v11363_v29  ;;  %v12575_v62 = vor.u32 %v13928_v50, %v12574_v2  ;;  %7191 = vmatpush.bf16.msra.mxu0 %v10819_v52  ;;  %v12542_v11 = vld [vmem:[%s20825_s3 + $0xf00] sm:$0xf]  ;;  %v3847_v24 = vadd.f32 %v3846_v23, %v3834_v22  ;;  %v13452_v41 = vld [vmem:[%s20825_s3 + $0x84] sm:$0xf]  ;;  %v11235_v28 = vor.u32 %v13588_v40, %v11232_v51 }
 0x367   :  { %v13920_v12 = vld [vmem:[%s20825_s3 + $0xf1c] sm:$0xf0]  ;;  %v10688_v10 = vld [vmem:[%s20825_s3 + $0xa0] sm:$0xf0] }
 0x368   :  { %7178 = vmatpush.bf16.msrb.mxu3 %v12607_v30  ;;  %7204 = vmatpush.bf16.msra.mxu1 %v11075_v4  ;;  %v12543_v18 = vor.u32 %v13920_v12, %v12542_v11  ;;  %v12510_v37 = vld [vmem:[%s20825_s3 + $0xec0] sm:$0xf]  ;;  %v13516_v29 = vld [vmem:[%s20825_s3 + $0x284] sm:$0xf]  ;;  %v3860_v36 = vadd.f32 %v3859_v58, %v3847_v24  ;;  %v10691_v4 = vor.u32 %v13452_v41, %v10688_v10 }
 0x369   :  { %v13912_v21 = vld [vmem:[%s20825_s3 + $0xedc] sm:$0xf0]  ;;  %v13580_v44 = vld [vmem:[%s20825_s3 + $0x484] sm:$0xf]  ;;  %v10947_v55 = vor.u32 %v13516_v29, %v10944_v31 }
 0x36a   :  { %7217 = vmatpush.bf16.msra.mxu2 %v11331_v60  ;;  %7192 = vmatpush.bf16.msra.mxu0 %v10787_v54  ;;  %v12511_v38 = vor.u32 %v13912_v21, %v12510_v37  ;;  %v12478_v42 = vld [vmem:[%s20825_s3 + $0xe80] sm:$0xf]  ;;  %v11200_v26 = vld [vmem:[%s20825_s3 + $0x4a0] sm:$0xf0]  ;;  %v3873_v52 = vadd.f32 %v3872_v43, %v3860_v36 }
 0x36b   :  { %v13904_v27 = vld [vmem:[%s20825_s3 + $0xe9c] sm:$0xf0]  ;;  %v13444_v56 = vld [vmem:[%s20825_s3 + $0x44] sm:$0xf]  ;;  %v11203_v63 = vor.u32 %v13580_v44, %v11200_v26 }
 0x36c   :  { %7179 = vmatpush.bf16.msrb.mxu3 %v12575_v62  ;;  %7205 = vmatpush.bf16.msra.mxu1 %v11043_v61  ;;  %v12479_v30 = vor.u32 %v13904_v27, %v12478_v42  ;;  %v12446_v59 = vld [vmem:[%s20825_s3 + $0xe40] sm:$0xf]  ;;  %v10656_v2 = vld [vmem:[%s20825_s3 + $0x60] sm:$0xf0]  ;;  %v3986_v62 = vmax.f32 %v3873_v52, 0.0  ;;  %v3874_v23 = vpop.f32.mrf.mxu3 }
 0x36d   :  { %v13896_v60 = vld [vmem:[%s20825_s3 + $0xe5c] sm:$0xf0]  ;;  %v13508_v50 = vld [vmem:[%s20825_s3 + $0x244] sm:$0xf]  ;;  %v10659_v16 = vor.u32 %v13444_v56, %v10656_v2 }
 0x36e   :  { %7218 = vmatpush.bf16.msra.mxu2 %v11299_v1  ;;  %7193 = vmatpush.bf16.msra.mxu0 %v10755_v19  ;;  %v10912_v48 = vld [vmem:[%s20825_s3 + $0x260] sm:$0xf0]  ;;  %v12447_v3 = vor.u32 %v13896_v60, %v12446_v59  ;;  %v17869_v15 = vpack.c.bf16 %v3986_v62, %v3986_v62  ;;  %v12414_v53 = vld [vmem:[%s20825_s3 + $0xe00] sm:$0xf] }
 0x36f   :  { %v13572_v54 = vld [vmem:[%s20825_s3 + $0x444] sm:$0xf]  ;;  %v10915_v17 = vor.u32 %v13508_v50, %v10912_v48 }
 0x370   :  { %7180 = vmatpush.bf16.msrb.mxu3 %v12543_v18  ;;  %7206 = vmatpush.bf16.msra.mxu1 %v11011_v20  ;;  %v11168_v61 = vld [vmem:[%s20825_s3 + $0x460] sm:$0xf0]  ;;  %v13888_v18 = vld [vmem:[%s20825_s3 + $0xe1c] sm:$0xf0] }
 0x371   :  { %v13436_v11 = vld [vmem:[%s20825_s3 + $0x4] sm:$0xf]  ;;  %v11171_v19 = vor.u32 %v13572_v54, %v11168_v61  ;;  %7172 = vmatmul.bf16.vlgmr.msrb.gmra.mxu2 %v17869_v15  ;;  %v12415_v7 = vor.u32 %v13888_v18, %v12414_v53 }
 0x372   :  { %7219 = vmatpush.bf16.msra.mxu2 %v11267_v33  ;;  %7194 = vmatpush.bf16.msra.mxu0 %v10723_v25  ;;  %v10624_v12 = vld [vmem:[%s20825_s3 + $0x20] sm:$0xf0] }
 0x373   :  { %v13500_v13 = vld [vmem:[%s20825_s3 + $0x204] sm:$0xf] }
 0x374   :  { %7181 = vmatpush.bf16.msrb.mxu3 %v12511_v38  ;;  %7207 = vmatpush.bf16.msra.mxu1 %v10979_v34  ;;  %v10880_v1 = vld [vmem:[%s20825_s3 + $0x220] sm:$0xf0]  ;;  %v10627_v38 = vor.u32 %v13436_v11, %v10624_v12 }
 0x375   :  { %v13564_v0 = vld [vmem:[%s20825_s3 + $0x404] sm:$0xf]  ;;  %v10883_v24 = vor.u32 %v13500_v13, %v10880_v1 }
 0x376   :  { %7220 = vmatpush.bf16.msra.mxu2 %v11235_v28  ;;  %7195 = vmatpush.bf16.msra.mxu0 %v10691_v4  ;;  %v11136_v20 = vld [vmem:[%s20825_s3 + $0x420] sm:$0xf0] }
 0x377   :  { %v13684_v49 = vld [vmem:[%s20825_s3 + $0x7c4] sm:$0xf]  ;;  %v11139_v25 = vor.u32 %v13564_v0, %v11136_v20 }
 0x378   :  { %7182 = vmatpush.bf16.msrb.mxu3 %v12479_v30  ;;  %7208 = vmatpush.bf16.msra.mxu1 %v10947_v55  ;;  %v11616_v37 = vld [vmem:[%s20825_s3 + $0x7e0] sm:$0xf0] }
 0x379   :  { %v13748_v21 = vld [vmem:[%s20825_s3 + $0x9c4] sm:$0xf]  ;;  %v11619_v51 = vor.u32 %v13684_v49, %v11616_v37 }
 0x37a   :  { %7221 = vmatpush.bf16.msra.mxu2 %v11203_v63  ;;  %v11872_v33 = vld [vmem:[%s20825_s3 + $0x9e0] sm:$0xf0]  ;;  %7196 = vmatpush.bf16.msra.mxu0 %v10659_v16 }
 0x37b   :  { %v13812_v22 = vld [vmem:[%s20825_s3 + $0xbc4] sm:$0xf]  ;;  %v11875_v34 = vor.u32 %v13748_v21, %v11872_v33  ;;  %v17997_v21 = vpop.f32.mrf.mxu0 }
 0x37c   :  { %7183 = vmatpush.bf16.msrb.mxu3 %v12447_v3  ;;  %v12128_v32 = vld [vmem:[%s20825_s3 + $0xbe0] sm:$0xf0]  ;;  %7209 = vmatpush.bf16.msra.mxu1 %v10915_v17 }
 0x37d   :  { %v13876_v14 = vld [vmem:[%s20825_s3 + $0xdc4] sm:$0xf]  ;;  %v12131_v27 = vor.u32 %v13812_v22, %v12128_v32  ;;  %v18003_v22 = vpop.f32.mrf.mxu1 }
 0x37e   :  { %v12384_v40 = vld [vmem:[%s20825_s3 + $0xde0] sm:$0xf0]  ;;  %7222 = vmatpush.bf16.msra.mxu2 %v11171_v19  ;;  %7197 = vmatpush.bf16.msra.mxu0 %v10627_v38 }
 0x37f   :  { %v13740_v41 = vld [vmem:[%s20825_s3 + $0x984] sm:$0xf]  ;;  %v12387_v28 = vor.u32 %v13876_v14, %v12384_v40 }
 0x380   :  { %v11840_v42 = vld [vmem:[%s20825_s3 + $0x9a0] sm:$0xf0]  ;;  %7184 = vmatpush.bf16.msrb.mxu3 %v12415_v7  ;;  %7210 = vmatpush.bf16.msra.mxu1 %v10883_v24 }
 0x381   :  { %v13804_v58 = vld [vmem:[%s20825_s3 + $0xb84] sm:$0xf]  ;;  %v11843_v26 = vor.u32 %v13740_v41, %v11840_v42  ;;  %7198 = vmatmul.bf16.vlgmr.msra.gmra.mxu0 %v17538_v5 }
 0x382   :  { %v13676_v10 = vld [vmem:[%s20825_s3 + $0x784] sm:$0xf]  ;;  %7223 = vmatpush.bf16.msra.mxu2 %v11139_v25  ;;  %7242 = vmatpush.bf16.msrb.mxu0 %v11875_v34 }
 0x383   :  { %v11584_v29 = vld [vmem:[%s20825_s3 + $0x7a0] sm:$0xf0]  ;;  %7211 = vmatmul.bf16.vlgmr.msra.gmra.mxu1 %v17540_v35 }
 0x384   :  { %v12096_v31 = vld [vmem:[%s20825_s3 + $0xba0] sm:$0xf0]  ;;  %7229 = vmatpush.bf16.msra.mxu3 %v11619_v51  ;;  %v11587_v44 = vor.u32 %v13676_v10, %v11584_v29  ;;  %7255 = vmatpush.bf16.msrb.mxu1 %v12131_v27  ;;  %v18037_v10 = vpop.f32.mrf.mxu3 }
 0x385   :  { %v13868_v36 = vld [vmem:[%s20825_s3 + $0xd84] sm:$0xf]  ;;  %v12099_v4 = vor.u32 %v13804_v58, %v12096_v31  ;;  %7224 = vmatmul.bf16.vlgmr.msra.gmra.mxu2 %v17542_v8  ;;  %v18035_v58 = vpop.f32.mrf.mxu2 }
 0x386   :  { %v12352_v43 = vld [vmem:[%s20825_s3 + $0xda0] sm:$0xf0]  ;;  %7268 = vmatpush.bf16.msrb.mxu2 %v12387_v28  ;;  %7243 = vmatpush.bf16.msrb.mxu0 %v11843_v26 }
 0x387   :  { %v13732_v30 = vld [vmem:[%s20825_s3 + $0x944] sm:$0xf]  ;;  %v12355_v55 = vor.u32 %v13868_v36, %v12352_v43 }
 0x388   :  { %v11808_v52 = vld [vmem:[%s20825_s3 + $0x960] sm:$0xf0]  ;;  %7230 = vmatpush.bf16.msra.mxu3 %v11587_v44  ;;  %7256 = vmatpush.bf16.msrb.mxu1 %v12099_v4 }
 0x389   :  { %v13796_v56 = vld [vmem:[%s20825_s3 + $0xb44] sm:$0xf]  ;;  %v11811_v48 = vor.u32 %v13732_v30, %v11808_v52 }
 0x38a   :  { %v12064_v57 = vld [vmem:[%s20825_s3 + $0xb60] sm:$0xf0]  ;;  %7269 = vmatpush.bf16.msrb.mxu2 %v12355_v55  ;;  %v3887_v55 = vpop.f32.mrf.mxu0 }
 0x38b   :  { %v13860_v59 = vld [vmem:[%s20825_s3 + $0xd44] sm:$0xf]  ;;  %v12067_v54 = vor.u32 %v13796_v56, %v12064_v57  ;;  %7244 = vmatpush.bf16.msrb.mxu0 %v11811_v48  ;;  %v3900_v57 = vpop.f32.mrf.mxu1  ;;  %v13473_v55 = vld [vmem:[%s20825_s3 + $0x124] sm:$0xf0] }
 0x38c   :  { %v12320_v60 = vld [vmem:[%s20825_s3 + $0xd60] sm:$0xf0]  ;;  %v11270_v57 = vld [vmem:[%s20825_s3 + $0x508] sm:$0xf] }
 0x38d   :  { %v13668_v63 = vld [vmem:[%s20825_s3 + $0x744] sm:$0xf]  ;;  %v12323_v61 = vor.u32 %v13860_v59, %v12320_v60  ;;  %7257 = vmatpush.bf16.msrb.mxu1 %v12067_v54 }
 0x38e   :  { %v11552_v2 = vld [vmem:[%s20825_s3 + $0x760] sm:$0xf0] }
 0x38f   :  { %v11555_v50 = vor.u32 %v13668_v63, %v11552_v2  ;;  %v13724_v47 = vld [vmem:[%s20825_s3 + $0x904] sm:$0xf]  ;;  %7270 = vmatpush.bf16.msrb.mxu2 %v12323_v61  ;;  %v579_v63 = vperm.slane %v17656_v45, 7 }
 0x390   :  { %v11776_v62 = vld [vmem:[%s20825_s3 + $0x920] sm:$0xf0] }
 0x391   :  { %v13788_v3 = vld [vmem:[%s20825_s3 + $0xb04] sm:$0xf]  ;;  %7231 = vmatpush.bf16.msra.mxu3 %v11555_v50  ;;  %v11779_v0 = vor.u32 %v13724_v47, %v11776_v62 }
 0x392   :  { %v13660_v11 = vld [vmem:[%s20825_s3 + $0x704] sm:$0xf] }
 0x393   :  { %v11520_v12 = vld [vmem:[%s20825_s3 + $0x720] sm:$0xf0]  ;;  %7245 = vmatpush.bf16.msrb.mxu0 %v11779_v0  ;;  %v11110_v0 = vld [vmem:[%s20825_s3 + $0x3c8] sm:$0xf] }
 0x394   :  { %v12032_v13 = vld [vmem:[%s20825_s3 + $0xb20] sm:$0xf0]  ;;  %v11523_v17 = vor.u32 %v13660_v11, %v11520_v12  ;;  %v10854_v12 = vld [vmem:[%s20825_s3 + $0x1c8] sm:$0xf] }
 0x395   :  { %v13852_v1 = vld [vmem:[%s20825_s3 + $0xd04] sm:$0xf]  ;;  %v12035_v19 = vor.u32 %v13788_v3, %v12032_v13  ;;  %v3913_v13 = vpop.f32.mrf.mxu2 }
 0x396   :  { %v12288_v16 = vld [vmem:[%s20825_s3 + $0xd20] sm:$0xf0]  ;;  %7232 = vmatpush.bf16.msra.mxu3 %v11523_v17  ;;  %v13497_v17 = vld [vmem:[%s20825_s3 + $0x1e4] sm:$0xf0] }
 0x397   :  { %v13716_v53 = vld [vmem:[%s20825_s3 + $0x8c4] sm:$0xf]  ;;  %v12291_v20 = vor.u32 %v13852_v1, %v12288_v16  ;;  %7258 = vmatpush.bf16.msrb.mxu1 %v12035_v19 }
 0x398   :  { %v11744_v18 = vld [vmem:[%s20825_s3 + $0x8e0] sm:$0xf0] }
 0x399   :  { %v13780_v6 = vld [vmem:[%s20825_s3 + $0xac4] sm:$0xf]  ;;  %v11747_v14 = vor.u32 %v13716_v53, %v11744_v18  ;;  %7271 = vmatpush.bf16.msrb.mxu2 %v12291_v20  ;;  %v13561_v53 = vld [vmem:[%s20825_s3 + $0x3e4] sm:$0xf0]  ;;  %v3926_v18 = vpop.f32.mrf.mxu3 }
 0x39a   :  { %v12000_v49 = vld [vmem:[%s20825_s3 + $0xae0] sm:$0xf0] }
 0x39b   :  { %v13844_v37 = vld [vmem:[%s20825_s3 + $0xcc4] sm:$0xf]  ;;  %v12003_v38 = vor.u32 %v13780_v6, %v12000_v49  ;;  %7246 = vmatpush.bf16.msrb.mxu0 %v11747_v14  ;;  %v11366_v6 = vld [vmem:[%s20825_s3 + $0x5c8] sm:$0xf] }
 0x39c   :  { %v12256_v33 = vld [vmem:[%s20825_s3 + $0xce0] sm:$0xf0]  ;;  %v13625_v49 = vld [vmem:[%s20825_s3 + $0x5e4] sm:$0xf0] }
 0x39d   :  { %v13652_v23 = vld [vmem:[%s20825_s3 + $0x6c4] sm:$0xf]  ;;  %v12259_v24 = vor.u32 %v13844_v37, %v12256_v33  ;;  %7259 = vmatpush.bf16.msrb.mxu1 %v12003_v38  ;;  %v10822_v14 = vld [vmem:[%s20825_s3 + $0x188] sm:$0xf] }
 0x39e   :  { %v11488_v7 = vld [vmem:[%s20825_s3 + $0x6e0] sm:$0xf0]  ;;  %v11078_v38 = vld [vmem:[%s20825_s3 + $0x388] sm:$0xf] }
 0x39f   :  { %v11491_v32 = vor.u32 %v13652_v23, %v11488_v7  ;;  %v13708_v40 = vld [vmem:[%s20825_s3 + $0x884] sm:$0xf]  ;;  %7272 = vmatpush.bf16.msrb.mxu2 %v12259_v24  ;;  %v3886_v23 = vadd.f32 %v17997_v21, %v579_v63  ;;  %v10855_v7 = vor.u32 %v13497_v17, %v10854_v12  ;;  %v13553_v24 = vld [vmem:[%s20825_s3 + $0x3a4] sm:$0xf0]  ;;  %v3937_v63 = vpop.f32.mrf.mxu0 }
 0x3a0   :  { %v11712_v51 = vld [vmem:[%s20825_s3 + $0x8a0] sm:$0xf0]  ;;  %v11334_v21 = vld [vmem:[%s20825_s3 + $0x588] sm:$0xf] }
 0x3a1   :  { %v13772_v25 = vld [vmem:[%s20825_s3 + $0xa84] sm:$0xf]  ;;  %7233 = vmatpush.bf16.msra.mxu3 %v11491_v32  ;;  %v11715_v31 = vor.u32 %v13708_v40, %v11712_v51  ;;  %v11111_v32 = vor.u32 %v13561_v53, %v11110_v0  ;;  %v11367_v40 = vor.u32 %v13625_v49, %v11366_v6  ;;  %v13489_v51 = vld [vmem:[%s20825_s3 + $0x1a4] sm:$0xf0]  ;;  %v3963_v6 = vpop.f32.mrf.mxu2 }
 0x3a2   :  { %v13644_v34 = vld [vmem:[%s20825_s3 + $0x684] sm:$0xf]  ;;  %v13457_v17 = vld [vmem:[%s20825_s3 + $0xa4] sm:$0xf0] }
 0x3a3   :  { %v11456_v41 = vld [vmem:[%s20825_s3 + $0x6a0] sm:$0xf0]  ;;  %7247 = vmatpush.bf16.msrb.mxu0 %v11715_v31  ;;  %v13545_v31 = vld [vmem:[%s20825_s3 + $0x364] sm:$0xf0] }
 0x3a4   :  { %v11968_v42 = vld [vmem:[%s20825_s3 + $0xaa0] sm:$0xf0]  ;;  %v11459_v29 = vor.u32 %v13644_v34, %v11456_v41  ;;  %v3899_v34 = vadd.f32 %v18003_v22, %v3886_v23  ;;  %v10823_v41 = vor.u32 %v13489_v51, %v10822_v14  ;;  %v11046_v22 = vld [vmem:[%s20825_s3 + $0x348] sm:$0xf] }
 0x3a5   :  { %v13836_v27 = vld [vmem:[%s20825_s3 + $0xc84] sm:$0xf]  ;;  %v11971_v44 = vor.u32 %v13772_v25, %v11968_v42  ;;  %v13617_v25 = vld [vmem:[%s20825_s3 + $0x5a4] sm:$0xf0]  ;;  %v11079_v42 = vor.u32 %v13553_v24, %v11078_v38 }
 0x3a6   :  { %v12224_v28 = vld [vmem:[%s20825_s3 + $0xca0] sm:$0xf0]  ;;  %7234 = vmatpush.bf16.msra.mxu3 %v11459_v29  ;;  %v13481_v29 = vld [vmem:[%s20825_s3 + $0x164] sm:$0xf0] }
 0x3a7   :  { %v13700_v36 = vld [vmem:[%s20825_s3 + $0x844] sm:$0xf]  ;;  %v12227_v26 = vor.u32 %v13836_v27, %v12224_v28  ;;  %7260 = vmatpush.bf16.msrb.mxu1 %v11971_v44  ;;  %v10790_v27 = vld [vmem:[%s20825_s3 + $0x148] sm:$0xf]  ;;  %v11335_v28 = vor.u32 %v13617_v25, %v11334_v21  ;;  %v3912_v44 = vadd.f32 %v18035_v58, %v3899_v34 }
 0x3a8   :  { %v11680_v43 = vld [vmem:[%s20825_s3 + $0x860] sm:$0xf0]  ;;  %v13537_v58 = vld [vmem:[%s20825_s3 + $0x324] sm:$0xf0] }
 0x3a9   :  { %v13764_v30 = vld [vmem:[%s20825_s3 + $0xa44] sm:$0xf]  ;;  %v11683_v50 = vor.u32 %v13700_v36, %v11680_v43  ;;  %7273 = vmatpush.bf16.msrb.mxu2 %v12227_v26  ;;  %v11302_v36 = vld [vmem:[%s20825_s3 + $0x548] sm:$0xf]  ;;  %v10791_v26 = vor.u32 %v13481_v29, %v10790_v27 }
 0x3aa   :  { %v11936_v52 = vld [vmem:[%s20825_s3 + $0xa60] sm:$0xf0]  ;;  %v13609_v43 = vld [vmem:[%s20825_s3 + $0x564] sm:$0xf0] }
 0x3ab   :  { %v13828_v4 = vld [vmem:[%s20825_s3 + $0xc44] sm:$0xf]  ;;  %v11939_v54 = vor.u32 %v13764_v30, %v11936_v52  ;;  %7248 = vmatpush.bf16.msrb.mxu0 %v11683_v50  ;;  %v11047_v30 = vor.u32 %v13545_v31, %v11046_v22  ;;  %v10758_v52 = vld [vmem:[%s20825_s3 + $0x108] sm:$0xf] }
 0x3ac   :  { %v12192_v56 = vld [vmem:[%s20825_s3 + $0xc60] sm:$0xf0]  ;;  %v10950_v0 = vld [vmem:[%s20825_s3 + $0x288] sm:$0xf] }
 0x3ad   :  { %v13636_v59 = vld [vmem:[%s20825_s3 + $0x644] sm:$0xf]  ;;  %v12195_v45 = vor.u32 %v13828_v4, %v12192_v56  ;;  %7261 = vmatpush.bf16.msrb.mxu1 %v11939_v54  ;;  %v11303_v4 = vor.u32 %v13609_v43, %v11302_v36  ;;  %v11014_v56 = vld [vmem:[%s20825_s3 + $0x308] sm:$0xf] }
 0x3ae   :  { %v11424_v60 = vld [vmem:[%s20825_s3 + $0x660] sm:$0xf0]  ;;  %v11015_v50 = vor.u32 %v13537_v58, %v11014_v56  ;;  %v13465_v54 = vld [vmem:[%s20825_s3 + $0xe4] sm:$0xf0] }
 0x3af   :  { %v11427_v2 = vor.u32 %v13636_v59, %v11424_v60  ;;  %v13692_v48 = vld [vmem:[%s20825_s3 + $0x804] sm:$0xf]  ;;  %7274 = vmatpush.bf16.msrb.mxu2 %v12195_v45  ;;  %v13601_v59 = vld [vmem:[%s20825_s3 + $0x524] sm:$0xf0]  ;;  %v3925_v60 = vadd.f32 %v18037_v10, %v3912_v44 }
 0x3b0   :  { %v11648_v47 = vld [vmem:[%s20825_s3 + $0x820] sm:$0xf0]  ;;  %v10982_v10 = vld [vmem:[%s20825_s3 + $0x2c8] sm:$0xf] }
 0x3b1   :  { %v13756_v62 = vld [vmem:[%s20825_s3 + $0xa04] sm:$0xf]  ;;  %7235 = vmatpush.bf16.msra.mxu3 %v11427_v2  ;;  %v11651_v20 = vor.u32 %v13692_v48, %v11648_v47  ;;  %v10759_v2 = vor.u32 %v13473_v55, %v10758_v52  ;;  %v10726_v48 = vld [vmem:[%s20825_s3 + $0xc8] sm:$0xf]  ;;  %v3950_v47 = vpop.f32.mrf.mxu1 }
 0x3b2   :  { %v11904_v61 = vld [vmem:[%s20825_s3 + $0xa20] sm:$0xf0]  ;;  %v13529_v45 = vld [vmem:[%s20825_s3 + $0x2e4] sm:$0xf0]  ;;  %v10727_v12 = vor.u32 %v13465_v54, %v10726_v48 }
 0x3b3   :  { %v13820_v3 = vld [vmem:[%s20825_s3 + $0xc04] sm:$0xf]  ;;  %v11907_v37 = vor.u32 %v13756_v62, %v11904_v61  ;;  %7249 = vmatpush.bf16.msrb.mxu0 %v11651_v20  ;;  %v11271_v62 = vor.u32 %v13601_v59, %v11270_v57  ;;  %v3938_v61 = vadd.f32 %v3937_v63, %v3925_v60  ;;  %v10983_v13 = vor.u32 %v13529_v45, %v10982_v10  ;;  %v13521_v53 = vld [vmem:[%s20825_s3 + $0x2a4] sm:$0xf0]  ;;  %v3965_v57 = vpop.f32.mrf.mxu2 }
 0x3b4   :  { %v12160_v11 = vld [vmem:[%s20825_s3 + $0xc20] sm:$0xf0]  ;;  %v13585_v20 = vld [vmem:[%s20825_s3 + $0x4a4] sm:$0xf0] }
 0x3b5   :  { %v13628_v1 = vld [vmem:[%s20825_s3 + $0x604] sm:$0xf]  ;;  %v12163_v33 = vor.u32 %v13820_v3, %v12160_v11  ;;  %7262 = vmatpush.bf16.msrb.mxu1 %v11907_v37  ;;  %v11238_v3 = vld [vmem:[%s20825_s3 + $0x4c8] sm:$0xf]  ;;  %v3951_v18 = vadd.f32 %v3950_v47, %v3938_v61  ;;  %v3976_v37 = vpop.f32.mrf.mxu3 }
 0x3b6   :  { %v11392_v16 = vld [vmem:[%s20825_s3 + $0x620] sm:$0xf0]  ;;  %7250 = vmatmul.bf16.vlgmr.msrb.gmra.mxu0 %v17729_v46  ;;  %v13593_v11 = vld [vmem:[%s20825_s3 + $0x4e4] sm:$0xf0] }
 0x3b7   :  { %v11395_v19 = vor.u32 %v13628_v1, %v11392_v16  ;;  %7275 = vmatpush.bf16.msrb.mxu2 %v12163_v33  ;;  %7294 = vmatpush.bf16.msra.mxu0 %v10855_v7  ;;  %v10694_v1 = vld [vmem:[%s20825_s3 + $0x88] sm:$0xf]  ;;  %v11239_v16 = vor.u32 %v13593_v11, %v11238_v3  ;;  %v3964_v49 = vadd.f32 %v3963_v6, %v3951_v18  ;;  %v3939_v33 = vpop.f32.mrf.mxu0  ;;  %v13932_v47 = vld [vmem:[%s20825_s3 + $0xf84] sm:$0xf] }
 0x3b8   :  { %7263 = vmatmul.bf16.vlgmr.msrb.gmra.mxu1 %v17731_v39  ;;  %v10695_v23 = vor.u32 %v13457_v17, %v10694_v1  ;;  %v10951_v7 = vor.u32 %v13521_v53, %v10950_v0  ;;  %v13449_v51 = vld [vmem:[%s20825_s3 + $0x64] sm:$0xf0]  ;;  %v13924_v0 = vld [vmem:[%s20825_s3 + $0xf44] sm:$0xf] }
 0x3b9   :  { %7236 = vmatpush.bf16.msra.mxu3 %v11395_v19  ;;  %7307 = vmatpush.bf16.msra.mxu1 %v11111_v32  ;;  %v11206_v19 = vld [vmem:[%s20825_s3 + $0x488] sm:$0xf]  ;;  %v3952_v14 = vpop.f32.mrf.mxu1  ;;  %v3977_v21 = vadd.f32 %v3976_v37, %v3964_v49  ;;  %v12576_v53 = vld [vmem:[%s20825_s3 + $0xf60] sm:$0xf0] }
 0x3ba   :  { %7276 = vmatmul.bf16.vlgmr.msrb.gmra.mxu2 %v17869_v15  ;;  %v10662_v32 = vld [vmem:[%s20825_s3 + $0x48] sm:$0xf]  ;;  %v18318_v14 = vld [vmem:[%s20826_s4] sm:$0xff] }
 0x3bb   :  { %7320 = vmatpush.bf16.msra.mxu2 %v11367_v40  ;;  %7295 = vmatpush.bf16.msra.mxu0 %v10823_v41  ;;  %v11207_v40 = vor.u32 %v13585_v20, %v11206_v19  ;;  %v10918_v38 = vld [vmem:[%s20825_s3 + $0x248] sm:$0xf]  ;;  %v13940_v41 = vld [vmem:[%s20825_s3 + $0xfc4] sm:$0xf]  ;;  %v10663_v29 = vor.u32 %v13449_v51, %v10662_v32 }
 0x3bc   :  { %v13513_v24 = vld [vmem:[%s20825_s3 + $0x264] sm:$0xf0]  ;;  %v12544_v51 = vld [vmem:[%s20825_s3 + $0xf20] sm:$0xf0] }
 0x3bd   :  { %7308 = vmatpush.bf16.msra.mxu1 %v11079_v42  ;;  %v11174_v25 = vld [vmem:[%s20825_s3 + $0x448] sm:$0xf]  ;;  %v12640_v42 = vld [vmem:[%s20825_s3 + $0xfe0] sm:$0xf0]  ;;  %v10919_v22 = vor.u32 %v13513_v24, %v10918_v38 }
 0x3be   :  { %v13577_v34 = vld [vmem:[%s20825_s3 + $0x464] sm:$0xf0] }
 0x3bf   :  { %7321 = vmatpush.bf16.msra.mxu2 %v11335_v28  ;;  %7296 = vmatpush.bf16.msra.mxu0 %v10791_v26  ;;  %v10630_v27 = vld [vmem:[%s20825_s3 + $0x8] sm:$0xf]  ;;  %v3987_v28 = vmax.f32 %v3977_v21, 0.0  ;;  %v11175_v43 = vor.u32 %v13577_v34, %v11174_v25  ;;  %v4510_v34 = vperm.slane %v18318_v14, 0 }
 0x3c0   :  { %v13441_v31 = vld [vmem:[%s20825_s3 + $0x24] sm:$0xf0] }
 0x3c1   :  { %7309 = vmatpush.bf16.msra.mxu1 %v11047_v30  ;;  %v10886_v36 = vld [vmem:[%s20825_s3 + $0x208] sm:$0xf]  ;;  %v18245_v52 = vpack.c.bf16 %v3987_v28, %v3987_v28 }
 0x3c2   :  { %v13505_v44 = vld [vmem:[%s20825_s3 + $0x224] sm:$0xf0] }
 0x3c3   :  { %7322 = vmatpush.bf16.msra.mxu2 %v11303_v4  ;;  %7297 = vmatpush.bf16.msra.mxu0 %v10759_v2  ;;  %v11142_v26 = vld [vmem:[%s20825_s3 + $0x408] sm:$0xf]  ;;  %v12643_v4 = vor.u32 %v13940_v41, %v12640_v42  ;;  %v3978_v2 = vpop.f32.mrf.mxu3  ;;  %v10887_v48 = vor.u32 %v13505_v44, %v10886_v36  ;;  %v12512_v36 = vld [vmem:[%s20825_s3 + $0xee0] sm:$0xf0]  ;;  %v7095_v44 = vpop.f32.mrf.mxu0 }
 0x3c4   :  { %v13569_v30 = vld [vmem:[%s20825_s3 + $0x424] sm:$0xf0]  ;;  %7185 = vmatmul.bf16.vlgmr.msrb.gmra.mxu3 %v18245_v52  ;;  %v7096_v57 = vadd.f32 %v7095_v44, %v4510_v34 }
 0x3c5   :  { %7310 = vmatpush.bf16.msra.mxu1 %v11015_v50  ;;  %v11878_v55 = vld [vmem:[%s20825_s3 + $0x9c8] sm:$0xf]  ;;  %v10631_v50 = vor.u32 %v13441_v31, %v10630_v27  ;;  %v11143_v54 = vor.u32 %v13569_v30, %v11142_v26  ;;  %7281 = vmatpush.bf16.msrb.mxu3 %v12643_v4  ;;  %v13908_v31 = vld [vmem:[%s20825_s3 + $0xec4] sm:$0xf]  ;;  %v7108_v26 = vpop.f32.mrf.mxu1 }
 0x3c6   :  { %v13753_v56 = vld [vmem:[%s20825_s3 + $0x9e4] sm:$0xf0] }
 0x3c7   :  { %7323 = vmatpush.bf16.msra.mxu2 %v11271_v62  ;;  %7298 = vmatpush.bf16.msra.mxu0 %v10727_v12  ;;  %v12134_v58 = vld [vmem:[%s20825_s3 + $0xbc8] sm:$0xf]  ;;  %v12608_v62 = vld [vmem:[%s20825_s3 + $0xfa0] sm:$0xf0]  ;;  %v11879_v10 = vor.u32 %v13753_v56, %v11878_v55 }
 0x3c8   :  { %v13817_v59 = vld [vmem:[%s20825_s3 + $0xbe4] sm:$0xf0] }
 0x3c9   :  { %7311 = vmatpush.bf16.msra.mxu1 %v10983_v13  ;;  %v12390_v60 = vld [vmem:[%s20825_s3 + $0xdc8] sm:$0xf]  ;;  %v12135_v45 = vor.u32 %v13817_v59, %v12134_v58  ;;  %v12611_v13 = vor.u32 %v13932_v47, %v12608_v62  ;;  %v12515_v59 = vor.u32 %v13908_v31, %v12512_v36  ;;  %v7109_v47 = vadd.f32 %v7108_v26, %v7096_v57 }
 0x3ca   :  { %v13881_v63 = vld [vmem:[%s20825_s3 + $0xde4] sm:$0xf0] }
 0x3cb   :  { %7324 = vmatpush.bf16.msra.mxu2 %v11239_v16  ;;  %7299 = vmatpush.bf16.msra.mxu0 %v10695_v23  ;;  %v12391_v61 = vor.u32 %v13881_v63, %v12390_v60  ;;  %v11846_v3 = vld [vmem:[%s20825_s3 + $0x988] sm:$0xf]  ;;  %v12579_v23 = vor.u32 %v13924_v0, %v12576_v53  ;;  %v7121_v0 = vpop.f32.mrf.mxu2  ;;  %v7134_v53 = vpop.f32.mrf.mxu3 }
 0x3cc   :  { %v13745_v11 = vld [vmem:[%s20825_s3 + $0x9a4] sm:$0xf0]  ;;  %7282 = vmatpush.bf16.msrb.mxu3 %v12611_v13 }
 0x3cd   :  { %7312 = vmatpush.bf16.msra.mxu1 %v10951_v7  ;;  %v12102_v12 = vld [vmem:[%s20825_s3 + $0xb88] sm:$0xf]  ;;  %v11847_v18 = vor.u32 %v13745_v11, %v11846_v3 }
 0x3ce   :  { %v13809_v1 = vld [vmem:[%s20825_s3 + $0xba4] sm:$0xf0] }
 0x3cf   :  { %7325 = vmatpush.bf16.msra.mxu2 %v11207_v40  ;;  %7300 = vmatpush.bf16.msra.mxu0 %v10663_v29  ;;  %v12358_v16 = vld [vmem:[%s20825_s3 + $0xd88] sm:$0xf]  ;;  %v12103_v20 = vor.u32 %v13809_v1, %v12102_v12  ;;  %v13916_v40 = vld [vmem:[%s20825_s3 + $0xf04] sm:$0xf] }
 0x3d0   :  { %v13873_v17 = vld [vmem:[%s20825_s3 + $0xda4] sm:$0xf0]  ;;  %7283 = vmatpush.bf16.msrb.mxu3 %v12579_v23  ;;  %v12547_v27 = vor.u32 %v13916_v40, %v12544_v51 }
 0x3d1   :  { %7313 = vmatpush.bf16.msra.mxu1 %v10919_v22  ;;  %v11814_v19 = vld [vmem:[%s20825_s3 + $0x948] sm:$0xf]  ;;  %v12359_v6 = vor.u32 %v13873_v17, %v12358_v16  ;;  %v13892_v16 = vld [vmem:[%s20825_s3 + $0xe44] sm:$0xf] }
 0x3d2   :  { %v13737_v49 = vld [vmem:[%s20825_s3 + $0x964] sm:$0xf0]  ;;  %v12448_v17 = vld [vmem:[%s20825_s3 + $0xe60] sm:$0xf0] }
 0x3d3   :  { %7326 = vmatpush.bf16.msra.mxu2 %v11175_v43  ;;  %7301 = vmatpush.bf16.msra.mxu0 %v10631_v50  ;;  %v12070_v37 = vld [vmem:[%s20825_s3 + $0xb48] sm:$0xf]  ;;  %v11815_v38 = vor.u32 %v13737_v49, %v11814_v19  ;;  %v13900_v50 = vld [vmem:[%s20825_s3 + $0xe84] sm:$0xf]  ;;  %v7122_v19 = vadd.f32 %v7121_v0, %v7109_v47  ;;  %v7136_v57 = vpop.f32.mrf.mxu3 }
 0x3d4   :  { %v13801_v33 = vld [vmem:[%s20825_s3 + $0xb64] sm:$0xf0]  ;;  %7284 = vmatpush.bf16.msrb.mxu3 %v12547_v27 }
 0x3d5   :  { %7314 = vmatpush.bf16.msra.mxu1 %v10887_v48  ;;  %v12326_v7 = vld [vmem:[%s20825_s3 + $0xd48] sm:$0xf]  ;;  %v12071_v21 = vor.u32 %v13801_v33, %v12070_v37  ;;  %v12480_v48 = vld [vmem:[%s20825_s3 + $0xea0] sm:$0xf0]  ;;  %7237 = vmatmul.bf16.vlgmr.msra.gmra.mxu3 %v17544_v9 }
 0x3d6   :  { %7302 = vmatmul.bf16.vlgmr.msra.gmra.mxu0 %v17538_v5  ;;  %v13865_v32 = vld [vmem:[%s20825_s3 + $0xd64] sm:$0xf0]  ;;  %v12483_v11 = vor.u32 %v13900_v50, %v12480_v48 }
 0x3d7   :  { %7327 = vmatpush.bf16.msra.mxu2 %v11143_v54  ;;  %7346 = vmatpush.bf16.msrb.mxu0 %v11879_v10  ;;  %v11782_v24 = vld [vmem:[%s20825_s3 + $0x908] sm:$0xf]  ;;  %v12327_v25 = vor.u32 %v13865_v32, %v12326_v7  ;;  %v12451_v32 = vor.u32 %v13892_v16, %v12448_v17  ;;  %v11336_v16 = vld [vmem:[%s20825_s3 + $0x5a8] sm:$0xf0] }
 0x3d8   :  { %7315 = vmatmul.bf16.vlgmr.msra.gmra.mxu1 %v17540_v35  ;;  %v13729_v41 = vld [vmem:[%s20825_s3 + $0x924] sm:$0xf0]  ;;  %7285 = vmatpush.bf16.msrb.mxu3 %v12515_v59 }
 0x3d9   :  { %7359 = vmatpush.bf16.msrb.mxu1 %v12135_v45  ;;  %v12038_v42 = vld [vmem:[%s20825_s3 + $0xb08] sm:$0xf]  ;;  %v11783_v43 = vor.u32 %v13729_v41, %v11782_v24  ;;  %v18420_v24 = vadd.f32 %v7134_v53, %v7122_v19 }
 0x3da   :  { %7328 = vmatmul.bf16.vlgmr.msra.gmra.mxu2 %v17542_v8  ;;  %v13793_v28 = vld [vmem:[%s20825_s3 + $0xb24] sm:$0xf0] }
 0x3db   :  { %7372 = vmatpush.bf16.msrb.mxu2 %v12391_v61  ;;  %7347 = vmatpush.bf16.msrb.mxu0 %v11847_v18  ;;  %v12294_v29 = vld [vmem:[%s20825_s3 + $0xd08] sm:$0xf]  ;;  %v12039_v30 = vor.u32 %v13793_v28, %v12038_v42 }
 0x3dc   :  { %v13857_v22 = vld [vmem:[%s20825_s3 + $0xd24] sm:$0xf0]  ;;  %7286 = vmatpush.bf16.msrb.mxu3 %v12483_v11  ;;  %v13549_v11 = vld [vmem:[%s20825_s3 + $0x38c] sm:$0xf] }
 0x3dd   :  { %7360 = vmatpush.bf16.msrb.mxu1 %v12103_v20  ;;  %v12295_v4 = vor.u32 %v13857_v22, %v12294_v29  ;;  %v11750_v55 = vld [vmem:[%s20825_s3 + $0x8c8] sm:$0xf]  ;;  %v7097_v20 = vpop.f32.mrf.mxu0 }
 0x3de   :  { %v13721_v56 = vld [vmem:[%s20825_s3 + $0x8e4] sm:$0xf0]  ;;  %v13477_v20 = vld [vmem:[%s20825_s3 + $0x14c] sm:$0xf] }
 0x3df   :  { %7373 = vmatpush.bf16.msrb.mxu2 %v12359_v6  ;;  %7348 = vmatpush.bf16.msrb.mxu0 %v11815_v38  ;;  %v12006_v58 = vld [vmem:[%s20825_s3 + $0xac8] sm:$0xf]  ;;  %v11751_v62 = vor.u32 %v13721_v56, %v11750_v55  ;;  %v7110_v6 = vpop.f32.mrf.mxu1  ;;  %v10856_v55 = vld [vmem:[%s20825_s3 + $0x1e8] sm:$0xf0] }
 0x3e0   :  { %v13785_v60 = vld [vmem:[%s20825_s3 + $0xae4] sm:$0xf0]  ;;  %7287 = vmatpush.bf16.msrb.mxu3 %v12451_v32  ;;  %v13557_v56 = vld [vmem:[%s20825_s3 + $0x3cc] sm:$0xf] }
 0x3e1   :  { %7361 = vmatpush.bf16.msrb.mxu1 %v12071_v21  ;;  %v12262_v63 = vld [vmem:[%s20825_s3 + $0xcc8] sm:$0xf]  ;;  %v12007_v54 = vor.u32 %v13785_v60, %v12006_v58  ;;  %v13884_v21 = vld [vmem:[%s20825_s3 + $0xe04] sm:$0xf]  ;;  %v7123_v58 = vpop.f32.mrf.mxu2  ;;  %v11112_v60 = vld [vmem:[%s20825_s3 + $0x3e8] sm:$0xf0] }
 0x3e2   :  { %v13849_v2 = vld [vmem:[%s20825_s3 + $0xce4] sm:$0xf0]  ;;  %v10792_v6 = vld [vmem:[%s20825_s3 + $0x168] sm:$0xf0] }
 0x3e3   :  { %7374 = vmatpush.bf16.msrb.mxu2 %v12327_v25  ;;  %7349 = vmatpush.bf16.msrb.mxu0 %v11783_v43  ;;  %v12263_v10 = vor.u32 %v13849_v2, %v12262_v63  ;;  %v11718_v45 = vld [vmem:[%s20825_s3 + $0x888] sm:$0xf]  ;;  %v12416_v25 = vld [vmem:[%s20825_s3 + $0xe20] sm:$0xf0]  ;;  %v13621_v63 = vld [vmem:[%s20825_s3 + $0x5cc] sm:$0xf] }
 0x3e4   :  { %v13713_v61 = vld [vmem:[%s20825_s3 + $0x8a4] sm:$0xf0]  ;;  %v12419_v36 = vor.u32 %v13884_v21, %v12416_v25  ;;  %v11368_v2 = vld [vmem:[%s20825_s3 + $0x5e8] sm:$0xf0] }
 0x3e5   :  { %7362 = vmatpush.bf16.msrb.mxu1 %v12039_v30  ;;  %v11974_v3 = vld [vmem:[%s20825_s3 + $0xa88] sm:$0xf]  ;;  %v11719_v18 = vor.u32 %v13713_v61, %v11718_v45  ;;  %v11371_v45 = vor.u32 %v13621_v63, %v11368_v2  ;;  %v13485_v61 = vld [vmem:[%s20825_s3 + $0x18c] sm:$0xf] }
 0x3e6   :  { %v13777_v12 = vld [vmem:[%s20825_s3 + $0xaa4] sm:$0xf0]  ;;  %7288 = vmatpush.bf16.msrb.mxu3 %v12419_v36  ;;  %v13469_v25 = vld [vmem:[%s20825_s3 + $0x10c] sm:$0xf]  ;;  %v7147_v36 = vpop.f32.mrf.mxu0 }
 0x3e7   :  { %7375 = vmatpush.bf16.msrb.mxu2 %v12295_v4  ;;  %v12230_v13 = vld [vmem:[%s20825_s3 + $0xc88] sm:$0xf]  ;;  %7350 = vmatpush.bf16.msrb.mxu0 %v11751_v62  ;;  %v11975_v49 = vor.u32 %v13777_v12, %v11974_v3  ;;  %v13493_v4 = vld [vmem:[%s20825_s3 + $0x1cc] sm:$0xf] }
 0x3e8   :  { %v13841_v1 = vld [vmem:[%s20825_s3 + $0xca4] sm:$0xf0]  ;;  %v10824_v3 = vld [vmem:[%s20825_s3 + $0x1a8] sm:$0xf0] }
 0x3e9   :  { %7363 = vmatpush.bf16.msrb.mxu1 %v12007_v54  ;;  %v12231_v37 = vor.u32 %v13841_v1, %v12230_v13  ;;  %v11686_v33 = vld [vmem:[%s20825_s3 + $0x848] sm:$0xf]  ;;  %v10859_v54 = vor.u32 %v13493_v4, %v10856_v55  ;;  %v11080_v13 = vld [vmem:[%s20825_s3 + $0x3a8] sm:$0xf0]  ;;  %7289 = vmatmul.bf16.vlgmr.msrb.gmra.mxu3 %v18245_v52  ;;  %v10827_v53 = vor.u32 %v13485_v61, %v10824_v3 }
 0x3ea   :  { %v13705_v23 = vld [vmem:[%s20825_s3 + $0x864] sm:$0xf0]  ;;  %v13613_v1 = vld [vmem:[%s20825_s3 + $0x58c] sm:$0xf] }
 0x3eb   :  { %7376 = vmatpush.bf16.msrb.mxu2 %v12263_v10  ;;  %v11942_v7 = vld [vmem:[%s20825_s3 + $0xa48] sm:$0xf]  ;;  %7351 = vmatpush.bf16.msrb.mxu0 %v11719_v18  ;;  %v11687_v34 = vor.u32 %v13705_v23, %v11686_v33  ;;  %v11115_v10 = vor.u32 %v13557_v56, %v11112_v60  ;;  %v11083_v18 = vor.u32 %v13549_v11, %v11080_v13  ;;  %v11048_v33 = vld [vmem:[%s20825_s3 + $0x368] sm:$0xf0] }
 0x3ec   :  { %v13769_v40 = vld [vmem:[%s20825_s3 + $0xa64] sm:$0xf0]  ;;  %v11339_v19 = vor.u32 %v13613_v1, %v11336_v16  ;;  %v13605_v23 = vld [vmem:[%s20825_s3 + $0x54c] sm:$0xf] }
 0x3ed   :  { %v12198_v51 = vld [vmem:[%s20825_s3 + $0xc48] sm:$0xf]  ;;  %7364 = vmatpush.bf16.msrb.mxu1 %v11975_v49  ;;  %v11943_v27 = vor.u32 %v13769_v40, %v11942_v7  ;;  %v13541_v49 = vld [vmem:[%s20825_s3 + $0x34c] sm:$0xf] }
 0x3ee   :  { %v13833_v38 = vld [vmem:[%s20825_s3 + $0xc64] sm:$0xf0]  ;;  %v11304_v7 = vld [vmem:[%s20825_s3 + $0x568] sm:$0xf0]  ;;  %v7149_v16 = vpop.f32.mrf.mxu0 }
 0x3ef   :  { %v11622_v41 = vld [vmem:[%s20825_s3 + $0x7c8] sm:$0xf]  ;;  %7377 = vmatpush.bf16.msrb.mxu2 %v12231_v37  ;;  %v12199_v28 = vor.u32 %v13833_v38, %v12198_v51  ;;  %7352 = vmatpush.bf16.msrb.mxu0 %v11687_v34  ;;  %v10795_v51 = vor.u32 %v13477_v20, %v10792_v6  ;;  %v11051_v38 = vor.u32 %v13541_v49, %v11048_v33  ;;  %v10760_v34 = vld [vmem:[%s20825_s3 + $0x128] sm:$0xf0] }
 0x3f0   :  { %v13689_v42 = vld [vmem:[%s20825_s3 + $0x7e4] sm:$0xf0]  ;;  %v11307_v21 = vor.u32 %v13605_v23, %v11304_v7  ;;  %v13461_v55 = vld [vmem:[%s20825_s3 + $0xcc] sm:$0xf] }
 0x3f1   :  { %v11654_v29 = vld [vmem:[%s20825_s3 + $0x808] sm:$0xf]  ;;  %v11623_v30 = vor.u32 %v13689_v42, %v11622_v41  ;;  %7365 = vmatpush.bf16.msrb.mxu1 %v11943_v27  ;;  %v13533_v41 = vld [vmem:[%s20825_s3 + $0x30c] sm:$0xf] }
 0x3f2   :  { %v13697_v22 = vld [vmem:[%s20825_s3 + $0x824] sm:$0xf0]  ;;  %v11016_v27 = vld [vmem:[%s20825_s3 + $0x328] sm:$0xf0] }
 0x3f3   :  { %v11910_v31 = vld [vmem:[%s20825_s3 + $0xa08] sm:$0xf]  ;;  %v11655_v59 = vor.u32 %v13697_v22, %v11654_v29  ;;  %7378 = vmatpush.bf16.msrb.mxu2 %v12199_v28  ;;  %7333 = vmatpush.bf16.msra.mxu3 %v11623_v30  ;;  %v13597_v28 = vld [vmem:[%s20825_s3 + $0x50c] sm:$0xf]  ;;  %v11019_v30 = vor.u32 %v13533_v41, %v11016_v27 }
 0x3f4   :  { %v13761_v43 = vld [vmem:[%s20825_s3 + $0xa24] sm:$0xf0]  ;;  %v11272_v29 = vld [vmem:[%s20825_s3 + $0x528] sm:$0xf0] }
 0x3f5   :  { %v12166_v44 = vld [vmem:[%s20825_s3 + $0xc08] sm:$0xf]  ;;  %v11911_v50 = vor.u32 %v13761_v43, %v11910_v31  ;;  %7353 = vmatpush.bf16.msrb.mxu0 %v11655_v59  ;;  %v10763_v43 = vor.u32 %v13469_v25, %v10760_v34  ;;  %v11275_v4 = vor.u32 %v13597_v28, %v11272_v29  ;;  %v10728_v56 = vld [vmem:[%s20825_s3 + $0xe8] sm:$0xf0] }
 0x3f6   :  { %v13825_v26 = vld [vmem:[%s20825_s3 + $0xc24] sm:$0xf0]  ;;  %v13525_v58 = vld [vmem:[%s20825_s3 + $0x2cc] sm:$0xf] }
 0x3f7   :  { %v12167_v48 = vor.u32 %v13825_v26, %v12166_v44  ;;  %v11590_v47 = vld [vmem:[%s20825_s3 + $0x788] sm:$0xf]  ;;  %7366 = vmatpush.bf16.msrb.mxu1 %v11911_v50  ;;  %v7148_v44 = vadd.f32 %v7147_v36, %v18420_v24  ;;  %v7160_v26 = vpop.f32.mrf.mxu1  ;;  %v10984_v24 = vld [vmem:[%s20825_s3 + $0x2e8] sm:$0xf0] }
 0x3f8   :  { %v13681_v62 = vld [vmem:[%s20825_s3 + $0x7a4] sm:$0xf0]  ;;  %7354 = vmatmul.bf16.vlgmr.msrb.gmra.mxu0 %v17729_v46  ;;  %v13589_v59 = vld [vmem:[%s20825_s3 + $0x4cc] sm:$0xf] }
 0x3f9   :  { %v11591_v12 = vor.u32 %v13681_v62, %v11590_v47  ;;  %7379 = vmatpush.bf16.msrb.mxu2 %v12167_v48  ;;  %v11558_v17 = vld [vmem:[%s20825_s3 + $0x748] sm:$0xf]  ;;  %7398 = vmatpush.bf16.msra.mxu0 %v10859_v54  ;;  %v11240_v60 = vld [vmem:[%s20825_s3 + $0x4e8] sm:$0xf0]  ;;  %v18571_v63 = vadd.f32 %v7160_v26, %v7148_v44  ;;  %v10731_v48 = vor.u32 %v13461_v55, %v10728_v56 }
 0x3fa   :  { %v13673_v0 = vld [vmem:[%s20825_s3 + $0x764] sm:$0xf0]  ;;  %7367 = vmatmul.bf16.vlgmr.msrb.gmra.mxu1 %v17731_v39  ;;  %v10987_v47 = vor.u32 %v13525_v58, %v10984_v24  ;;  %v11243_v62 = vor.u32 %v13589_v59, %v11240_v60  ;;  %v13453_v54 = vld [vmem:[%s20825_s3 + $0x8c] sm:$0xf] }
 0x3fb   :  { %7411 = vmatpush.bf16.msra.mxu1 %v11115_v10  ;;  %7334 = vmatpush.bf16.msra.mxu3 %v11591_v12  ;;  %v11559_v37 = vor.u32 %v13673_v0, %v11558_v17  ;;  %v11526_v32 = vld [vmem:[%s20825_s3 + $0x708] sm:$0xf]  ;;  %v10696_v10 = vld [vmem:[%s20825_s3 + $0xa8] sm:$0xf0] }
 0x3fc   :  { %7380 = vmatmul.bf16.vlgmr.msrb.gmra.mxu2 %v17869_v15  ;;  %v13665_v40 = vld [vmem:[%s20825_s3 + $0x724] sm:$0xf0]  ;;  %v10952_v3 = vld [vmem:[%s20825_s3 + $0x2a8] sm:$0xf0]  ;;  %v10699_v17 = vor.u32 %v13453_v54, %v10696_v10 }
 0x3fd   :  { %7424 = vmatpush.bf16.msra.mxu2 %v11371_v45  ;;  %7399 = vmatpush.bf16.msra.mxu0 %v10827_v53  ;;  %v11527_v42 = vor.u32 %v13665_v40, %v11526_v32  ;;  %v11494_v22 = vld [vmem:[%s20825_s3 + $0x6c8] sm:$0xf]  ;;  %v13517_v45 = vld [vmem:[%s20825_s3 + $0x28c] sm:$0xf] }
 0x3fe   :  { %v13657_v31 = vld [vmem:[%s20825_s3 + $0x6e4] sm:$0xf0]  ;;  %v13581_v11 = vld [vmem:[%s20825_s3 + $0x48c] sm:$0xf]  ;;  %v10955_v53 = vor.u32 %v13517_v45, %v10952_v3 }
 0x3ff   :  { %7412 = vmatpush.bf16.msra.mxu1 %v11083_v18  ;;  %7335 = vmatpush.bf16.msra.mxu3 %v11559_v37  ;;  %v11495_v57 = vor.u32 %v13657_v31, %v11494_v22  ;;  %v11462_v2 = vld [vmem:[%s20825_s3 + $0x688] sm:$0xf]  ;;  %v11208_v12 = vld [vmem:[%s20825_s3 + $0x4a8] sm:$0xf0]  ;;  %v7162_v0 = vpop.f32.mrf.mxu1 }
 0x400   :  { %v13649_v50 = vld [vmem:[%s20825_s3 + $0x6a4] sm:$0xf0]  ;;  %v11211_v18 = vor.u32 %v13581_v11, %v11208_v12  ;;  %v10664_v20 = vld [vmem:[%s20825_s3 + $0x68] sm:$0xf0] }
 0x401   :  { %7425 = vmatpush.bf16.msra.mxu2 %v11339_v19  ;;  %7400 = vmatpush.bf16.msra.mxu0 %v10795_v51  ;;  %v11463_v61 = vor.u32 %v13649_v50, %v11462_v2  ;;  %v11430_v13 = vld [vmem:[%s20825_s3 + $0x648] sm:$0xf]  ;;  %v13445_v19 = vld [vmem:[%s20825_s3 + $0x4c] sm:$0xf] }
 0x402   :  { %v13641_v1 = vld [vmem:[%s20825_s3 + $0x664] sm:$0xf0]  ;;  %v13509_v6 = vld [vmem:[%s20825_s3 + $0x24c] sm:$0xf]  ;;  %v10667_v40 = vor.u32 %v13445_v19, %v10664_v20 }
 0x403   :  { %7413 = vmatpush.bf16.msra.mxu1 %v11051_v38  ;;  %7336 = vmatpush.bf16.msra.mxu3 %v11527_v42  ;;  %v11431_v49 = vor.u32 %v13641_v1, %v11430_v13  ;;  %v10920_v37 = vld [vmem:[%s20825_s3 + $0x268] sm:$0xf0]  ;;  %v11398_v7 = vld [vmem:[%s20825_s3 + $0x608] sm:$0xf] }
 0x404   :  { %v13573_v33 = vld [vmem:[%s20825_s3 + $0x44c] sm:$0xf]  ;;  %v13633_v32 = vld [vmem:[%s20825_s3 + $0x624] sm:$0xf0] }
 0x405   :  { %7426 = vmatpush.bf16.msra.mxu2 %v11307_v21  ;;  %7401 = vmatpush.bf16.msra.mxu0 %v10763_v43  ;;  %v11176_v23 = vld [vmem:[%s20825_s3 + $0x468] sm:$0xf0]  ;;  %v12646_v51 = vld [vmem:[%s20825_s3 + $0xfc8] sm:$0xf]  ;;  %v10923_v21 = vor.u32 %v13509_v6, %v10920_v37  ;;  %v11399_v27 = vor.u32 %v13633_v32, %v11398_v7  ;;  %v4511_v37 = vperm.slane %v18318_v14, 1  ;;  %v7173_v7 = vpop.f32.mrf.mxu2 }
 0x406   :  { %v13945_v38 = vld [vmem:[%s20825_s3 + $0xfe4] sm:$0xf0]  ;;  %v11179_v25 = vor.u32 %v13573_v33, %v11176_v23  ;;  %v13437_v34 = vld [vmem:[%s20825_s3 + $0xc] sm:$0xf]  ;;  %v18738_v14 = vadd.f32 %v7173_v7, %v18571_v63 }
 0x407   :  { %7414 = vmatpush.bf16.msra.mxu1 %v11019_v30  ;;  %7337 = vmatpush.bf16.msra.mxu3 %v11495_v57  ;;  %v10632_v41 = vld [vmem:[%s20825_s3 + $0x28] sm:$0xf0]  ;;  %v12647_v31 = vor.u32 %v13945_v38, %v12646_v51  ;;  %v12614_v58 = vld [vmem:[%s20825_s3 + $0xf88] sm:$0xf] }
 0x408   :  { %v13501_v42 = vld [vmem:[%s20825_s3 + $0x20c] sm:$0xf]  ;;  %v10635_v26 = vor.u32 %v13437_v34, %v10632_v41  ;;  %v13937_v57 = vld [vmem:[%s20825_s3 + $0xfa4] sm:$0xf0] }
 0x409   :  { %7427 = vmatpush.bf16.msra.mxu2 %v11275_v4  ;;  %7402 = vmatpush.bf16.msra.mxu0 %v10731_v48  ;;  %v10888_v28 = vld [vmem:[%s20825_s3 + $0x228] sm:$0xf0]  ;;  %v13929_v3 = vld [vmem:[%s20825_s3 + $0xf64] sm:$0xf0] }
 0x40a   :  { %v13565_v29 = vld [vmem:[%s20825_s3 + $0x40c] sm:$0xf]  ;;  %v10891_v56 = vor.u32 %v13501_v42, %v10888_v28  ;;  %v12550_v20 = vld [vmem:[%s20825_s3 + $0xf08] sm:$0xf]  ;;  %v7199_v42 = vpop.f32.mrf.mxu0 }
 0x40b   :  { %7415 = vmatpush.bf16.msra.mxu1 %v10987_v47  ;;  %7338 = vmatpush.bf16.msra.mxu3 %v11463_v61  ;;  %v11144_v22 = vld [vmem:[%s20825_s3 + $0x428] sm:$0xf0]  ;;  %v12582_v61 = vld [vmem:[%s20825_s3 + $0xf48] sm:$0xf] }
 0x40c   :  { %v13749_v36 = vld [vmem:[%s20825_s3 + $0x9cc] sm:$0xf]  ;;  %v11147_v24 = vor.u32 %v13565_v29, %v11144_v22  ;;  %v12583_v0 = vor.u32 %v13929_v3, %v12582_v61  ;;  %v13921_v6 = vld [vmem:[%s20825_s3 + $0xf24] sm:$0xf0]  ;;  %v7200_v29 = vadd.f32 %v7199_v42, %v4511_v37 }
 0x40d   :  { %7428 = vmatpush.bf16.msra.mxu2 %v11243_v62  ;;  %7403 = vmatpush.bf16.msra.mxu0 %v10699_v17  ;;  %v11880_v43 = vld [vmem:[%s20825_s3 + $0x9e8] sm:$0xf0]  ;;  %v12615_v62 = vor.u32 %v13937_v57, %v12614_v58  ;;  %v12551_v38 = vor.u32 %v13921_v6, %v12550_v20  ;;  %v12518_v41 = vld [vmem:[%s20825_s3 + $0xec8] sm:$0xf] }
 0x40e   :  { %v13813_v44 = vld [vmem:[%s20825_s3 + $0xbcc] sm:$0xf]  ;;  %v11883_v59 = vor.u32 %v13749_v36, %v11880_v43  ;;  %v13913_v63 = vld [vmem:[%s20825_s3 + $0xee4] sm:$0xf0] }
 0x40f   :  { %7416 = vmatpush.bf16.msra.mxu1 %v10955_v53  ;;  %7339 = vmatpush.bf16.msra.mxu3 %v11431_v49  ;;  %v12136_v30 = vld [vmem:[%s20825_s3 + $0xbe8] sm:$0xf0]  ;;  %v12486_v58 = vld [vmem:[%s20825_s3 + $0xe88] sm:$0xf] }
 0x410   :  { %v13877_v4 = vld [vmem:[%s20825_s3 + $0xdcc] sm:$0xf]  ;;  %v12139_v60 = vor.u32 %v13813_v44, %v12136_v30  ;;  %v13905_v57 = vld [vmem:[%s20825_s3 + $0xea4] sm:$0xf0] }
 0x411   :  { %7429 = vmatpush.bf16.msra.mxu2 %v11211_v18  ;;  %7404 = vmatpush.bf16.msra.mxu0 %v10667_v40  ;;  %v12392_v55 = vld [vmem:[%s20825_s3 + $0xde8] sm:$0xf0]  ;;  %v12454_v61 = vld [vmem:[%s20825_s3 + $0xe48] sm:$0xf] }
 0x412   :  { %v12395_v2 = vor.u32 %v13877_v4, %v12392_v55  ;;  %v13741_v50 = vld [vmem:[%s20825_s3 + $0x98c] sm:$0xf]  ;;  %v13897_v3 = vld [vmem:[%s20825_s3 + $0xe64] sm:$0xf0] }
 0x413   :  { %7417 = vmatpush.bf16.msra.mxu1 %v10923_v21  ;;  %7340 = vmatpush.bf16.msra.mxu3 %v11399_v27  ;;  %v11848_v48 = vld [vmem:[%s20825_s3 + $0x9a8] sm:$0xf0]  ;;  %v7212_v27 = vpop.f32.mrf.mxu1  ;;  %v13889_v37 = vld [vmem:[%s20825_s3 + $0xe24] sm:$0xf0] }
 0x414   :  { %v13805_v47 = vld [vmem:[%s20825_s3 + $0xb8c] sm:$0xf]  ;;  %v11851_v11 = vor.u32 %v13741_v50, %v11848_v48 }
 0x415   :  { %7430 = vmatpush.bf16.msra.mxu2 %v11179_v25  ;;  %7405 = vmatpush.bf16.msra.mxu0 %v10635_v26  ;;  %v12104_v54 = vld [vmem:[%s20825_s3 + $0xba8] sm:$0xf0]  ;;  %v12519_v26 = vor.u32 %v13913_v63, %v12518_v41 }
 0x416   :  { %v13869_v10 = vld [vmem:[%s20825_s3 + $0xd8c] sm:$0xf]  ;;  %7341 = vmatmul.bf16.vlgmr.msra.gmra.mxu3 %v17544_v9  ;;  %v12107_v12 = vor.u32 %v13805_v47, %v12104_v54 }
 0x417   :  { %7385 = vmatpush.bf16.msrb.mxu3 %v12647_v31  ;;  %v12360_v45 = vld [vmem:[%s20825_s3 + $0xda8] sm:$0xf0]  ;;  %7418 = vmatpush.bf16.msra.mxu1 %v10891_v56  ;;  %v7213_v56 = vadd.f32 %v7212_v27, %v7200_v29  ;;  %v10862_v29 = vld [vmem:[%s20825_s3 + $0x1d0] sm:$0xf] }
 0x418   :  { %v12363_v13 = vor.u32 %v13869_v10, %v12360_v45  ;;  %v13733_v1 = vld [vmem:[%s20825_s3 + $0x94c] sm:$0xf]  ;;  %7406 = vmatmul.bf16.vlgmr.msra.gmra.mxu0 %v17538_v5 }
 0x419   :  { %7431 = vmatpush.bf16.msra.mxu2 %v11147_v24  ;;  %7450 = vmatpush.bf16.msrb.mxu0 %v11883_v59  ;;  %v11816_v16 = vld [vmem:[%s20825_s3 + $0x968] sm:$0xf0] }
 0x41a   :  { %v13797_v17 = vld [vmem:[%s20825_s3 + $0xb4c] sm:$0xf]  ;;  %7419 = vmatmul.bf16.vlgmr.msra.gmra.mxu1 %v17540_v35  ;;  %v11819_v49 = vor.u32 %v13733_v1, %v11816_v16 }
 0x41b   :  { %7463 = vmatpush.bf16.msrb.mxu1 %v12139_v60  ;;  %7386 = vmatpush.bf16.msrb.mxu3 %v12615_v62  ;;  %v12072_v53 = vld [vmem:[%s20825_s3 + $0xb68] sm:$0xf0]  ;;  %v12487_v62 = vor.u32 %v13905_v57, %v12486_v58 }
 0x41c   :  { %v13861_v18 = vld [vmem:[%s20825_s3 + $0xd4c] sm:$0xf]  ;;  %7432 = vmatmul.bf16.vlgmr.msra.gmra.mxu2 %v17542_v8  ;;  %v12075_v33 = vor.u32 %v13797_v17, %v12072_v53 }
 0x41d   :  { %7476 = vmatpush.bf16.msrb.mxu2 %v12395_v2  ;;  %v12328_v19 = vld [vmem:[%s20825_s3 + $0xd68] sm:$0xf0]  ;;  %7451 = vmatpush.bf16.msrb.mxu0 %v11851_v11  ;;  %v7175_v2 = vpop.f32.mrf.mxu2  ;;  %v7201_v11 = vpop.f32.mrf.mxu0 }
 0x41e   :  { %v12331_v23 = vor.u32 %v13861_v18, %v12328_v19  ;;  %v13725_v32 = vld [vmem:[%s20825_s3 + $0x90c] sm:$0xf]  ;;  %v12455_v18 = vor.u32 %v13897_v3, %v12454_v61  ;;  %v11086_v2 = vld [vmem:[%s20825_s3 + $0x390] sm:$0xf] }
 0x41f   :  { %7464 = vmatpush.bf16.msrb.mxu1 %v12107_v12  ;;  %v11784_v40 = vld [vmem:[%s20825_s3 + $0x928] sm:$0xf0]  ;;  %7387 = vmatpush.bf16.msrb.mxu3 %v12583_v0  ;;  %v7214_v12 = vpop.f32.mrf.mxu1 }
 0x420   :  { %v13789_v51 = vld [vmem:[%s20825_s3 + $0xb0c] sm:$0xf]  ;;  %v11787_v28 = vor.u32 %v13725_v32, %v11784_v40  ;;  %v10798_v12 = vld [vmem:[%s20825_s3 + $0x150] sm:$0xf] }
 0x421   :  { %7477 = vmatpush.bf16.msrb.mxu2 %v12363_v13  ;;  %v12040_v21 = vld [vmem:[%s20825_s3 + $0xb28] sm:$0xf0]  ;;  %7452 = vmatpush.bf16.msrb.mxu0 %v11819_v49  ;;  %v12422_v49 = vld [vmem:[%s20825_s3 + $0xe08] sm:$0xf] }
 0x422   :  { %v13853_v25 = vld [vmem:[%s20825_s3 + $0xd0c] sm:$0xf]  ;;  %v12043_v22 = vor.u32 %v13789_v51, %v12040_v21 }
 0x423   :  { %v12296_v34 = vld [vmem:[%s20825_s3 + $0xd28] sm:$0xf0]  ;;  %7465 = vmatpush.bf16.msrb.mxu1 %v12075_v33  ;;  %7388 = vmatpush.bf16.msrb.mxu3 %v12551_v38 }
 0x424   :  { %v12299_v31 = vor.u32 %v13853_v25, %v12296_v34  ;;  %v13717_v36 = vld [vmem:[%s20825_s3 + $0x8cc] sm:$0xf]  ;;  %v12423_v25 = vor.u32 %v13889_v37, %v12422_v49  ;;  %v10766_v37 = vld [vmem:[%s20825_s3 + $0x110] sm:$0xf] }
 0x425   :  { %7478 = vmatpush.bf16.msrb.mxu2 %v12331_v23  ;;  %v11752_v43 = vld [vmem:[%s20825_s3 + $0x8e8] sm:$0xf0]  ;;  %7453 = vmatpush.bf16.msrb.mxu0 %v11787_v28  ;;  %v7225_v34 = vpop.f32.mrf.mxu2 }
 0x426   :  { %v13781_v44 = vld [vmem:[%s20825_s3 + $0xacc] sm:$0xf]  ;;  %v11755_v24 = vor.u32 %v13717_v36, %v11752_v43  ;;  %v18851_v28 = vadd.f32 %v7225_v34, %v7213_v56  ;;  %v13562_v43 = vld [vmem:[%s20825_s3 + $0x3ec] sm:$0xf0] }
 0x427   :  { %v12008_v30 = vld [vmem:[%s20825_s3 + $0xae8] sm:$0xf0]  ;;  %7466 = vmatpush.bf16.msrb.mxu1 %v12043_v22  ;;  %7389 = vmatpush.bf16.msrb.mxu3 %v12519_v26  ;;  %v13498_v22 = vld [vmem:[%s20825_s3 + $0x1ec] sm:$0xf0] }
 0x428   :  { %v13845_v4 = vld [vmem:[%s20825_s3 + $0xccc] sm:$0xf]  ;;  %v12011_v59 = vor.u32 %v13781_v44, %v12008_v30  ;;  %v11374_v44 = vld [vmem:[%s20825_s3 + $0x5d0] sm:$0xf]  ;;  %v10863_v58 = vor.u32 %v13498_v22, %v10862_v29 }
 0x429   :  { %v12264_v55 = vld [vmem:[%s20825_s3 + $0xce8] sm:$0xf0]  ;;  %7479 = vmatpush.bf16.msrb.mxu2 %v12299_v31  ;;  %7454 = vmatpush.bf16.msrb.mxu0 %v11755_v24  ;;  %v11118_v31 = vld [vmem:[%s20825_s3 + $0x3d0] sm:$0xf] }
 0x42a   :  { %v12267_v60 = vor.u32 %v13845_v4, %v12264_v55  ;;  %v13709_v50 = vld [vmem:[%s20825_s3 + $0x88c] sm:$0xf]  ;;  %v13626_v26 = vld [vmem:[%s20825_s3 + $0x5ec] sm:$0xf0]  ;;  %v11119_v57 = vor.u32 %v13562_v43, %v11118_v31 }
 0x42b   :  { %v11720_v48 = vld [vmem:[%s20825_s3 + $0x8a8] sm:$0xf0]  ;;  %7467 = vmatpush.bf16.msrb.mxu1 %v12011_v59  ;;  %7390 = vmatpush.bf16.msrb.mxu3 %v12487_v62  ;;  %v11375_v24 = vor.u32 %v13626_v26, %v11374_v44  ;;  %v10830_v59 = vld [vmem:[%s20825_s3 + $0x190] sm:$0xf] }
 0x42c   :  { %v13773_v47 = vld [vmem:[%s20825_s3 + $0xa8c] sm:$0xf]  ;;  %v11723_v13 = vor.u32 %v13709_v50, %v11720_v48  ;;  %v13554_v48 = vld [vmem:[%s20825_s3 + $0x3ac] sm:$0xf0] }
 0x42d   :  { %v11976_v54 = vld [vmem:[%s20825_s3 + $0xaa8] sm:$0xf0]  ;;  %7480 = vmatpush.bf16.msrb.mxu2 %v12267_v60  ;;  %v13490_v60 = vld [vmem:[%s20825_s3 + $0x1ac] sm:$0xf0]  ;;  %v7227_v61 = vpop.f32.mrf.mxu2  ;;  %v11087_v3 = vor.u32 %v13554_v48, %v11086_v2 }
 0x42e   :  { %v13837_v10 = vld [vmem:[%s20825_s3 + $0xc8c] sm:$0xf]  ;;  %v11979_v1 = vor.u32 %v13773_v47, %v11976_v54  ;;  %7455 = vmatpush.bf16.msrb.mxu0 %v11723_v13  ;;  %v11342_v47 = vld [vmem:[%s20825_s3 + $0x590] sm:$0xf] }
 0x42f   :  { %v12232_v45 = vld [vmem:[%s20825_s3 + $0xca8] sm:$0xf0]  ;;  %7391 = vmatpush.bf16.msrb.mxu3 %v12455_v18  ;;  %v13618_v62 = vld [vmem:[%s20825_s3 + $0x5ac] sm:$0xf0] }
 0x430   :  { %v12235_v16 = vor.u32 %v13837_v10, %v12232_v45  ;;  %v13701_v17 = vld [vmem:[%s20825_s3 + $0x84c] sm:$0xf]  ;;  %7468 = vmatpush.bf16.msrb.mxu1 %v11979_v1  ;;  %v10831_v45 = vor.u32 %v13490_v60, %v10830_v59  ;;  %v11343_v11 = vor.u32 %v13618_v62, %v11342_v47  ;;  %v13482_v13 = vld [vmem:[%s20825_s3 + $0x16c] sm:$0xf0] }
 0x431   :  { %v11688_v0 = vld [vmem:[%s20825_s3 + $0x868] sm:$0xf0]  ;;  %v11054_v1 = vld [vmem:[%s20825_s3 + $0x350] sm:$0xf] }
 0x432   :  { %v13765_v53 = vld [vmem:[%s20825_s3 + $0xa4c] sm:$0xf]  ;;  %v11691_v33 = vor.u32 %v13701_v17, %v11688_v0  ;;  %7481 = vmatpush.bf16.msrb.mxu2 %v12235_v16  ;;  %v13546_v17 = vld [vmem:[%s20825_s3 + $0x36c] sm:$0xf0] }
 0x433   :  { %v11944_v19 = vld [vmem:[%s20825_s3 + $0xa68] sm:$0xf0]  ;;  %7392 = vmatpush.bf16.msrb.mxu3 %v12423_v25  ;;  %v11310_v0 = vld [vmem:[%s20825_s3 + $0x550] sm:$0xf] }
 0x434   :  { %v13829_v20 = vld [vmem:[%s20825_s3 + $0xc4c] sm:$0xf]  ;;  %v11947_v32 = vor.u32 %v13765_v53, %v11944_v19  ;;  %7456 = vmatpush.bf16.msrb.mxu0 %v11691_v33  ;;  %v13610_v53 = vld [vmem:[%s20825_s3 + $0x56c] sm:$0xf0] }
 0x435   :  { %v12200_v6 = vld [vmem:[%s20825_s3 + $0xc68] sm:$0xf0]  ;;  %v11311_v49 = vor.u32 %v13610_v53, %v11310_v0  ;;  %v13474_v33 = vld [vmem:[%s20825_s3 + $0x12c] sm:$0xf0]  ;;  %v18955_v34 = vpop.f32.mrf.mxu1 }
 0x436   :  { %v13685_v23 = vld [vmem:[%s20825_s3 + $0x7cc] sm:$0xf]  ;;  %v12203_v40 = vor.u32 %v13829_v20, %v12200_v6  ;;  %7469 = vmatpush.bf16.msrb.mxu1 %v11947_v32  ;;  %7393 = vmatmul.bf16.vlgmr.msrb.gmra.mxu3 %v18245_v52  ;;  %v10799_v20 = vor.u32 %v13482_v13, %v10798_v12  ;;  %v11055_v6 = vor.u32 %v13546_v17, %v11054_v1  ;;  %v13538_v32 = vld [vmem:[%s20825_s3 + $0x32c] sm:$0xf0] }
 0x437   :  { %v11624_v7 = vld [vmem:[%s20825_s3 + $0x7e8] sm:$0xf0]  ;;  %v13466_v29 = vld [vmem:[%s20825_s3 + $0xec] sm:$0xf0] }
 0x438   :  { %v13693_v51 = vld [vmem:[%s20825_s3 + $0x80c] sm:$0xf]  ;;  %v11627_v27 = vor.u32 %v13685_v23, %v11624_v7  ;;  %7482 = vmatpush.bf16.msrb.mxu2 %v12203_v40  ;;  %v11022_v23 = vld [vmem:[%s20825_s3 + $0x310] sm:$0xf] }
 0x439   :  { %v11656_v38 = vld [vmem:[%s20825_s3 + $0x828] sm:$0xf0]  ;;  %v11278_v40 = vld [vmem:[%s20825_s3 + $0x510] sm:$0xf] }
 0x43a   :  { %v13757_v21 = vld [vmem:[%s20825_s3 + $0xa0c] sm:$0xf]  ;;  %v11659_v36 = vor.u32 %v13693_v51, %v11656_v38  ;;  %7437 = vmatpush.bf16.msra.mxu3 %v11627_v27  ;;  %v13602_v51 = vld [vmem:[%s20825_s3 + $0x52c] sm:$0xf0]  ;;  %v18947_v38 = vpop.f32.mrf.mxu0 }
 0x43b   :  { %v11912_v41 = vld [vmem:[%s20825_s3 + $0xa28] sm:$0xf0]  ;;  %v10734_v27 = vld [vmem:[%s20825_s3 + $0xd0] sm:$0xf] }
 0x43c   :  { %v13821_v63 = vld [vmem:[%s20825_s3 + $0xc0c] sm:$0xf]  ;;  %v11915_v30 = vor.u32 %v13757_v21, %v11912_v41  ;;  %7457 = vmatpush.bf16.msrb.mxu0 %v11659_v36  ;;  %v10767_v41 = vor.u32 %v13474_v33, %v10766_v37  ;;  %v10990_v22 = vld [vmem:[%s20825_s3 + $0x2d0] sm:$0xf] }
 0x43d   :  { %v12168_v42 = vld [vmem:[%s20825_s3 + $0xc28] sm:$0xf0]  ;;  %v13530_v36 = vld [vmem:[%s20825_s3 + $0x2ec] sm:$0xf0]  ;;  %v18990_v59 = vpop.f32.mrf.mxu2 }
 0x43e   :  { %v13677_v4 = vld [vmem:[%s20825_s3 + $0x78c] sm:$0xf]  ;;  %v12171_v56 = vor.u32 %v13821_v63, %v12168_v42  ;;  %7470 = vmatpush.bf16.msrb.mxu1 %v11915_v30  ;;  %v11023_v63 = vor.u32 %v13538_v32, %v11022_v23  ;;  %v11279_v42 = vor.u32 %v13602_v51, %v11278_v40  ;;  %v11246_v43 = vld [vmem:[%s20825_s3 + $0x4d0] sm:$0xf] }
 0x43f   :  { %v11592_v55 = vld [vmem:[%s20825_s3 + $0x7a8] sm:$0xf0]  ;;  %7458 = vmatmul.bf16.vlgmr.msrb.gmra.mxu0 %v17729_v46  ;;  %v13594_v44 = vld [vmem:[%s20825_s3 + $0x4ec] sm:$0xf0] }
 0x440   :  { %v11595_v50 = vor.u32 %v13677_v4, %v11592_v55  ;;  %v13669_v54 = vld [vmem:[%s20825_s3 + $0x74c] sm:$0xf]  ;;  %7483 = vmatpush.bf16.msrb.mxu2 %v12171_v56  ;;  %7502 = vmatpush.bf16.msra.mxu0 %v10863_v58  ;;  %v10735_v4 = vor.u32 %v13466_v29, %v10734_v27  ;;  %v10991_v55 = vor.u32 %v13530_v36, %v10990_v22  ;;  %v10702_v58 = vld [vmem:[%s20825_s3 + $0x90] sm:$0xf] }
 0x441   :  { %v11560_v10 = vld [vmem:[%s20825_s3 + $0x768] sm:$0xf0]  ;;  %7471 = vmatmul.bf16.vlgmr.msrb.gmra.mxu1 %v17731_v39  ;;  %v11247_v56 = vor.u32 %v13594_v44, %v11246_v43  ;;  %v13522_v2 = vld [vmem:[%s20825_s3 + $0x2ac] sm:$0xf0] }
 0x442   :  { %7515 = vmatpush.bf16.msra.mxu1 %v11119_v57  ;;  %7438 = vmatpush.bf16.msra.mxu3 %v11595_v50  ;;  %v11563_v16 = vor.u32 %v13669_v54, %v11560_v10  ;;  %v13661_v18 = vld [vmem:[%s20825_s3 + $0x70c] sm:$0xf]  ;;  %v13458_v57 = vld [vmem:[%s20825_s3 + $0xac] sm:$0xf0]  ;;  %v7253_v47 = vpop.f32.mrf.mxu0  ;;  %v7266_v10 = vpop.f32.mrf.mxu1 }
 0x443   :  { %7484 = vmatmul.bf16.vlgmr.msrb.gmra.mxu2 %v17869_v15  ;;  %v11528_v19 = vld [vmem:[%s20825_s3 + $0x728] sm:$0xf0]  ;;  %v11214_v50 = vld [vmem:[%s20825_s3 + $0x490] sm:$0xf] }
 0x444   :  { %7528 = vmatpush.bf16.msra.mxu2 %v11375_v24  ;;  %7503 = vmatpush.bf16.msra.mxu0 %v10831_v45  ;;  %v11531_v7 = vor.u32 %v13661_v18, %v11528_v19  ;;  %v13653_v21 = vld [vmem:[%s20825_s3 + $0x6cc] sm:$0xf]  ;;  %v10958_v24 = vld [vmem:[%s20825_s3 + $0x290] sm:$0xf]  ;;  %v10703_v45 = vor.u32 %v13458_v57, %v10702_v58 }
 0x445   :  { %v11496_v25 = vld [vmem:[%s20825_s3 + $0x6e8] sm:$0xf0]  ;;  %v13586_v48 = vld [vmem:[%s20825_s3 + $0x4ac] sm:$0xf0]  ;;  %v10959_v61 = vor.u32 %v13522_v2, %v10958_v24  ;;  %v7279_v32 = vpop.f32.mrf.mxu2 }
 0x446   :  { %7516 = vmatpush.bf16.msra.mxu1 %v11087_v3  ;;  %7439 = vmatpush.bf16.msra.mxu3 %v11563_v16  ;;  %v11499_v31 = vor.u32 %v13653_v21, %v11496_v25  ;;  %v13645_v26 = vld [vmem:[%s20825_s3 + $0x68c] sm:$0xf]  ;;  %v11215_v3 = vor.u32 %v13586_v48, %v11214_v50  ;;  %v13450_v12 = vld [vmem:[%s20825_s3 + $0x6c] sm:$0xf0] }
 0x447   :  { %v11464_v30 = vld [vmem:[%s20825_s3 + $0x6a8] sm:$0xf0]  ;;  %v10926_v13 = vld [vmem:[%s20825_s3 + $0x250] sm:$0xf] }
 0x448   :  { %7529 = vmatpush.bf16.msra.mxu2 %v11343_v11  ;;  %7504 = vmatpush.bf16.msra.mxu0 %v10799_v20  ;;  %v11467_v60 = vor.u32 %v13645_v26, %v11464_v30  ;;  %v13637_v62 = vld [vmem:[%s20825_s3 + $0x64c] sm:$0xf]  ;;  %v10670_v11 = vld [vmem:[%s20825_s3 + $0x50] sm:$0xf] }
 0x449   :  { %v11432_v54 = vld [vmem:[%s20825_s3 + $0x668] sm:$0xf0]  ;;  %v13514_v16 = vld [vmem:[%s20825_s3 + $0x26c] sm:$0xf0]  ;;  %v10671_v19 = vor.u32 %v13450_v12, %v10670_v11 }
 0x44a   :  { %7517 = vmatpush.bf16.msra.mxu1 %v11055_v6  ;;  %7440 = vmatpush.bf16.msra.mxu3 %v11531_v7  ;;  %v11435_v1 = vor.u32 %v13637_v62, %v11432_v54  ;;  %v11182_v17 = vld [vmem:[%s20825_s3 + $0x450] sm:$0xf]  ;;  %v13629_v53 = vld [vmem:[%s20825_s3 + $0x60c] sm:$0xf] }
 0x44b   :  { %v13578_v0 = vld [vmem:[%s20825_s3 + $0x46c] sm:$0xf0]  ;;  %v11400_v18 = vld [vmem:[%s20825_s3 + $0x628] sm:$0xf0] }
 0x44c   :  { %7530 = vmatpush.bf16.msra.mxu2 %v11311_v49  ;;  %7505 = vmatpush.bf16.msra.mxu0 %v10767_v41  ;;  %v13941_v20 = vld [vmem:[%s20825_s3 + $0xfcc] sm:$0xf]  ;;  %v10927_v49 = vor.u32 %v13514_v16, %v10926_v13  ;;  %v11183_v37 = vor.u32 %v13578_v0, %v11182_v17  ;;  %v10638_v33 = vld [vmem:[%s20825_s3 + $0x10] sm:$0xf]  ;;  %v11403_v40 = vor.u32 %v13629_v53, %v11400_v18  ;;  %v19134_v18 = vld [vmem:[%s20826_s4] sm:$0xff] }
 0x44d   :  { %v12648_v6 = vld [vmem:[%s20825_s3 + $0xfe8] sm:$0xf0]  ;;  %v13442_v23 = vld [vmem:[%s20825_s3 + $0x2c] sm:$0xf0] }
 0x44e   :  { %7518 = vmatpush.bf16.msra.mxu1 %v11023_v63  ;;  %7441 = vmatpush.bf16.msra.mxu3 %v11499_v31  ;;  %v10894_v7 = vld [vmem:[%s20825_s3 + $0x210] sm:$0xf]  ;;  %v12651_v41 = vor.u32 %v13941_v20, %v12648_v6  ;;  %v10639_v29 = vor.u32 %v13442_v23, %v10638_v33  ;;  %v13933_v44 = vld [vmem:[%s20825_s3 + $0xf8c] sm:$0xf] }
 0x44f   :  { %v13506_v51 = vld [vmem:[%s20825_s3 + $0x22c] sm:$0xf0]  ;;  %v12616_v26 = vld [vmem:[%s20825_s3 + $0xfa8] sm:$0xf0] }
 0x450   :  { %7531 = vmatpush.bf16.msra.mxu2 %v11279_v42  ;;  %7506 = vmatpush.bf16.msra.mxu0 %v10735_v4  ;;  %v11150_v21 = vld [vmem:[%s20825_s3 + $0x410] sm:$0xf]  ;;  %v10895_v43 = vor.u32 %v13506_v51, %v10894_v7  ;;  %v13925_v47 = vld [vmem:[%s20825_s3 + $0xf4c] sm:$0xf] }
 0x451   :  { %v13570_v25 = vld [vmem:[%s20825_s3 + $0x42c] sm:$0xf0]  ;;  %v12584_v62 = vld [vmem:[%s20825_s3 + $0xf68] sm:$0xf0] }
 0x452   :  { %7519 = vmatpush.bf16.msra.mxu1 %v10991_v55  ;;  %7442 = vmatpush.bf16.msra.mxu3 %v11467_v60  ;;  %v11886_v63 = vld [vmem:[%s20825_s3 + $0x9d0] sm:$0xf]  ;;  %v11151_v30 = vor.u32 %v13570_v25, %v11150_v21  ;;  %v12619_v60 = vor.u32 %v13933_v44, %v12616_v26  ;;  %v12587_v12 = vor.u32 %v13925_v47, %v12584_v62  ;;  %v13917_v17 = vld [vmem:[%s20825_s3 + $0xf0c] sm:$0xf]  ;;  %v7186_v21 = vpop.f32.mrf.mxu3 }
 0x453   :  { %v13754_v42 = vld [vmem:[%s20825_s3 + $0x9ec] sm:$0xf0]  ;;  %v12552_v0 = vld [vmem:[%s20825_s3 + $0xf28] sm:$0xf0]  ;;  %v7303_v51 = vpop.f32.mrf.mxu0 }
 0x454   :  { %7532 = vmatpush.bf16.msra.mxu2 %v11247_v56  ;;  %7507 = vmatpush.bf16.msra.mxu0 %v10703_v45  ;;  %v12142_v27 = vld [vmem:[%s20825_s3 + $0xbd0] sm:$0xf]  ;;  %v11887_v4 = vor.u32 %v13754_v42, %v11886_v63  ;;  %v12555_v23 = vor.u32 %v13917_v17, %v12552_v0  ;;  %v13909_v25 = vld [vmem:[%s20825_s3 + $0xecc] sm:$0xf] }
 0x455   :  { %v13818_v22 = vld [vmem:[%s20825_s3 + $0xbec] sm:$0xf0]  ;;  %v7316_v42 = vpop.f32.mrf.mxu1 }
 0x456   :  { %7520 = vmatpush.bf16.msra.mxu1 %v10959_v61  ;;  %7443 = vmatpush.bf16.msra.mxu3 %v11435_v1  ;;  %v12398_v31 = vld [vmem:[%s20825_s3 + $0xdd0] sm:$0xf]  ;;  %v12143_v55 = vor.u32 %v13818_v22, %v12142_v27  ;;  %v19162_v27 = vadd.f32 %v7186_v21, %v18738_v14 }
 0x457   :  { %v13882_v36 = vld [vmem:[%s20825_s3 + $0xdec] sm:$0xf0] }
 0x458   :  { %7533 = vmatpush.bf16.msra.mxu2 %v11215_v3  ;;  %7508 = vmatpush.bf16.msra.mxu0 %v10671_v19  ;;  %v12399_v56 = vor.u32 %v13882_v36, %v12398_v31  ;;  %v11854_v58 = vld [vmem:[%s20825_s3 + $0x990] sm:$0xf]  ;;  %v4512_v19 = vperm.slane %v19134_v18, 2 }
 0x459   :  { %v13746_v57 = vld [vmem:[%s20825_s3 + $0x9ac] sm:$0xf0] }
 0x45a   :  { %7521 = vmatpush.bf16.msra.mxu1 %v10927_v49  ;;  %7444 = vmatpush.bf16.msra.mxu3 %v11403_v40  ;;  %v12110_v24 = vld [vmem:[%s20825_s3 + $0xb90] sm:$0xf]  ;;  %v11855_v54 = vor.u32 %v13746_v57, %v11854_v58  ;;  %v7304_v63 = vadd.f32 %v7303_v51, %v4512_v19  ;;  %v12488_v58 = vld [vmem:[%s20825_s3 + $0xea8] sm:$0xf0] }
 0x45b   :  { %v13810_v2 = vld [vmem:[%s20825_s3 + $0xbac] sm:$0xf0] }
 0x45c   :  { %7534 = vmatpush.bf16.msra.mxu2 %v11183_v37  ;;  %7509 = vmatpush.bf16.msra.mxu0 %v10639_v29  ;;  %v12366_v50 = vld [vmem:[%s20825_s3 + $0xd90] sm:$0xf]  ;;  %v12111_v10 = vor.u32 %v13810_v2, %v12110_v24  ;;  %v7317_v14 = vadd.f32 %v7316_v42, %v7304_v63 }
 0x45d   :  { %v13874_v48 = vld [vmem:[%s20825_s3 + $0xdac] sm:$0xf0]  ;;  %7445 = vmatmul.bf16.vlgmr.msra.gmra.mxu3 %v17544_v9  ;;  %v7329_v47 = vpop.f32.mrf.mxu2 }
 0x45e   :  { %7489 = vmatpush.bf16.msrb.mxu3 %v12651_v41  ;;  %7522 = vmatpush.bf16.msra.mxu1 %v10895_v43  ;;  %v12367_v45 = vor.u32 %v13874_v48, %v12366_v50  ;;  %v11822_v61 = vld [vmem:[%s20825_s3 + $0x950] sm:$0xf]  ;;  %v12520_v41 = vld [vmem:[%s20825_s3 + $0xee8] sm:$0xf0] }
 0x45f   :  { %v13738_v3 = vld [vmem:[%s20825_s3 + $0x96c] sm:$0xf0]  ;;  %7510 = vmatmul.bf16.vlgmr.msra.gmra.mxu0 %v17538_v5  ;;  %v12523_v26 = vor.u32 %v13909_v25, %v12520_v41 }
 0x460   :  { %7535 = vmatpush.bf16.msra.mxu2 %v11151_v30  ;;  %7554 = vmatpush.bf16.msrb.mxu0 %v11887_v4  ;;  %v12078_v11 = vld [vmem:[%s20825_s3 + $0xb50] sm:$0xf]  ;;  %v11823_v53 = vor.u32 %v13738_v3, %v11822_v61  ;;  %v19206_v61 = vadd.f32 %v7329_v47, %v7317_v14  ;;  %v7305_v3 = vpop.f32.mrf.mxu0 }
 0x461   :  { %v13802_v13 = vld [vmem:[%s20825_s3 + $0xb6c] sm:$0xf0]  ;;  %7523 = vmatmul.bf16.vlgmr.msra.gmra.mxu1 %v17540_v35  ;;  %v13550_v3 = vld [vmem:[%s20825_s3 + $0x394] sm:$0xf] }
 0x462   :  { %7567 = vmatpush.bf16.msrb.mxu1 %v12143_v55  ;;  %7490 = vmatpush.bf16.msrb.mxu3 %v12619_v60  ;;  %v12334_v1 = vld [vmem:[%s20825_s3 + $0xd50] sm:$0xf]  ;;  %v12079_v20 = vor.u32 %v13802_v13, %v12078_v11  ;;  %v7188_v11 = vpop.f32.mrf.mxu3  ;;  %v12456_v13 = vld [vmem:[%s20825_s3 + $0xe68] sm:$0xf0] }
 0x463   :  { %v13866_v16 = vld [vmem:[%s20825_s3 + $0xd6c] sm:$0xf0]  ;;  %7536 = vmatmul.bf16.vlgmr.msra.gmra.mxu2 %v17542_v8 }
 0x464   :  { %7580 = vmatpush.bf16.msrb.mxu2 %v12399_v56  ;;  %7555 = vmatpush.bf16.msrb.mxu0 %v11855_v54  ;;  %v12335_v6 = vor.u32 %v13866_v16, %v12334_v1  ;;  %v11790_v49 = vld [vmem:[%s20825_s3 + $0x910] sm:$0xf]  ;;  %v13901_v56 = vld [vmem:[%s20825_s3 + $0xe8c] sm:$0xf]  ;;  %v7318_v1 = vpop.f32.mrf.mxu1 }
 0x465   :  { %v13730_v37 = vld [vmem:[%s20825_s3 + $0x92c] sm:$0xf0]  ;;  %v12491_v62 = vor.u32 %v13901_v56, %v12488_v58  ;;  %v11120_v58 = vld [vmem:[%s20825_s3 + $0x3f0] sm:$0xf0] }
 0x466   :  { %7568 = vmatpush.bf16.msrb.mxu1 %v12111_v10  ;;  %v12046_v33 = vld [vmem:[%s20825_s3 + $0xb10] sm:$0xf]  ;;  %7491 = vmatpush.bf16.msrb.mxu3 %v12587_v12  ;;  %v11791_v29 = vor.u32 %v13730_v37, %v11790_v49  ;;  %v13893_v12 = vld [vmem:[%s20825_s3 + $0xe4c] sm:$0xf] }
 0x467   :  { %v13794_v7 = vld [vmem:[%s20825_s3 + $0xb2c] sm:$0xf0] }
 0x468   :  { %7581 = vmatpush.bf16.msrb.mxu2 %v12367_v45  ;;  %v12302_v32 = vld [vmem:[%s20825_s3 + $0xd10] sm:$0xf]  ;;  %7556 = vmatpush.bf16.msrb.mxu0 %v11823_v53  ;;  %v12047_v22 = vor.u32 %v13794_v7, %v12046_v33  ;;  %v12424_v7 = vld [vmem:[%s20825_s3 + $0xe28] sm:$0xf0] }
 0x469   :  { %v13858_v40 = vld [vmem:[%s20825_s3 + $0xd2c] sm:$0xf0] }
 0x46a   :  { %7569 = vmatpush.bf16.msrb.mxu1 %v12079_v20  ;;  %v12303_v31 = vor.u32 %v13858_v40, %v12302_v32  ;;  %v11758_v36 = vld [vmem:[%s20825_s3 + $0x8d0] sm:$0xf]  ;;  %7492 = vmatpush.bf16.msrb.mxu3 %v12555_v23  ;;  %v13885_v23 = vld [vmem:[%s20825_s3 + $0xe0c] sm:$0xf]  ;;  %v7238_v14 = vpop.f32.mrf.mxu3 }
 0x46b   :  { %v13722_v43 = vld [vmem:[%s20825_s3 + $0x8ec] sm:$0xf0] }
 0x46c   :  { %7582 = vmatpush.bf16.msrb.mxu2 %v12335_v6  ;;  %v12014_v44 = vld [vmem:[%s20825_s3 + $0xad0] sm:$0xf]  ;;  %7557 = vmatpush.bf16.msrb.mxu0 %v11791_v29  ;;  %v11759_v57 = vor.u32 %v13722_v43, %v11758_v36  ;;  %v12459_v6 = vor.u32 %v13893_v12, %v12456_v13  ;;  %v7331_v29 = vpop.f32.mrf.mxu2  ;;  %v13614_v12 = vld [vmem:[%s20825_s3 + $0x594] sm:$0xf] }
 0x46d   :  { %v13786_v30 = vld [vmem:[%s20825_s3 + $0xaec] sm:$0xf0]  ;;  %v11344_v13 = vld [vmem:[%s20825_s3 + $0x5b0] sm:$0xf0] }
 0x46e   :  { %v12270_v4 = vld [vmem:[%s20825_s3 + $0xcd0] sm:$0xf]  ;;  %7570 = vmatpush.bf16.msrb.mxu1 %v12047_v22  ;;  %v12015_v24 = vor.u32 %v13786_v30, %v12014_v44  ;;  %7493 = vmatpush.bf16.msrb.mxu3 %v12523_v26  ;;  %v12427_v22 = vor.u32 %v13885_v23, %v12424_v7  ;;  %v13494_v26 = vld [vmem:[%s20825_s3 + $0x1d4] sm:$0xf] }
 0x46f   :  { %v13850_v55 = vld [vmem:[%s20825_s3 + $0xcec] sm:$0xf0]  ;;  %v10864_v30 = vld [vmem:[%s20825_s3 + $0x1f0] sm:$0xf0] }
 0x470   :  { %7583 = vmatpush.bf16.msrb.mxu2 %v12303_v31  ;;  %v12271_v60 = vor.u32 %v13850_v55, %v12270_v4  ;;  %v11726_v2 = vld [vmem:[%s20825_s3 + $0x890] sm:$0xf]  ;;  %7558 = vmatpush.bf16.msrb.mxu0 %v11759_v57  ;;  %v13558_v4 = vld [vmem:[%s20825_s3 + $0x3d4] sm:$0xf]  ;;  %v7239_v55 = vadd.f32 %v7238_v14, %v18851_v28  ;;  %v10867_v47 = vor.u32 %v13494_v26, %v10864_v30 }
 0x471   :  { %v13714_v50 = vld [vmem:[%s20825_s3 + $0x8ac] sm:$0xf0]  ;;  %v13622_v57 = vld [vmem:[%s20825_s3 + $0x5d4] sm:$0xf] }
 0x472   :  { %v11982_v48 = vld [vmem:[%s20825_s3 + $0xa90] sm:$0xf]  ;;  %v11727_v16 = vor.u32 %v13714_v50, %v11726_v2  ;;  %7571 = vmatpush.bf16.msrb.mxu1 %v12015_v24  ;;  %7494 = vmatpush.bf16.msrb.mxu3 %v12491_v62  ;;  %v11376_v24 = vld [vmem:[%s20825_s3 + $0x5f0] sm:$0xf0]  ;;  %v7252_v50 = vadd.f32 %v18947_v38, %v7239_v55  ;;  %v11123_v62 = vor.u32 %v13558_v4, %v11120_v58 }
 0x473   :  { %v13778_v54 = vld [vmem:[%s20825_s3 + $0xaac] sm:$0xf0]  ;;  %v11088_v38 = vld [vmem:[%s20825_s3 + $0x3b0] sm:$0xf0] }
 0x474   :  { %v12238_v10 = vld [vmem:[%s20825_s3 + $0xc90] sm:$0xf]  ;;  %7584 = vmatpush.bf16.msrb.mxu2 %v12271_v60  ;;  %v11983_v17 = vor.u32 %v13778_v54, %v11982_v48  ;;  %7559 = vmatpush.bf16.msrb.mxu0 %v11727_v16  ;;  %v11379_v54 = vor.u32 %v13622_v57, %v11376_v24  ;;  %v7265_v1 = vadd.f32 %v18955_v34, %v7252_v50  ;;  %v13606_v23 = vld [vmem:[%s20825_s3 + $0x554] sm:$0xf] }
 0x475   :  { %v13842_v45 = vld [vmem:[%s20825_s3 + $0xcac] sm:$0xf0]  ;;  %v11347_v34 = vor.u32 %v13614_v12, %v11344_v13  ;;  %v11312_v7 = vld [vmem:[%s20825_s3 + $0x570] sm:$0xf0] }
 0x476   :  { %v12239_v0 = vor.u32 %v13842_v45, %v12238_v10  ;;  %v11694_v53 = vld [vmem:[%s20825_s3 + $0x850] sm:$0xf]  ;;  %7572 = vmatpush.bf16.msrb.mxu1 %v11983_v17  ;;  %7495 = vmatpush.bf16.msrb.mxu3 %v12459_v6  ;;  %v13486_v10 = vld [vmem:[%s20825_s3 + $0x194] sm:$0xf] }
 0x477   :  { %v13706_v19 = vld [vmem:[%s20825_s3 + $0x86c] sm:$0xf0]  ;;  %v10832_v45 = vld [vmem:[%s20825_s3 + $0x1b0] sm:$0xf0]  ;;  %v19368_v26 = vpop.f32.mrf.mxu1 }
 0x478   :  { %v11950_v20 = vld [vmem:[%s20825_s3 + $0xa50] sm:$0xf]  ;;  %v11695_v32 = vor.u32 %v13706_v19, %v11694_v53  ;;  %7585 = vmatpush.bf16.msrb.mxu2 %v12239_v0  ;;  %v10835_v0 = vor.u32 %v13486_v10, %v10832_v45  ;;  %v7278_v53 = vadd.f32 %v18990_v59, %v7265_v1  ;;  %v11091_v19 = vor.u32 %v13550_v3, %v11088_v38  ;;  %v13478_v6 = vld [vmem:[%s20825_s3 + $0x154] sm:$0xf] }
 0x479   :  { %v13770_v49 = vld [vmem:[%s20825_s3 + $0xa6c] sm:$0xf0]  ;;  %v10736_v58 = vld [vmem:[%s20825_s3 + $0xf0] sm:$0xf0] }
 0x47a   :  { %v12206_v37 = vld [vmem:[%s20825_s3 + $0xc50] sm:$0xf]  ;;  %v11951_v21 = vor.u32 %v13770_v49, %v11950_v20  ;;  %7560 = vmatpush.bf16.msrb.mxu0 %v11695_v32  ;;  %7496 = vmatpush.bf16.msrb.mxu3 %v12427_v22  ;;  %v7240_v20 = vpop.f32.mrf.mxu3  ;;  %v10800_v49 = vld [vmem:[%s20825_s3 + $0x170] sm:$0xf0] }
 0x47b   :  { %v13834_v33 = vld [vmem:[%s20825_s3 + $0xc6c] sm:$0xf0]  ;;  %v11024_v22 = vld [vmem:[%s20825_s3 + $0x330] sm:$0xf0] }
 0x47c   :  { %v11630_v40 = vld [vmem:[%s20825_s3 + $0x7d0] sm:$0xf]  ;;  %v12207_v25 = vor.u32 %v13834_v33, %v12206_v37  ;;  %7573 = vmatpush.bf16.msrb.mxu1 %v11951_v21  ;;  %v13542_v37 = vld [vmem:[%s20825_s3 + $0x354] sm:$0xf] }
 0x47d   :  { %v13690_v51 = vld [vmem:[%s20825_s3 + $0x7ec] sm:$0xf0]  ;;  %7497 = vmatmul.bf16.vlgmr.msrb.gmra.mxu3 %v18245_v52  ;;  %v11056_v33 = vld [vmem:[%s20825_s3 + $0x370] sm:$0xf0] }
 0x47e   :  { %v11662_v41 = vld [vmem:[%s20825_s3 + $0x810] sm:$0xf]  ;;  %v11631_v44 = vor.u32 %v13690_v51, %v11630_v40  ;;  %7586 = vmatpush.bf16.msrb.mxu2 %v12207_v25  ;;  %v10803_v51 = vor.u32 %v13478_v6, %v10800_v49  ;;  %v11059_v21 = vor.u32 %v13542_v37, %v11056_v33  ;;  %v11315_v25 = vor.u32 %v13606_v23, %v11312_v7  ;;  %v13526_v57 = vld [vmem:[%s20825_s3 + $0x2d4] sm:$0xf] }
 0x47f   :  { %v13698_v63 = vld [vmem:[%s20825_s3 + $0x82c] sm:$0xf0]  ;;  %v13454_v3 = vld [vmem:[%s20825_s3 + $0x94] sm:$0xf]  ;;  %v19405_v12 = vpop.f32.mrf.mxu2 }
 0x480   :  { %v11918_v42 = vld [vmem:[%s20825_s3 + $0xa10] sm:$0xf]  ;;  %v11663_v56 = vor.u32 %v13698_v63, %v11662_v41  ;;  %7541 = vmatpush.bf16.msra.mxu3 %v11631_v44  ;;  %v13470_v41 = vld [vmem:[%s20825_s3 + $0x114] sm:$0xf] }
 0x481   :  { %v13762_v31 = vld [vmem:[%s20825_s3 + $0xa2c] sm:$0xf0]  ;;  %v10768_v63 = vld [vmem:[%s20825_s3 + $0x130] sm:$0xf0] }
 0x482   :  { %v12174_v36 = vld [vmem:[%s20825_s3 + $0xc10] sm:$0xf]  ;;  %v11919_v60 = vor.u32 %v13762_v31, %v11918_v42  ;;  %7561 = vmatpush.bf16.msrb.mxu0 %v11663_v56  ;;  %v13534_v42 = vld [vmem:[%s20825_s3 + $0x314] sm:$0xf]  ;;  %v10771_v30 = vor.u32 %v13470_v41, %v10768_v63  ;;  %v7290_v50 = vpop.f32.mrf.mxu3 }
 0x483   :  { %v13826_v43 = vld [vmem:[%s20825_s3 + $0xc2c] sm:$0xf0]  ;;  %v13598_v31 = vld [vmem:[%s20825_s3 + $0x514] sm:$0xf]  ;;  %v11027_v4 = vor.u32 %v13534_v42, %v11024_v22 }
 0x484   :  { %v11598_v28 = vld [vmem:[%s20825_s3 + $0x790] sm:$0xf]  ;;  %v12175_v48 = vor.u32 %v13826_v43, %v12174_v36  ;;  %7574 = vmatpush.bf16.msrb.mxu1 %v11919_v60  ;;  %v11280_v36 = vld [vmem:[%s20825_s3 + $0x530] sm:$0xf0]  ;;  %v19360_v43 = vpop.f32.mrf.mxu0 }
 0x485   :  { %v13682_v2 = vld [vmem:[%s20825_s3 + $0x7ac] sm:$0xf0]  ;;  %7562 = vmatmul.bf16.vlgmr.msrb.gmra.mxu0 %v17729_v46  ;;  %v11283_v55 = vor.u32 %v13598_v31, %v11280_v36  ;;  %v13462_v56 = vld [vmem:[%s20825_s3 + $0xd4] sm:$0xf] }
 0x486   :  { %v11599_v11 = vor.u32 %v13682_v2, %v11598_v28  ;;  %v11566_v16 = vld [vmem:[%s20825_s3 + $0x750] sm:$0xf]  ;;  %7587 = vmatpush.bf16.msrb.mxu2 %v12175_v48  ;;  %7606 = vmatpush.bf16.msra.mxu0 %v10867_v47  ;;  %v10992_v60 = vld [vmem:[%s20825_s3 + $0x2f0] sm:$0xf0] }
 0x487   :  { %v13674_v17 = vld [vmem:[%s20825_s3 + $0x76c] sm:$0xf0]  ;;  %7575 = vmatmul.bf16.vlgmr.msrb.gmra.mxu1 %v17731_v39  ;;  %v13590_v28 = vld [vmem:[%s20825_s3 + $0x4d4] sm:$0xf]  ;;  %v10995_v10 = vor.u32 %v13526_v57, %v10992_v60 }
 0x488   :  { %7619 = vmatpush.bf16.msra.mxu1 %v11123_v62  ;;  %7542 = vmatpush.bf16.msra.mxu3 %v11599_v11  ;;  %v11567_v59 = vor.u32 %v13674_v17, %v11566_v16  ;;  %v11534_v32 = vld [vmem:[%s20825_s3 + $0x710] sm:$0xf]  ;;  %v11248_v2 = vld [vmem:[%s20825_s3 + $0x4f0] sm:$0xf0]  ;;  %v19394_v62 = vadd.f32 %v7290_v50, %v7278_v53 }
 0x489   :  { %7588 = vmatmul.bf16.vlgmr.msrb.gmra.mxu2 %v17869_v15  ;;  %v13666_v40 = vld [vmem:[%s20825_s3 + $0x72c] sm:$0xf0]  ;;  %v11251_v45 = vor.u32 %v13590_v28, %v11248_v2  ;;  %v10704_v11 = vld [vmem:[%s20825_s3 + $0xb0] sm:$0xf0] }
 0x48a   :  { %7632 = vmatpush.bf16.msra.mxu2 %v11379_v54  ;;  %7607 = vmatpush.bf16.msra.mxu0 %v10835_v0  ;;  %v11535_v29 = vor.u32 %v13666_v40, %v11534_v32  ;;  %v11502_v44 = vld [vmem:[%s20825_s3 + $0x6d0] sm:$0xf]  ;;  %v10739_v54 = vor.u32 %v13462_v56, %v10736_v58  ;;  %v13518_v38 = vld [vmem:[%s20825_s3 + $0x294] sm:$0xf]  ;;  %v10707_v20 = vor.u32 %v13454_v3, %v10704_v11 }
 0x48b   :  { %v13658_v14 = vld [vmem:[%s20825_s3 + $0x6ec] sm:$0xf0]  ;;  %v10960_v1 = vld [vmem:[%s20825_s3 + $0x2b0] sm:$0xf0] }
 0x48c   :  { %7620 = vmatpush.bf16.msra.mxu1 %v11091_v19  ;;  %7543 = vmatpush.bf16.msra.mxu3 %v11567_v59  ;;  %v11503_v24 = vor.u32 %v13658_v14, %v11502_v44  ;;  %v11470_v48 = vld [vmem:[%s20825_s3 + $0x690] sm:$0xf]  ;;  %v13582_v16 = vld [vmem:[%s20825_s3 + $0x494] sm:$0xf]  ;;  %v7357_v0 = vpop.f32.mrf.mxu0  ;;  %v10963_v6 = vor.u32 %v13518_v38, %v10960_v1  ;;  %v7383_v14 = vpop.f32.mrf.mxu2 }
 0x48d   :  { %v13650_v47 = vld [vmem:[%s20825_s3 + $0x6ac] sm:$0xf0]  ;;  %v11216_v17 = vld [vmem:[%s20825_s3 + $0x4b0] sm:$0xf0] }
 0x48e   :  { %7633 = vmatpush.bf16.msra.mxu2 %v11347_v34  ;;  %7608 = vmatpush.bf16.msra.mxu0 %v10803_v51  ;;  %v11471_v13 = vor.u32 %v13650_v47, %v11470_v48  ;;  %v11438_v53 = vld [vmem:[%s20825_s3 + $0x650] sm:$0xf]  ;;  %v7370_v34 = vpop.f32.mrf.mxu1  ;;  %v11219_v49 = vor.u32 %v13582_v16, %v11216_v17  ;;  %v13446_v37 = vld [vmem:[%s20825_s3 + $0x54] sm:$0xf]  ;;  %v7292_v51 = vpop.f32.mrf.mxu3 }
 0x48f   :  { %v13642_v19 = vld [vmem:[%s20825_s3 + $0x66c] sm:$0xf0]  ;;  %v10672_v59 = vld [vmem:[%s20825_s3 + $0x70] sm:$0xf0] }
 0x490   :  { %7621 = vmatpush.bf16.msra.mxu1 %v11059_v21  ;;  %7544 = vmatpush.bf16.msra.mxu3 %v11535_v29  ;;  %v13510_v33 = vld [vmem:[%s20825_s3 + $0x254] sm:$0xf]  ;;  %v11439_v23 = vor.u32 %v13642_v19, %v11438_v53  ;;  %v11406_v21 = vld [vmem:[%s20825_s3 + $0x610] sm:$0xf]  ;;  %v10675_v41 = vor.u32 %v13446_v37, %v10672_v59 }
 0x491   :  { %v10928_v7 = vld [vmem:[%s20825_s3 + $0x270] sm:$0xf0]  ;;  %v12654_v63 = vld [vmem:[%s20825_s3 + $0xfd0] sm:$0xf] }
 0x492   :  { %7634 = vmatpush.bf16.msra.mxu2 %v11315_v25  ;;  %7609 = vmatpush.bf16.msra.mxu0 %v10771_v30  ;;  %v13574_v32 = vld [vmem:[%s20825_s3 + $0x454] sm:$0xf]  ;;  %v13634_v25 = vld [vmem:[%s20825_s3 + $0x62c] sm:$0xf0]  ;;  %v10931_v29 = vor.u32 %v13510_v33, %v10928_v7 }
 0x493   :  { %v11184_v40 = vld [vmem:[%s20825_s3 + $0x470] sm:$0xf0]  ;;  %v13946_v42 = vld [vmem:[%s20825_s3 + $0xfec] sm:$0xf0]  ;;  %v11407_v30 = vor.u32 %v13634_v25, %v11406_v21 }
 0x494   :  { %7622 = vmatpush.bf16.msra.mxu1 %v11027_v4  ;;  %7545 = vmatpush.bf16.msra.mxu3 %v11503_v24  ;;  %v11187_v22 = vor.u32 %v13574_v32, %v11184_v40  ;;  %v13438_v31 = vld [vmem:[%s20825_s3 + $0x14] sm:$0xf]  ;;  %v12655_v58 = vor.u32 %v13946_v42, %v12654_v63  ;;  %v12590_v34 = vld [vmem:[%s20825_s3 + $0xf50] sm:$0xf]  ;;  %v4513_v63 = vperm.slane %v19134_v18, 3 }
 0x495   :  { %v10640_v36 = vld [vmem:[%s20825_s3 + $0x30] sm:$0xf0]  ;;  %v12558_v21 = vld [vmem:[%s20825_s3 + $0xf10] sm:$0xf] }
 0x496   :  { %7635 = vmatpush.bf16.msra.mxu2 %v11283_v55  ;;  %7610 = vmatpush.bf16.msra.mxu0 %v10739_v54  ;;  %v13502_v44 = vld [vmem:[%s20825_s3 + $0x214] sm:$0xf]  ;;  %v10643_v28 = vor.u32 %v13438_v31, %v10640_v36  ;;  %v12622_v54 = vld [vmem:[%s20825_s3 + $0xf90] sm:$0xf] }
 0x497   :  { %v10896_v4 = vld [vmem:[%s20825_s3 + $0x230] sm:$0xf0]  ;;  %v13922_v25 = vld [vmem:[%s20825_s3 + $0xf2c] sm:$0xf0] }
 0x498   :  { %7623 = vmatpush.bf16.msra.mxu1 %v10995_v10  ;;  %7546 = vmatpush.bf16.msra.mxu3 %v11471_v13  ;;  %v13566_v55 = vld [vmem:[%s20825_s3 + $0x414] sm:$0xf]  ;;  %v10899_v47 = vor.u32 %v13502_v44, %v10896_v4  ;;  %v13938_v10 = vld [vmem:[%s20825_s3 + $0xfac] sm:$0xf0]  ;;  %v12559_v44 = vor.u32 %v13922_v25, %v12558_v21  ;;  %v7407_v4 = vpop.f32.mrf.mxu0 }
 0x499   :  { %v11152_v56 = vld [vmem:[%s20825_s3 + $0x430] sm:$0xf0]  ;;  %v12623_v17 = vor.u32 %v13938_v10, %v12622_v54  ;;  %v7342_v10 = vpop.f32.mrf.mxu3 }
 0x49a   :  { %7636 = vmatpush.bf16.msra.mxu2 %v11251_v45  ;;  %7611 = vmatpush.bf16.msra.mxu0 %v10707_v20  ;;  %v13750_v57 = vld [vmem:[%s20825_s3 + $0x9d4] sm:$0xf]  ;;  %v11155_v45 = vor.u32 %v13566_v55, %v11152_v56  ;;  %v13930_v20 = vld [vmem:[%s20825_s3 + $0xf6c] sm:$0xf0] }
 0x49b   :  { %v11888_v24 = vld [vmem:[%s20825_s3 + $0x9f0] sm:$0xf0]  ;;  %v12591_v7 = vor.u32 %v13930_v20, %v12590_v34  ;;  %v12526_v55 = vld [vmem:[%s20825_s3 + $0xed0] sm:$0xf] }
 0x49c   :  { %7624 = vmatpush.bf16.msra.mxu1 %v10963_v6  ;;  %7547 = vmatpush.bf16.msra.mxu3 %v11439_v23  ;;  %v13814_v60 = vld [vmem:[%s20825_s3 + $0xbd4] sm:$0xf]  ;;  %v11891_v3 = vor.u32 %v13750_v57, %v11888_v24  ;;  %v13914_v56 = vld [vmem:[%s20825_s3 + $0xeec] sm:$0xf0]  ;;  %v7420_v57 = vpop.f32.mrf.mxu1 }
 0x49d   :  { %v12144_v2 = vld [vmem:[%s20825_s3 + $0xbf0] sm:$0xf0]  ;;  %v12527_v54 = vor.u32 %v13914_v56, %v12526_v55 }
 0x49e   :  { %7637 = vmatpush.bf16.msra.mxu2 %v11219_v49  ;;  %7612 = vmatpush.bf16.msra.mxu0 %v10675_v41  ;;  %v13878_v50 = vld [vmem:[%s20825_s3 + $0xdd4] sm:$0xf]  ;;  %v12147_v11 = vor.u32 %v13814_v60, %v12144_v2 }
 0x49f   :  { %v12400_v48 = vld [vmem:[%s20825_s3 + $0xdf0] sm:$0xf0]  ;;  %v7433_v20 = vpop.f32.mrf.mxu2 }
 0x4a0   :  { %7625 = vmatpush.bf16.msra.mxu1 %v10931_v29  ;;  %7548 = vmatpush.bf16.msra.mxu3 %v11407_v30  ;;  %v12403_v38 = vor.u32 %v13878_v50, %v12400_v48  ;;  %v13742_v13 = vld [vmem:[%s20825_s3 + $0x994] sm:$0xf] }
 0x4a1   :  { %v11856_v1 = vld [vmem:[%s20825_s3 + $0x9b0] sm:$0xf0] }
 0x4a2   :  { %7638 = vmatpush.bf16.msra.mxu2 %v11187_v22  ;;  %v13806_v16 = vld [vmem:[%s20825_s3 + $0xb94] sm:$0xf]  ;;  %7613 = vmatpush.bf16.msra.mxu0 %v10643_v28  ;;  %v11859_v6 = vor.u32 %v13742_v13, %v11856_v1  ;;  %v12494_v13 = vld [vmem:[%s20825_s3 + $0xe90] sm:$0xf] }
 0x4a3   :  { %v12112_v0 = vld [vmem:[%s20825_s3 + $0xbb0] sm:$0xf0]  ;;  %7549 = vmatmul.bf16.vlgmr.msra.gmra.mxu3 %v17544_v9  ;;  %v13906_v1 = vld [vmem:[%s20825_s3 + $0xeac] sm:$0xf0] }
 0x4a4   :  { %7593 = vmatpush.bf16.msrb.mxu3 %v12655_v58  ;;  %v13870_v53 = vld [vmem:[%s20825_s3 + $0xd94] sm:$0xf]  ;;  %7626 = vmatpush.bf16.msra.mxu1 %v10899_v47  ;;  %v12115_v49 = vor.u32 %v13806_v16, %v12112_v0  ;;  %v7408_v58 = vadd.f32 %v7407_v4, %v4513_v63 }
 0x4a5   :  { %v12368_v19 = vld [vmem:[%s20825_s3 + $0xdb0] sm:$0xf0]  ;;  %7614 = vmatmul.bf16.vlgmr.msra.gmra.mxu0 %v17538_v5 }
 0x4a6   :  { %7639 = vmatpush.bf16.msra.mxu2 %v11155_v45  ;;  %7658 = vmatpush.bf16.msrb.mxu0 %v11891_v3  ;;  %v12371_v37 = vor.u32 %v13870_v53, %v12368_v19  ;;  %v13734_v59 = vld [vmem:[%s20825_s3 + $0x954] sm:$0xf]  ;;  %v7421_v47 = vadd.f32 %v7420_v57, %v7408_v58 }
 0x4a7   :  { %v11824_v33 = vld [vmem:[%s20825_s3 + $0x970] sm:$0xf0]  ;;  %7627 = vmatmul.bf16.vlgmr.msra.gmra.mxu1 %v17540_v35 }
 0x4a8   :  { %7671 = vmatpush.bf16.msrb.mxu1 %v12147_v11  ;;  %v13798_v23 = vld [vmem:[%s20825_s3 + $0xb54] sm:$0xf]  ;;  %7594 = vmatpush.bf16.msrb.mxu3 %v12623_v17  ;;  %v11827_v41 = vor.u32 %v13734_v59, %v11824_v33  ;;  %v19615_v59 = vadd.f32 %v7433_v20, %v7421_v47  ;;  %v7409_v33 = vpop.f32.mrf.mxu0  ;;  %v13491_v20 = vld [vmem:[%s20825_s3 + $0x1b4] sm:$0xf0] }
 0x4a9   :  { %v12080_v32 = vld [vmem:[%s20825_s3 + $0xb70] sm:$0xf0]  ;;  %7640 = vmatmul.bf16.vlgmr.msra.gmra.mxu2 %v17542_v8  ;;  %v13619_v33 = vld [vmem:[%s20825_s3 + $0x5b4] sm:$0xf0] }
 0x4aa   :  { %7684 = vmatpush.bf16.msrb.mxu2 %v12403_v38  ;;  %v13862_v40 = vld [vmem:[%s20825_s3 + $0xd54] sm:$0xf]  ;;  %7659 = vmatpush.bf16.msrb.mxu0 %v11859_v6  ;;  %v12083_v42 = vor.u32 %v13798_v23, %v12080_v32  ;;  %v7343_v38 = vadd.f32 %v7342_v10, %v19206_v61  ;;  %v12495_v6 = vor.u32 %v13906_v1, %v12494_v13  ;;  %v12462_v23 = vld [vmem:[%s20825_s3 + $0xe50] sm:$0xf]  ;;  %v13499_v10 = vld [vmem:[%s20825_s3 + $0x1f4] sm:$0xf0] }
 0x4ab   :  { %v12336_v51 = vld [vmem:[%s20825_s3 + $0xd70] sm:$0xf0]  ;;  %v13627_v13 = vld [vmem:[%s20825_s3 + $0x5f4] sm:$0xf0] }
 0x4ac   :  { %7672 = vmatpush.bf16.msrb.mxu1 %v12115_v49  ;;  %v12339_v29 = vor.u32 %v13862_v40, %v12336_v51  ;;  %v13726_v22 = vld [vmem:[%s20825_s3 + $0x914] sm:$0xf]  ;;  %7595 = vmatpush.bf16.msrb.mxu3 %v12591_v7  ;;  %v7356_v17 = vadd.f32 %v19360_v43, %v7343_v38  ;;  %v13898_v7 = vld [vmem:[%s20825_s3 + $0xe6c] sm:$0xf0]  ;;  %v7422_v40 = vpop.f32.mrf.mxu1  ;;  %v11382_v38 = vld [vmem:[%s20825_s3 + $0x5d8] sm:$0xf] }
 0x4ad   :  { %v11792_v31 = vld [vmem:[%s20825_s3 + $0x930] sm:$0xf0] }
 0x4ae   :  { %7685 = vmatpush.bf16.msrb.mxu2 %v12371_v37  ;;  %v13790_v36 = vld [vmem:[%s20825_s3 + $0xb14] sm:$0xf]  ;;  %7660 = vmatpush.bf16.msrb.mxu0 %v11827_v41  ;;  %v11795_v24 = vor.u32 %v13726_v22, %v11792_v31  ;;  %v7369_v32 = vadd.f32 %v19368_v26, %v7356_v17  ;;  %v7344_v22 = vpop.f32.mrf.mxu3 }
 0x4af   :  { %v12048_v18 = vld [vmem:[%s20825_s3 + $0xb30] sm:$0xf0]  ;;  %v13611_v22 = vld [vmem:[%s20825_s3 + $0x574] sm:$0xf0] }
 0x4b0   :  { %v13854_v14 = vld [vmem:[%s20825_s3 + $0xd14] sm:$0xf]  ;;  %7673 = vmatpush.bf16.msrb.mxu1 %v12083_v42  ;;  %v12051_v60 = vor.u32 %v13790_v36, %v12048_v18  ;;  %7596 = vmatpush.bf16.msrb.mxu3 %v12559_v44  ;;  %v19634_v26 = vadd.f32 %v19405_v12, %v7369_v32  ;;  %v12430_v12 = vld [vmem:[%s20825_s3 + $0xe10] sm:$0xf] }
 0x4b1   :  { %v12304_v30 = vld [vmem:[%s20825_s3 + $0xd30] sm:$0xf0]  ;;  %v13890_v18 = vld [vmem:[%s20825_s3 + $0xe2c] sm:$0xf0] }
 0x4b2   :  { %7686 = vmatpush.bf16.msrb.mxu2 %v12339_v29  ;;  %v12307_v28 = vor.u32 %v13854_v14, %v12304_v30  ;;  %v13718_v2 = vld [vmem:[%s20825_s3 + $0x8d4] sm:$0xf]  ;;  %7661 = vmatpush.bf16.msrb.mxu0 %v11795_v24  ;;  %v12463_v29 = vor.u32 %v13898_v7, %v12462_v23 }
 0x4b3   :  { %v11760_v50 = vld [vmem:[%s20825_s3 + $0x8f0] sm:$0xf0] }
 0x4b4   :  { %v13782_v48 = vld [vmem:[%s20825_s3 + $0xad4] sm:$0xf]  ;;  %v11763_v16 = vor.u32 %v13718_v2, %v11760_v50  ;;  %7674 = vmatpush.bf16.msrb.mxu1 %v12051_v60  ;;  %7597 = vmatpush.bf16.msrb.mxu3 %v12527_v54  ;;  %v7435_v60 = vpop.f32.mrf.mxu2  ;;  %v10870_v54 = vld [vmem:[%s20825_s3 + $0x1d8] sm:$0xf] }
 0x4b5   :  { %v12016_v45 = vld [vmem:[%s20825_s3 + $0xaf0] sm:$0xf0] }
 0x4b6   :  { %v13846_v3 = vld [vmem:[%s20825_s3 + $0xcd4] sm:$0xf]  ;;  %7687 = vmatpush.bf16.msrb.mxu2 %v12307_v28  ;;  %v12019_v0 = vor.u32 %v13782_v48, %v12016_v45  ;;  %7662 = vmatpush.bf16.msrb.mxu0 %v11763_v16  ;;  %v12431_v28 = vor.u32 %v13890_v18, %v12430_v12  ;;  %v11126_v45 = vld [vmem:[%s20825_s3 + $0x3d8] sm:$0xf] }
 0x4b7   :  { %v12272_v11 = vld [vmem:[%s20825_s3 + $0xcf0] sm:$0xf0] }
 0x4b8   :  { %v12275_v53 = vor.u32 %v13846_v3, %v12272_v11  ;;  %v13710_v61 = vld [vmem:[%s20825_s3 + $0x894] sm:$0xf]  ;;  %7675 = vmatpush.bf16.msrb.mxu1 %v12019_v0  ;;  %7598 = vmatpush.bf16.msrb.mxu3 %v12495_v6  ;;  %v13563_v11 = vld [vmem:[%s20825_s3 + $0x3f4] sm:$0xf0] }
 0x4b9   :  { %v11728_v19 = vld [vmem:[%s20825_s3 + $0x8b0] sm:$0xf0]  ;;  %v11094_v6 = vld [vmem:[%s20825_s3 + $0x398] sm:$0xf] }
 0x4ba   :  { %v13774_v34 = vld [vmem:[%s20825_s3 + $0xa94] sm:$0xf]  ;;  %v11731_v51 = vor.u32 %v13710_v61, %v11728_v19  ;;  %7688 = vmatpush.bf16.msrb.mxu2 %v12275_v53  ;;  %v10871_v53 = vor.u32 %v13499_v10, %v10870_v54  ;;  %v11127_v61 = vor.u32 %v13563_v11, %v11126_v45  ;;  %v11383_v19 = vor.u32 %v13627_v13, %v11382_v38  ;;  %v10742_v54 = vld [vmem:[%s20825_s3 + $0xd8] sm:$0xf]  ;;  %v7394_v11 = vpop.f32.mrf.mxu3 }
 0x4bb   :  { %v11984_v43 = vld [vmem:[%s20825_s3 + $0xab0] sm:$0xf0]  ;;  %v13467_v10 = vld [vmem:[%s20825_s3 + $0xf4] sm:$0xf0] }
 0x4bc   :  { %v13838_v49 = vld [vmem:[%s20825_s3 + $0xc94] sm:$0xf]  ;;  %v11987_v21 = vor.u32 %v13774_v34, %v11984_v43  ;;  %7663 = vmatpush.bf16.msrb.mxu0 %v11731_v51  ;;  %7599 = vmatpush.bf16.msrb.mxu3 %v12463_v29  ;;  %v10838_v34 = vld [vmem:[%s20825_s3 + $0x198] sm:$0xf] }
 0x4bd   :  { %v12240_v37 = vld [vmem:[%s20825_s3 + $0xcb0] sm:$0xf0]  ;;  %v10839_v32 = vor.u32 %v13491_v20, %v10838_v34  ;;  %v11318_v29 = vld [vmem:[%s20825_s3 + $0x558] sm:$0xf] }
 0x4be   :  { %v12243_v25 = vor.u32 %v13838_v49, %v12240_v37  ;;  %v13702_v41 = vld [vmem:[%s20825_s3 + $0x854] sm:$0xf]  ;;  %7676 = vmatpush.bf16.msrb.mxu1 %v11987_v21  ;;  %v13555_v49 = vld [vmem:[%s20825_s3 + $0x3b4] sm:$0xf0]  ;;  %v11319_v18 = vor.u32 %v13611_v22, %v11318_v29 }
 0x4bf   :  { %v11696_v63 = vld [vmem:[%s20825_s3 + $0x870] sm:$0xf0]  ;;  %v11350_v37 = vld [vmem:[%s20825_s3 + $0x598] sm:$0xf]  ;;  %v11095_v40 = vor.u32 %v13555_v49, %v11094_v6 }
 0x4c0   :  { %v13766_v42 = vld [vmem:[%s20825_s3 + $0xa54] sm:$0xf]  ;;  %v11699_v14 = vor.u32 %v13702_v41, %v11696_v63  ;;  %7689 = vmatpush.bf16.msrb.mxu2 %v12243_v25  ;;  %7600 = vmatpush.bf16.msrb.mxu3 %v12431_v28  ;;  %v11351_v51 = vor.u32 %v13619_v33, %v11350_v37  ;;  %v10806_v21 = vld [vmem:[%s20825_s3 + $0x158] sm:$0xf] }
 0x4c1   :  { %v11952_v31 = vld [vmem:[%s20825_s3 + $0xa70] sm:$0xf0]  ;;  %v13483_v25 = vld [vmem:[%s20825_s3 + $0x174] sm:$0xf0] }
 0x4c2   :  { %v13830_v36 = vld [vmem:[%s20825_s3 + $0xc54] sm:$0xf]  ;;  %v11955_v55 = vor.u32 %v13766_v42, %v11952_v31  ;;  %7664 = vmatpush.bf16.msrb.mxu0 %v11699_v14  ;;  %v11062_v41 = vld [vmem:[%s20825_s3 + $0x358] sm:$0xf]  ;;  %v7396_v22 = vpop.f32.mrf.mxu3 }
 0x4c3   :  { %v12208_v44 = vld [vmem:[%s20825_s3 + $0xc70] sm:$0xf0]  ;;  %7601 = vmatmul.bf16.vlgmr.msrb.gmra.mxu3 %v18245_v52  ;;  %v13547_v42 = vld [vmem:[%s20825_s3 + $0x374] sm:$0xf0] }
 0x4c4   :  { %v13686_v30 = vld [vmem:[%s20825_s3 + $0x7d4] sm:$0xf]  ;;  %v12211_v56 = vor.u32 %v13830_v36, %v12208_v44  ;;  %7677 = vmatpush.bf16.msrb.mxu1 %v11955_v55  ;;  %v10807_v44 = vor.u32 %v13483_v25, %v10806_v21  ;;  %v11063_v12 = vor.u32 %v13547_v42, %v11062_v41  ;;  %v10774_v14 = vld [vmem:[%s20825_s3 + $0x118] sm:$0xf] }
 0x4c5   :  { %v11632_v4 = vld [vmem:[%s20825_s3 + $0x7f0] sm:$0xf0]  ;;  %v10998_v45 = vld [vmem:[%s20825_s3 + $0x2d8] sm:$0xf] }
 0x4c6   :  { %v13694_v58 = vld [vmem:[%s20825_s3 + $0x814] sm:$0xf]  ;;  %v11635_v47 = vor.u32 %v13686_v30, %v11632_v4  ;;  %7690 = vmatpush.bf16.msrb.mxu2 %v12211_v56  ;;  %v13475_v30 = vld [vmem:[%s20825_s3 + $0x134] sm:$0xf0]  ;;  %v19815_v6 = vpop.f32.mrf.mxu2 }
 0x4c7   :  { %v11664_v57 = vld [vmem:[%s20825_s3 + $0x830] sm:$0xf0]  ;;  %v11030_v4 = vld [vmem:[%s20825_s3 + $0x318] sm:$0xf] }
 0x4c8   :  { %v13758_v24 = vld [vmem:[%s20825_s3 + $0xa14] sm:$0xf]  ;;  %v11667_v3 = vor.u32 %v13694_v58, %v11664_v57  ;;  %7645 = vmatpush.bf16.msra.mxu3 %v11635_v47  ;;  %v13539_v56 = vld [vmem:[%s20825_s3 + $0x334] sm:$0xf0] }
 0x4c9   :  { %v11920_v2 = vld [vmem:[%s20825_s3 + $0xa30] sm:$0xf0]  ;;  %v11286_v58 = vld [vmem:[%s20825_s3 + $0x518] sm:$0xf] }
 0x4ca   :  { %v13822_v50 = vld [vmem:[%s20825_s3 + $0xc14] sm:$0xf]  ;;  %v11923_v1 = vor.u32 %v13758_v24, %v11920_v2  ;;  %7665 = vmatpush.bf16.msrb.mxu0 %v11667_v3  ;;  %v13603_v57 = vld [vmem:[%s20825_s3 + $0x534] sm:$0xf0]  ;;  %v19769_v24 = vpop.f32.mrf.mxu0  ;;  %v19777_v2 = vpop.f32.mrf.mxu1 }
 0x4cb   :  { %v12176_v48 = vld [vmem:[%s20825_s3 + $0xc30] sm:$0xf0]  ;;  %v11287_v47 = vor.u32 %v13603_v57, %v11286_v58  ;;  %v13531_v38 = vld [vmem:[%s20825_s3 + $0x2f4] sm:$0xf0] }
 0x4cc   :  { %v13678_v16 = vld [vmem:[%s20825_s3 + $0x794] sm:$0xf]  ;;  %v12179_v0 = vor.u32 %v13822_v50, %v12176_v48  ;;  %7678 = vmatpush.bf16.msrb.mxu1 %v11923_v1  ;;  %v10775_v50 = vor.u32 %v13475_v30, %v10774_v14  ;;  %v11031_v48 = vor.u32 %v13539_v56, %v11030_v4  ;;  %v11254_v13 = vld [vmem:[%s20825_s3 + $0x4d8] sm:$0xf] }
 0x4cd   :  { %v11600_v17 = vld [vmem:[%s20825_s3 + $0x7b0] sm:$0xf0]  ;;  %7666 = vmatmul.bf16.vlgmr.msrb.gmra.mxu0 %v17729_v46  ;;  %v13595_v1 = vld [vmem:[%s20825_s3 + $0x4f4] sm:$0xf0] }
 0x4ce   :  { %v11603_v43 = vor.u32 %v13678_v16, %v11600_v17  ;;  %v13670_v23 = vld [vmem:[%s20825_s3 + $0x754] sm:$0xf]  ;;  %7691 = vmatpush.bf16.msrb.mxu2 %v12179_v0  ;;  %7710 = vmatpush.bf16.msra.mxu0 %v10871_v53  ;;  %v19798_v16 = vadd.f32 %v7394_v11, %v19634_v26  ;;  %v10743_v53 = vor.u32 %v13467_v10, %v10742_v54  ;;  %v10710_v34 = vld [vmem:[%s20825_s3 + $0x98] sm:$0xf] }
 0x4cf   :  { %v11568_v7 = vld [vmem:[%s20825_s3 + $0x770] sm:$0xf0]  ;;  %7679 = vmatmul.bf16.vlgmr.msrb.gmra.mxu1 %v17731_v39  ;;  %v13459_v26 = vld [vmem:[%s20825_s3 + $0xb4] sm:$0xf0] }
 0x4d0   :  { %7723 = vmatpush.bf16.msra.mxu1 %v11127_v61  ;;  %7646 = vmatpush.bf16.msra.mxu3 %v11603_v43  ;;  %v11571_v63 = vor.u32 %v13670_v23, %v11568_v7  ;;  %v13662_v31 = vld [vmem:[%s20825_s3 + $0x714] sm:$0xf]  ;;  %v10999_v61 = vor.u32 %v13531_v38, %v10998_v45  ;;  %v10966_v20 = vld [vmem:[%s20825_s3 + $0x298] sm:$0xf] }
 0x4d1   :  { %7692 = vmatmul.bf16.vlgmr.msrb.gmra.mxu2 %v17869_v15  ;;  %v11536_v36 = vld [vmem:[%s20825_s3 + $0x730] sm:$0xf0]  ;;  %v13523_v49 = vld [vmem:[%s20825_s3 + $0x2b4] sm:$0xf0] }
 0x4d2   :  { %7736 = vmatpush.bf16.msra.mxu2 %v11383_v19  ;;  %7711 = vmatpush.bf16.msra.mxu0 %v10839_v32  ;;  %v11539_v55 = vor.u32 %v13662_v31, %v11536_v36  ;;  %v13654_v60 = vld [vmem:[%s20825_s3 + $0x6d4] sm:$0xf]  ;;  %v11255_v19 = vor.u32 %v13595_v1, %v11254_v13  ;;  %v11222_v37 = vld [vmem:[%s20825_s3 + $0x498] sm:$0xf]  ;;  %v7461_v23 = vpop.f32.mrf.mxu0  ;;  %v10967_v21 = vor.u32 %v13523_v49, %v10966_v20 }
 0x4d3   :  { %v11504_v28 = vld [vmem:[%s20825_s3 + $0x6f0] sm:$0xf0]  ;;  %v13587_v33 = vld [vmem:[%s20825_s3 + $0x4b4] sm:$0xf0] }
 0x4d4   :  { %7724 = vmatpush.bf16.msra.mxu1 %v11095_v40  ;;  %7647 = vmatpush.bf16.msra.mxu3 %v11571_v63  ;;  %v11507_v3 = vor.u32 %v13654_v60, %v11504_v28  ;;  %v13646_v17 = vld [vmem:[%s20825_s3 + $0x694] sm:$0xf]  ;;  %v7474_v40 = vpop.f32.mrf.mxu1  ;;  %v11223_v25 = vor.u32 %v13587_v33, %v11222_v37  ;;  %v10678_v41 = vld [vmem:[%s20825_s3 + $0x58] sm:$0xf]  ;;  %v7487_v28 = vpop.f32.mrf.mxu2 }
 0x4d5   :  { %v11472_v0 = vld [vmem:[%s20825_s3 + $0x6b0] sm:$0xf0]  ;;  %v13451_v63 = vld [vmem:[%s20825_s3 + $0x74] sm:$0xf0] }
 0x4d6   :  { %7737 = vmatpush.bf16.msra.mxu2 %v11351_v51  ;;  %7712 = vmatpush.bf16.msra.mxu0 %v10807_v44  ;;  %v11475_v43 = vor.u32 %v13646_v17, %v11472_v0  ;;  %v13638_v7 = vld [vmem:[%s20825_s3 + $0x654] sm:$0xf]  ;;  %v10711_v51 = vor.u32 %v13459_v26, %v10710_v34  ;;  %v10934_v42 = vld [vmem:[%s20825_s3 + $0x258] sm:$0xf]  ;;  %v10679_v14 = vor.u32 %v13451_v63, %v10678_v41 }
 0x4d7   :  { %v11440_v32 = vld [vmem:[%s20825_s3 + $0x670] sm:$0xf0]  ;;  %v13515_v31 = vld [vmem:[%s20825_s3 + $0x274] sm:$0xf0] }
 0x4d8   :  { %7725 = vmatpush.bf16.msra.mxu1 %v11063_v12  ;;  %7648 = vmatpush.bf16.msra.mxu3 %v11539_v55  ;;  %v11443_v29 = vor.u32 %v13638_v7, %v11440_v32  ;;  %v11190_v36 = vld [vmem:[%s20825_s3 + $0x458] sm:$0xf]  ;;  %v13630_v12 = vld [vmem:[%s20825_s3 + $0x614] sm:$0xf]  ;;  %v10935_v55 = vor.u32 %v13515_v31, %v10934_v42 }
 0x4d9   :  { %v13579_v44 = vld [vmem:[%s20825_s3 + $0x474] sm:$0xf0]  ;;  %v13942_v30 = vld [vmem:[%s20825_s3 + $0xfd4] sm:$0xf] }
 0x4da   :  { %7738 = vmatpush.bf16.msra.mxu2 %v11319_v18  ;;  %7713 = vmatpush.bf16.msra.mxu0 %v10775_v50  ;;  %v11408_v18 = vld [vmem:[%s20825_s3 + $0x630] sm:$0xf0]  ;;  %v11191_v56 = vor.u32 %v13579_v44, %v11190_v36  ;;  %v10646_v58 = vld [vmem:[%s20825_s3 + $0x18] sm:$0xf] }
 0x4db   :  { %v12656_v4 = vld [vmem:[%s20825_s3 + $0xff0] sm:$0xf0]  ;;  %v13443_v57 = vld [vmem:[%s20825_s3 + $0x34] sm:$0xf0]  ;;  %v11411_v50 = vor.u32 %v13630_v12, %v11408_v18 }
 0x4dc   :  { %7726 = vmatpush.bf16.msra.mxu1 %v11031_v48  ;;  %7649 = vmatpush.bf16.msra.mxu3 %v11507_v3  ;;  %v10902_v60 = vld [vmem:[%s20825_s3 + $0x218] sm:$0xf]  ;;  %v12659_v10 = vor.u32 %v13942_v30, %v12656_v4  ;;  %v10647_v38 = vor.u32 %v13443_v57, %v10646_v58  ;;  %v13926_v40 = vld [vmem:[%s20825_s3 + $0xf54] sm:$0xf]  ;;  %v19959_v30 = vld [vmem:[%s20826_s4] sm:$0xff] }
 0x4dd   :  { %v13507_v48 = vld [vmem:[%s20825_s3 + $0x234] sm:$0xf0]  ;;  %v13918_v12 = vld [vmem:[%s20825_s3 + $0xf14] sm:$0xf]  ;;  %v4514_v4 = vperm.slane %v19959_v30, 4 }
 0x4de   :  { %7739 = vmatpush.bf16.msra.mxu2 %v11287_v47  ;;  %7714 = vmatpush.bf16.msra.mxu0 %v10743_v53  ;;  %v11158_v47 = vld [vmem:[%s20825_s3 + $0x418] sm:$0xf]  ;;  %v10903_v0 = vor.u32 %v13507_v48, %v10902_v60  ;;  %v13934_v53 = vld [vmem:[%s20825_s3 + $0xf94] sm:$0xf] }
 0x4df   :  { %v13571_v54 = vld [vmem:[%s20825_s3 + $0x434] sm:$0xf0]  ;;  %v12560_v18 = vld [vmem:[%s20825_s3 + $0xf30] sm:$0xf0] }
 0x4e0   :  { %7727 = vmatpush.bf16.msra.mxu1 %v10999_v61  ;;  %7650 = vmatpush.bf16.msra.mxu3 %v11475_v43  ;;  %v11894_v45 = vld [vmem:[%s20825_s3 + $0x9d8] sm:$0xf]  ;;  %v12624_v61 = vld [vmem:[%s20825_s3 + $0xfb0] sm:$0xf0]  ;;  %v12563_v28 = vor.u32 %v13918_v12, %v12560_v18 }
 0x4e1   :  { %v13755_v3 = vld [vmem:[%s20825_s3 + $0x9f4] sm:$0xf0]  ;;  %v12627_v33 = vor.u32 %v13934_v53, %v12624_v61 }
 0x4e2   :  { %7740 = vmatpush.bf16.msra.mxu2 %v11255_v19  ;;  %7715 = vmatpush.bf16.msra.mxu0 %v10711_v51  ;;  %v12150_v11 = vld [vmem:[%s20825_s3 + $0xbd8] sm:$0xf]  ;;  %v11159_v19 = vor.u32 %v13571_v54, %v11158_v47  ;;  %v11895_v34 = vor.u32 %v13755_v3, %v11894_v45  ;;  %v12592_v51 = vld [vmem:[%s20825_s3 + $0xf70] sm:$0xf0]  ;;  %v7511_v54 = vpop.f32.mrf.mxu0 }
 0x4e3   :  { %v13819_v13 = vld [vmem:[%s20825_s3 + $0xbf4] sm:$0xf0]  ;;  %v12595_v22 = vor.u32 %v13926_v40, %v12592_v51  ;;  %v12528_v45 = vld [vmem:[%s20825_s3 + $0xef0] sm:$0xf0]  ;;  %v7512_v3 = vadd.f32 %v7511_v54, %v4514_v4 }
 0x4e4   :  { %7728 = vmatpush.bf16.msra.mxu1 %v10967_v21  ;;  %7651 = vmatpush.bf16.msra.mxu3 %v11443_v29  ;;  %v12406_v1 = vld [vmem:[%s20825_s3 + $0xdd8] sm:$0xf]  ;;  %v12151_v26 = vor.u32 %v13819_v13, %v12150_v11  ;;  %v7524_v11 = vpop.f32.mrf.mxu1 }
 0x4e5   :  { %v13883_v17 = vld [vmem:[%s20825_s3 + $0xdf4] sm:$0xf0]  ;;  %v7525_v61 = vadd.f32 %v7524_v11, %v7512_v3 }
 0x4e6   :  { %7741 = vmatpush.bf16.msra.mxu2 %v11223_v25  ;;  %7716 = vmatpush.bf16.msra.mxu0 %v10679_v14  ;;  %v12407_v20 = vor.u32 %v13883_v17, %v12406_v1  ;;  %v11862_v43 = vld [vmem:[%s20825_s3 + $0x998] sm:$0xf] }
 0x4e7   :  { %v13747_v49 = vld [vmem:[%s20825_s3 + $0x9b4] sm:$0xf0] }
 0x4e8   :  { %7729 = vmatpush.bf16.msra.mxu1 %v10935_v55  ;;  %7652 = vmatpush.bf16.msra.mxu3 %v11411_v50  ;;  %v12118_v37 = vld [vmem:[%s20825_s3 + $0xb98] sm:$0xf]  ;;  %v11863_v21 = vor.u32 %v13747_v49, %v11862_v43 }
 0x4e9   :  { %v13811_v23 = vld [vmem:[%s20825_s3 + $0xbb4] sm:$0xf0] }
 0x4ea   :  { %7742 = vmatpush.bf16.msra.mxu2 %v11191_v56  ;;  %7717 = vmatpush.bf16.msra.mxu0 %v10647_v38  ;;  %v12374_v7 = vld [vmem:[%s20825_s3 + $0xd98] sm:$0xf]  ;;  %v12119_v25 = vor.u32 %v13811_v23, %v12118_v37  ;;  %v13902_v37 = vld [vmem:[%s20825_s3 + $0xe94] sm:$0xf] }
 0x4eb   :  { %v13875_v32 = vld [vmem:[%s20825_s3 + $0xdb4] sm:$0xf0]  ;;  %7653 = vmatmul.bf16.vlgmr.msra.gmra.mxu3 %v17544_v9 }
 0x4ec   :  { %7697 = vmatpush.bf16.msrb.mxu3 %v12659_v10  ;;  %7730 = vmatpush.bf16.msra.mxu1 %v10903_v0  ;;  %v12375_v41 = vor.u32 %v13875_v32, %v12374_v7  ;;  %v11830_v63 = vld [vmem:[%s20825_s3 + $0x958] sm:$0xf]  ;;  %v13910_v10 = vld [vmem:[%s20825_s3 + $0xed4] sm:$0xf]  ;;  %v7526_v12 = vpop.f32.mrf.mxu1 }
 0x4ed   :  { %v13739_v42 = vld [vmem:[%s20825_s3 + $0x974] sm:$0xf0]  ;;  %7718 = vmatmul.bf16.vlgmr.msra.gmra.mxu0 %v17538_v5 }
 0x4ee   :  { %7743 = vmatpush.bf16.msra.mxu2 %v11159_v19  ;;  %7762 = vmatpush.bf16.msrb.mxu0 %v11895_v34  ;;  %v12086_v29 = vld [vmem:[%s20825_s3 + $0xb58] sm:$0xf]  ;;  %v11831_v14 = vor.u32 %v13739_v42, %v11830_v63  ;;  %v12531_v19 = vor.u32 %v13910_v10, %v12528_v45  ;;  %v7446_v34 = vpop.f32.mrf.mxu3 }
 0x4ef   :  { %v13803_v31 = vld [vmem:[%s20825_s3 + $0xb74] sm:$0xf0]  ;;  %7731 = vmatmul.bf16.vlgmr.msra.gmra.mxu1 %v17540_v35  ;;  %v7447_v49 = vadd.f32 %v7446_v34, %v19615_v59 }
 0x4f0   :  { %7775 = vmatpush.bf16.msrb.mxu1 %v12151_v26  ;;  %7698 = vmatpush.bf16.msrb.mxu3 %v12627_v33  ;;  %v12342_v36 = vld [vmem:[%s20825_s3 + $0xd58] sm:$0xf]  ;;  %v12087_v55 = vor.u32 %v13803_v31, %v12086_v29  ;;  %v12496_v33 = vld [vmem:[%s20825_s3 + $0xeb0] sm:$0xf0] }
 0x4f1   :  { %v13867_v44 = vld [vmem:[%s20825_s3 + $0xd74] sm:$0xf0]  ;;  %7744 = vmatmul.bf16.vlgmr.msra.gmra.mxu2 %v17542_v8  ;;  %v7460_v7 = vadd.f32 %v19769_v24, %v7447_v49  ;;  %v13894_v31 = vld [vmem:[%s20825_s3 + $0xe54] sm:$0xf] }
 0x4f2   :  { %7788 = vmatpush.bf16.msrb.mxu2 %v12407_v20  ;;  %7763 = vmatpush.bf16.msrb.mxu0 %v11863_v21  ;;  %v12343_v56 = vor.u32 %v13867_v44, %v12342_v36  ;;  %v11798_v58 = vld [vmem:[%s20825_s3 + $0x918] sm:$0xf]  ;;  %v12464_v36 = vld [vmem:[%s20825_s3 + $0xe70] sm:$0xf0] }
 0x4f3   :  { %v13731_v57 = vld [vmem:[%s20825_s3 + $0x934] sm:$0xf0]  ;;  %v7473_v44 = vadd.f32 %v19777_v2, %v7460_v7 }
 0x4f4   :  { %7776 = vmatpush.bf16.msrb.mxu1 %v12119_v25  ;;  %v12054_v60 = vld [vmem:[%s20825_s3 + $0xb18] sm:$0xf]  ;;  %7699 = vmatpush.bf16.msrb.mxu3 %v12595_v22  ;;  %v11799_v38 = vor.u32 %v13731_v57, %v11798_v58  ;;  %v7537_v25 = vpop.f32.mrf.mxu2  ;;  %v7513_v22 = vpop.f32.mrf.mxu0  ;;  %v12467_v57 = vor.u32 %v13894_v31, %v12464_v36  ;;  %v13615_v31 = vld [vmem:[%s20825_s3 + $0x59c] sm:$0xf] }
 0x4f5   :  { %v13795_v50 = vld [vmem:[%s20825_s3 + $0xb34] sm:$0xf0]  ;;  %v20030_v29 = vadd.f32 %v7537_v25, %v7525_v61  ;;  %v20049_v2 = vadd.f32 %v19815_v6, %v7473_v44  ;;  %v13886_v6 = vld [vmem:[%s20825_s3 + $0xe14] sm:$0xf]  ;;  %v11096_v22 = vld [vmem:[%s20825_s3 + $0x3b8] sm:$0xf0] }
 0x4f6   :  { %7789 = vmatpush.bf16.msrb.mxu2 %v12375_v41  ;;  %v12310_v48 = vld [vmem:[%s20825_s3 + $0xd18] sm:$0xf]  ;;  %7764 = vmatpush.bf16.msrb.mxu0 %v11831_v14  ;;  %v12055_v13 = vor.u32 %v13795_v50, %v12054_v60  ;;  %v12499_v41 = vor.u32 %v13902_v37, %v12496_v33  ;;  %v7448_v60 = vpop.f32.mrf.mxu3  ;;  %v11128_v37 = vld [vmem:[%s20825_s3 + $0x3f8] sm:$0xf0] }
 0x4f7   :  { %v13859_v47 = vld [vmem:[%s20825_s3 + $0xd34] sm:$0xf0]  ;;  %v13623_v33 = vld [vmem:[%s20825_s3 + $0x5dc] sm:$0xf] }
 0x4f8   :  { %7777 = vmatpush.bf16.msrb.mxu1 %v12087_v55  ;;  %v12311_v1 = vor.u32 %v13859_v47, %v12310_v48  ;;  %v11766_v17 = vld [vmem:[%s20825_s3 + $0x8d8] sm:$0xf]  ;;  %7700 = vmatpush.bf16.msrb.mxu3 %v12563_v28  ;;  %v12432_v47 = vld [vmem:[%s20825_s3 + $0xe30] sm:$0xf0]  ;;  %v11352_v36 = vld [vmem:[%s20825_s3 + $0x5b8] sm:$0xf0] }
 0x4f9   :  { %v13723_v0 = vld [vmem:[%s20825_s3 + $0x8f4] sm:$0xf0]  ;;  %v11064_v60 = vld [vmem:[%s20825_s3 + $0x378] sm:$0xf0] }
 0x4fa   :  { %7790 = vmatpush.bf16.msrb.mxu2 %v12343_v56  ;;  %v12022_v53 = vld [vmem:[%s20825_s3 + $0xad8] sm:$0xf]  ;;  %7765 = vmatpush.bf16.msrb.mxu0 %v11799_v38  ;;  %v11767_v23 = vor.u32 %v13723_v0, %v11766_v17  ;;  %v12435_v0 = vor.u32 %v13886_v6, %v12432_v47 }
 0x4fb   :  { %v13787_v26 = vld [vmem:[%s20825_s3 + $0xaf4] sm:$0xf0] }
 0x4fc   :  { %v12278_v20 = vld [vmem:[%s20825_s3 + $0xcd8] sm:$0xf]  ;;  %7778 = vmatpush.bf16.msrb.mxu1 %v12055_v13  ;;  %v12023_v32 = vor.u32 %v13787_v26, %v12022_v53  ;;  %7701 = vmatpush.bf16.msrb.mxu3 %v12531_v19  ;;  %v7539_v17 = vpop.f32.mrf.mxu2  ;;  %v13495_v26 = vld [vmem:[%s20825_s3 + $0x1dc] sm:$0xf] }
 0x4fd   :  { %v13851_v43 = vld [vmem:[%s20825_s3 + $0xcf4] sm:$0xf0]  ;;  %v11288_v17 = vld [vmem:[%s20825_s3 + $0x538] sm:$0xf0] }
 0x4fe   :  { %7791 = vmatpush.bf16.msrb.mxu2 %v12311_v1  ;;  %v12279_v40 = vor.u32 %v13851_v43, %v12278_v20  ;;  %v11734_v59 = vld [vmem:[%s20825_s3 + $0x898] sm:$0xf]  ;;  %7766 = vmatpush.bf16.msrb.mxu0 %v11767_v23  ;;  %v10872_v20 = vld [vmem:[%s20825_s3 + $0x1f8] sm:$0xf0] }
 0x4ff   :  { %v13715_v51 = vld [vmem:[%s20825_s3 + $0x8b4] sm:$0xf0]  ;;  %v13559_v43 = vld [vmem:[%s20825_s3 + $0x3dc] sm:$0xf] }
 0x500   :  { %v11990_v21 = vld [vmem:[%s20825_s3 + $0xa98] sm:$0xf]  ;;  %v11735_v18 = vor.u32 %v13715_v51, %v11734_v59  ;;  %7779 = vmatpush.bf16.msrb.mxu1 %v12023_v32  ;;  %7702 = vmatpush.bf16.msrb.mxu3 %v12499_v41  ;;  %v11384_v23 = vld [vmem:[%s20825_s3 + $0x5f8] sm:$0xf0]  ;;  %v10875_v51 = vor.u32 %v13495_v26, %v10872_v20 }
 0x501   :  { %v13779_v24 = vld [vmem:[%s20825_s3 + $0xab4] sm:$0xf0]  ;;  %v11387_v25 = vor.u32 %v13623_v33, %v11384_v23  ;;  %v13487_v41 = vld [vmem:[%s20825_s3 + $0x19c] sm:$0xf]  ;;  %v7498_v23 = vpop.f32.mrf.mxu3 }
 0x502   :  { %v12246_v63 = vld [vmem:[%s20825_s3 + $0xc98] sm:$0xf]  ;;  %7792 = vmatpush.bf16.msrb.mxu2 %v12279_v40  ;;  %v11991_v14 = vor.u32 %v13779_v24, %v11990_v21  ;;  %7767 = vmatpush.bf16.msrb.mxu0 %v11735_v18  ;;  %v11131_v21 = vor.u32 %v13559_v43, %v11128_v37  ;;  %v10840_v24 = vld [vmem:[%s20825_s3 + $0x1b8] sm:$0xf0] }
 0x503   :  { %v13843_v42 = vld [vmem:[%s20825_s3 + $0xcb4] sm:$0xf0]  ;;  %v10843_v18 = vor.u32 %v13487_v41, %v10840_v24  ;;  %v13463_v43 = vld [vmem:[%s20825_s3 + $0xdc] sm:$0xf] }
 0x504   :  { %v12247_v4 = vor.u32 %v13843_v42, %v12246_v63  ;;  %v11702_v55 = vld [vmem:[%s20825_s3 + $0x858] sm:$0xf]  ;;  %7780 = vmatpush.bf16.msrb.mxu1 %v11991_v14  ;;  %7703 = vmatpush.bf16.msrb.mxu3 %v12467_v57  ;;  %v13551_v63 = vld [vmem:[%s20825_s3 + $0x39c] sm:$0xf] }
 0x505   :  { %v13707_v56 = vld [vmem:[%s20825_s3 + $0x874] sm:$0xf0]  ;;  %v11099_v14 = vor.u32 %v13551_v63, %v11096_v22  ;;  %v13527_v37 = vld [vmem:[%s20825_s3 + $0x2dc] sm:$0xf] }
 0x506   :  { %v11958_v58 = vld [vmem:[%s20825_s3 + $0xa58] sm:$0xf]  ;;  %v11703_v54 = vor.u32 %v13707_v56, %v11702_v55  ;;  %7793 = vmatpush.bf16.msrb.mxu2 %v12247_v4  ;;  %v11355_v4 = vor.u32 %v13615_v31, %v11352_v36  ;;  %v13479_v55 = vld [vmem:[%s20825_s3 + $0x15c] sm:$0xf] }
 0x507   :  { %v13771_v28 = vld [vmem:[%s20825_s3 + $0xa74] sm:$0xf0]  ;;  %v10808_v56 = vld [vmem:[%s20825_s3 + $0x178] sm:$0xf0] }
 0x508   :  { %v12214_v50 = vld [vmem:[%s20825_s3 + $0xc58] sm:$0xf]  ;;  %v11959_v3 = vor.u32 %v13771_v28, %v11958_v58  ;;  %7768 = vmatpush.bf16.msrb.mxu0 %v11703_v54  ;;  %7704 = vmatpush.bf16.msrb.mxu3 %v12435_v0  ;;  %v13543_v58 = vld [vmem:[%s20825_s3 + $0x35c] sm:$0xf]  ;;  %v10811_v47 = vor.u32 %v13479_v55, %v10808_v56  ;;  %v20184_v0 = vpop.f32.mrf.mxu0 }
 0x509   :  { %v13835_v48 = vld [vmem:[%s20825_s3 + $0xc74] sm:$0xf0]  ;;  %v13607_v28 = vld [vmem:[%s20825_s3 + $0x55c] sm:$0xf]  ;;  %v11067_v54 = vor.u32 %v13543_v58, %v11064_v60 }
 0x50a   :  { %v11638_v10 = vld [vmem:[%s20825_s3 + $0x7d8] sm:$0xf]  ;;  %v12215_v11 = vor.u32 %v13835_v48, %v12214_v50  ;;  %7781 = vmatpush.bf16.msrb.mxu1 %v11959_v3  ;;  %v11320_v50 = vld [vmem:[%s20825_s3 + $0x578] sm:$0xf0] }
 0x50b   :  { %v13691_v45 = vld [vmem:[%s20825_s3 + $0x7f4] sm:$0xf0]  ;;  %7705 = vmatmul.bf16.vlgmr.msrb.gmra.mxu3 %v18245_v52  ;;  %v10776_v3 = vld [vmem:[%s20825_s3 + $0x138] sm:$0xf0] }
 0x50c   :  { %v11670_v38 = vld [vmem:[%s20825_s3 + $0x818] sm:$0xf]  ;;  %v11639_v34 = vor.u32 %v13691_v45, %v11638_v10  ;;  %7794 = vmatpush.bf16.msrb.mxu2 %v12215_v11  ;;  %v11323_v10 = vor.u32 %v13607_v28, %v11320_v50  ;;  %v13471_v45 = vld [vmem:[%s20825_s3 + $0x11c] sm:$0xf]  ;;  %v20230_v22 = vpop.f32.mrf.mxu2 }
 0x50d   :  { %v13699_v13 = vld [vmem:[%s20825_s3 + $0x834] sm:$0xf0]  ;;  %v13535_v11 = vld [vmem:[%s20825_s3 + $0x31c] sm:$0xf] }
 0x50e   :  { %v11926_v1 = vld [vmem:[%s20825_s3 + $0xa18] sm:$0xf]  ;;  %v11671_v49 = vor.u32 %v13699_v13, %v11670_v38  ;;  %7749 = vmatpush.bf16.msra.mxu3 %v11639_v34  ;;  %v11032_v13 = vld [vmem:[%s20825_s3 + $0x338] sm:$0xf0]  ;;  %v10779_v34 = vor.u32 %v13471_v45, %v10776_v3 }
 0x50f   :  { %v13763_v53 = vld [vmem:[%s20825_s3 + $0xa34] sm:$0xf0]  ;;  %v11035_v26 = vor.u32 %v13535_v11, %v11032_v13  ;;  %v13455_v63 = vld [vmem:[%s20825_s3 + $0x9c] sm:$0xf] }
 0x510   :  { %v12182_v61 = vld [vmem:[%s20825_s3 + $0xc18] sm:$0xf]  ;;  %v11927_v7 = vor.u32 %v13763_v53, %v11926_v1  ;;  %7769 = vmatpush.bf16.msrb.mxu0 %v11671_v49  ;;  %v13599_v1 = vld [vmem:[%s20825_s3 + $0x51c] sm:$0xf] }
 0x511   :  { %v13827_v19 = vld [vmem:[%s20825_s3 + $0xc34] sm:$0xf0]  ;;  %v11291_v20 = vor.u32 %v13599_v1, %v11288_v17  ;;  %v10744_v49 = vld [vmem:[%s20825_s3 + $0xf8] sm:$0xf0] }
 0x512   :  { %v11606_v32 = vld [vmem:[%s20825_s3 + $0x798] sm:$0xf]  ;;  %v12183_v59 = vor.u32 %v13827_v19, %v12182_v61  ;;  %7782 = vmatpush.bf16.msrb.mxu1 %v11927_v7  ;;  %v20192_v19 = vpop.f32.mrf.mxu1  ;;  %v11000_v7 = vld [vmem:[%s20825_s3 + $0x2f8] sm:$0xf0] }
 0x513   :  { %v13683_v40 = vld [vmem:[%s20825_s3 + $0x7b4] sm:$0xf0]  ;;  %7770 = vmatmul.bf16.vlgmr.msrb.gmra.mxu0 %v17729_v46  ;;  %v11003_v41 = vor.u32 %v13527_v37, %v11000_v7  ;;  %v10968_v36 = vld [vmem:[%s20825_s3 + $0x2b8] sm:$0xf0] }
 0x514   :  { %v11607_v42 = vor.u32 %v13683_v40, %v11606_v32  ;;  %v11574_v44 = vld [vmem:[%s20825_s3 + $0x758] sm:$0xf]  ;;  %7795 = vmatpush.bf16.msrb.mxu2 %v12183_v59  ;;  %7814 = vmatpush.bf16.msra.mxu0 %v10875_v51  ;;  %v13591_v32 = vld [vmem:[%s20825_s3 + $0x4dc] sm:$0xf]  ;;  %v20213_v59 = vadd.f32 %v7498_v23, %v20049_v2 }
 0x515   :  { %v13675_v12 = vld [vmem:[%s20825_s3 + $0x774] sm:$0xf0]  ;;  %7783 = vmatmul.bf16.vlgmr.msrb.gmra.mxu1 %v17731_v39  ;;  %v11256_v40 = vld [vmem:[%s20825_s3 + $0x4f8] sm:$0xf0] }
 0x516   :  { %7827 = vmatpush.bf16.msra.mxu1 %v11131_v21  ;;  %7750 = vmatpush.bf16.msra.mxu3 %v11607_v42  ;;  %v11575_v57 = vor.u32 %v13675_v12, %v11574_v44  ;;  %v11542_v48 = vld [vmem:[%s20825_s3 + $0x718] sm:$0xf]  ;;  %v11259_v24 = vor.u32 %v13591_v32, %v11256_v40  ;;  %v10712_v2 = vld [vmem:[%s20825_s3 + $0xb8] sm:$0xf0] }
 0x517   :  { %7796 = vmatmul.bf16.vlgmr.msrb.gmra.mxu2 %v17869_v15  ;;  %v13667_v6 = vld [vmem:[%s20825_s3 + $0x734] sm:$0xf0]  ;;  %v13519_v42 = vld [vmem:[%s20825_s3 + $0x29c] sm:$0xf]  ;;  %v10715_v56 = vor.u32 %v13455_v63, %v10712_v2 }
 0x518   :  { %7840 = vmatpush.bf16.msra.mxu2 %v11387_v25  ;;  %7815 = vmatpush.bf16.msra.mxu0 %v10843_v18  ;;  %v11543_v38 = vor.u32 %v13667_v6, %v11542_v48  ;;  %v11510_v53 = vld [vmem:[%s20825_s3 + $0x6d8] sm:$0xf]  ;;  %v10747_v25 = vor.u32 %v13463_v43, %v10744_v49  ;;  %v13583_v44 = vld [vmem:[%s20825_s3 + $0x49c] sm:$0xf]  ;;  %v7565_v18 = vpop.f32.mrf.mxu0  ;;  %v10971_v58 = vor.u32 %v13519_v42, %v10968_v36  ;;  %v7500_v6 = vpop.f32.mrf.mxu3 }
 0x519   :  { %v13659_v61 = vld [vmem:[%s20825_s3 + $0x6f4] sm:$0xf0]  ;;  %v11224_v12 = vld [vmem:[%s20825_s3 + $0x4b8] sm:$0xf0] }
 0x51a   :  { %7828 = vmatpush.bf16.msra.mxu1 %v11099_v14  ;;  %7751 = vmatpush.bf16.msra.mxu3 %v11575_v57  ;;  %v11511_v33 = vor.u32 %v13659_v61, %v11510_v53  ;;  %v11478_v51 = vld [vmem:[%s20825_s3 + $0x698] sm:$0xf]  ;;  %v7578_v55 = vpop.f32.mrf.mxu1  ;;  %v11227_v57 = vor.u32 %v13583_v44, %v11224_v12  ;;  %v13447_v60 = vld [vmem:[%s20825_s3 + $0x5c] sm:$0xf] }
 0x51b   :  { %v13651_v21 = vld [vmem:[%s20825_s3 + $0x6b4] sm:$0xf0]  ;;  %v10680_v28 = vld [vmem:[%s20825_s3 + $0x78] sm:$0xf0] }
 0x51c   :  { %7841 = vmatpush.bf16.msra.mxu2 %v11355_v4  ;;  %7816 = vmatpush.bf16.msra.mxu0 %v10811_v47  ;;  %v11479_v31 = vor.u32 %v13651_v21, %v11478_v51  ;;  %v11446_v14 = vld [vmem:[%s20825_s3 + $0x658] sm:$0xf]  ;;  %v13511_v50 = vld [vmem:[%s20825_s3 + $0x25c] sm:$0xf]  ;;  %v10683_v11 = vor.u32 %v13447_v60, %v10680_v28 }
 0x51d   :  { %v13643_v4 = vld [vmem:[%s20825_s3 + $0x674] sm:$0xf0]  ;;  %v10936_v47 = vld [vmem:[%s20825_s3 + $0x278] sm:$0xf0] }
 0x51e   :  { %7829 = vmatpush.bf16.msra.mxu1 %v11067_v54  ;;  %7752 = vmatpush.bf16.msra.mxu3 %v11543_v38  ;;  %v11447_v48 = vor.u32 %v13643_v4, %v11446_v14  ;;  %v13575_v54 = vld [vmem:[%s20825_s3 + $0x45c] sm:$0xf]  ;;  %v11414_v45 = vld [vmem:[%s20825_s3 + $0x618] sm:$0xf]  ;;  %v10939_v1 = vor.u32 %v13511_v50, %v10936_v47 }
 0x51f   :  { %v13635_v3 = vld [vmem:[%s20825_s3 + $0x634] sm:$0xf0]  ;;  %v13439_v53 = vld [vmem:[%s20825_s3 + $0x1c] sm:$0xf] }
 0x520   :  { %7842 = vmatpush.bf16.msra.mxu2 %v11323_v10  ;;  %7817 = vmatpush.bf16.msra.mxu0 %v10779_v34  ;;  %v11192_v10 = vld [vmem:[%s20825_s3 + $0x478] sm:$0xf0]  ;;  %v12662_v38 = vld [vmem:[%s20825_s3 + $0xfd8] sm:$0xf] }
 0x521   :  { %v13947_v13 = vld [vmem:[%s20825_s3 + $0xff4] sm:$0xf0]  ;;  %v11195_v17 = vor.u32 %v13575_v54, %v11192_v10  ;;  %v10648_v61 = vld [vmem:[%s20825_s3 + $0x38] sm:$0xf0] }
 0x522   :  { %7830 = vmatpush.bf16.msra.mxu1 %v11035_v26  ;;  %7753 = vmatpush.bf16.msra.mxu3 %v11511_v33  ;;  %v13503_v34 = vld [vmem:[%s20825_s3 + $0x21c] sm:$0xf]  ;;  %v7591_v26 = vpop.f32.mrf.mxu2  ;;  %v12663_v33 = vor.u32 %v13947_v13, %v12662_v38  ;;  %v10651_v40 = vor.u32 %v13439_v53, %v10648_v61  ;;  %v13939_v63 = vld [vmem:[%s20825_s3 + $0xfb4] sm:$0xf0]  ;;  %v4515_v13 = vperm.slane %v19959_v30, 5 }
 0x523   :  { %v10904_v43 = vld [vmem:[%s20825_s3 + $0x238] sm:$0xf0] }
 0x524   :  { %7843 = vmatpush.bf16.msra.mxu2 %v11291_v20  ;;  %7818 = vmatpush.bf16.msra.mxu0 %v10747_v25  ;;  %v11415_v20 = vor.u32 %v13635_v3, %v11414_v45  ;;  %v13567_v49 = vld [vmem:[%s20825_s3 + $0x41c] sm:$0xf] }
 0x525   :  { %v11160_v37 = vld [vmem:[%s20825_s3 + $0x438] sm:$0xf0] }
 0x526   :  { %7831 = vmatpush.bf16.msra.mxu1 %v11003_v41  ;;  %7754 = vmatpush.bf16.msra.mxu3 %v11479_v31  ;;  %v13751_v23 = vld [vmem:[%s20825_s3 + $0x9dc] sm:$0xf]  ;;  %v10907_v41 = vor.u32 %v13503_v34, %v10904_v43  ;;  %v11163_v2 = vor.u32 %v13567_v49, %v11160_v37  ;;  %v12534_v43 = vld [vmem:[%s20825_s3 + $0xed8] sm:$0xf] }
 0x527   :  { %v11896_v7 = vld [vmem:[%s20825_s3 + $0x9f8] sm:$0xf0]  ;;  %v13915_v49 = vld [vmem:[%s20825_s3 + $0xef4] sm:$0xf0] }
 0x528   :  { %7844 = vmatpush.bf16.msra.mxu2 %v11259_v24  ;;  %7819 = vmatpush.bf16.msra.mxu0 %v10715_v56  ;;  %v13815_v32 = vld [vmem:[%s20825_s3 + $0xbdc] sm:$0xf]  ;;  %v12630_v24 = vld [vmem:[%s20825_s3 + $0xf98] sm:$0xf]  ;;  %v11899_v42 = vor.u32 %v13751_v23, %v11896_v7 }
 0x529   :  { %v12152_v51 = vld [vmem:[%s20825_s3 + $0xbf8] sm:$0xf0]  ;;  %v12631_v14 = vor.u32 %v13939_v63, %v12630_v24  ;;  %v7550_v24 = vpop.f32.mrf.mxu3 }
 0x52a   :  { %7832 = vmatpush.bf16.msra.mxu1 %v10971_v58  ;;  %7755 = vmatpush.bf16.msra.mxu3 %v11447_v48  ;;  %v13879_v21 = vld [vmem:[%s20825_s3 + $0xddc] sm:$0xf]  ;;  %v12155_v31 = vor.u32 %v13815_v32, %v12152_v51  ;;  %v12598_v58 = vld [vmem:[%s20825_s3 + $0xf58] sm:$0xf] }
 0x52b   :  { %v12408_v25 = vld [vmem:[%s20825_s3 + $0xdf8] sm:$0xf0] }
 0x52c   :  { %7845 = vmatpush.bf16.msra.mxu2 %v11227_v57  ;;  %7820 = vmatpush.bf16.msra.mxu0 %v10683_v11  ;;  %v12411_v36 = vor.u32 %v13879_v21, %v12408_v25  ;;  %v13743_v44 = vld [vmem:[%s20825_s3 + $0x99c] sm:$0xf]  ;;  %v13931_v57 = vld [vmem:[%s20825_s3 + $0xf74] sm:$0xf0] }
 0x52d   :  { %v11864_v12 = vld [vmem:[%s20825_s3 + $0x9b8] sm:$0xf0]  ;;  %v12599_v54 = vor.u32 %v13931_v57, %v12598_v58  ;;  %v13923_v11 = vld [vmem:[%s20825_s3 + $0xf34] sm:$0xf0]  ;;  %v7641_v58 = vpop.f32.mrf.mxu2 }
 0x52e   :  { %7833 = vmatpush.bf16.msra.mxu1 %v10939_v1  ;;  %7756 = vmatpush.bf16.msra.mxu3 %v11415_v20  ;;  %v13807_v18 = vld [vmem:[%s20825_s3 + $0xb9c] sm:$0xf]  ;;  %v11867_v60 = vor.u32 %v13743_v44, %v11864_v12  ;;  %v7615_v20 = vpop.f32.mrf.mxu0  ;;  %v13907_v44 = vld [vmem:[%s20825_s3 + $0xeb4] sm:$0xf0] }
 0x52f   :  { %v12120_v4 = vld [vmem:[%s20825_s3 + $0xbb8] sm:$0xf0]  ;;  %v7616_v37 = vadd.f32 %v7615_v20, %v4515_v13 }
 0x530   :  { %7846 = vmatpush.bf16.msra.mxu2 %v11195_v17  ;;  %7821 = vmatpush.bf16.msra.mxu0 %v10651_v40  ;;  %v13871_v55 = vld [vmem:[%s20825_s3 + $0xd9c] sm:$0xf]  ;;  %v12123_v28 = vor.u32 %v13807_v18, %v12120_v4 }
 0x531   :  { %v12376_v56 = vld [vmem:[%s20825_s3 + $0xdb8] sm:$0xf0]  ;;  %7757 = vmatmul.bf16.vlgmr.msra.gmra.mxu3 %v17544_v9 }
 0x532   :  { %7801 = vmatpush.bf16.msrb.mxu3 %v12663_v33  ;;  %7834 = vmatpush.bf16.msra.mxu1 %v10907_v41  ;;  %v12379_v50 = vor.u32 %v13871_v55, %v12376_v56  ;;  %v13735_v48 = vld [vmem:[%s20825_s3 + $0x95c] sm:$0xf]  ;;  %v7628_v33 = vpop.f32.mrf.mxu1  ;;  %v12535_v41 = vor.u32 %v13915_v49, %v12534_v43 }
 0x533   :  { %v11832_v6 = vld [vmem:[%s20825_s3 + $0x978] sm:$0xf0]  ;;  %7822 = vmatmul.bf16.vlgmr.msra.gmra.mxu0 %v17538_v5  ;;  %v12566_v5 = vld [vmem:[%s20825_s3 + $0xf18] sm:$0xf]  ;;  %v7629_v25 = vadd.f32 %v7628_v33, %v7616_v37 }
 0x534   :  { %7847 = vmatpush.bf16.msra.mxu2 %v11163_v2  ;;  %7866 = vmatpush.bf16.msrb.mxu0 %v11899_v42  ;;  %v13799_v47 = vld [vmem:[%s20825_s3 + $0xb5c] sm:$0xf]  ;;  %v11835_v38 = vor.u32 %v13735_v48, %v11832_v6  ;;  %v12567_v61 = vor.u32 %v13923_v11, %v12566_v5  ;;  %v12470_v6 = vld [vmem:[%s20825_s3 + $0xe58] sm:$0xf] }
 0x535   :  { %v12088_v10 = vld [vmem:[%s20825_s3 + $0xb78] sm:$0xf0]  ;;  %7835 = vmatmul.bf16.vlgmr.msra.gmra.mxu1 %v17540_v35  ;;  %v7643_v33 = vpop.f32.mrf.mxu2 }
 0x536   :  { %7879 = vmatpush.bf16.msrb.mxu1 %v12155_v31  ;;  %7802 = vmatpush.bf16.msrb.mxu3 %v12631_v14  ;;  %v13863_v45 = vld [vmem:[%s20825_s3 + $0xd5c] sm:$0xf]  ;;  %v12091_v1 = vor.u32 %v13799_v47, %v12088_v10  ;;  %v7551_v31 = vadd.f32 %v7550_v24, %v20030_v29  ;;  %v7617_v48 = vpop.f32.mrf.mxu0  ;;  %v13899_v47 = vld [vmem:[%s20825_s3 + $0xe74] sm:$0xf0] }
 0x537   :  { %v12344_v3 = vld [vmem:[%s20825_s3 + $0xd78] sm:$0xf0]  ;;  %7848 = vmatmul.bf16.vlgmr.msra.gmra.mxu2 %v17542_v8 }
 0x538   :  { %7892 = vmatpush.bf16.msrb.mxu2 %v12411_v36  ;;  %7867 = vmatpush.bf16.msrb.mxu0 %v11867_v60  ;;  %v12347_v17 = vor.u32 %v13863_v45, %v12344_v3  ;;  %v13727_v35 = vld [vmem:[%s20825_s3 + $0x91c] sm:$0xf]  ;;  %v12502_v36 = vld [vmem:[%s20825_s3 + $0xe98] sm:$0xf]  ;;  %v7564_v18 = vadd.f32 %v20184_v0, %v7551_v31 }
 0x539   :  { %v11800_v8 = vld [vmem:[%s20825_s3 + $0x938] sm:$0xf0]  ;;  %v12503_v57 = vor.u32 %v13907_v44, %v12502_v36 }
 0x53a   :  { %7880 = vmatpush.bf16.msrb.mxu1 %v12123_v28  ;;  %v13791_v53 = vld [vmem:[%s20825_s3 + $0xb1c] sm:$0xf]  ;;  %7803 = vmatpush.bf16.msrb.mxu3 %v12599_v54  ;;  %v11803_v23 = vor.u32 %v13727_v35, %v11800_v8  ;;  %v7577_v54 = vadd.f32 %v20192_v19, %v7564_v18  ;;  %v7630_v10 = vpop.f32.mrf.mxu1 }
 0x53b   :  { %v12056_v30 = vld [vmem:[%s20825_s3 + $0xb38] sm:$0xf0] }
 0x53c   :  { %7893 = vmatpush.bf16.msrb.mxu2 %v12379_v50  ;;  %v13855_v34 = vld [vmem:[%s20825_s3 + $0xd1c] sm:$0xf]  ;;  %7868 = vmatpush.bf16.msrb.mxu0 %v11835_v38  ;;  %v12059_v7 = vor.u32 %v13791_v53, %v12056_v30  ;;  %v20440_v50 = vadd.f32 %v7641_v58, %v7629_v25  ;;  %v20459_v19 = vadd.f32 %v20230_v22, %v7577_v54  ;;  %v12438_v22 = vld [vmem:[%s20825_s3 + $0xe18] sm:$0xf]  ;;  %v13968_v54 = vld [vmem:[%s20827_s5 + $0xa0] sm:$0xff] }
 0x53d   :  { %v12312_v26 = vld [vmem:[%s20825_s3 + $0xd38] sm:$0xf0] }
 0x53e   :  { %7881 = vmatpush.bf16.msrb.mxu1 %v12091_v1  ;;  %v12315_v32 = vor.u32 %v13855_v34, %v12312_v26  ;;  %v13719_v40 = vld [vmem:[%s20825_s3 + $0x8dc] sm:$0xf]  ;;  %7804 = vmatpush.bf16.msrb.mxu3 %v12567_v61  ;;  %v12471_v1 = vor.u32 %v13899_v47, %v12470_v6  ;;  %v13891_v61 = vld [vmem:[%s20825_s3 + $0xe34] sm:$0xf0]  ;;  %v13952_v6 = vld [vmem:[%s20827_s5 + $0x20] sm:$0xff] }
 0x53f   :  { %v11768_v51 = vld [vmem:[%s20825_s3 + $0x8f8] sm:$0xf0]  ;;  %v13960_v47 = vld [vmem:[%s20827_s5 + $0x60] sm:$0xff] }
 0x540   :  { %7894 = vmatpush.bf16.msrb.mxu2 %v12347_v17  ;;  %v13783_v21 = vld [vmem:[%s20825_s3 + $0xadc] sm:$0xf]  ;;  %7869 = vmatpush.bf16.msrb.mxu0 %v11803_v23  ;;  %v11771_v12 = vor.u32 %v13719_v40, %v11768_v51  ;;  %v7552_v17 = vpop.f32.mrf.mxu3  ;;  %v12439_v23 = vor.u32 %v13891_v61, %v12438_v22  ;;  %v13950_v61 = vld [vmem:[%s20827_s5 + $0x10] sm:$0xff] }
 0x541   :  { %v12024_v63 = vld [vmem:[%s20825_s3 + $0xaf8] sm:$0xf0] }
 0x542   :  { %v13847_v2 = vld [vmem:[%s20825_s3 + $0xcdc] sm:$0xf]  ;;  %7882 = vmatpush.bf16.msrb.mxu1 %v12059_v7  ;;  %v12027_v14 = vor.u32 %v13783_v21, %v12024_v63  ;;  %7805 = vmatpush.bf16.msrb.mxu3 %v12535_v41 }
 0x543   :  { %v12280_v42 = vld [vmem:[%s20825_s3 + $0xcf8] sm:$0xf0] }
 0x544   :  { %7895 = vmatpush.bf16.msrb.mxu2 %v12315_v32  ;;  %v12283_v4 = vor.u32 %v13847_v2, %v12280_v42  ;;  %v13711_v29 = vld [vmem:[%s20825_s3 + $0x89c] sm:$0xf]  ;;  %7870 = vmatpush.bf16.msrb.mxu0 %v11771_v12 }
 0x545   :  { %v11736_v55 = vld [vmem:[%s20825_s3 + $0x8b8] sm:$0xf0] }
 0x546   :  { %v13775_v56 = vld [vmem:[%s20825_s3 + $0xa9c] sm:$0xf]  ;;  %v11739_v45 = vor.u32 %v13711_v29, %v11736_v55  ;;  %7883 = vmatpush.bf16.msrb.mxu1 %v12027_v14  ;;  %7806 = vmatpush.bf16.msrb.mxu3 %v12503_v57  ;;  %v13954_v14 = vld [vmem:[%s20827_s5 + $0x30] sm:$0xff]  ;;  %v13953_v57 = vld [vmem:[%s20827_s5 + $0x28] sm:$0xff] }
 0x547   :  { %v11992_v0 = vld [vmem:[%s20825_s3 + $0xab8] sm:$0xf0]  ;;  %v13970_v29 = vld [vmem:[%s20827_s5 + $0xb0] sm:$0xff] }
 0x548   :  { %v13839_v60 = vld [vmem:[%s20825_s3 + $0xc9c] sm:$0xf]  ;;  %7896 = vmatpush.bf16.msrb.mxu2 %v12283_v4  ;;  %v11995_v3 = vor.u32 %v13775_v56, %v11992_v0  ;;  %7871 = vmatpush.bf16.msrb.mxu0 %v11739_v45  ;;  %v13962_v4 = vld [vmem:[%s20827_s5 + $0x70] sm:$0xff]  ;;  %v20568_v45 = vpop.f32.mrf.mxu3 }
 0x549   :  { %v12248_v28 = vld [vmem:[%s20825_s3 + $0xcb8] sm:$0xf0] }
 0x54a   :  { %v12251_v5 = vor.u32 %v13839_v60, %v12248_v28  ;;  %v13703_v11 = vld [vmem:[%s20825_s3 + $0x85c] sm:$0xf]  ;;  %7884 = vmatpush.bf16.msrb.mxu1 %v11995_v3  ;;  %7807 = vmatpush.bf16.msrb.mxu3 %v12471_v1  ;;  %v20549_v0 = vpop.f32.mrf.mxu0 }
 0x54b   :  { %v11704_v38 = vld [vmem:[%s20825_s3 + $0x878] sm:$0xf0] }
 0x54c   :  { %v13767_v13 = vld [vmem:[%s20825_s3 + $0xa5c] sm:$0xf]  ;;  %v11707_v30 = vor.u32 %v13703_v11, %v11704_v38  ;;  %7897 = vmatpush.bf16.msrb.mxu2 %v12251_v5  ;;  %v20557_v48 = vpop.f32.mrf.mxu1 }
 0x54d   :  { %v11960_v35 = vld [vmem:[%s20825_s3 + $0xa78] sm:$0xf0] }
 0x54e   :  { %v13831_v8 = vld [vmem:[%s20825_s3 + $0xc5c] sm:$0xf]  ;;  %v11963_v20 = vor.u32 %v13767_v13, %v11960_v35  ;;  %7872 = vmatpush.bf16.msrb.mxu0 %v11707_v30  ;;  %7808 = vmatpush.bf16.msrb.mxu3 %v12439_v23  ;;  %v13958_v30 = vld [vmem:[%s20827_s5 + $0x50] sm:$0xff] }
 0x54f   :  { %v12216_v53 = vld [vmem:[%s20825_s3 + $0xc78] sm:$0xf0] }
 0x550   :  { %v13687_v34 = vld [vmem:[%s20825_s3 + $0x7dc] sm:$0xf]  ;;  %v12219_v43 = vor.u32 %v13831_v8, %v12216_v53  ;;  %7885 = vmatpush.bf16.msrb.mxu1 %v11963_v20  ;;  %v7604_v20 = vpop.f32.mrf.mxu3 }
 0x551   :  { %v11640_v26 = vld [vmem:[%s20825_s3 + $0x7f8] sm:$0xf0]  ;;  %7809 = vmatmul.bf16.vlgmr.msrb.gmra.mxu3 %v18245_v52 }
 0x552   :  { %v13695_v49 = vld [vmem:[%s20825_s3 + $0x81c] sm:$0xf]  ;;  %v11643_v40 = vor.u32 %v13687_v34, %v11640_v26  ;;  %7898 = vmatpush.bf16.msrb.mxu2 %v12219_v43  ;;  %v7669_v35 = vpop.f32.mrf.mxu0  ;;  %v13966_v34 = vld [vmem:[%s20827_s5 + $0x90] sm:$0xff] }
 0x553   :  { %v11672_v37 = vld [vmem:[%s20825_s3 + $0x838] sm:$0xf0]  ;;  %v13992_v35 = vld [vmem:[%s20827_s5 + $0x160] sm:$0xff] }
 0x554   :  { %v13759_v7 = vld [vmem:[%s20825_s3 + $0xa1c] sm:$0xf]  ;;  %v11675_v25 = vor.u32 %v13695_v49, %v11672_v37  ;;  %7853 = vmatpush.bf16.msra.mxu3 %v11643_v40  ;;  %v20585_v1 = vpop.f32.mrf.mxu2  ;;  %v7682_v22 = vpop.f32.mrf.mxu1  ;;  %v13949_v37 = vld [vmem:[%s20827_s5 + $0x8] sm:$0xff] }
 0x555   :  { %v11928_v32 = vld [vmem:[%s20825_s3 + $0xa38] sm:$0xf0] }
 0x556   :  { %v13823_v51 = vld [vmem:[%s20825_s3 + $0xc1c] sm:$0xf]  ;;  %v11931_v41 = vor.u32 %v13759_v7, %v11928_v32  ;;  %7873 = vmatpush.bf16.msrb.mxu0 %v11675_v25  ;;  %v13957_v7 = vld [vmem:[%s20827_s5 + $0x48] sm:$0xff]  ;;  %v13948_v25 = vld [vmem:[%s20827_s5] sm:$0xff] }
 0x557   :  { %v12184_v21 = vld [vmem:[%s20825_s3 + $0xc38] sm:$0xf0]  ;;  %v13965_v32 = vld [vmem:[%s20827_s5 + $0x88] sm:$0xff] }
 0x558   :  { %v13679_v24 = vld [vmem:[%s20825_s3 + $0x79c] sm:$0xf]  ;;  %v12187_v2 = vor.u32 %v13823_v51, %v12184_v21  ;;  %7886 = vmatpush.bf16.msrb.mxu1 %v11931_v41 }
 0x559   :  { %v11608_v63 = vld [vmem:[%s20825_s3 + $0x7b8] sm:$0xf0]  ;;  %7874 = vmatmul.bf16.vlgmr.msrb.gmra.mxu0 %v17729_v46  ;;  %v13961_v46 = vld [vmem:[%s20827_s5 + $0x68] sm:$0xff] }
 0x55a   :  { %v13955_v42 = vld [vmem:[%s20827_s5 + $0x38] sm:$0xff]  ;;  %v11611_v44 = vor.u32 %v13679_v24, %v11608_v63  ;;  %7899 = vmatpush.bf16.msrb.mxu2 %v12187_v2  ;;  %v7918_v63 = vmax.f32 %v19162_v27, 0.0  ;;  %v13956_v2 = vld [vmem:[%s20827_s5 + $0x40] sm:$0xff] }
 0x55b   :  { %v13963_v31 = vld [vmem:[%s20827_s5 + $0x78] sm:$0xff]  ;;  %8450 = vmatpush.bf16.msra.mxu0 %v13955_v42  ;;  %7887 = vmatmul.bf16.vlgmr.msrb.gmra.mxu1 %v17731_v39  ;;  %v13969_v39 = vld [vmem:[%s20827_s5 + $0xa8] sm:$0xff]  ;;  %v7919_v42 = vmax.f32 %v19394_v62, 0.0 }
 0x55c   :  { %v13971_v36 = vld [vmem:[%s20827_s5 + $0xb8] sm:$0xff]  ;;  %8463 = vmatpush.bf16.msra.mxu1 %v13963_v31  ;;  %7854 = vmatpush.bf16.msra.mxu3 %v11611_v44  ;;  %v7695_v40 = vpop.f32.mrf.mxu2  ;;  %v13964_v31 = vld [vmem:[%s20827_s5 + $0x80] sm:$0xff]  ;;  %v7920_v44 = vmax.f32 %v19798_v16, 0.0 }
 0x55d   :  { %v13671_v12 = vld [vmem:[%s20825_s3 + $0x75c] sm:$0xf]  ;;  %7900 = vmatmul.bf16.vlgmr.msrb.gmra.mxu2 %v17869_v15  ;;  %v7927_v16 = vpack.c.bf16 %v7919_v42, %v7919_v42  ;;  %v13981_v40 = vld [vmem:[%s20827_s5 + $0x108] sm:$0xff]  ;;  %v13988_v42 = vld [vmem:[%s20827_s5 + $0x140] sm:$0xff] }
 0x55e   :  { %v11576_v18 = vld [vmem:[%s20825_s3 + $0x778] sm:$0xf0]  ;;  %8476 = vmatpush.bf16.msra.mxu2 %v13971_v36 }
 0x55f   :  { %v11579_v55 = vor.u32 %v13671_v12, %v11576_v18  ;;  %v13663_v56 = vld [vmem:[%s20825_s3 + $0x71c] sm:$0xf]  ;;  %8451 = vmatpush.bf16.msra.mxu0 %v13954_v14  ;;  %v7926_v18 = vpack.c.bf16 %v7918_v63, %v7918_v63  ;;  %v13980_v63 = vld [vmem:[%s20827_s5 + $0x100] sm:$0xff] }
 0x560   :  { %v11544_v58 = vld [vmem:[%s20825_s3 + $0x738] sm:$0xf0]  ;;  %8464 = vmatpush.bf16.msra.mxu1 %v13962_v4  ;;  %v13986_v4 = vld [vmem:[%s20827_s5 + $0x130] sm:$0xff] }
 0x561   :  { %7855 = vmatpush.bf16.msra.mxu3 %v11579_v55  ;;  %v11547_v15 = vor.u32 %v13663_v56, %v11544_v58  ;;  %v13655_v60 = vld [vmem:[%s20825_s3 + $0x6dc] sm:$0xf]  ;;  %v13994_v58 = vld [vmem:[%s20827_s5 + $0x170] sm:$0xff] }
 0x562   :  { %8477 = vmatpush.bf16.msra.mxu2 %v13970_v29  ;;  %v11512_v28 = vld [vmem:[%s20825_s3 + $0x6f8] sm:$0xf0]  ;;  %v7928_v29 = vpack.c.bf16 %v7920_v44, %v7920_v44 }
 0x563   :  { %8452 = vmatpush.bf16.msra.mxu0 %v13953_v57  ;;  %v11515_v10 = vor.u32 %v13655_v60, %v11512_v28  ;;  %v13647_v3 = vld [vmem:[%s20825_s3 + $0x69c] sm:$0xf]  ;;  %v13985_v57 = vld [vmem:[%s20827_s5 + $0x128] sm:$0xff] }
 0x564   :  { %8465 = vmatpush.bf16.msra.mxu1 %v13961_v46  ;;  %v11480_v5 = vld [vmem:[%s20825_s3 + $0x6b8] sm:$0xf0]  ;;  %v20672_v46 = vld [vmem:[%s20826_s4] sm:$0xff] }
 0x565   :  { %7856 = vmatpush.bf16.msra.mxu3 %v11547_v15  ;;  %v13951_v11 = vld [vmem:[%s20827_s5 + $0x18] sm:$0xff]  ;;  %v11483_v17 = vor.u32 %v13647_v3, %v11480_v5  ;;  %v13984_v3 = vld [vmem:[%s20827_s5 + $0x120] sm:$0xff] }
 0x566   :  { %8478 = vmatpush.bf16.msra.mxu2 %v13969_v39  ;;  %v13959_v38 = vld [vmem:[%s20827_s5 + $0x58] sm:$0xff]  ;;  %v4516_v39 = vperm.slane %v20672_v46, 6 }
 0x567   :  { %8453 = vmatpush.bf16.msra.mxu0 %v13952_v6  ;;  %v13967_v13 = vld [vmem:[%s20827_s5 + $0x98] sm:$0xff] }
 0x568   :  { %8466 = vmatpush.bf16.msra.mxu1 %v13960_v47  ;;  %v13639_v8 = vld [vmem:[%s20825_s3 + $0x65c] sm:$0xf]  ;;  %v13993_v47 = vld [vmem:[%s20827_s5 + $0x168] sm:$0xff] }
 0x569   :  { %7857 = vmatpush.bf16.msra.mxu3 %v11515_v10  ;;  %v11448_v53 = vld [vmem:[%s20825_s3 + $0x678] sm:$0xf0] }
 0x56a   :  { %8479 = vmatpush.bf16.msra.mxu2 %v13968_v54  ;;  %v11451_v26 = vor.u32 %v13639_v8, %v11448_v53  ;;  %v13631_v43 = vld [vmem:[%s20825_s3 + $0x61c] sm:$0xf]  ;;  %v7719_v6 = vpop.f32.mrf.mxu0 }
 0x56b   :  { %8454 = vmatpush.bf16.msra.mxu0 %v13951_v11  ;;  %v11416_v49 = vld [vmem:[%s20825_s3 + $0x638] sm:$0xf0]  ;;  %v7720_v54 = vadd.f32 %v7719_v6, %v4516_v39  ;;  %v13972_v39 = vld [vmem:[%s20827_s5 + $0xc0] sm:$0xff] }
 0x56c   :  { %8467 = vmatpush.bf16.msra.mxu1 %v13959_v38  ;;  %v13943_v33 = vld [vmem:[%s20825_s3 + $0xfdc] sm:$0xf]  ;;  %v11419_v51 = vor.u32 %v13631_v43, %v11416_v49  ;;  %v7732_v10 = vpop.f32.mrf.mxu1  ;;  %v13982_v49 = vld [vmem:[%s20827_s5 + $0x110] sm:$0xff]  ;;  %v14000_v6 = vld [vmem:[%s20827_s5 + $0x1a0] sm:$0xff] }
 0x56d   :  { %7858 = vmatpush.bf16.msra.mxu3 %v11483_v17  ;;  %v12664_v23 = vld [vmem:[%s20825_s3 + $0xff8] sm:$0xf0]  ;;  %v7733_v11 = vadd.f32 %v7732_v10, %v7720_v54  ;;  %v13998_v10 = vld [vmem:[%s20827_s5 + $0x190] sm:$0xff] }
 0x56e   :  { %8480 = vmatpush.bf16.msra.mxu2 %v13967_v13  ;;  %v12667_v21 = vor.u32 %v13943_v33, %v12664_v23  ;;  %v13935_v41 = vld [vmem:[%s20825_s3 + $0xf9c] sm:$0xf]  ;;  %v7654_v38 = vpop.f32.mrf.mxu3 }
 0x56f   :  { %8455 = vmatpush.bf16.msra.mxu0 %v13950_v61  ;;  %v12632_v24 = vld [vmem:[%s20825_s3 + $0xfb8] sm:$0xf0] }
 0x570   :  { %8468 = vmatpush.bf16.msra.mxu1 %v13958_v30  ;;  %v13987_v36 = vld [vmem:[%s20827_s5 + $0x138] sm:$0xff]  ;;  %v12635_v27 = vor.u32 %v13935_v41, %v12632_v24  ;;  %v13989_v24 = vld [vmem:[%s20827_s5 + $0x148] sm:$0xff] }
 0x571   :  { %7859 = vmatpush.bf16.msra.mxu3 %v11451_v26  ;;  %v13927_v12 = vld [vmem:[%s20825_s3 + $0xf5c] sm:$0xf] }
 0x572   :  { %8481 = vmatpush.bf16.msra.mxu2 %v13966_v34  ;;  %v12600_v62 = vld [vmem:[%s20825_s3 + $0xf78] sm:$0xf0]  ;;  %v7721_v26 = vpop.f32.mrf.mxu0 }
 0x573   :  { %8456 = vmatpush.bf16.msra.mxu0 %v13949_v37  ;;  %v13995_v14 = vld [vmem:[%s20827_s5 + $0x178] sm:$0xff]  ;;  %v12603_v55 = vor.u32 %v13927_v12, %v12600_v62 }
 0x574   :  { %8469 = vmatpush.bf16.msra.mxu1 %v13957_v7  ;;  %v12568_v56 = vld [vmem:[%s20825_s3 + $0xf38] sm:$0xf0]  ;;  %v7745_v22 = vpop.f32.mrf.mxu2  ;;  %v7734_v43 = vpop.f32.mrf.mxu1 }
 0x575   :  { %7860 = vmatpush.bf16.msra.mxu3 %v11419_v51  ;;  %v13911_v60 = vld [vmem:[%s20825_s3 + $0xedc] sm:$0xf]  ;;  %v20705_v34 = vadd.f32 %v7745_v22, %v7733_v11  ;;  %v7603_v51 = vadd.f32 %v20568_v45, %v20459_v19  ;;  %v13978_v19 = vld [vmem:[%s20827_s5 + $0xf0] sm:$0xff]  ;;  %v7655_v45 = vadd.f32 %v7654_v38, %v20440_v50  ;;  %v13976_v50 = vld [vmem:[%s20827_s5 + $0xe0] sm:$0xff] }
 0x576   :  { %8482 = vmatpush.bf16.msra.mxu2 %v13965_v32  ;;  %v12536_v28 = vld [vmem:[%s20825_s3 + $0xef8] sm:$0xf0]  ;;  %v7656_v33 = vpop.f32.mrf.mxu3  ;;  %v13990_v32 = vld [vmem:[%s20827_s5 + $0x150] sm:$0xff]  ;;  %v13997_v38 = vld [vmem:[%s20827_s5 + $0x188] sm:$0xff] }
 0x577   :  { %8457 = vmatpush.bf16.msra.mxu0 %v13948_v25  ;;  %v12539_v5 = vor.u32 %v13911_v60, %v12536_v28  ;;  %v13903_v13 = vld [vmem:[%s20825_s3 + $0xe9c] sm:$0xf]  ;;  %v7668_v44 = vadd.f32 %v20549_v0, %v7655_v45  ;;  %v7921_v60 = vmax.f32 %v20213_v59, 0.0  ;;  %v4517_v59 = vperm.slane %v20672_v46, 7 }
 0x578   :  { %7861 = vmatmul.bf16.vlgmr.msra.gmra.mxu3 %v17544_v9  ;;  %8470 = vmatpush.bf16.msra.mxu1 %v13956_v2  ;;  %v13919_v9 = vld [vmem:[%s20825_s3 + $0xf1c] sm:$0xf]  ;;  %v7922_v2 = vmax.f32 %v7603_v51, 0.0 }
 0x579   :  { %7905 = vmatpush.bf16.msrb.mxu3 %v12667_v21  ;;  %v12571_v15 = vor.u32 %v13919_v9, %v12568_v56  ;;  %v12504_v17 = vld [vmem:[%s20825_s3 + $0xeb8] sm:$0xf0] }
 0x57a   :  { %8483 = vmatpush.bf16.msra.mxu2 %v13964_v31  ;;  %8458 = vmatmul.bf16.vlgmr.msra.gmra.mxu0 %v7926_v18  ;;  %v13983_v8 = vld [vmem:[%s20827_s5 + $0x118] sm:$0xff]  ;;  %v12507_v53 = vor.u32 %v13903_v13, %v12504_v17  ;;  %v7930_v31 = vpack.c.bf16 %v7922_v2, %v7922_v2 }
 0x57b   :  { %8502 = vmatpush.bf16.msrb.mxu0 %v13987_v36  ;;  %8471 = vmatmul.bf16.vlgmr.msra.gmra.mxu1 %v7927_v16  ;;  %v13895_v61 = vld [vmem:[%s20825_s3 + $0xe5c] sm:$0xf]  ;;  %v13977_v36 = vld [vmem:[%s20827_s5 + $0xe8] sm:$0xff]  ;;  %v13974_v16 = vld [vmem:[%s20827_s5 + $0xd0] sm:$0xff] }
 0x57c   :  { %8515 = vmatpush.bf16.msrb.mxu1 %v13995_v14  ;;  %v12472_v30 = vld [vmem:[%s20825_s3 + $0xe78] sm:$0xf0]  ;;  %v7747_v25 = vpop.f32.mrf.mxu2 }
 0x57d   :  { %7906 = vmatpush.bf16.msrb.mxu3 %v12635_v27  ;;  %8484 = vmatmul.bf16.vlgmr.msra.gmra.mxu2 %v7928_v29  ;;  %v13991_v20 = vld [vmem:[%s20827_s5 + $0x158] sm:$0xff]  ;;  %v12475_v37 = vor.u32 %v13895_v61, %v12472_v30  ;;  %v7681_v27 = vadd.f32 %v20557_v48, %v7668_v44  ;;  %v14005_v44 = vld [vmem:[%s20827_s5 + $0x1c8] sm:$0xff] }
 0x57e   :  { %v13887_v23 = vld [vmem:[%s20825_s3 + $0xe1c] sm:$0xf] }
 0x57f   :  { %8503 = vmatpush.bf16.msrb.mxu0 %v13986_v4  ;;  %v12440_v7 = vld [vmem:[%s20825_s3 + $0xe38] sm:$0xf0]  ;;  %v7694_v18 = vadd.f32 %v20585_v1, %v7681_v27  ;;  %v13973_v1 = vld [vmem:[%s20827_s5 + $0xc8] sm:$0xff]  ;;  %s8563_s3 = sshll.u32 %s20829_s7, 4  ;;  %s8564_s3 = int_to_ptr.hbm [resolvable:$true] %s8563_s3 }
 0x580   :  { %8516 = vmatpush.bf16.msrb.mxu1 %v13994_v58  ;;  %v12443_v21 = vor.u32 %v13887_v23, %v12440_v7  ;;  %v13979_v41 = vld [vmem:[%s20827_s5 + $0xf8] sm:$0xff]  ;;  %v14002_v58 = vld [vmem:[%s20827_s5 + $0x1b0] sm:$0xff] }
 0x581   :  { %7907 = vmatpush.bf16.msrb.mxu3 %v12603_v55  ;;  %v13975_v62 = vld [vmem:[%s20827_s5 + $0xd8] sm:$0xff] }
 0x582   :  { %v14003_v48 = vld [vmem:[%s20827_s5 + $0x1b8] sm:$0xff] }
 0x583   :  { %8504 = vmatpush.bf16.msrb.mxu0 %v13985_v57  ;;  %8528 = vmatpush.bf16.msrb.mxu2 %v14003_v48  ;;  %v13999_v54 = vld [vmem:[%s20827_s5 + $0x198] sm:$0xff] }
 0x584   :  { %8517 = vmatpush.bf16.msrb.mxu1 %v13993_v47  ;;  %v7929_v47 = vpack.c.bf16 %v7921_v60, %v7921_v60  ;;  %v14007_v45 = vld [vmem:[%s20827_s5 + $0x1d8] sm:$0xff] }
 0x585   :  { %7908 = vmatpush.bf16.msrb.mxu3 %v12571_v15  ;;  %v14001_v15 = vld [vmem:[%s20827_s5 + $0x1a8] sm:$0xff] }
 0x587   :  { %8505 = vmatpush.bf16.msrb.mxu0 %v13984_v3  ;;  %8529 = vmatpush.bf16.msrb.mxu2 %v14002_v58 }
 0x588   :  { %8518 = vmatpush.bf16.msrb.mxu1 %v13992_v35  ;;  %v13996_v35 = vld [vmem:[%s20827_s5 + $0x180] sm:$0xff] }
 0x589   :  { %7909 = vmatpush.bf16.msrb.mxu3 %v12539_v5 }
 0x58b   :  { %8506 = vmatpush.bf16.msrb.mxu0 %v13983_v8  ;;  %8530 = vmatpush.bf16.msrb.mxu2 %v14001_v15 }
 0x58c   :  { %8519 = vmatpush.bf16.msrb.mxu1 %v13991_v20 }
 0x58d   :  { %7910 = vmatpush.bf16.msrb.mxu3 %v12507_v53 }
 0x58e   :  { %v7706_v14 = vpop.f32.mrf.mxu3 }
 0x58f   :  { %8507 = vmatpush.bf16.msrb.mxu0 %v13982_v49  ;;  %v7707_v0 = vadd.f32 %v7706_v14, %v7694_v18  ;;  %8531 = vmatpush.bf16.msrb.mxu2 %v14000_v6 }
 0x590   :  { %8520 = vmatpush.bf16.msrb.mxu1 %v13990_v32  ;;  %v7771_v12 = vpop.f32.mrf.mxu0  ;;  %v14011_v32 = vld [vmem:[%s20827_s5 + $0x1f8] sm:$0xff] }
 0x591   :  { %7911 = vmatpush.bf16.msrb.mxu3 %v12475_v37  ;;  %v7923_v4 = vmax.f32 %v7707_v0, 0.0 }
 0x593   :  { %8508 = vmatpush.bf16.msrb.mxu0 %v13981_v40  ;;  %v7931_v55 = vpack.c.bf16 %v7923_v4, %v7923_v4  ;;  %8532 = vmatpush.bf16.msrb.mxu2 %v13999_v54 }
 0x594   :  { %8521 = vmatpush.bf16.msrb.mxu1 %v13989_v24 }
 0x595   :  { %7912 = vmatpush.bf16.msrb.mxu3 %v12443_v21 }
 0x596   :  { %v7708_v57 = vpop.f32.mrf.mxu3 }
 0x597   :  { %8509 = vmatpush.bf16.msrb.mxu0 %v13980_v63  ;;  %8533 = vmatpush.bf16.msrb.mxu2 %v13998_v10  ;;  %v14009_v63 = vld [vmem:[%s20827_s5 + $0x1e8] sm:$0xff] }
 0x598   :  { %7913 = vmatmul.bf16.vlgmr.msrb.gmra.mxu3 %v18245_v52  ;;  %8522 = vmatpush.bf16.msrb.mxu1 %v13988_v42  ;;  %v7784_v52 = vpop.f32.mrf.mxu1  ;;  %v7773_v9 = vpop.f32.mrf.mxu0  ;;  %v14006_v42 = vld [vmem:[%s20827_s5 + $0x1d0] sm:$0xff] }
 0x599   :  { %8489 = vmatpush.bf16.msra.mxu3 %v13979_v41 }
 0x59a   :  { %8510 = vmatmul.bf16.vlgmr.msrb.gmra.mxu0 %v7930_v31  ;;  %v7797_v29 = vpop.f32.mrf.mxu2  ;;  %v14013_v31 = vld [vmem:[%s20828_s6] ss:$0 sm:$0xff] }
 0x59b   :  { %8523 = vmatmul.bf16.vlgmr.msrb.gmra.mxu1 %v7931_v55  ;;  %8534 = vmatpush.bf16.msrb.mxu2 %v13997_v38 }
 0x59d   :  { %8490 = vmatpush.bf16.msra.mxu3 %v13978_v19  ;;  %v14008_v19 = vld [vmem:[%s20827_s5 + $0x1e0] sm:$0xff] }
 0x59f   :  { %8535 = vmatpush.bf16.msrb.mxu2 %v13996_v35 }
 0x5a0   :  { %v7786_v56 = vpop.f32.mrf.mxu1 }
 0x5a1   :  { %8491 = vmatpush.bf16.msra.mxu3 %v13977_v36 }
 0x5a2   :  { %v7799_v28 = vpop.f32.mrf.mxu2 }
 0x5a5   :  { %8492 = vmatpush.bf16.msra.mxu3 %v13976_v50 }
 0x5a9   :  { %8493 = vmatpush.bf16.msra.mxu3 %v13975_v62  ;;  %v14004_v62 = vld [vmem:[%s20827_s5 + $0x1c0] sm:$0xff] }
 0x5ad   :  { %8494 = vmatpush.bf16.msra.mxu3 %v13974_v16 }
 0x5b0   :  { %v7823_v3 = vpop.f32.mrf.mxu0 }
 0x5b1   :  { %8495 = vmatpush.bf16.msra.mxu3 %v13973_v1  ;;  %v7824_v5 = vadd.f32 %v7823_v3, %v4517_v59 }
 0x5b2   :  { %v7836_v11 = vpop.f32.mrf.mxu1 }
 0x5b3   :  { %v7837_v13 = vadd.f32 %v7836_v11, %v7824_v5 }
 0x5b4   :  { %v7758_v17 = vpop.f32.mrf.mxu3 }
 0x5b5   :  { %8496 = vmatpush.bf16.msra.mxu3 %v13972_v39  ;;  %v7759_v26 = vadd.f32 %v7758_v17, %v20705_v34  ;;  %v14010_v34 = vld [vmem:[%s20827_s5 + $0x1f0] sm:$0xff]  ;;  %s14046_s5 = smov [#allocation2]  }
 0x5b6   :  { %s8561_s6 = sshll.u32 %s14046_s5, 4  ;;  %s8562_s6 = int_to_ptr.vmem [resolvable:$true] %s8561_s6 }
 0x5b7   :  { %v7772_v20 = vadd.f32 %v7771_v12, %v7759_v26 }
 0x5b8   :  { %8497 = vmatmul.bf16.vlgmr.msra.gmra.mxu3 %v7929_v47  ;;  %v7825_v22 = vpop.f32.mrf.mxu0 }
 0x5b9   :  { %v7785_v43 = vadd.f32 %v7784_v52, %v7772_v20  ;;  %8541 = vmatpush.bf16.msrb.mxu3 %v14011_v32 }
 0x5ba   :  { %v7849_v8 = vpop.f32.mrf.mxu2  ;;  %v7838_v46 = vpop.f32.mrf.mxu1 }
 0x5bb   :  { %v7850_v53 = vadd.f32 %v7849_v8, %v7837_v13  ;;  %v7798_v33 = vadd.f32 %v7797_v29, %v7785_v43 }
 0x5bc   :  { %v7760_v61 = vpop.f32.mrf.mxu3 }
 0x5bd   :  { %8542 = vmatpush.bf16.msrb.mxu3 %v14010_v34 }
 0x5c1   :  { %8543 = vmatpush.bf16.msrb.mxu3 %v14009_v63 }
 0x5c2   :  { %v7851_v30 = vpop.f32.mrf.mxu2 }
 0x5c5   :  { %8544 = vmatpush.bf16.msrb.mxu3 %v14008_v19 }
 0x5c9   :  { %8545 = vmatpush.bf16.msrb.mxu3 %v14007_v45 }
 0x5cd   :  { %8546 = vmatpush.bf16.msrb.mxu3 %v14006_v42 }
 0x5d1   :  { %8547 = vmatpush.bf16.msrb.mxu3 %v14005_v44 }
 0x5d4   :  { %v7810_v23 = vpop.f32.mrf.mxu3 }
 0x5d5   :  { %v7811_v7 = vadd.f32 %v7810_v23, %v7798_v33  ;;  %8548 = vmatpush.bf16.msrb.mxu3 %v14004_v62 }
 0x5d6   :  { %v7875_v49 = vpop.f32.mrf.mxu0 }
 0x5d7   :  { %v7924_v40 = vmax.f32 %v7811_v7, 0.0 }
 0x5d8   :  { %v7888_v37 = vpop.f32.mrf.mxu1 }
 0x5d9   :  { %v7932_v21 = vpack.c.bf16 %v7924_v40, %v7924_v40 }
 0x5db   :  { %8536 = vmatmul.bf16.vlgmr.msrb.gmra.mxu2 %v7932_v21 }
 0x5dc   :  { %v7812_v24 = vpop.f32.mrf.mxu3 }
 0x5de   :  { %v7877_v25 = vpop.f32.mrf.mxu0 }
 0x5e0   :  { %v7901_v51 = vpop.f32.mrf.mxu2  ;;  %v7890_v41 = vpop.f32.mrf.mxu1 }
 0x5e8   :  { %v7903_v2 = vpop.f32.mrf.mxu2 }
 0x5f7   :  { %v8459_v36 = vpop.f32.mrf.mxu0 }
 0x5f8   :  { %v8460_v50 = vadd.f32 %v14013_v31, %v8459_v36  ;;  %v8472_v27 = vpop.f32.mrf.mxu1 }
 0x5fa   :  { %v8473_v12 = vadd.f32 %v8472_v27, %v8460_v50 }
 0x5fb   :  { %v7862_v52 = vpop.f32.mrf.mxu3 }
 0x5fc   :  { %v7863_v48 = vadd.f32 %v7862_v52, %v7850_v53 }
 0x5fe   :  { %v7876_v55 = vadd.f32 %v7875_v49, %v7863_v48 }
 0x5ff   :  { %v8461_v14 = vpop.f32.mrf.mxu0 }
 0x600   :  { %v8485_v18 = vpop.f32.mrf.mxu2  ;;  %v8474_v16 = vpop.f32.mrf.mxu1  ;;  %v7889_v9 = vadd.f32 %v7888_v37, %v7876_v55 }
 0x601   :  { %v8486_v0 = vadd.f32 %v8485_v18, %v8473_v12 }
 0x602   :  { %v7902_v1 = vadd.f32 %v7901_v51, %v7889_v9 }
 0x603   :  { %v7864_v4 = vpop.f32.mrf.mxu3 }
 0x608   :  { %v8487_v29 = vpop.f32.mrf.mxu2 }
 0x617   :  { %v8511_v56 = vpop.f32.mrf.mxu0 }
 0x618   :  { %v8524_v6 = vpop.f32.mrf.mxu1 }
 0x61b   :  { %v7914_v58 = vpop.f32.mrf.mxu3 }
 0x61c   :  { %v7915_v57 = vadd.f32 %v7914_v58, %v7902_v1 }
 0x61e   :  { %v7925_v39 = vmax.f32 %v7915_v57, 0.0 }
 0x61f   :  { %v8513_v60 = vpop.f32.mrf.mxu0 }
 0x620   :  { %v7933_v15 = vpack.c.bf16 %v7925_v39, %v7925_v39  ;;  %v8526_v47 = vpop.f32.mrf.mxu1 }
 0x622   :  { %8549 = vmatmul.bf16.vlgmr.msrb.gmra.mxu3 %v7933_v15 }
 0x623   :  { %v7916_v28 = vpop.f32.mrf.mxu3 }
 0x63b   :  { %v8498_v54 = vpop.f32.mrf.mxu3 }
 0x63c   :  { %v8499_v10 = vadd.f32 %v8498_v54, %v8486_v0 }
 0x63e   :  { %v8512_v59 = vadd.f32 %v8511_v56, %v8499_v10 }
 0x640   :  { %v8525_v3 = vadd.f32 %v8524_v6, %v8512_v59 }
 0x643   :  { %v8500_v5 = vpop.f32.mrf.mxu3 }
 0x65e   :  { %v8537_v11 = vpop.f32.mrf.mxu2 }
 0x65f   :  { %v8538_v13 = vadd.f32 %v8537_v11, %v8525_v3 }
 0x666   :  { %v8539_v38 = vpop.f32.mrf.mxu2 }
 0x6a5   :  { %v8550_v17 = vpop.f32.mrf.mxu3 }
 0x6a6   :  { %v8551_v35 = vadd.f32 %v8550_v17, %v8538_v13 }
 0x6a8   :  { %8555 = vst.msk [vmem:[#allocation2] sm:$0x3] %vm8554_vm0, %v8551_v35 }
 0x6a9   :  { %8566 = dma.vmem_to_hbm [thread:$0]  %s8562_s6, 32, %s8564_s3, [#allocation3]  }
 0x6ad   :  { %v8552_v8 = vpop.f32.mrf.mxu3 }
 0x6ae   :  { %14044 = dma.done.wait [#allocation3], 32  }
 0x6af   :  { %14045 = vsyncadd [#allocation3], 4294967264 }
 0x6b0   :  { %8571 = vsyncpa [#allocation3], 1 }

</bundles_post_ra>
